<compile_context>
chip_gen: v7x
topology: tpu7x:2x2x1
jax: 0.10.0
libtpu: 0.0.40
codegen_flags: <defaults>
</compile_context>

<pallas_src>
import functools
import math

import jax
import jax.numpy as jnp
from jax.experimental import pallas as pl
from jax.experimental.pallas import tpu as pltpu

LANE = 128
VMEM_LIMIT = 40 * 1024 * 1024   # v7x-safe (64 MiB phys); ample on v5e/v6e
_ENC_REVERSE = False            # encoder Resnet1D dilation order (decoder always reversed)


def _round_up(x, m):
    return ((x + m - 1) // m) * m


# ---------------------------------------------------------------------------
# In-kernel building blocks (all operate on VMEM-resident values)
# ---------------------------------------------------------------------------
def _conv(h, w_ref, b_ref, K, dil, pre_relu):
    """'same' stride-1 conv as ONE MXU matmul over lane-packed taps.

    h: (T, Cin) f32 value.  w_ref: (K*Cin, Cout) bf16.  b_ref: (1, Cout) f32.
    """
    T, Cin = h.shape
    x = jnp.maximum(h, 0.0) if pre_relu else h
    xb = x.astype(jnp.bfloat16)                        # bf16 MXU inputs, f32 accum
    if K == 1:
        xk = xb
    else:
        pad = (K - 1) // 2 * dil
        z = jnp.zeros((pad, Cin), jnp.bfloat16)
        xp = jnp.concatenate([z, xb, z], axis=0)
        xk = jnp.concatenate([xp[k * dil:k * dil + T, :] for k in range(K)], axis=1)
    return jnp.dot(xk, w_ref[...], preferred_element_type=jnp.float32) + b_ref[...]


def _fold2(h):
    """(T, C) -> (T//2, 2C), row s = [h[2s], h[2s+1]]; via 0/1 selection matmuls."""
    T, C = h.shape
    S = T // 2
    r = jax.lax.broadcasted_iota(jnp.int32, (S, T), 0)
    c = jax.lax.broadcasted_iota(jnp.int32, (S, T), 1)
    ev = (c == 2 * r).astype(jnp.float32)
    od = (c == 2 * r + 1).astype(jnp.float32)
    return jnp.concatenate(
        [jnp.dot(ev, h, preferred_element_type=jnp.float32),
         jnp.dot(od, h, preferred_element_type=jnp.float32)], axis=1)


def _unfold2(h):
    """(S, 2C) -> (2S, C): out[2s]=h[s,:C], out[2s+1]=h[s,C:]; via selection matmuls."""
    S, C2 = h.shape
    C = C2 // 2
    r = jax.lax.broadcasted_iota(jnp.int32, (2 * S, S), 0)
    c = jax.lax.broadcasted_iota(jnp.int32, (2 * S, S), 1)
    ev = (r == 2 * c).astype(jnp.float32)
    od = (r == 2 * c + 1).astype(jnp.float32)
    return (jnp.dot(ev, h[:, :C], preferred_element_type=jnp.float32) +
            jnp.dot(od, h[:, C:], preferred_element_type=jnp.float32))


def _run_chain(h, ops, wr):
    """Run a list of ops on a VMEM-resident (T, C) value, consuming weights in order."""
    ri = 0
    for op in ops:
        kind = op[0]
        if kind == 'conv':                 # ('conv', K, dil, pre_relu, post_relu)
            _, K, dil, pre, post = op
            h = _conv(h, wr[ri], wr[ri + 1], K, dil, pre)
            ri += 2
            if post:
                h = jnp.maximum(h, 0.0)
        elif kind == 'res':                # x + conv1x1(relu(conv3_dil(relu(x))))
            d = op[1]
            t = _conv(h, wr[ri], wr[ri + 1], 3, d, True)
            t = jnp.maximum(t, 0.0)
            t = _conv(t, wr[ri + 2], wr[ri + 3], 1, 1, False)
            h = h + t
            ri += 4
        elif kind == 'fold':
            h = _fold2(h)
        elif kind == 'unfold':
            h = _unfold2(h)
    return h


# ---------------------------------------------------------------------------
# Fused stage kernels
# ---------------------------------------------------------------------------
def _encoders_kernel(body_ref, hand_ref, *refs, ops_b, nwb, ops_h):
    """Kernel A: encoder_body and encoder_hand (+ quantize_conv_h) in one launch."""
    xb_out, qh_out = refs[-2], refs[-1]
    wr = refs[:-2]
    hb = _run_chain(body_ref[0].astype(jnp.float32), ops_b, wr[:nwb])
    hh = _run_chain(hand_ref[0].astype(jnp.float32), ops_h, wr[nwb:])
    xb_out[0] = hb.astype(xb_out.dtype)        # bf16 inter-stage activation
    qh_out[0] = hh.astype(qh_out.dtype)        # f32 (feeds VQ)


def _dechand_kernel(qh_ref, xb_ref, *refs, ops_dec, nwd):
    """Kernel C: decoder_hand, in-VMEM concat with x_enc_b, quantize_conv_b."""
    out_ref = refs[-1]
    wr = refs[:-1]
    h = _run_chain(qh_ref[0].astype(jnp.float32), ops_dec, wr[:nwd])     # dec_hand
    cat = jnp.concatenate([h, xb_ref[0].astype(jnp.float32)], axis=1)    # (T/2, 2*oew)
    qb = _conv(cat, wr[nwd], wr[nwd + 1], 1, 1, False)                   # 1x1 conv
    out_ref[0] = qb.astype(out_ref.dtype)


def _decode_kernel(qt_ref, qb_ref, *refs, ops_dec):
    """Kernel E: upsample_t (folded ConvTranspose), in-VMEM concat, final decoder."""
    out_ref = refs[-1]
    wr = refs[:-1]
    up = _conv(qt_ref[0].astype(jnp.float32), wr[0], wr[1], 3, 1, False)  # folded CT
    up = _unfold2(up)                                                     # (T/2, oew)
    h = jnp.concatenate([up, qb_ref[0].astype(jnp.float32)], axis=1)      # (T/2, 2*oew)
    h = _run_chain(h, ops_dec, wr[2:])
    out_ref[0] = h.astype(out_ref.dtype)


# ---------------------------------------------------------------------------
# Pallas kernel: EMA-reset VQ bottleneck (eval semantics), tiled over M rows
# ---------------------------------------------------------------------------
def _vq_kernel(x_ref, cb_ref, nhs_ref, xd_ref, commit_ref, perp_ref,
               counts_ref, sse_ref, *, M, C):
    i = pl.program_id(0)
    TM = x_ref.shape[0]

    @pl.when(i == 0)
    def _init():
        counts_ref[...] = jnp.zeros_like(counts_ref)
        sse_ref[...] = jnp.zeros_like(sse_ref)

    x = x_ref[...]                                   # (TM, C) f32
    cb = cb_ref[...]                                 # (nb_p, C) f32
    nb_p = cb.shape[0]
    # argmin ||x-cb||^2 == argmax (x.cb - 0.5||cb||^2); nhs precomputed (1, nb_p).
    cross = jax.lax.dot_general(x, cb, (((1,), (1,)), ((), ())),
                                preferred_element_type=jnp.float32)
    score = cross + nhs_ref[...]
    smax = jnp.max(score, axis=1, keepdims=True)
    iota = jax.lax.broadcasted_iota(jnp.int32, (TM, nb_p), 1)
    cand = jnp.where(score == smax, iota, nb_p)
    idx = jnp.min(cand, axis=1, keepdims=True)       # first-occurrence argmin
    onehot = (iota == idx).astype(jnp.float32)
    xd = jnp.dot(onehot, cb, preferred_element_type=jnp.float32)
    xd_ref[...] = xd

    rows = i * TM + jax.lax.broadcasted_iota(jnp.int32, (TM, 1), 0)
    valid = (rows < M).astype(jnp.float32)           # mask padded rows
    counts_ref[...] += jnp.sum(onehot * valid, axis=0, keepdims=True)
    diff = (x - xd) * valid
    sse = jnp.sum(jnp.sum(diff * diff, axis=1, keepdims=True), axis=0, keepdims=True)
    sse_ref[...] += sse

    @pl.when(i == pl.num_programs(0) - 1)
    def _fin():
        commit_ref[...] = sse_ref[...] * (1.0 / (M * C))
        prob = counts_ref[...] * (1.0 / M)
        ent = jnp.sum(prob * jnp.log(prob + 1e-7), axis=1, keepdims=True)
        perp_ref[...] = jnp.exp(-ent)


def quantize_ema_reset(x, codebook):
    """x: (N, Tq, C) f32 -> (x_d (N,Tq,C), commit_loss, perplexity)."""
    N, Tq, C = x.shape
    nb = codebook.shape[0]
    M = N * Tq
    xf = x.reshape(M, C)

    nb_p = _round_up(nb, LANE)
    cb = jnp.pad(codebook, ((0, nb_p - nb), (0, 0)))
    nhs = -0.5 * jnp.sum(codebook * codebook, axis=1)
    nhs = jnp.pad(nhs, (0, nb_p - nb), constant_values=-1e30).reshape(1, nb_p)

    TM = min(512, _round_up(M, 8))                   # fill MXU rows when M is realistic
    Mp = _round_up(M, TM)
    xp = jnp.pad(xf, ((0, Mp - M), (0, 0)))

    kernel = functools.partial(_vq_kernel, M=M, C=C)
    scalar = jax.ShapeDtypeStruct((1, 1), jnp.float32)
    xd, commit, perp = pl.pallas_call(
        kernel,
        out_shape=(jax.ShapeDtypeStruct((Mp, C), jnp.float32), scalar, scalar),
        grid_spec=pltpu.PrefetchScalarGridSpec(
            num_scalar_prefetch=0,
            grid=(Mp // TM,),
            in_specs=[pl.BlockSpec((TM, C), lambda i: (i, 0)),
                      pl.BlockSpec((nb_p, C), lambda i: (0, 0)),
                      pl.BlockSpec((1, nb_p), lambda i: (0, 0))],
            out_specs=(pl.BlockSpec((TM, C), lambda i: (i, 0)),
                       pl.BlockSpec((1, 1), lambda i: (0, 0)),
                       pl.BlockSpec((1, 1), lambda i: (0, 0))),
            scratch_shapes=[pltpu.VMEM((1, nb_p), jnp.float32),
                            pltpu.VMEM((1, 1), jnp.float32)]),
        compiler_params=pltpu.CompilerParams(
            dimension_semantics=("arbitrary",),
            vmem_limit_bytes=VMEM_LIMIT),
    )(xp, cb, nhs)
    return xd[:M].reshape(N, Tq, C), commit.reshape(()), perp.reshape(())


# ---------------------------------------------------------------------------
# Weight preparation (PyTorch layouts -> packed tap layouts, with folding)
# ---------------------------------------------------------------------------
def _pt_conv(key, cin, cout, K):
    k1, k2 = jax.random.split(key)
    bound = 1.0 / math.sqrt(cin * K)
    w = jax.random.uniform(k1, (cout, cin, K), jnp.float32, -bound, bound)
    b = jax.random.uniform(k2, (cout,), jnp.float32, -bound, bound)
    return w, b


def _pack(w_pt):                      # (Cout, Cin, K) -> (K*Cin, Cout) bf16, tap-major
    cout, cin, K = w_pt.shape
    return jnp.transpose(w_pt, (2, 1, 0)).reshape(K * cin, cout).astype(jnp.bfloat16)


def _bias(b):
    return b.reshape(1, -1).astype(jnp.float32)


def _pack_down(w_pt, b):
    """Conv1d(k=4, s=2, p=1) as stride-1 k=3 conv on a time-folded (T/2, 2Cin) input."""
    W = [w_pt[:, :, k].T for k in range(4)]          # (Cin, Cout) each
    Z = jnp.zeros_like(W[0])
    taps = jnp.stack([jnp.concatenate([Z, W[0]], axis=0),
                      jnp.concatenate([W[1], W[2]], axis=0),
                      jnp.concatenate([W[3], Z], axis=0)], axis=0)   # (3, 2Cin, Cout)
    return taps.reshape(-1, W[0].shape[1]).astype(jnp.bfloat16), _bias(b)


def _pack_up(w_pt, b):
    """Upsample(x2 nearest) + Conv1d(k=3,p=1) as stride-1 k=3 conv with folded (T, 2Cout) output."""
    W = [w_pt[:, :, k].T for k in range(3)]
    Z = jnp.zeros_like(W[0])
    taps = jnp.stack([jnp.concatenate([W[0], Z], axis=1),
                      jnp.concatenate([W[1] + W[2], W[0] + W[1]], axis=1),
                      jnp.concatenate([Z, W[2]], axis=1)], axis=0)   # (3, Cin, 2Cout)
    bb = jnp.concatenate([b, b]).reshape(1, -1).astype(jnp.float32)
    return taps.reshape(3 * W[0].shape[0], -1).astype(jnp.bfloat16), bb


def _pack_convtranspose(w_ct, b):
    """ConvTranspose1d(k=4, s=2, p=1) as stride-1 k=3 conv with folded (T, 2Cout) output."""
    Wt = [w_ct[:, :, k] for k in range(4)]           # (Cin, Cout) each
    Z = jnp.zeros_like(Wt[0])
    taps = jnp.stack([jnp.concatenate([Wt[3], Z], axis=1),
                      jnp.concatenate([Wt[1], Wt[2]], axis=1),
                      jnp.concatenate([Z, Wt[0]], axis=1)], axis=0)
    bb = jnp.concatenate([b, b]).reshape(1, -1).astype(jnp.float32)
    return taps.reshape(3 * Wt[0].shape[0], -1).astype(jnp.bfloat16), bb


def init_params(key, cfg):
    assert cfg.get('stride_t', 2) == 2               # folding assumes stride_t == 2
    width, oew = cfg['width'], cfg['output_emb_width']
    depth, nb, cdim, nfeats = cfg['depth'], cfg['nb_code'], cfg['code_dim'], cfg['nfeats']
    cnt = [0]

    def nk():
        cnt[0] += 1
        return jax.random.fold_in(key, cnt[0])

    p = {}

    def add_encoder(prefix, cin, down_t):
        w, b = _pt_conv(nk(), cin, width, 3)
        p[f'{prefix}_in_w'], p[f'{prefix}_in_b'] = _pack(w), _bias(b)
        for i in range(down_t):
            w, b = _pt_conv(nk(), width, width, 4)
            p[f'{prefix}_down{i}_w'], p[f'{prefix}_down{i}_b'] = _pack_down(w, b)
            for j in range(depth):
                w1, b1 = _pt_conv(nk(), width, width, 3)
                w2, b2 = _pt_conv(nk(), width, width, 1)
                p[f'{prefix}_res{i}_{j}_w1'], p[f'{prefix}_res{i}_{j}_b1'] = _pack(w1), _bias(b1)
                p[f'{prefix}_res{i}_{j}_w2'], p[f'{prefix}_res{i}_{j}_b2'] = _pack(w2), _bias(b2)
        w, b = _pt_conv(nk(), width, oew, 3)
        p[f'{prefix}_out_w'], p[f'{prefix}_out_b'] = _pack(w), _bias(b)

    def add_decoder(prefix, in_ch, out_dim, down_t):
        w, b = _pt_conv(nk(), in_ch, width, 3)
        p[f'{prefix}_in_w'], p[f'{prefix}_in_b'] = _pack(w), _bias(b)
        for i in range(down_t):
            for j in range(depth):
                w1, b1 = _pt_conv(nk(), width, width, 3)
                w2, b2 = _pt_conv(nk(), width, width, 1)
                p[f'{prefix}_res{i}_{j}_w1'], p[f'{prefix}_res{i}_{j}_b1'] = _pack(w1), _bias(b1)
                p[f'{prefix}_res{i}_{j}_w2'], p[f'{prefix}_res{i}_{j}_b2'] = _pack(w2), _bias(b2)
            w, b = _pt_conv(nk(), width, width, 3)
            p[f'{prefix}_up{i}_w'], p[f'{prefix}_up{i}_b'] = _pack_up(w, b)
        w, b = _pt_conv(nk(), width, width, 3)
        p[f'{prefix}_mid_w'], p[f'{prefix}_mid_b'] = _pack(w), _bias(b)
        w, b = _pt_conv(nk(), width, out_dim, 3)
        p[f'{prefix}_out_w'], p[f'{prefix}_out_b'] = _pack(w), _bias(b)

    add_encoder('eb', 133, 1)        # encoder_body  (down_t=1)
    add_encoder('eh', 180, 2)        # encoder_hand  (down_t=2)

    w, b = _pt_conv(nk(), oew, oew, 1)               # quantize_conv_h (1x1)
    p['qh_w'], p['qh_b'] = _pack(w), _bias(b)
    w, b = _pt_conv(nk(), 2 * oew, oew, 1)           # quantize_conv_b (1x1)
    p['qb_w'], p['qb_b'] = _pack(w), _bias(b)

    add_decoder('dh', oew, oew, 1)                   # decoder_hand
    add_decoder('dd', 2 * oew, nfeats, 1)            # final decoder (313-ch output)

    k1, k2 = jax.random.split(nk())                  # upsample_t = ConvTranspose1d(oew,oew,4,2,1)
    bound = 1.0 / math.sqrt(oew * 4)
    w_ct = jax.random.uniform(k1, (oew, oew, 4), jnp.float32, -bound, bound)
    b_ct = jax.random.uniform(k2, (oew,), jnp.float32, -bound, bound)
    p['ut_w'], p['ut_b'] = _pack_convtranspose(w_ct, b_ct)

    p['cb_hand'] = jax.random.normal(nk(), (nb, cdim), jnp.float32)
    p['cb_body'] = jax.random.normal(nk(), (nb, cdim), jnp.float32)
    return p


# ---------------------------------------------------------------------------
# Op/weight programs (shared by init layout and kernel bodies)
# ---------------------------------------------------------------------------
def encoder_program(prefix, down_t, depth, dgr, with_qconv=None):
    dils = [dgr ** d for d in range(depth)]
    if _ENC_REVERSE:
        dils = dils[::-1]
    ops = [('conv', 3, 1, False, True)]
    keys = [f'{prefix}_in_w', f'{prefix}_in_b']
    for i in range(down_t):
        ops += [('fold',), ('conv', 3, 1, False, False)]       # strided down-conv (folded)
        keys += [f'{prefix}_down{i}_w', f'{prefix}_down{i}_b']
        for j, d in enumerate(dils):
            ops.append(('res', d))
            keys += [f'{prefix}_res{i}_{j}_w1', f'{prefix}_res{i}_{j}_b1',
                     f'{prefix}_res{i}_{j}_w2', f'{prefix}_res{i}_{j}_b2']
    ops.append(('conv', 3, 1, False, False))                   # encoder output conv
    keys += [f'{prefix}_out_w', f'{prefix}_out_b']
    if with_qconv is not None:                                  # fused quantize_conv_h
        ops.append(('conv', 1, 1, False, False))
        keys += [f'{with_qconv}_w', f'{with_qconv}_b']
    return ops, keys


def decoder_program(prefix, down_t, depth, dgr):
    dils = [dgr ** d for d in range(depth)][::-1]               # reverse_dilation=True
    ops = [('conv', 3, 1, False, True)]
    keys = [f'{prefix}_in_w', f'{prefix}_in_b']
    for i in range(down_t):
        for j, d in enumerate(dils):
            ops.append(('res', d))
            keys += [f'{prefix}_res{i}_{j}_w1', f'{prefix}_res{i}_{j}_b1',
                     f'{prefix}_res{i}_{j}_w2', f'{prefix}_res{i}_{j}_b2']
        ops += [('conv', 3, 1, False, False), ('unfold',)]      # upsample+conv (folded out)
        keys += [f'{prefix}_up{i}_w', f'{prefix}_up{i}_b']
    ops += [('conv', 3, 1, False, True), ('conv', 3, 1, False, False)]   # mid+relu, out
    keys += [f'{prefix}_mid_w', f'{prefix}_mid_b', f'{prefix}_out_w', f'{prefix}_out_b']
    return ops, keys


def _wspec(w):
    return pl.BlockSpec(w.shape, lambda n: (0, 0))


# ---------------------------------------------------------------------------
# pallas_call wrappers for the three fused stage kernels (grid over batch)
# ---------------------------------------------------------------------------
def encoders_call(body, hand, p, cfg):
    N, T, _ = body.shape
    oew, depth, dgr = cfg['output_emb_width'], cfg['depth'], cfg['dilation_growth_rate']
    ops_b, keys_b = encoder_program('eb', 1, depth, dgr)
    ops_h, keys_h = encoder_program('eh', 2, depth, dgr, with_qconv='qh')
    ws = [p[k] for k in keys_b + keys_h]
    kernel = functools.partial(_encoders_kernel, ops_b=tuple(ops_b),
                               nwb=len(keys_b), ops_h=tuple(ops_h))
    out_shape = (jax.ShapeDtypeStruct((N, T // 2, oew), jnp.bfloat16),   # x_enc_b (bf16)
                 jax.ShapeDtypeStruct((N, T // 4, oew), jnp.float32))    # quant_h_in
    return pl.pallas_call(
        kernel, out_shape=out_shape,
        grid_spec=pltpu.PrefetchScalarGridSpec(
            num_scalar_prefetch=0, grid=(N,),
            in_specs=[pl.BlockSpec((1, T, body.shape[-1]), lambda n: (n, 0, 0)),
                      pl.BlockSpec((1, T, hand.shape[-1]), lambda n: (n, 0, 0))]
                     + [_wspec(w) for w in ws],
            out_specs=(pl.BlockSpec((1, T // 2, oew), lambda n: (n, 0, 0)),
                       pl.BlockSpec((1, T // 4, oew), lambda n: (n, 0, 0)))),
        compiler_params=pltpu.CompilerParams(
            dimension_semantics=("parallel",), vmem_limit_bytes=VMEM_LIMIT),
    )(body, hand, *ws)


def dec_hand_call(quant_hand, x_enc_b, p, cfg):
    N, Th, oew = quant_hand.shape
    Tb = x_enc_b.shape[1]
    depth, dgr = cfg['depth'], cfg['dilation_growth_rate']
    ops_d, keys_d = decoder_program('dh', 1, depth, dgr)
    ws = [p[k] for k in keys_d] + [p['qb_w'], p['qb_b']]
    kernel = functools.partial(_dechand_kernel, ops_dec=tuple(ops_d), nwd=len(keys_d))
    return pl.pallas_call(
        kernel,
        out_shape=jax.ShapeDtypeStruct((N, Tb, oew), jnp.float32),       # quant_b_in
        grid_spec=pltpu.PrefetchScalarGridSpec(
            num_scalar_prefetch=0, grid=(N,),
            in_specs=[pl.BlockSpec((1, Th, oew), lambda n: (n, 0, 0)),
                      pl.BlockSpec((1, Tb, oew), lambda n: (n, 0, 0))]
                     + [_wspec(w) for w in ws],
            out_specs=pl.BlockSpec((1, Tb, oew), lambda n: (n, 0, 0))),
        compiler_params=pltpu.CompilerParams(
            dimension_semantics=("parallel",), vmem_limit_bytes=VMEM_LIMIT),
    )(quant_hand, x_enc_b, *ws)


def decode_call(quant_hand, quant_body, p, cfg):
    N, Th, oew = quant_hand.shape
    Tb = quant_body.shape[1]
    T = 2 * Tb
    nfeats, depth, dgr = cfg['nfeats'], cfg['depth'], cfg['dilation_growth_rate']
    ops_d, keys_d = decoder_program('dd', 1, depth, dgr)
    ws = [p['ut_w'], p['ut_b']] + [p[k] for k in keys_d]
    kernel = functools.partial(_decode_kernel, ops_dec=tuple(ops_d))
    return pl.pallas_call(
        kernel,
        out_shape=jax.ShapeDtypeStruct((N, T, nfeats), jnp.float32),     # x_out, 313 direct
        grid_spec=pltpu.PrefetchScalarGridSpec(
            num_scalar_prefetch=0, grid=(N,),
            in_specs=[pl.BlockSpec((1, Th, oew), lambda n: (n, 0, 0)),
                      pl.BlockSpec((1, Tb, oew), lambda n: (n, 0, 0))]
                     + [_wspec(w) for w in ws],
            out_specs=pl.BlockSpec((1, T, nfeats), lambda n: (n, 0, 0))),
        compiler_params=pltpu.CompilerParams(
            dimension_semantics=("parallel",), vmem_limit_bytes=VMEM_LIMIT),
    )(quant_hand, quant_body, *ws)


# ---------------------------------------------------------------------------
# Full forward (HumanVQVAE_2_body_hand.forward -> vqvae.forward)
# ---------------------------------------------------------------------------
def human_vqvae_forward(x, p, cfg):
    N, T, _ = x.shape
    assert T % 4 == 0, "hand path downsamples by 4"
    x = x.astype(jnp.float32)                                              # preprocess().float()
    # body / hand feature split (channels-last equivalent of the NCW slicing)
    body = jnp.concatenate([x[:, :, :67], x[:, :, 157:223]], axis=-1)      # 133 feats
    hand = jnp.concatenate([x[:, :, 67:157], x[:, :, 223:]], axis=-1)      # 180 feats

    x_enc_b, quant_h_in = encoders_call(body, hand, p, cfg)                # one fused launch
    quant_hand, loss_hand, _perp_hand = quantize_ema_reset(quant_h_in, p['cb_hand'])
    quant_b_in = dec_hand_call(quant_hand, x_enc_b, p, cfg)                # dec_hand + concat + 1x1
    quant_body, loss_body, _perp_body = quantize_ema_reset(quant_b_in, p['cb_body'])
    x_out = decode_call(quant_hand, quant_body, p, cfg)                    # upsample_t + decoder
    return x_out, loss_hand, loss_body


# ---------------------------------------------------------------------------
if __name__ == "__main__":
    cfg = dict(nfeats=313, nb_code=256, code_dim=128, output_emb_width=128,
               stride_t=2, width=128, depth=2, dilation_growth_rate=3)
    assert cfg['code_dim'] == cfg['output_emb_width']

    key = jax.random.PRNGKey(0)
    kp, kx = jax.random.split(key)
    params = init_params(kp, cfg)

    N, T = 2, 16                                    # T divisible by 4 (hand path downsamples 4x)
    x = jax.random.normal(kx, (N, T, cfg['nfeats']), jnp.float32)

    fwd = jax.jit(lambda xx: human_vqvae_forward(xx, params, cfg))
    x_out, loss_hand, loss_body = fwd(x)
    jax.block_until_ready((x_out, loss_hand, loss_body))

    assert x_out.shape == x.shape, x_out.shape
    assert loss_hand.shape == () and loss_body.shape == ()
    assert bool(jnp.all(jnp.isfinite(x_out)))
    print("KERNEL_OK")
</pallas_src>

<mosaic_0001>
module attributes {stable_mosaic.version = 11 : i64} {
  func.func @_vq_kernel(%arg0: i32, %arg1: memref<8x128xf32, #tpu.memory_space<vmem>>, %arg2: memref<256x128xf32, #tpu.memory_space<vmem>>, %arg3: memref<1x256xf32, #tpu.memory_space<vmem>>, %arg4: memref<8x128xf32, #tpu.memory_space<vmem>>, %arg5: memref<1x1xf32, #tpu.memory_space<vmem>>, %arg6: memref<1x1xf32, #tpu.memory_space<vmem>>, %arg7: memref<1x256xf32, #tpu.memory_space<vmem>>, %arg8: memref<1x1xf32, #tpu.memory_space<vmem>>) attributes {dimension_semantics = [#tpu.dimension_semantics<arbitrary>], iteration_bounds = array<i64: 1>, scalar_prefetch = 0 : i64, scratch_operands = 2 : i64, tpu.core_type = #tpu.core_type<tc>, window_params = [{transform_indices = @transform_0, window_bounds = array<i64: 8, 128>}, {pipeline_mode = #tpu.pipeline_mode<synchronous>, transform_indices = @transform_1, window_bounds = array<i64: 256, 128>}, {pipeline_mode = #tpu.pipeline_mode<synchronous>, transform_indices = @transform_2, window_bounds = array<i64: 1, 256>}, {transform_indices = @transform_3, window_bounds = array<i64: 8, 128>}, {pipeline_mode = #tpu.pipeline_mode<synchronous>, transform_indices = @transform_4, window_bounds = array<i64: 1, 1>}, {pipeline_mode = #tpu.pipeline_mode<synchronous>, transform_indices = @transform_5, window_bounds = array<i64: 1, 1>}]} {
    %c0_i32 = arith.constant 0 : i32
    %0 = arith.cmpi eq, %arg0, %c0_i32 : i32
    %1 = arith.extui %0 : i1 to i32
    %c0_i32_0 = arith.constant 0 : i32
    %2 = arith.cmpi ne, %1, %c0_i32_0 : i32
    scf.if %2 {
      %cst_25 = arith.constant 0.000000e+00 : f32
      %53 = vector.broadcast %cst_25 : f32 to vector<1x256xf32>
      %c0_26 = arith.constant 0 : index
      %c0_27 = arith.constant 0 : index
      %54 = vector.load %arg7[%c0_26, %c0_27] : memref<1x256xf32, #tpu.memory_space<vmem>>, vector<1x256xf32>
      tpu.vector_store %arg7[%c0_26, %c0_27], %53 {strides = array<i32>} : memref<1x256xf32, #tpu.memory_space<vmem>>, vector<1x256xf32>,
      %cst_28 = arith.constant 0.000000e+00 : f32
      %55 = vector.broadcast %cst_28 : f32 to vector<1x1xf32>
      %c0_29 = arith.constant 0 : index
      %c0_30 = arith.constant 0 : index
      %56 = vector.load %arg8[%c0_29, %c0_30] : memref<1x1xf32, #tpu.memory_space<vmem>>, vector<1x1xf32>
      tpu.vector_store %arg8[%c0_29, %c0_30], %55 {strides = array<i32>} : memref<1x1xf32, #tpu.memory_space<vmem>>, vector<1x1xf32>,
    } else {
    }
    %c0 = arith.constant 0 : index
    %c0_1 = arith.constant 0 : index
    %3 = vector.load %arg1[%c0, %c0_1] : memref<8x128xf32, #tpu.memory_space<vmem>>, vector<8x128xf32>
    %c0_2 = arith.constant 0 : index
    %c0_3 = arith.constant 0 : index
    %4 = vector.load %arg2[%c0_2, %c0_3] : memref<256x128xf32, #tpu.memory_space<vmem>>, vector<256x128xf32>
    %cst = arith.constant dense<0.000000e+00> : vector<8x256xf32>
    %5 = tpu.matmul %3, %4, %cst {dimension_numbers = #tpu.dot_dimension_numbers<[1], [1], [0], [0], [0, 0, 1, 0], [], []>} : vector<8x128xf32>, vector<256x128xf32>, vector<8x256xf32> -> vector<8x256xf32>
    %c0_4 = arith.constant 0 : index
    %c0_5 = arith.constant 0 : index
    %6 = vector.load %arg3[%c0_4, %c0_5] : memref<1x256xf32, #tpu.memory_space<vmem>>, vector<1x256xf32>
    %7 = vector.broadcast %6 : vector<1x256xf32> to vector<8x256xf32>
    %8 = arith.addf %5, %7 : vector<8x256xf32>
    %cst_6 = arith.constant dense<0xFF800000> : vector<8xf32>
    %9 = vector.multi_reduction <maximumf>, %8, %cst_6 [1] : vector<8x256xf32> to vector<8xf32>
    %10 = vector.shape_cast %9 : vector<8xf32> to vector<8x1xf32>
    %11 = tpu.iota {dimensions = array<i32: 1>} : vector<8x256xi32>
    %12 = vector.broadcast %10 : vector<8x1xf32> to vector<8x256xf32>
    %13 = arith.cmpf oeq, %8, %12 : vector<8x256xf32>
    %c256_i32 = arith.constant 256 : i32
    %14 = vector.broadcast %c256_i32 : i32 to vector<8x256xi32>
    %15 = arith.select %13, %11, %14 : vector<8x256xi1>, vector<8x256xi32>
    %cst_7 = arith.constant dense<2147483647> : vector<8xi32>
    %16 = vector.multi_reduction <minsi>, %15, %cst_7 [1] : vector<8x256xi32> to vector<8xi32>
    %17 = vector.shape_cast %16 : vector<8xi32> to vector<8x1xi32>
    %18 = vector.broadcast %17 : vector<8x1xi32> to vector<8x256xi32>
    %19 = arith.cmpi eq, %11, %18 : vector<8x256xi32>
    %20 = arith.extui %19 : vector<8x256xi1> to vector<8x256xi32>
    %21 = arith.sitofp %20 : vector<8x256xi32> to vector<8x256xf32>
    %cst_8 = arith.constant dense<0.000000e+00> : vector<8x128xf32>
    %22 = tpu.matmul %21, %4, %cst_8 {dimension_numbers = #tpu.dot_dimension_numbers<[1], [0], [0], [1], [0, 0, 1, 1], [], []>} : vector<8x256xf32>, vector<256x128xf32>, vector<8x128xf32> -> vector<8x128xf32>
    %c0_9 = arith.constant 0 : index
    %c0_10 = arith.constant 0 : index
    %23 = vector.load %arg4[%c0_9, %c0_10] : memref<8x128xf32, #tpu.memory_space<vmem>>, vector<8x128xf32>
    tpu.vector_store %arg4[%c0_9, %c0_10], %22 {strides = array<i32>} : memref<8x128xf32, #tpu.memory_space<vmem>>, vector<8x128xf32>,
    %c8_i32 = arith.constant 8 : i32
    %24 = arith.muli %arg0, %c8_i32 : i32
    %25 = tpu.iota {dimensions = array<i32: 0>} : vector<8x1xi32>
    %26 = vector.broadcast %24 : i32 to vector<8x1xi32>
    %27 = arith.addi %26, %25 : vector<8x1xi32>
    %c8_i32_11 = arith.constant 8 : i32
    %28 = vector.broadcast %c8_i32_11 : i32 to vector<8x1xi32>
    %29 = arith.cmpi slt, %27, %28 : vector<8x1xi32>
    %30 = arith.extui %29 : vector<8x1xi1> to vector<8x1xi32>
    %31 = arith.sitofp %30 : vector<8x1xi32> to vector<8x1xf32>
    %c0_12 = arith.constant 0 : index
    %c0_13 = arith.constant 0 : index
    %32 = vector.load %arg7[%c0_12, %c0_13] : memref<1x256xf32, #tpu.memory_space<vmem>>, vector<1x256xf32>
    %33 = vector.broadcast %31 : vector<8x1xf32> to vector<8x256xf32>
    %34 = arith.mulf %21, %33 : vector<8x256xf32>
    %cst_14 = arith.constant dense<0.000000e+00> : vector<256xf32>
    %35 = vector.multi_reduction <add>, %34, %cst_14 [0] : vector<8x256xf32> to vector<256xf32>
    %36 = vector.shape_cast %35 : vector<256xf32> to vector<1x256xf32>
    %37 = arith.addf %32, %36 : vector<1x256xf32>
    %c0_15 = arith.constant 0 : index
    %c0_16 = arith.constant 0 : index
    %38 = vector.load %arg7[%c0_15, %c0_16] : memref<1x256xf32, #tpu.memory_space<vmem>>, vector<1x256xf32>
    tpu.vector_store %arg7[%c0_15, %c0_16], %37 {strides = array<i32>} : memref<1x256xf32, #tpu.memory_space<vmem>>, vector<1x256xf32>,
    %39 = arith.subf %3, %22 : vector<8x128xf32>
    %40 = vector.broadcast %31 : vector<8x1xf32> to vector<8x128xf32>
    %41 = arith.mulf %39, %40 : vector<8x128xf32>
    %42 = arith.mulf %41, %41 : vector<8x128xf32>
    %cst_17 = arith.constant dense<0.000000e+00> : vector<8xf32>
    %43 = vector.multi_reduction <add>, %42, %cst_17 [1] : vector<8x128xf32> to vector<8xf32>
    %44 = vector.shape_cast %43 : vector<8xf32> to vector<8x1xf32>
    %cst_18 = arith.constant dense<0.000000e+00> : vector<1xf32>
    %45 = vector.multi_reduction <add>, %44, %cst_18 [0] : vector<8x1xf32> to vector<1xf32>
    %46 = vector.shape_cast %45 : vector<1xf32> to vector<1x1xf32>
    %c0_19 = arith.constant 0 : index
    %c0_20 = arith.constant 0 : index
    %47 = vector.load %arg8[%c0_19, %c0_20] : memref<1x1xf32, #tpu.memory_space<vmem>>, vector<1x1xf32>
    %48 = arith.addf %47, %46 : vector<1x1xf32>
    %c0_21 = arith.constant 0 : index
    %c0_22 = arith.constant 0 : index
    %49 = vector.load %arg8[%c0_21, %c0_22] : memref<1x1xf32, #tpu.memory_space<vmem>>, vector<1x1xf32>
    tpu.vector_store %arg8[%c0_21, %c0_22], %48 {strides = array<i32>} : memref<1x1xf32, #tpu.memory_space<vmem>>, vector<1x1xf32>,
    %c0_i32_23 = arith.constant 0 : i32
    %50 = arith.cmpi eq, %arg0, %c0_i32_23 : i32
    %51 = arith.extui %50 : i1 to i32
    %c0_i32_24 = arith.constant 0 : i32
    %52 = arith.cmpi ne, %51, %c0_i32_24 : i32
    scf.if %52 {
      %c0_25 = arith.constant 0 : index
      %c0_26 = arith.constant 0 : index
      %53 = vector.load %arg8[%c0_25, %c0_26] : memref<1x1xf32, #tpu.memory_space<vmem>>, vector<1x1xf32>
      %cst_27 = arith.constant 9.765625E-4 : f32
      %54 = vector.broadcast %cst_27 : f32 to vector<1x1xf32>
      %55 = arith.mulf %53, %54 : vector<1x1xf32>
      %c0_28 = arith.constant 0 : index
      %c0_29 = arith.constant 0 : index
      %56 = vector.load %arg5[%c0_28, %c0_29] : memref<1x1xf32, #tpu.memory_space<vmem>>, vector<1x1xf32>
      tpu.vector_store %arg5[%c0_28, %c0_29], %55 {strides = array<i32>} : memref<1x1xf32, #tpu.memory_space<vmem>>, vector<1x1xf32>,
      %c0_30 = arith.constant 0 : index
      %c0_31 = arith.constant 0 : index
      %57 = vector.load %arg7[%c0_30, %c0_31] : memref<1x256xf32, #tpu.memory_space<vmem>>, vector<1x256xf32>
      %cst_32 = arith.constant 1.250000e-01 : f32
      %58 = vector.broadcast %cst_32 : f32 to vector<1x256xf32>
      %59 = arith.mulf %57, %58 : vector<1x256xf32>
      %cst_33 = arith.constant 1.000000e-07 : f32
      %60 = vector.broadcast %cst_33 : f32 to vector<1x256xf32>
      %61 = arith.addf %59, %60 : vector<1x256xf32>
      %62 = math.log %61 : vector<1x256xf32>
      %63 = arith.mulf %59, %62 : vector<1x256xf32>
      %cst_34 = arith.constant dense<0.000000e+00> : vector<1xf32>
      %64 = vector.multi_reduction <add>, %63, %cst_34 [1] : vector<1x256xf32> to vector<1xf32>
      %65 = vector.shape_cast %64 : vector<1xf32> to vector<1x1xf32>
      %cst_35 = arith.constant 0.000000e+00 : f32
      %66 = vector.broadcast %cst_35 : f32 to vector<1x1xf32>
      %67 = arith.subf %66, %65 : vector<1x1xf32>
      %68 = math.exp %67 : vector<1x1xf32>
      %c0_36 = arith.constant 0 : index
      %c0_37 = arith.constant 0 : index
      %69 = vector.load %arg6[%c0_36, %c0_37] : memref<1x1xf32, #tpu.memory_space<vmem>>, vector<1x1xf32>
      tpu.vector_store %arg6[%c0_36, %c0_37], %68 {strides = array<i32>} : memref<1x1xf32, #tpu.memory_space<vmem>>, vector<1x1xf32>,
    } else {
    }
    return
  }
  func.func @transform_0(%arg0: i32) -> (i32, i32) {
    %c0_i32 = arith.constant 0 : i32
    %c0_i32_0 = arith.constant 0 : i32
    return %arg0, %c0_i32 : i32, i32
  }
  func.func @transform_1(%arg0: i32) -> (i32, i32) {
    %c0_i32 = arith.constant 0 : i32
    %c0_i32_0 = arith.constant 0 : i32
    %c0_i32_1 = arith.constant 0 : i32
    return %c0_i32, %c0_i32_0 : i32, i32
  }
  func.func @transform_2(%arg0: i32) -> (i32, i32) {
    %c0_i32 = arith.constant 0 : i32
    %c0_i32_0 = arith.constant 0 : i32
    %c0_i32_1 = arith.constant 0 : i32
    return %c0_i32, %c0_i32_0 : i32, i32
  }
  func.func @transform_3(%arg0: i32) -> (i32, i32) {
    %c0_i32 = arith.constant 0 : i32
    %c0_i32_0 = arith.constant 0 : i32
    return %arg0, %c0_i32 : i32, i32
  }
  func.func @transform_4(%arg0: i32) -> (i32, i32) {
    %c0_i32 = arith.constant 0 : i32
    %c0_i32_0 = arith.constant 0 : i32
    %c0_i32_1 = arith.constant 0 : i32
    return %c0_i32, %c0_i32_0 : i32, i32
  }
  func.func @transform_5(%arg0: i32) -> (i32, i32) {
    %c0_i32 = arith.constant 0 : i32
    %c0_i32_0 = arith.constant 0 : i32
    %c0_i32_1 = arith.constant 0 : i32
    return %c0_i32, %c0_i32_0 : i32, i32
  }
}

module attributes {stable_mosaic.version = 11 : i64} {
  func.func @_vq_kernel(%arg0: i32, %arg1: memref<16x128xf32, #tpu.memory_space<vmem>>, %arg2: memref<256x128xf32, #tpu.memory_space<vmem>>, %arg3: memref<1x256xf32, #tpu.memory_space<vmem>>, %arg4: memref<16x128xf32, #tpu.memory_space<vmem>>, %arg5: memref<1x1xf32, #tpu.memory_space<vmem>>, %arg6: memref<1x1xf32, #tpu.memory_space<vmem>>, %arg7: memref<1x256xf32, #tpu.memory_space<vmem>>, %arg8: memref<1x1xf32, #tpu.memory_space<vmem>>) attributes {dimension_semantics = [#tpu.dimension_semantics<arbitrary>], iteration_bounds = array<i64: 1>, scalar_prefetch = 0 : i64, scratch_operands = 2 : i64, tpu.core_type = #tpu.core_type<tc>, window_params = [{transform_indices = @transform_0, window_bounds = array<i64: 16, 128>}, {pipeline_mode = #tpu.pipeline_mode<synchronous>, transform_indices = @transform_1, window_bounds = array<i64: 256, 128>}, {pipeline_mode = #tpu.pipeline_mode<synchronous>, transform_indices = @transform_2, window_bounds = array<i64: 1, 256>}, {transform_indices = @transform_3, window_bounds = array<i64: 16, 128>}, {pipeline_mode = #tpu.pipeline_mode<synchronous>, transform_indices = @transform_4, window_bounds = array<i64: 1, 1>}, {pipeline_mode = #tpu.pipeline_mode<synchronous>, transform_indices = @transform_5, window_bounds = array<i64: 1, 1>}]} {
    %c0_i32 = arith.constant 0 : i32
    %0 = arith.cmpi eq, %arg0, %c0_i32 : i32
    %1 = arith.extui %0 : i1 to i32
    %c0_i32_0 = arith.constant 0 : i32
    %2 = arith.cmpi ne, %1, %c0_i32_0 : i32
    scf.if %2 {
      %cst_25 = arith.constant 0.000000e+00 : f32
      %53 = vector.broadcast %cst_25 : f32 to vector<1x256xf32>
      %c0_26 = arith.constant 0 : index
      %c0_27 = arith.constant 0 : index
      %54 = vector.load %arg7[%c0_26, %c0_27] : memref<1x256xf32, #tpu.memory_space<vmem>>, vector<1x256xf32>
      tpu.vector_store %arg7[%c0_26, %c0_27], %53 {strides = array<i32>} : memref<1x256xf32, #tpu.memory_space<vmem>>, vector<1x256xf32>,
      %cst_28 = arith.constant 0.000000e+00 : f32
      %55 = vector.broadcast %cst_28 : f32 to vector<1x1xf32>
      %c0_29 = arith.constant 0 : index
      %c0_30 = arith.constant 0 : index
      %56 = vector.load %arg8[%c0_29, %c0_30] : memref<1x1xf32, #tpu.memory_space<vmem>>, vector<1x1xf32>
      tpu.vector_store %arg8[%c0_29, %c0_30], %55 {strides = array<i32>} : memref<1x1xf32, #tpu.memory_space<vmem>>, vector<1x1xf32>,
    } else {
    }
    %c0 = arith.constant 0 : index
    %c0_1 = arith.constant 0 : index
    %3 = vector.load %arg1[%c0, %c0_1] : memref<16x128xf32, #tpu.memory_space<vmem>>, vector<16x128xf32>
    %c0_2 = arith.constant 0 : index
    %c0_3 = arith.constant 0 : index
    %4 = vector.load %arg2[%c0_2, %c0_3] : memref<256x128xf32, #tpu.memory_space<vmem>>, vector<256x128xf32>
    %cst = arith.constant dense<0.000000e+00> : vector<16x256xf32>
    %5 = tpu.matmul %3, %4, %cst {dimension_numbers = #tpu.dot_dimension_numbers<[1], [1], [0], [0], [0, 0, 1, 0], [], []>} : vector<16x128xf32>, vector<256x128xf32>, vector<16x256xf32> -> vector<16x256xf32>
    %c0_4 = arith.constant 0 : index
    %c0_5 = arith.constant 0 : index
    %6 = vector.load %arg3[%c0_4, %c0_5] : memref<1x256xf32, #tpu.memory_space<vmem>>, vector<1x256xf32>
    %7 = vector.broadcast %6 : vector<1x256xf32> to vector<16x256xf32>
    %8 = arith.addf %5, %7 : vector<16x256xf32>
    %cst_6 = arith.constant dense<0xFF800000> : vector<16xf32>
    %9 = vector.multi_reduction <maximumf>, %8, %cst_6 [1] : vector<16x256xf32> to vector<16xf32>
    %10 = vector.shape_cast %9 : vector<16xf32> to vector<16x1xf32>
    %11 = tpu.iota {dimensions = array<i32: 1>} : vector<16x256xi32>
    %12 = vector.broadcast %10 : vector<16x1xf32> to vector<16x256xf32>
    %13 = arith.cmpf oeq, %8, %12 : vector<16x256xf32>
    %c256_i32 = arith.constant 256 : i32
    %14 = vector.broadcast %c256_i32 : i32 to vector<16x256xi32>
    %15 = arith.select %13, %11, %14 : vector<16x256xi1>, vector<16x256xi32>
    %cst_7 = arith.constant dense<2147483647> : vector<16xi32>
    %16 = vector.multi_reduction <minsi>, %15, %cst_7 [1] : vector<16x256xi32> to vector<16xi32>
    %17 = vector.shape_cast %16 : vector<16xi32> to vector<16x1xi32>
    %18 = vector.broadcast %17 : vector<16x1xi32> to vector<16x256xi32>
    %19 = arith.cmpi eq, %11, %18 : vector<16x256xi32>
    %20 = arith.extui %19 : vector<16x256xi1> to vector<16x256xi32>
    %21 = arith.sitofp %20 : vector<16x256xi32> to vector<16x256xf32>
    %cst_8 = arith.constant dense<0.000000e+00> : vector<16x128xf32>
    %22 = tpu.matmul %21, %4, %cst_8 {dimension_numbers = #tpu.dot_dimension_numbers<[1], [0], [0], [1], [0, 0, 1, 1], [], []>} : vector<16x256xf32>, vector<256x128xf32>, vector<16x128xf32> -> vector<16x128xf32>
    %c0_9 = arith.constant 0 : index
    %c0_10 = arith.constant 0 : index
    %23 = vector.load %arg4[%c0_9, %c0_10] : memref<16x128xf32, #tpu.memory_space<vmem>>, vector<16x128xf32>
    tpu.vector_store %arg4[%c0_9, %c0_10], %22 {strides = array<i32>} : memref<16x128xf32, #tpu.memory_space<vmem>>, vector<16x128xf32>,
    %c16_i32 = arith.constant 16 : i32
    %24 = arith.muli %arg0, %c16_i32 : i32
    %25 = tpu.iota {dimensions = array<i32: 0>} : vector<16x1xi32>
    %26 = vector.broadcast %24 : i32 to vector<16x1xi32>
    %27 = arith.addi %26, %25 : vector<16x1xi32>
    %c16_i32_11 = arith.constant 16 : i32
    %28 = vector.broadcast %c16_i32_11 : i32 to vector<16x1xi32>
    %29 = arith.cmpi slt, %27, %28 : vector<16x1xi32>
    %30 = arith.extui %29 : vector<16x1xi1> to vector<16x1xi32>
    %31 = arith.sitofp %30 : vector<16x1xi32> to vector<16x1xf32>
    %c0_12 = arith.constant 0 : index
    %c0_13 = arith.constant 0 : index
    %32 = vector.load %arg7[%c0_12, %c0_13] : memref<1x256xf32, #tpu.memory_space<vmem>>, vector<1x256xf32>
    %33 = vector.broadcast %31 : vector<16x1xf32> to vector<16x256xf32>
    %34 = arith.mulf %21, %33 : vector<16x256xf32>
    %cst_14 = arith.constant dense<0.000000e+00> : vector<256xf32>
    %35 = vector.multi_reduction <add>, %34, %cst_14 [0] : vector<16x256xf32> to vector<256xf32>
    %36 = vector.shape_cast %35 : vector<256xf32> to vector<1x256xf32>
    %37 = arith.addf %32, %36 : vector<1x256xf32>
    %c0_15 = arith.constant 0 : index
    %c0_16 = arith.constant 0 : index
    %38 = vector.load %arg7[%c0_15, %c0_16] : memref<1x256xf32, #tpu.memory_space<vmem>>, vector<1x256xf32>
    tpu.vector_store %arg7[%c0_15, %c0_16], %37 {strides = array<i32>} : memref<1x256xf32, #tpu.memory_space<vmem>>, vector<1x256xf32>,
    %39 = arith.subf %3, %22 : vector<16x128xf32>
    %40 = vector.broadcast %31 : vector<16x1xf32> to vector<16x128xf32>
    %41 = arith.mulf %39, %40 : vector<16x128xf32>
    %42 = arith.mulf %41, %41 : vector<16x128xf32>
    %cst_17 = arith.constant dense<0.000000e+00> : vector<16xf32>
    %43 = vector.multi_reduction <add>, %42, %cst_17 [1] : vector<16x128xf32> to vector<16xf32>
    %44 = vector.shape_cast %43 : vector<16xf32> to vector<16x1xf32>
    %cst_18 = arith.constant dense<0.000000e+00> : vector<1xf32>
    %45 = vector.multi_reduction <add>, %44, %cst_18 [0] : vector<16x1xf32> to vector<1xf32>
    %46 = vector.shape_cast %45 : vector<1xf32> to vector<1x1xf32>
    %c0_19 = arith.constant 0 : index
    %c0_20 = arith.constant 0 : index
    %47 = vector.load %arg8[%c0_19, %c0_20] : memref<1x1xf32, #tpu.memory_space<vmem>>, vector<1x1xf32>
    %48 = arith.addf %47, %46 : vector<1x1xf32>
    %c0_21 = arith.constant 0 : index
    %c0_22 = arith.constant 0 : index
    %49 = vector.load %arg8[%c0_21, %c0_22] : memref<1x1xf32, #tpu.memory_space<vmem>>, vector<1x1xf32>
    tpu.vector_store %arg8[%c0_21, %c0_22], %48 {strides = array<i32>} : memref<1x1xf32, #tpu.memory_space<vmem>>, vector<1x1xf32>,
    %c0_i32_23 = arith.constant 0 : i32
    %50 = arith.cmpi eq, %arg0, %c0_i32_23 : i32
    %51 = arith.extui %50 : i1 to i32
    %c0_i32_24 = arith.constant 0 : i32
    %52 = arith.cmpi ne, %51, %c0_i32_24 : i32
    scf.if %52 {
      %c0_25 = arith.constant 0 : index
      %c0_26 = arith.constant 0 : index
      %53 = vector.load %arg8[%c0_25, %c0_26] : memref<1x1xf32, #tpu.memory_space<vmem>>, vector<1x1xf32>
      %cst_27 = arith.constant 4.8828125E-4 : f32
      %54 = vector.broadcast %cst_27 : f32 to vector<1x1xf32>
      %55 = arith.mulf %53, %54 : vector<1x1xf32>
      %c0_28 = arith.constant 0 : index
      %c0_29 = arith.constant 0 : index
      %56 = vector.load %arg5[%c0_28, %c0_29] : memref<1x1xf32, #tpu.memory_space<vmem>>, vector<1x1xf32>
      tpu.vector_store %arg5[%c0_28, %c0_29], %55 {strides = array<i32>} : memref<1x1xf32, #tpu.memory_space<vmem>>, vector<1x1xf32>,
      %c0_30 = arith.constant 0 : index
      %c0_31 = arith.constant 0 : index
      %57 = vector.load %arg7[%c0_30, %c0_31] : memref<1x256xf32, #tpu.memory_space<vmem>>, vector<1x256xf32>
      %cst_32 = arith.constant 6.250000e-02 : f32
      %58 = vector.broadcast %cst_32 : f32 to vector<1x256xf32>
      %59 = arith.mulf %57, %58 : vector<1x256xf32>
      %cst_33 = arith.constant 1.000000e-07 : f32
      %60 = vector.broadcast %cst_33 : f32 to vector<1x256xf32>
      %61 = arith.addf %59, %60 : vector<1x256xf32>
      %62 = math.log %61 : vector<1x256xf32>
      %63 = arith.mulf %59, %62 : vector<1x256xf32>
      %cst_34 = arith.constant dense<0.000000e+00> : vector<1xf32>
      %64 = vector.multi_reduction <add>, %63, %cst_34 [1] : vector<1x256xf32> to vector<1xf32>
      %65 = vector.shape_cast %64 : vector<1xf32> to vector<1x1xf32>
      %cst_35 = arith.constant 0.000000e+00 : f32
      %66 = vector.broadcast %cst_35 : f32 to vector<1x1xf32>
      %67 = arith.subf %66, %65 : vector<1x1xf32>
      %68 = math.exp %67 : vector<1x1xf32>
      %c0_36 = arith.constant 0 : index
      %c0_37 = arith.constant 0 : index
      %69 = vector.load %arg6[%c0_36, %c0_37] : memref<1x1xf32, #tpu.memory_space<vmem>>, vector<1x1xf32>
      tpu.vector_store %arg6[%c0_36, %c0_37], %68 {strides = array<i32>} : memref<1x1xf32, #tpu.memory_space<vmem>>, vector<1x1xf32>,
    } else {
    }
    return
  }
  func.func @transform_0(%arg0: i32) -> (i32, i32) {
    %c0_i32 = arith.constant 0 : i32
    %c0_i32_0 = arith.constant 0 : i32
    return %arg0, %c0_i32 : i32, i32
  }
  func.func @transform_1(%arg0: i32) -> (i32, i32) {
    %c0_i32 = arith.constant 0 : i32
    %c0_i32_0 = arith.constant 0 : i32
    %c0_i32_1 = arith.constant 0 : i32
    return %c0_i32, %c0_i32_0 : i32, i32
  }
  func.func @transform_2(%arg0: i32) -> (i32, i32) {
    %c0_i32 = arith.constant 0 : i32
    %c0_i32_0 = arith.constant 0 : i32
    %c0_i32_1 = arith.constant 0 : i32
    return %c0_i32, %c0_i32_0 : i32, i32
  }
  func.func @transform_3(%arg0: i32) -> (i32, i32) {
    %c0_i32 = arith.constant 0 : i32
    %c0_i32_0 = arith.constant 0 : i32
    return %arg0, %c0_i32 : i32, i32
  }
  func.func @transform_4(%arg0: i32) -> (i32, i32) {
    %c0_i32 = arith.constant 0 : i32
    %c0_i32_0 = arith.constant 0 : i32
    %c0_i32_1 = arith.constant 0 : i32
    return %c0_i32, %c0_i32_0 : i32, i32
  }
  func.func @transform_5(%arg0: i32) -> (i32, i32) {
    %c0_i32 = arith.constant 0 : i32
    %c0_i32_0 = arith.constant 0 : i32
    %c0_i32_1 = arith.constant 0 : i32
    return %c0_i32, %c0_i32_0 : i32, i32
  }
}

module attributes {stable_mosaic.version = 11 : i64} {
  func.func @_encoders_kernel(%arg0: i32, %arg1: memref<1x16x133xf32, #tpu.memory_space<vmem>>, %arg2: memref<1x16x180xf32, #tpu.memory_space<vmem>>, %arg3: memref<399x128xbf16, #tpu.memory_space<vmem>>, %arg4: memref<1x128xf32, #tpu.memory_space<vmem>>, %arg5: memref<768x128xbf16, #tpu.memory_space<vmem>>, %arg6: memref<1x128xf32, #tpu.memory_space<vmem>>, %arg7: memref<384x128xbf16, #tpu.memory_space<vmem>>, %arg8: memref<1x128xf32, #tpu.memory_space<vmem>>, %arg9: memref<128x128xbf16, #tpu.memory_space<vmem>>, %arg10: memref<1x128xf32, #tpu.memory_space<vmem>>, %arg11: memref<384x128xbf16, #tpu.memory_space<vmem>>, %arg12: memref<1x128xf32, #tpu.memory_space<vmem>>, %arg13: memref<128x128xbf16, #tpu.memory_space<vmem>>, %arg14: memref<1x128xf32, #tpu.memory_space<vmem>>, %arg15: memref<384x128xbf16, #tpu.memory_space<vmem>>, %arg16: memref<1x128xf32, #tpu.memory_space<vmem>>, %arg17: memref<540x128xbf16, #tpu.memory_space<vmem>>, %arg18: memref<1x128xf32, #tpu.memory_space<vmem>>, %arg19: memref<768x128xbf16, #tpu.memory_space<vmem>>, %arg20: memref<1x128xf32, #tpu.memory_space<vmem>>, %arg21: memref<384x128xbf16, #tpu.memory_space<vmem>>, %arg22: memref<1x128xf32, #tpu.memory_space<vmem>>, %arg23: memref<128x128xbf16, #tpu.memory_space<vmem>>, %arg24: memref<1x128xf32, #tpu.memory_space<vmem>>, %arg25: memref<384x128xbf16, #tpu.memory_space<vmem>>, %arg26: memref<1x128xf32, #tpu.memory_space<vmem>>, %arg27: memref<128x128xbf16, #tpu.memory_space<vmem>>, %arg28: memref<1x128xf32, #tpu.memory_space<vmem>>, %arg29: memref<768x128xbf16, #tpu.memory_space<vmem>>, %arg30: memref<1x128xf32, #tpu.memory_space<vmem>>, %arg31: memref<384x128xbf16, #tpu.memory_space<vmem>>, %arg32: memref<1x128xf32, #tpu.memory_space<vmem>>, %arg33: memref<128x128xbf16, #tpu.memory_space<vmem>>, %arg34: memref<1x128xf32, #tpu.memory_space<vmem>>, %arg35: memref<384x128xbf16, #tpu.memory_space<vmem>>, %arg36: memref<1x128xf32, #tpu.memory_space<vmem>>, %arg37: memref<128x128xbf16, #tpu.memory_space<vmem>>, %arg38: memref<1x128xf32, #tpu.memory_space<vmem>>, %arg39: memref<384x128xbf16, #tpu.memory_space<vmem>>, %arg40: memref<1x128xf32, #tpu.memory_space<vmem>>, %arg41: memref<128x128xbf16, #tpu.memory_space<vmem>>, %arg42: memref<1x128xf32, #tpu.memory_space<vmem>>, %arg43: memref<1x8x128xbf16, #tpu.memory_space<vmem>>, %arg44: memref<1x4x128xf32, #tpu.memory_space<vmem>>) attributes {dimension_semantics = [#tpu.dimension_semantics<parallel>], iteration_bounds = array<i64: 2>, scalar_prefetch = 0 : i64, scratch_operands = 0 : i64, tpu.core_type = #tpu.core_type<tc>, window_params = [{transform_indices = @transform_0, window_bounds = array<i64: 1, 16, 133>}, {transform_indices = @transform_1, window_bounds = array<i64: 1, 16, 180>}, {pipeline_mode = #tpu.pipeline_mode<synchronous>, transform_indices = @transform_2, window_bounds = array<i64: 399, 128>}, {pipeline_mode = #tpu.pipeline_mode<synchronous>, transform_indices = @transform_3, window_bounds = array<i64: 1, 128>}, {pipeline_mode = #tpu.pipeline_mode<synchronous>, transform_indices = @transform_4, window_bounds = array<i64: 768, 128>}, {pipeline_mode = #tpu.pipeline_mode<synchronous>, transform_indices = @transform_5, window_bounds = array<i64: 1, 128>}, {pipeline_mode = #tpu.pipeline_mode<synchronous>, transform_indices = @transform_6, window_bounds = array<i64: 384, 128>}, {pipeline_mode = #tpu.pipeline_mode<synchronous>, transform_indices = @transform_7, window_bounds = array<i64: 1, 128>}, {pipeline_mode = #tpu.pipeline_mode<synchronous>, transform_indices = @transform_8, window_bounds = array<i64: 128, 128>}, {pipeline_mode = #tpu.pipeline_mode<synchronous>, transform_indices = @transform_9, window_bounds = array<i64: 1, 128>}, {pipeline_mode = #tpu.pipeline_mode<synchronous>, transform_indices = @transform_10, window_bounds = array<i64: 384, 128>}, {pipeline_mode = #tpu.pipeline_mode<synchronous>, transform_indices = @transform_11, window_bounds = array<i64: 1, 128>}, {pipeline_mode = #tpu.pipeline_mode<synchronous>, transform_indices = @transform_12, window_bounds = array<i64: 128, 128>}, {pipeline_mode = #tpu.pipeline_mode<synchronous>, transform_indices = @transform_13, window_bounds = array<i64: 1, 128>}, {pipeline_mode = #tpu.pipeline_mode<synchronous>, transform_indices = @transform_14, window_bounds = array<i64: 384, 128>}, {pipeline_mode = #tpu.pipeline_mode<synchronous>, transform_indices = @transform_15, window_bounds = array<i64: 1, 128>}, {pipeline_mode = #tpu.pipeline_mode<synchronous>, transform_indices = @transform_16, window_bounds = array<i64: 540, 128>}, {pipeline_mode = #tpu.pipeline_mode<synchronous>, transform_indices = @transform_17, window_bounds = array<i64: 1, 128>}, {pipeline_mode = #tpu.pipeline_mode<synchronous>, transform_indices = @transform_18, window_bounds = array<i64: 768, 128>}, {pipeline_mode = #tpu.pipeline_mode<synchronous>, transform_indices = @transform_19, window_bounds = array<i64: 1, 128>}, {pipeline_mode = #tpu.pipeline_mode<synchronous>, transform_indices = @transform_20, window_bounds = array<i64: 384, 128>}, {pipeline_mode = #tpu.pipeline_mode<synchronous>, transform_indices = @transform_21, window_bounds = array<i64: 1, 128>}, {pipeline_mode = #tpu.pipeline_mode<synchronous>, transform_indices = @transform_22, window_bounds = array<i64: 128, 128>}, {pipeline_mode = #tpu.pipeline_mode<synchronous>, transform_indices = @transform_23, window_bounds = array<i64: 1, 128>}, {pipeline_mode = #tpu.pipeline_mode<synchronous>, transform_indices = @transform_24, window_bounds = array<i64: 384, 128>}, {pipeline_mode = #tpu.pipeline_mode<synchronous>, transform_indices = @transform_25, window_bounds = array<i64: 1, 128>}, {pipeline_mode = #tpu.pipeline_mode<synchronous>, transform_indices = @transform_26, window_bounds = array<i64: 128, 128>}, {pipeline_mode = #tpu.pipeline_mode<synchronous>, transform_indices = @transform_27, window_bounds = array<i64: 1, 128>}, {pipeline_mode = #tpu.pipeline_mode<synchronous>, transform_indices = @transform_28, window_bounds = array<i64: 768, 128>}, {pipeline_mode = #tpu.pipeline_mode<synchronous>, transform_indices = @transform_29, window_bounds = array<i64: 1, 128>}, {pipeline_mode = #tpu.pipeline_mode<synchronous>, transform_indices = @transform_30, window_bounds = array<i64: 384, 128>}, {pipeline_mode = #tpu.pipeline_mode<synchronous>, transform_indices = @transform_31, window_bounds = array<i64: 1, 128>}, {pipeline_mode = #tpu.pipeline_mode<synchronous>, transform_indices = @transform_32, window_bounds = array<i64: 128, 128>}, {pipeline_mode = #tpu.pipeline_mode<synchronous>, transform_indices = @transform_33, window_bounds = array<i64: 1, 128>}, {pipeline_mode = #tpu.pipeline_mode<synchronous>, transform_indices = @transform_34, window_bounds = array<i64: 384, 128>}, {pipeline_mode = #tpu.pipeline_mode<synchronous>, transform_indices = @transform_35, window_bounds = array<i64: 1, 128>}, {pipeline_mode = #tpu.pipeline_mode<synchronous>, transform_indices = @transform_36, window_bounds = array<i64: 128, 128>}, {pipeline_mode = #tpu.pipeline_mode<synchronous>, transform_indices = @transform_37, window_bounds = array<i64: 1, 128>}, {pipeline_mode = #tpu.pipeline_mode<synchronous>, transform_indices = @transform_38, window_bounds = array<i64: 384, 128>}, {pipeline_mode = #tpu.pipeline_mode<synchronous>, transform_indices = @transform_39, window_bounds = array<i64: 1, 128>}, {pipeline_mode = #tpu.pipeline_mode<synchronous>, transform_indices = @transform_40, window_bounds = array<i64: 128, 128>}, {pipeline_mode = #tpu.pipeline_mode<synchronous>, transform_indices = @transform_41, window_bounds = array<i64: 1, 128>}, {transform_indices = @transform_42, window_bounds = array<i64: 1, 8, 128>}, {transform_indices = @transform_43, window_bounds = array<i64: 1, 4, 128>}]} {
    %c0 = arith.constant 0 : index
    %c0_0 = arith.constant 0 : index
    %c0_1 = arith.constant 0 : index
    %0 = vector.load %arg1[%c0, %c0_0, %c0_1] : memref<1x16x133xf32, #tpu.memory_space<vmem>>, vector<1x16x133xf32>
    %1 = vector.shape_cast %0 : vector<1x16x133xf32> to vector<16x133xf32>
    %2 = arith.truncf %1 : vector<16x133xf32> to vector<16x133xbf16>
    %cst = arith.constant 0.000000e+00 : bf16
    %3 = vector.broadcast %cst : bf16 to vector<1x133xbf16>
    %4 = tpu.concatenate %3, %2, %3 in 0 : vector<1x133xbf16>, vector<16x133xbf16>, vector<1x133xbf16> -> vector<18x133xbf16>
    %5 = vector.extract_strided_slice %4 {offsets = [0, 0], sizes = [16, 133], strides = [1, 1]} : vector<18x133xbf16> to vector<16x133xbf16>
    %6 = vector.extract_strided_slice %4 {offsets = [1, 0], sizes = [16, 133], strides = [1, 1]} : vector<18x133xbf16> to vector<16x133xbf16>
    %7 = vector.extract_strided_slice %4 {offsets = [2, 0], sizes = [16, 133], strides = [1, 1]} : vector<18x133xbf16> to vector<16x133xbf16>
    %8 = tpu.concatenate %5, %6, %7 in 1 : vector<16x133xbf16>, vector<16x133xbf16>, vector<16x133xbf16> -> vector<16x399xbf16>
    %c0_2 = arith.constant 0 : index
    %c0_3 = arith.constant 0 : index
    %9 = vector.load %arg3[%c0_2, %c0_3] : memref<399x128xbf16, #tpu.memory_space<vmem>>, vector<399x128xbf16>
    %cst_4 = arith.constant dense<0.000000e+00> : vector<16x128xf32>
    %10 = tpu.matmul %8, %9, %cst_4 {dimension_numbers = #tpu.dot_dimension_numbers<[1], [0], [0], [1], [0, 0, 1, 1], [], []>} : vector<16x399xbf16>, vector<399x128xbf16>, vector<16x128xf32> -> vector<16x128xf32>
    %c0_5 = arith.constant 0 : index
    %c0_6 = arith.constant 0 : index
    %11 = vector.load %arg4[%c0_5, %c0_6] : memref<1x128xf32, #tpu.memory_space<vmem>>, vector<1x128xf32>
    %12 = vector.broadcast %11 : vector<1x128xf32> to vector<16x128xf32>
    %13 = arith.addf %10, %12 : vector<16x128xf32>
    %cst_7 = arith.constant 0.000000e+00 : f32
    %14 = vector.broadcast %cst_7 : f32 to vector<16x128xf32>
    %15 = arith.maximumf %13, %14 : vector<16x128xf32>
    %16 = tpu.iota {dimensions = array<i32: 0>} : vector<8x16xi32>
    %17 = tpu.iota {dimensions = array<i32: 1>} : vector<8x16xi32>
    %c2_i32 = arith.constant 2 : i32
    %18 = vector.broadcast %c2_i32 : i32 to vector<8x16xi32>
    %19 = arith.muli %18, %16 : vector<8x16xi32>
    %20 = arith.cmpi eq, %17, %19 : vector<8x16xi32>
    %21 = arith.extui %20 : vector<8x16xi1> to vector<8x16xi32>
    %22 = arith.sitofp %21 : vector<8x16xi32> to vector<8x16xf32>
    %c2_i32_8 = arith.constant 2 : i32
    %23 = vector.broadcast %c2_i32_8 : i32 to vector<8x16xi32>
    %24 = arith.muli %23, %16 : vector<8x16xi32>
    %c1_i32 = arith.constant 1 : i32
    %25 = vector.broadcast %c1_i32 : i32 to vector<8x16xi32>
    %26 = arith.addi %24, %25 : vector<8x16xi32>
    %27 = arith.cmpi eq, %17, %26 : vector<8x16xi32>
    %28 = arith.extui %27 : vector<8x16xi1> to vector<8x16xi32>
    %29 = arith.sitofp %28 : vector<8x16xi32> to vector<8x16xf32>
    %cst_9 = arith.constant dense<0.000000e+00> : vector<8x128xf32>
    %30 = tpu.matmul %22, %15, %cst_9 {dimension_numbers = #tpu.dot_dimension_numbers<[1], [0], [0], [1], [0, 0, 1, 1], [], []>} : vector<8x16xf32>, vector<16x128xf32>, vector<8x128xf32> -> vector<8x128xf32>
    %cst_10 = arith.constant dense<0.000000e+00> : vector<8x128xf32>
    %31 = tpu.matmul %29, %15, %cst_10 {dimension_numbers = #tpu.dot_dimension_numbers<[1], [0], [0], [1], [0, 0, 1, 1], [], []>} : vector<8x16xf32>, vector<16x128xf32>, vector<8x128xf32> -> vector<8x128xf32>
    %32 = tpu.concatenate %30, %31 in 1 : vector<8x128xf32>, vector<8x128xf32> -> vector<8x256xf32>
    %33 = arith.truncf %32 : vector<8x256xf32> to vector<8x256xbf16>
    %cst_11 = arith.constant 0.000000e+00 : bf16
    %34 = vector.broadcast %cst_11 : bf16 to vector<1x256xbf16>
    %35 = tpu.concatenate %34, %33, %34 in 0 : vector<1x256xbf16>, vector<8x256xbf16>, vector<1x256xbf16> -> vector<10x256xbf16>
    %36 = vector.extract_strided_slice %35 {offsets = [0, 0], sizes = [8, 256], strides = [1, 1]} : vector<10x256xbf16> to vector<8x256xbf16>
    %37 = vector.extract_strided_slice %35 {offsets = [1, 0], sizes = [8, 256], strides = [1, 1]} : vector<10x256xbf16> to vector<8x256xbf16>
    %38 = vector.extract_strided_slice %35 {offsets = [2, 0], sizes = [8, 256], strides = [1, 1]} : vector<10x256xbf16> to vector<8x256xbf16>
    %39 = tpu.concatenate %36, %37, %38 in 1 : vector<8x256xbf16>, vector<8x256xbf16>, vector<8x256xbf16> -> vector<8x768xbf16>
    %c0_12 = arith.constant 0 : index
    %c0_13 = arith.constant 0 : index
    %40 = vector.load %arg5[%c0_12, %c0_13] : memref<768x128xbf16, #tpu.memory_space<vmem>>, vector<768x128xbf16>
    %cst_14 = arith.constant dense<0.000000e+00> : vector<8x128xf32>
    %41 = tpu.matmul %39, %40, %cst_14 {dimension_numbers = #tpu.dot_dimension_numbers<[1], [0], [0], [1], [0, 0, 1, 1], [], []>} : vector<8x768xbf16>, vector<768x128xbf16>, vector<8x128xf32> -> vector<8x128xf32>
    %c0_15 = arith.constant 0 : index
    %c0_16 = arith.constant 0 : index
    %42 = vector.load %arg6[%c0_15, %c0_16] : memref<1x128xf32, #tpu.memory_space<vmem>>, vector<1x128xf32>
    %43 = vector.broadcast %42 : vector<1x128xf32> to vector<8x128xf32>
    %44 = arith.addf %41, %43 : vector<8x128xf32>
    %cst_17 = arith.constant 0.000000e+00 : f32
    %45 = vector.broadcast %cst_17 : f32 to vector<8x128xf32>
    %46 = arith.maximumf %44, %45 : vector<8x128xf32>
    %47 = arith.truncf %46 : vector<8x128xf32> to vector<8x128xbf16>
    %cst_18 = arith.constant 0.000000e+00 : bf16
    %48 = vector.broadcast %cst_18 : bf16 to vector<1x128xbf16>
    %49 = tpu.concatenate %48, %47, %48 in 0 : vector<1x128xbf16>, vector<8x128xbf16>, vector<1x128xbf16> -> vector<10x128xbf16>
    %50 = vector.extract_strided_slice %49 {offsets = [0, 0], sizes = [8, 128], strides = [1, 1]} : vector<10x128xbf16> to vector<8x128xbf16>
    %51 = vector.extract_strided_slice %49 {offsets = [1, 0], sizes = [8, 128], strides = [1, 1]} : vector<10x128xbf16> to vector<8x128xbf16>
    %52 = vector.extract_strided_slice %49 {offsets = [2, 0], sizes = [8, 128], strides = [1, 1]} : vector<10x128xbf16> to vector<8x128xbf16>
    %53 = tpu.concatenate %50, %51, %52 in 1 : vector<8x128xbf16>, vector<8x128xbf16>, vector<8x128xbf16> -> vector<8x384xbf16>
    %c0_19 = arith.constant 0 : index
    %c0_20 = arith.constant 0 : index
    %54 = vector.load %arg7[%c0_19, %c0_20] : memref<384x128xbf16, #tpu.memory_space<vmem>>, vector<384x128xbf16>
    %cst_21 = arith.constant dense<0.000000e+00> : vector<8x128xf32>
    %55 = tpu.matmul %53, %54, %cst_21 {dimension_numbers = #tpu.dot_dimension_numbers<[1], [0], [0], [1], [0, 0, 1, 1], [], []>} : vector<8x384xbf16>, vector<384x128xbf16>, vector<8x128xf32> -> vector<8x128xf32>
    %c0_22 = arith.constant 0 : index
    %c0_23 = arith.constant 0 : index
    %56 = vector.load %arg8[%c0_22, %c0_23] : memref<1x128xf32, #tpu.memory_space<vmem>>, vector<1x128xf32>
    %57 = vector.broadcast %56 : vector<1x128xf32> to vector<8x128xf32>
    %58 = arith.addf %55, %57 : vector<8x128xf32>
    %cst_24 = arith.constant 0.000000e+00 : f32
    %59 = vector.broadcast %cst_24 : f32 to vector<8x128xf32>
    %60 = arith.maximumf %58, %59 : vector<8x128xf32>
    %61 = arith.truncf %60 : vector<8x128xf32> to vector<8x128xbf16>
    %c0_25 = arith.constant 0 : index
    %c0_26 = arith.constant 0 : index
    %62 = vector.load %arg9[%c0_25, %c0_26] : memref<128x128xbf16, #tpu.memory_space<vmem>>, vector<128x128xbf16>
    %cst_27 = arith.constant dense<0.000000e+00> : vector<8x128xf32>
    %63 = tpu.matmul %61, %62, %cst_27 {dimension_numbers = #tpu.dot_dimension_numbers<[1], [0], [0], [1], [0, 0, 1, 1], [], []>} : vector<8x128xbf16>, vector<128x128xbf16>, vector<8x128xf32> -> vector<8x128xf32>
    %c0_28 = arith.constant 0 : index
    %c0_29 = arith.constant 0 : index
    %64 = vector.load %arg10[%c0_28, %c0_29] : memref<1x128xf32, #tpu.memory_space<vmem>>, vector<1x128xf32>
    %65 = vector.broadcast %64 : vector<1x128xf32> to vector<8x128xf32>
    %66 = arith.addf %63, %65 : vector<8x128xf32>
    %67 = arith.addf %44, %66 : vector<8x128xf32>
    %cst_30 = arith.constant 0.000000e+00 : f32
    %68 = vector.broadcast %cst_30 : f32 to vector<8x128xf32>
    %69 = arith.maximumf %67, %68 : vector<8x128xf32>
    %70 = arith.truncf %69 : vector<8x128xf32> to vector<8x128xbf16>
    %cst_31 = arith.constant 0.000000e+00 : bf16
    %71 = vector.broadcast %cst_31 : bf16 to vector<3x128xbf16>
    %72 = tpu.concatenate %71, %70, %71 in 0 : vector<3x128xbf16>, vector<8x128xbf16>, vector<3x128xbf16> -> vector<14x128xbf16>
    %73 = vector.extract_strided_slice %72 {offsets = [0, 0], sizes = [8, 128], strides = [1, 1]} : vector<14x128xbf16> to vector<8x128xbf16>
    %74 = vector.extract_strided_slice %72 {offsets = [3, 0], sizes = [8, 128], strides = [1, 1]} : vector<14x128xbf16> to vector<8x128xbf16>
    %75 = vector.extract_strided_slice %72 {offsets = [6, 0], sizes = [8, 128], strides = [1, 1]} : vector<14x128xbf16> to vector<8x128xbf16>
    %76 = tpu.concatenate %73, %74, %75 in 1 : vector<8x128xbf16>, vector<8x128xbf16>, vector<8x128xbf16> -> vector<8x384xbf16>
    %c0_32 = arith.constant 0 : index
    %c0_33 = arith.constant 0 : index
    %77 = vector.load %arg11[%c0_32, %c0_33] : memref<384x128xbf16, #tpu.memory_space<vmem>>, vector<384x128xbf16>
    %cst_34 = arith.constant dense<0.000000e+00> : vector<8x128xf32>
    %78 = tpu.matmul %76, %77, %cst_34 {dimension_numbers = #tpu.dot_dimension_numbers<[1], [0], [0], [1], [0, 0, 1, 1], [], []>} : vector<8x384xbf16>, vector<384x128xbf16>, vector<8x128xf32> -> vector<8x128xf32>
    %c0_35 = arith.constant 0 : index
    %c0_36 = arith.constant 0 : index
    %79 = vector.load %arg12[%c0_35, %c0_36] : memref<1x128xf32, #tpu.memory_space<vmem>>, vector<1x128xf32>
    %80 = vector.broadcast %79 : vector<1x128xf32> to vector<8x128xf32>
    %81 = arith.addf %78, %80 : vector<8x128xf32>
    %cst_37 = arith.constant 0.000000e+00 : f32
    %82 = vector.broadcast %cst_37 : f32 to vector<8x128xf32>
    %83 = arith.maximumf %81, %82 : vector<8x128xf32>
    %84 = arith.truncf %83 : vector<8x128xf32> to vector<8x128xbf16>
    %c0_38 = arith.constant 0 : index
    %c0_39 = arith.constant 0 : index
    %85 = vector.load %arg13[%c0_38, %c0_39] : memref<128x128xbf16, #tpu.memory_space<vmem>>, vector<128x128xbf16>
    %cst_40 = arith.constant dense<0.000000e+00> : vector<8x128xf32>
    %86 = tpu.matmul %84, %85, %cst_40 {dimension_numbers = #tpu.dot_dimension_numbers<[1], [0], [0], [1], [0, 0, 1, 1], [], []>} : vector<8x128xbf16>, vector<128x128xbf16>, vector<8x128xf32> -> vector<8x128xf32>
    %c0_41 = arith.constant 0 : index
    %c0_42 = arith.constant 0 : index
    %87 = vector.load %arg14[%c0_41, %c0_42] : memref<1x128xf32, #tpu.memory_space<vmem>>, vector<1x128xf32>
    %88 = vector.broadcast %87 : vector<1x128xf32> to vector<8x128xf32>
    %89 = arith.addf %86, %88 : vector<8x128xf32>
    %90 = arith.addf %67, %89 : vector<8x128xf32>
    %91 = arith.truncf %90 : vector<8x128xf32> to vector<8x128xbf16>
    %cst_43 = arith.constant 0.000000e+00 : bf16
    %92 = vector.broadcast %cst_43 : bf16 to vector<1x128xbf16>
    %93 = tpu.concatenate %92, %91, %92 in 0 : vector<1x128xbf16>, vector<8x128xbf16>, vector<1x128xbf16> -> vector<10x128xbf16>
    %94 = vector.extract_strided_slice %93 {offsets = [0, 0], sizes = [8, 128], strides = [1, 1]} : vector<10x128xbf16> to vector<8x128xbf16>
    %95 = vector.extract_strided_slice %93 {offsets = [1, 0], sizes = [8, 128], strides = [1, 1]} : vector<10x128xbf16> to vector<8x128xbf16>
    %96 = vector.extract_strided_slice %93 {offsets = [2, 0], sizes = [8, 128], strides = [1, 1]} : vector<10x128xbf16> to vector<8x128xbf16>
    %97 = tpu.concatenate %94, %95, %96 in 1 : vector<8x128xbf16>, vector<8x128xbf16>, vector<8x128xbf16> -> vector<8x384xbf16>
    %c0_44 = arith.constant 0 : index
    %c0_45 = arith.constant 0 : index
    %98 = vector.load %arg15[%c0_44, %c0_45] : memref<384x128xbf16, #tpu.memory_space<vmem>>, vector<384x128xbf16>
    %cst_46 = arith.constant dense<0.000000e+00> : vector<8x128xf32>
    %99 = tpu.matmul %97, %98, %cst_46 {dimension_numbers = #tpu.dot_dimension_numbers<[1], [0], [0], [1], [0, 0, 1, 1], [], []>} : vector<8x384xbf16>, vector<384x128xbf16>, vector<8x128xf32> -> vector<8x128xf32>
    %c0_47 = arith.constant 0 : index
    %c0_48 = arith.constant 0 : index
    %100 = vector.load %arg16[%c0_47, %c0_48] : memref<1x128xf32, #tpu.memory_space<vmem>>, vector<1x128xf32>
    %101 = vector.broadcast %100 : vector<1x128xf32> to vector<8x128xf32>
    %102 = arith.addf %99, %101 : vector<8x128xf32>
    %c0_49 = arith.constant 0 : index
    %c0_50 = arith.constant 0 : index
    %c0_51 = arith.constant 0 : index
    %103 = vector.load %arg2[%c0_49, %c0_50, %c0_51] : memref<1x16x180xf32, #tpu.memory_space<vmem>>, vector<1x16x180xf32>
    %104 = vector.shape_cast %103 : vector<1x16x180xf32> to vector<16x180xf32>
    %105 = arith.truncf %104 : vector<16x180xf32> to vector<16x180xbf16>
    %cst_52 = arith.constant 0.000000e+00 : bf16
    %106 = vector.broadcast %cst_52 : bf16 to vector<1x180xbf16>
    %107 = tpu.concatenate %106, %105, %106 in 0 : vector<1x180xbf16>, vector<16x180xbf16>, vector<1x180xbf16> -> vector<18x180xbf16>
    %108 = vector.extract_strided_slice %107 {offsets = [0, 0], sizes = [16, 180], strides = [1, 1]} : vector<18x180xbf16> to vector<16x180xbf16>
    %109 = vector.extract_strided_slice %107 {offsets = [1, 0], sizes = [16, 180], strides = [1, 1]} : vector<18x180xbf16> to vector<16x180xbf16>
    %110 = vector.extract_strided_slice %107 {offsets = [2, 0], sizes = [16, 180], strides = [1, 1]} : vector<18x180xbf16> to vector<16x180xbf16>
    %111 = tpu.concatenate %108, %109, %110 in 1 : vector<16x180xbf16>, vector<16x180xbf16>, vector<16x180xbf16> -> vector<16x540xbf16>
    %c0_53 = arith.constant 0 : index
    %c0_54 = arith.constant 0 : index
    %112 = vector.load %arg17[%c0_53, %c0_54] : memref<540x128xbf16, #tpu.memory_space<vmem>>, vector<540x128xbf16>
    %cst_55 = arith.constant dense<0.000000e+00> : vector<16x128xf32>
    %113 = tpu.matmul %111, %112, %cst_55 {dimension_numbers = #tpu.dot_dimension_numbers<[1], [0], [0], [1], [0, 0, 1, 1], [], []>} : vector<16x540xbf16>, vector<540x128xbf16>, vector<16x128xf32> -> vector<16x128xf32>
    %c0_56 = arith.constant 0 : index
    %c0_57 = arith.constant 0 : index
    %114 = vector.load %arg18[%c0_56, %c0_57] : memref<1x128xf32, #tpu.memory_space<vmem>>, vector<1x128xf32>
    %115 = vector.broadcast %114 : vector<1x128xf32> to vector<16x128xf32>
    %116 = arith.addf %113, %115 : vector<16x128xf32>
    %cst_58 = arith.constant 0.000000e+00 : f32
    %117 = vector.broadcast %cst_58 : f32 to vector<16x128xf32>
    %118 = arith.maximumf %116, %117 : vector<16x128xf32>
    %119 = tpu.iota {dimensions = array<i32: 0>} : vector<8x16xi32>
    %120 = tpu.iota {dimensions = array<i32: 1>} : vector<8x16xi32>
    %c2_i32_59 = arith.constant 2 : i32
    %121 = vector.broadcast %c2_i32_59 : i32 to vector<8x16xi32>
    %122 = arith.muli %121, %119 : vector<8x16xi32>
    %123 = arith.cmpi eq, %120, %122 : vector<8x16xi32>
    %124 = arith.extui %123 : vector<8x16xi1> to vector<8x16xi32>
    %125 = arith.sitofp %124 : vector<8x16xi32> to vector<8x16xf32>
    %c2_i32_60 = arith.constant 2 : i32
    %126 = vector.broadcast %c2_i32_60 : i32 to vector<8x16xi32>
    %127 = arith.muli %126, %119 : vector<8x16xi32>
    %c1_i32_61 = arith.constant 1 : i32
    %128 = vector.broadcast %c1_i32_61 : i32 to vector<8x16xi32>
    %129 = arith.addi %127, %128 : vector<8x16xi32>
    %130 = arith.cmpi eq, %120, %129 : vector<8x16xi32>
    %131 = arith.extui %130 : vector<8x16xi1> to vector<8x16xi32>
    %132 = arith.sitofp %131 : vector<8x16xi32> to vector<8x16xf32>
    %cst_62 = arith.constant dense<0.000000e+00> : vector<8x128xf32>
    %133 = tpu.matmul %125, %118, %cst_62 {dimension_numbers = #tpu.dot_dimension_numbers<[1], [0], [0], [1], [0, 0, 1, 1], [], []>} : vector<8x16xf32>, vector<16x128xf32>, vector<8x128xf32> -> vector<8x128xf32>
    %cst_63 = arith.constant dense<0.000000e+00> : vector<8x128xf32>
    %134 = tpu.matmul %132, %118, %cst_63 {dimension_numbers = #tpu.dot_dimension_numbers<[1], [0], [0], [1], [0, 0, 1, 1], [], []>} : vector<8x16xf32>, vector<16x128xf32>, vector<8x128xf32> -> vector<8x128xf32>
    %135 = tpu.concatenate %133, %134 in 1 : vector<8x128xf32>, vector<8x128xf32> -> vector<8x256xf32>
    %136 = arith.truncf %135 : vector<8x256xf32> to vector<8x256xbf16>
    %cst_64 = arith.constant 0.000000e+00 : bf16
    %137 = vector.broadcast %cst_64 : bf16 to vector<1x256xbf16>
    %138 = tpu.concatenate %137, %136, %137 in 0 : vector<1x256xbf16>, vector<8x256xbf16>, vector<1x256xbf16> -> vector<10x256xbf16>
    %139 = vector.extract_strided_slice %138 {offsets = [0, 0], sizes = [8, 256], strides = [1, 1]} : vector<10x256xbf16> to vector<8x256xbf16>
    %140 = vector.extract_strided_slice %138 {offsets = [1, 0], sizes = [8, 256], strides = [1, 1]} : vector<10x256xbf16> to vector<8x256xbf16>
    %141 = vector.extract_strided_slice %138 {offsets = [2, 0], sizes = [8, 256], strides = [1, 1]} : vector<10x256xbf16> to vector<8x256xbf16>
    %142 = tpu.concatenate %139, %140, %141 in 1 : vector<8x256xbf16>, vector<8x256xbf16>, vector<8x256xbf16> -> vector<8x768xbf16>
    %c0_65 = arith.constant 0 : index
    %c0_66 = arith.constant 0 : index
    %143 = vector.load %arg19[%c0_65, %c0_66] : memref<768x128xbf16, #tpu.memory_space<vmem>>, vector<768x128xbf16>
    %cst_67 = arith.constant dense<0.000000e+00> : vector<8x128xf32>
    %144 = tpu.matmul %142, %143, %cst_67 {dimension_numbers = #tpu.dot_dimension_numbers<[1], [0], [0], [1], [0, 0, 1, 1], [], []>} : vector<8x768xbf16>, vector<768x128xbf16>, vector<8x128xf32> -> vector<8x128xf32>
    %c0_68 = arith.constant 0 : index
    %c0_69 = arith.constant 0 : index
    %145 = vector.load %arg20[%c0_68, %c0_69] : memref<1x128xf32, #tpu.memory_space<vmem>>, vector<1x128xf32>
    %146 = vector.broadcast %145 : vector<1x128xf32> to vector<8x128xf32>
    %147 = arith.addf %144, %146 : vector<8x128xf32>
    %cst_70 = arith.constant 0.000000e+00 : f32
    %148 = vector.broadcast %cst_70 : f32 to vector<8x128xf32>
    %149 = arith.maximumf %147, %148 : vector<8x128xf32>
    %150 = arith.truncf %149 : vector<8x128xf32> to vector<8x128xbf16>
    %cst_71 = arith.constant 0.000000e+00 : bf16
    %151 = vector.broadcast %cst_71 : bf16 to vector<1x128xbf16>
    %152 = tpu.concatenate %151, %150, %151 in 0 : vector<1x128xbf16>, vector<8x128xbf16>, vector<1x128xbf16> -> vector<10x128xbf16>
    %153 = vector.extract_strided_slice %152 {offsets = [0, 0], sizes = [8, 128], strides = [1, 1]} : vector<10x128xbf16> to vector<8x128xbf16>
    %154 = vector.extract_strided_slice %152 {offsets = [1, 0], sizes = [8, 128], strides = [1, 1]} : vector<10x128xbf16> to vector<8x128xbf16>
    %155 = vector.extract_strided_slice %152 {offsets = [2, 0], sizes = [8, 128], strides = [1, 1]} : vector<10x128xbf16> to vector<8x128xbf16>
    %156 = tpu.concatenate %153, %154, %155 in 1 : vector<8x128xbf16>, vector<8x128xbf16>, vector<8x128xbf16> -> vector<8x384xbf16>
    %c0_72 = arith.constant 0 : index
    %c0_73 = arith.constant 0 : index
    %157 = vector.load %arg21[%c0_72, %c0_73] : memref<384x128xbf16, #tpu.memory_space<vmem>>, vector<384x128xbf16>
    %cst_74 = arith.constant dense<0.000000e+00> : vector<8x128xf32>
    %158 = tpu.matmul %156, %157, %cst_74 {dimension_numbers = #tpu.dot_dimension_numbers<[1], [0], [0], [1], [0, 0, 1, 1], [], []>} : vector<8x384xbf16>, vector<384x128xbf16>, vector<8x128xf32> -> vector<8x128xf32>
    %c0_75 = arith.constant 0 : index
    %c0_76 = arith.constant 0 : index
    %159 = vector.load %arg22[%c0_75, %c0_76] : memref<1x128xf32, #tpu.memory_space<vmem>>, vector<1x128xf32>
    %160 = vector.broadcast %159 : vector<1x128xf32> to vector<8x128xf32>
    %161 = arith.addf %158, %160 : vector<8x128xf32>
    %cst_77 = arith.constant 0.000000e+00 : f32
    %162 = vector.broadcast %cst_77 : f32 to vector<8x128xf32>
    %163 = arith.maximumf %161, %162 : vector<8x128xf32>
    %164 = arith.truncf %163 : vector<8x128xf32> to vector<8x128xbf16>
    %c0_78 = arith.constant 0 : index
    %c0_79 = arith.constant 0 : index
    %165 = vector.load %arg23[%c0_78, %c0_79] : memref<128x128xbf16, #tpu.memory_space<vmem>>, vector<128x128xbf16>
    %cst_80 = arith.constant dense<0.000000e+00> : vector<8x128xf32>
    %166 = tpu.matmul %164, %165, %cst_80 {dimension_numbers = #tpu.dot_dimension_numbers<[1], [0], [0], [1], [0, 0, 1, 1], [], []>} : vector<8x128xbf16>, vector<128x128xbf16>, vector<8x128xf32> -> vector<8x128xf32>
    %c0_81 = arith.constant 0 : index
    %c0_82 = arith.constant 0 : index
    %167 = vector.load %arg24[%c0_81, %c0_82] : memref<1x128xf32, #tpu.memory_space<vmem>>, vector<1x128xf32>
    %168 = vector.broadcast %167 : vector<1x128xf32> to vector<8x128xf32>
    %169 = arith.addf %166, %168 : vector<8x128xf32>
    %170 = arith.addf %147, %169 : vector<8x128xf32>
    %cst_83 = arith.constant 0.000000e+00 : f32
    %171 = vector.broadcast %cst_83 : f32 to vector<8x128xf32>
    %172 = arith.maximumf %170, %171 : vector<8x128xf32>
    %173 = arith.truncf %172 : vector<8x128xf32> to vector<8x128xbf16>
    %cst_84 = arith.constant 0.000000e+00 : bf16
    %174 = vector.broadcast %cst_84 : bf16 to vector<3x128xbf16>
    %175 = tpu.concatenate %174, %173, %174 in 0 : vector<3x128xbf16>, vector<8x128xbf16>, vector<3x128xbf16> -> vector<14x128xbf16>
    %176 = vector.extract_strided_slice %175 {offsets = [0, 0], sizes = [8, 128], strides = [1, 1]} : vector<14x128xbf16> to vector<8x128xbf16>
    %177 = vector.extract_strided_slice %175 {offsets = [3, 0], sizes = [8, 128], strides = [1, 1]} : vector<14x128xbf16> to vector<8x128xbf16>
    %178 = vector.extract_strided_slice %175 {offsets = [6, 0], sizes = [8, 128], strides = [1, 1]} : vector<14x128xbf16> to vector<8x128xbf16>
    %179 = tpu.concatenate %176, %177, %178 in 1 : vector<8x128xbf16>, vector<8x128xbf16>, vector<8x128xbf16> -> vector<8x384xbf16>
    %c0_85 = arith.constant 0 : index
    %c0_86 = arith.constant 0 : index
    %180 = vector.load %arg25[%c0_85, %c0_86] : memref<384x128xbf16, #tpu.memory_space<vmem>>, vector<384x128xbf16>
    %cst_87 = arith.constant dense<0.000000e+00> : vector<8x128xf32>
    %181 = tpu.matmul %179, %180, %cst_87 {dimension_numbers = #tpu.dot_dimension_numbers<[1], [0], [0], [1], [0, 0, 1, 1], [], []>} : vector<8x384xbf16>, vector<384x128xbf16>, vector<8x128xf32> -> vector<8x128xf32>
    %c0_88 = arith.constant 0 : index
    %c0_89 = arith.constant 0 : index
    %182 = vector.load %arg26[%c0_88, %c0_89] : memref<1x128xf32, #tpu.memory_space<vmem>>, vector<1x128xf32>
    %183 = vector.broadcast %182 : vector<1x128xf32> to vector<8x128xf32>
    %184 = arith.addf %181, %183 : vector<8x128xf32>
    %cst_90 = arith.constant 0.000000e+00 : f32
    %185 = vector.broadcast %cst_90 : f32 to vector<8x128xf32>
    %186 = arith.maximumf %184, %185 : vector<8x128xf32>
    %187 = arith.truncf %186 : vector<8x128xf32> to vector<8x128xbf16>
    %c0_91 = arith.constant 0 : index
    %c0_92 = arith.constant 0 : index
    %188 = vector.load %arg27[%c0_91, %c0_92] : memref<128x128xbf16, #tpu.memory_space<vmem>>, vector<128x128xbf16>
    %cst_93 = arith.constant dense<0.000000e+00> : vector<8x128xf32>
    %189 = tpu.matmul %187, %188, %cst_93 {dimension_numbers = #tpu.dot_dimension_numbers<[1], [0], [0], [1], [0, 0, 1, 1], [], []>} : vector<8x128xbf16>, vector<128x128xbf16>, vector<8x128xf32> -> vector<8x128xf32>
    %c0_94 = arith.constant 0 : index
    %c0_95 = arith.constant 0 : index
    %190 = vector.load %arg28[%c0_94, %c0_95] : memref<1x128xf32, #tpu.memory_space<vmem>>, vector<1x128xf32>
    %191 = vector.broadcast %190 : vector<1x128xf32> to vector<8x128xf32>
    %192 = arith.addf %189, %191 : vector<8x128xf32>
    %193 = arith.addf %170, %192 : vector<8x128xf32>
    %194 = tpu.iota {dimensions = array<i32: 0>} : vector<4x8xi32>
    %195 = tpu.iota {dimensions = array<i32: 1>} : vector<4x8xi32>
    %c2_i32_96 = arith.constant 2 : i32
    %196 = vector.broadcast %c2_i32_96 : i32 to vector<4x8xi32>
    %197 = arith.muli %196, %194 : vector<4x8xi32>
    %198 = arith.cmpi eq, %195, %197 : vector<4x8xi32>
    %199 = arith.extui %198 : vector<4x8xi1> to vector<4x8xi32>
    %200 = arith.sitofp %199 : vector<4x8xi32> to vector<4x8xf32>
    %c2_i32_97 = arith.constant 2 : i32
    %201 = vector.broadcast %c2_i32_97 : i32 to vector<4x8xi32>
    %202 = arith.muli %201, %194 : vector<4x8xi32>
    %c1_i32_98 = arith.constant 1 : i32
    %203 = vector.broadcast %c1_i32_98 : i32 to vector<4x8xi32>
    %204 = arith.addi %202, %203 : vector<4x8xi32>
    %205 = arith.cmpi eq, %195, %204 : vector<4x8xi32>
    %206 = arith.extui %205 : vector<4x8xi1> to vector<4x8xi32>
    %207 = arith.sitofp %206 : vector<4x8xi32> to vector<4x8xf32>
    %cst_99 = arith.constant dense<0.000000e+00> : vector<4x128xf32>
    %208 = tpu.matmul %200, %193, %cst_99 {dimension_numbers = #tpu.dot_dimension_numbers<[1], [0], [0], [1], [0, 0, 1, 1], [], []>} : vector<4x8xf32>, vector<8x128xf32>, vector<4x128xf32> -> vector<4x128xf32>
    %cst_100 = arith.constant dense<0.000000e+00> : vector<4x128xf32>
    %209 = tpu.matmul %207, %193, %cst_100 {dimension_numbers = #tpu.dot_dimension_numbers<[1], [0], [0], [1], [0, 0, 1, 1], [], []>} : vector<4x8xf32>, vector<8x128xf32>, vector<4x128xf32> -> vector<4x128xf32>
    %210 = tpu.concatenate %208, %209 in 1 : vector<4x128xf32>, vector<4x128xf32> -> vector<4x256xf32>
    %211 = arith.truncf %210 : vector<4x256xf32> to vector<4x256xbf16>
    %cst_101 = arith.constant 0.000000e+00 : bf16
    %212 = vector.broadcast %cst_101 : bf16 to vector<1x256xbf16>
    %213 = tpu.concatenate %212, %211, %212 in 0 : vector<1x256xbf16>, vector<4x256xbf16>, vector<1x256xbf16> -> vector<6x256xbf16>
    %214 = vector.extract_strided_slice %213 {offsets = [0, 0], sizes = [4, 256], strides = [1, 1]} : vector<6x256xbf16> to vector<4x256xbf16>
    %215 = vector.extract_strided_slice %213 {offsets = [1, 0], sizes = [4, 256], strides = [1, 1]} : vector<6x256xbf16> to vector<4x256xbf16>
    %216 = vector.extract_strided_slice %213 {offsets = [2, 0], sizes = [4, 256], strides = [1, 1]} : vector<6x256xbf16> to vector<4x256xbf16>
    %217 = tpu.concatenate %214, %215, %216 in 1 : vector<4x256xbf16>, vector<4x256xbf16>, vector<4x256xbf16> -> vector<4x768xbf16>
    %c0_102 = arith.constant 0 : index
    %c0_103 = arith.constant 0 : index
    %218 = vector.load %arg29[%c0_102, %c0_103] : memref<768x128xbf16, #tpu.memory_space<vmem>>, vector<768x128xbf16>
    %cst_104 = arith.constant dense<0.000000e+00> : vector<4x128xf32>
    %219 = tpu.matmul %217, %218, %cst_104 {dimension_numbers = #tpu.dot_dimension_numbers<[1], [0], [0], [1], [0, 0, 1, 1], [], []>} : vector<4x768xbf16>, vector<768x128xbf16>, vector<4x128xf32> -> vector<4x128xf32>
    %c0_105 = arith.constant 0 : index
    %c0_106 = arith.constant 0 : index
    %220 = vector.load %arg30[%c0_105, %c0_106] : memref<1x128xf32, #tpu.memory_space<vmem>>, vector<1x128xf32>
    %221 = vector.broadcast %220 : vector<1x128xf32> to vector<4x128xf32>
    %222 = arith.addf %219, %221 : vector<4x128xf32>
    %cst_107 = arith.constant 0.000000e+00 : f32
    %223 = vector.broadcast %cst_107 : f32 to vector<4x128xf32>
    %224 = arith.maximumf %222, %223 : vector<4x128xf32>
    %225 = arith.truncf %224 : vector<4x128xf32> to vector<4x128xbf16>
    %cst_108 = arith.constant 0.000000e+00 : bf16
    %226 = vector.broadcast %cst_108 : bf16 to vector<1x128xbf16>
    %227 = tpu.concatenate %226, %225, %226 in 0 : vector<1x128xbf16>, vector<4x128xbf16>, vector<1x128xbf16> -> vector<6x128xbf16>
    %228 = vector.extract_strided_slice %227 {offsets = [0, 0], sizes = [4, 128], strides = [1, 1]} : vector<6x128xbf16> to vector<4x128xbf16>
    %229 = vector.extract_strided_slice %227 {offsets = [1, 0], sizes = [4, 128], strides = [1, 1]} : vector<6x128xbf16> to vector<4x128xbf16>
    %230 = vector.extract_strided_slice %227 {offsets = [2, 0], sizes = [4, 128], strides = [1, 1]} : vector<6x128xbf16> to vector<4x128xbf16>
    %231 = tpu.concatenate %228, %229, %230 in 1 : vector<4x128xbf16>, vector<4x128xbf16>, vector<4x128xbf16> -> vector<4x384xbf16>
    %c0_109 = arith.constant 0 : index
    %c0_110 = arith.constant 0 : index
    %232 = vector.load %arg31[%c0_109, %c0_110] : memref<384x128xbf16, #tpu.memory_space<vmem>>, vector<384x128xbf16>
    %cst_111 = arith.constant dense<0.000000e+00> : vector<4x128xf32>
    %233 = tpu.matmul %231, %232, %cst_111 {dimension_numbers = #tpu.dot_dimension_numbers<[1], [0], [0], [1], [0, 0, 1, 1], [], []>} : vector<4x384xbf16>, vector<384x128xbf16>, vector<4x128xf32> -> vector<4x128xf32>
    %c0_112 = arith.constant 0 : index
    %c0_113 = arith.constant 0 : index
    %234 = vector.load %arg32[%c0_112, %c0_113] : memref<1x128xf32, #tpu.memory_space<vmem>>, vector<1x128xf32>
    %235 = vector.broadcast %234 : vector<1x128xf32> to vector<4x128xf32>
    %236 = arith.addf %233, %235 : vector<4x128xf32>
    %cst_114 = arith.constant 0.000000e+00 : f32
    %237 = vector.broadcast %cst_114 : f32 to vector<4x128xf32>
    %238 = arith.maximumf %236, %237 : vector<4x128xf32>
    %239 = arith.truncf %238 : vector<4x128xf32> to vector<4x128xbf16>
    %c0_115 = arith.constant 0 : index
    %c0_116 = arith.constant 0 : index
    %240 = vector.load %arg33[%c0_115, %c0_116] : memref<128x128xbf16, #tpu.memory_space<vmem>>, vector<128x128xbf16>
    %cst_117 = arith.constant dense<0.000000e+00> : vector<4x128xf32>
    %241 = tpu.matmul %239, %240, %cst_117 {dimension_numbers = #tpu.dot_dimension_numbers<[1], [0], [0], [1], [0, 0, 1, 1], [], []>} : vector<4x128xbf16>, vector<128x128xbf16>, vector<4x128xf32> -> vector<4x128xf32>
    %c0_118 = arith.constant 0 : index
    %c0_119 = arith.constant 0 : index
    %242 = vector.load %arg34[%c0_118, %c0_119] : memref<1x128xf32, #tpu.memory_space<vmem>>, vector<1x128xf32>
    %243 = vector.broadcast %242 : vector<1x128xf32> to vector<4x128xf32>
    %244 = arith.addf %241, %243 : vector<4x128xf32>
    %245 = arith.addf %222, %244 : vector<4x128xf32>
    %cst_120 = arith.constant 0.000000e+00 : f32
    %246 = vector.broadcast %cst_120 : f32 to vector<4x128xf32>
    %247 = arith.maximumf %245, %246 : vector<4x128xf32>
    %248 = arith.truncf %247 : vector<4x128xf32> to vector<4x128xbf16>
    %cst_121 = arith.constant 0.000000e+00 : bf16
    %249 = vector.broadcast %cst_121 : bf16 to vector<3x128xbf16>
    %250 = tpu.concatenate %249, %248, %249 in 0 : vector<3x128xbf16>, vector<4x128xbf16>, vector<3x128xbf16> -> vector<10x128xbf16>
    %251 = vector.extract_strided_slice %250 {offsets = [0, 0], sizes = [4, 128], strides = [1, 1]} : vector<10x128xbf16> to vector<4x128xbf16>
    %252 = vector.extract_strided_slice %250 {offsets = [3, 0], sizes = [4, 128], strides = [1, 1]} : vector<10x128xbf16> to vector<4x128xbf16>
    %253 = vector.extract_strided_slice %250 {offsets = [6, 0], sizes = [4, 128], strides = [1, 1]} : vector<10x128xbf16> to vector<4x128xbf16>
    %254 = tpu.concatenate %251, %252, %253 in 1 : vector<4x128xbf16>, vector<4x128xbf16>, vector<4x128xbf16> -> vector<4x384xbf16>
    %c0_122 = arith.constant 0 : index
    %c0_123 = arith.constant 0 : index
    %255 = vector.load %arg35[%c0_122, %c0_123] : memref<384x128xbf16, #tpu.memory_space<vmem>>, vector<384x128xbf16>
    %cst_124 = arith.constant dense<0.000000e+00> : vector<4x128xf32>
    %256 = tpu.matmul %254, %255, %cst_124 {dimension_numbers = #tpu.dot_dimension_numbers<[1], [0], [0], [1], [0, 0, 1, 1], [], []>} : vector<4x384xbf16>, vector<384x128xbf16>, vector<4x128xf32> -> vector<4x128xf32>
    %c0_125 = arith.constant 0 : index
    %c0_126 = arith.constant 0 : index
    %257 = vector.load %arg36[%c0_125, %c0_126] : memref<1x128xf32, #tpu.memory_space<vmem>>, vector<1x128xf32>
    %258 = vector.broadcast %257 : vector<1x128xf32> to vector<4x128xf32>
    %259 = arith.addf %256, %258 : vector<4x128xf32>
    %cst_127 = arith.constant 0.000000e+00 : f32
    %260 = vector.broadcast %cst_127 : f32 to vector<4x128xf32>
    %261 = arith.maximumf %259, %260 : vector<4x128xf32>
    %262 = arith.truncf %261 : vector<4x128xf32> to vector<4x128xbf16>
    %c0_128 = arith.constant 0 : index
    %c0_129 = arith.constant 0 : index
    %263 = vector.load %arg37[%c0_128, %c0_129] : memref<128x128xbf16, #tpu.memory_space<vmem>>, vector<128x128xbf16>
    %cst_130 = arith.constant dense<0.000000e+00> : vector<4x128xf32>
    %264 = tpu.matmul %262, %263, %cst_130 {dimension_numbers = #tpu.dot_dimension_numbers<[1], [0], [0], [1], [0, 0, 1, 1], [], []>} : vector<4x128xbf16>, vector<128x128xbf16>, vector<4x128xf32> -> vector<4x128xf32>
    %c0_131 = arith.constant 0 : index
    %c0_132 = arith.constant 0 : index
    %265 = vector.load %arg38[%c0_131, %c0_132] : memref<1x128xf32, #tpu.memory_space<vmem>>, vector<1x128xf32>
    %266 = vector.broadcast %265 : vector<1x128xf32> to vector<4x128xf32>
    %267 = arith.addf %264, %266 : vector<4x128xf32>
    %268 = arith.addf %245, %267 : vector<4x128xf32>
    %269 = arith.truncf %268 : vector<4x128xf32> to vector<4x128xbf16>
    %cst_133 = arith.constant 0.000000e+00 : bf16
    %270 = vector.broadcast %cst_133 : bf16 to vector<1x128xbf16>
    %271 = tpu.concatenate %270, %269, %270 in 0 : vector<1x128xbf16>, vector<4x128xbf16>, vector<1x128xbf16> -> vector<6x128xbf16>
    %272 = vector.extract_strided_slice %271 {offsets = [0, 0], sizes = [4, 128], strides = [1, 1]} : vector<6x128xbf16> to vector<4x128xbf16>
    %273 = vector.extract_strided_slice %271 {offsets = [1, 0], sizes = [4, 128], strides = [1, 1]} : vector<6x128xbf16> to vector<4x128xbf16>
    %274 = vector.extract_strided_slice %271 {offsets = [2, 0], sizes = [4, 128], strides = [1, 1]} : vector<6x128xbf16> to vector<4x128xbf16>
    %275 = tpu.concatenate %272, %273, %274 in 1 : vector<4x128xbf16>, vector<4x128xbf16>, vector<4x128xbf16> -> vector<4x384xbf16>
    %c0_134 = arith.constant 0 : index
    %c0_135 = arith.constant 0 : index
    %276 = vector.load %arg39[%c0_134, %c0_135] : memref<384x128xbf16, #tpu.memory_space<vmem>>, vector<384x128xbf16>
    %cst_136 = arith.constant dense<0.000000e+00> : vector<4x128xf32>
    %277 = tpu.matmul %275, %276, %cst_136 {dimension_numbers = #tpu.dot_dimension_numbers<[1], [0], [0], [1], [0, 0, 1, 1], [], []>} : vector<4x384xbf16>, vector<384x128xbf16>, vector<4x128xf32> -> vector<4x128xf32>
    %c0_137 = arith.constant 0 : index
    %c0_138 = arith.constant 0 : index
    %278 = vector.load %arg40[%c0_137, %c0_138] : memref<1x128xf32, #tpu.memory_space<vmem>>, vector<1x128xf32>
    %279 = vector.broadcast %278 : vector<1x128xf32> to vector<4x128xf32>
    %280 = arith.addf %277, %279 : vector<4x128xf32>
    %281 = arith.truncf %280 : vector<4x128xf32> to vector<4x128xbf16>
    %c0_139 = arith.constant 0 : index
    %c0_140 = arith.constant 0 : index
    %282 = vector.load %arg41[%c0_139, %c0_140] : memref<128x128xbf16, #tpu.memory_space<vmem>>, vector<128x128xbf16>
    %cst_141 = arith.constant dense<0.000000e+00> : vector<4x128xf32>
    %283 = tpu.matmul %281, %282, %cst_141 {dimension_numbers = #tpu.dot_dimension_numbers<[1], [0], [0], [1], [0, 0, 1, 1], [], []>} : vector<4x128xbf16>, vector<128x128xbf16>, vector<4x128xf32> -> vector<4x128xf32>
    %c0_142 = arith.constant 0 : index
    %c0_143 = arith.constant 0 : index
    %284 = vector.load %arg42[%c0_142, %c0_143] : memref<1x128xf32, #tpu.memory_space<vmem>>, vector<1x128xf32>
    %285 = vector.broadcast %284 : vector<1x128xf32> to vector<4x128xf32>
    %286 = arith.addf %283, %285 : vector<4x128xf32>
    %287 = arith.truncf %102 : vector<8x128xf32> to vector<8x128xbf16>
    %c0_144 = arith.constant 0 : index
    %c0_145 = arith.constant 0 : index
    %c0_146 = arith.constant 0 : index
    %288 = vector.load %arg43[%c0_144, %c0_145, %c0_146] : memref<1x8x128xbf16, #tpu.memory_space<vmem>>, vector<1x8x128xbf16>
    %289 = vector.shape_cast %288 : vector<1x8x128xbf16> to vector<8x128xbf16>
    %290 = vector.shape_cast %287 : vector<8x128xbf16> to vector<1x8x128xbf16>
    tpu.vector_store %arg43[%c0_144, %c0_145, %c0_146], %290 {strides = array<i32>} : memref<1x8x128xbf16, #tpu.memory_space<vmem>>, vector<1x8x128xbf16>,
    %c0_147 = arith.constant 0 : index
    %c0_148 = arith.constant 0 : index
    %c0_149 = arith.constant 0 : index
    %291 = vector.load %arg44[%c0_147, %c0_148, %c0_149] : memref<1x4x128xf32, #tpu.memory_space<vmem>>, vector<1x4x128xf32>
    %292 = vector.shape_cast %291 : vector<1x4x128xf32> to vector<4x128xf32>
    %293 = vector.shape_cast %286 : vector<4x128xf32> to vector<1x4x128xf32>
    tpu.vector_store %arg44[%c0_147, %c0_148, %c0_149], %293 {strides = array<i32>} : memref<1x4x128xf32, #tpu.memory_space<vmem>>, vector<1x4x128xf32>,
    return
  }
  func.func @transform_0(%arg0: i32) -> (i32, i32, i32) {
    %c0_i32 = arith.constant 0 : i32
    %c0_i32_0 = arith.constant 0 : i32
    %c0_i32_1 = arith.constant 0 : i32
    return %arg0, %c0_i32, %c0_i32_0 : i32, i32, i32
  }
  func.func @transform_1(%arg0: i32) -> (i32, i32, i32) {
    %c0_i32 = arith.constant 0 : i32
    %c0_i32_0 = arith.constant 0 : i32
    %c0_i32_1 = arith.constant 0 : i32
    return %arg0, %c0_i32, %c0_i32_0 : i32, i32, i32
  }
  func.func @transform_2(%arg0: i32) -> (i32, i32) {
    %c0_i32 = arith.constant 0 : i32
    %c0_i32_0 = arith.constant 0 : i32
    %c0_i32_1 = arith.constant 0 : i32
    return %c0_i32, %c0_i32_0 : i32, i32
  }
  func.func @transform_3(%arg0: i32) -> (i32, i32) {
    %c0_i32 = arith.constant 0 : i32
    %c0_i32_0 = arith.constant 0 : i32
    %c0_i32_1 = arith.constant 0 : i32
    return %c0_i32, %c0_i32_0 : i32, i32
  }
  func.func @transform_4(%arg0: i32) -> (i32, i32) {
    %c0_i32 = arith.constant 0 : i32
    %c0_i32_0 = arith.constant 0 : i32
    %c0_i32_1 = arith.constant 0 : i32
    return %c0_i32, %c0_i32_0 : i32, i32
  }
  func.func @transform_5(%arg0: i32) -> (i32, i32) {
    %c0_i32 = arith.constant 0 : i32
    %c0_i32_0 = arith.constant 0 : i32
    %c0_i32_1 = arith.constant 0 : i32
    return %c0_i32, %c0_i32_0 : i32, i32
  }
  func.func @transform_6(%arg0: i32) -> (i32, i32) {
    %c0_i32 = arith.constant 0 : i32
    %c0_i32_0 = arith.constant 0 : i32
    %c0_i32_1 = arith.constant 0 : i32
    return %c0_i32, %c0_i32_0 : i32, i32
  }
  func.func @transform_7(%arg0: i32) -> (i32, i32) {
    %c0_i32 = arith.constant 0 : i32
    %c0_i32_0 = arith.constant 0 : i32
    %c0_i32_1 = arith.constant 0 : i32
    return %c0_i32, %c0_i32_0 : i32, i32
  }
  func.func @transform_8(%arg0: i32) -> (i32, i32) {
    %c0_i32 = arith.constant 0 : i32
    %c0_i32_0 = arith.constant 0 : i32
    %c0_i32_1 = arith.constant 0 : i32
    return %c0_i32, %c0_i32_0 : i32, i32
  }
  func.func @transform_9(%arg0: i32) -> (i32, i32) {
    %c0_i32 = arith.constant 0 : i32
    %c0_i32_0 = arith.constant 0 : i32
    %c0_i32_1 = arith.constant 0 : i32
    return %c0_i32, %c0_i32_0 : i32, i32
  }
  func.func @transform_10(%arg0: i32) -> (i32, i32) {
    %c0_i32 = arith.constant 0 : i32
    %c0_i32_0 = arith.constant 0 : i32
    %c0_i32_1 = arith.constant 0 : i32
    return %c0_i32, %c0_i32_0 : i32, i32
  }
  func.func @transform_11(%arg0: i32) -> (i32, i32) {
    %c0_i32 = arith.constant 0 : i32
    %c0_i32_0 = arith.constant 0 : i32
    %c0_i32_1 = arith.constant 0 : i32
    return %c0_i32, %c0_i32_0 : i32, i32
  }
  func.func @transform_12(%arg0: i32) -> (i32, i32) {
    %c0_i32 = arith.constant 0 : i32
    %c0_i32_0 = arith.constant 0 : i32
    %c0_i32_1 = arith.constant 0 : i32
    return %c0_i32, %c0_i32_0 : i32, i32
  }
  func.func @transform_13(%arg0: i32) -> (i32, i32) {
    %c0_i32 = arith.constant 0 : i32
    %c0_i32_0 = arith.constant 0 : i32
    %c0_i32_1 = arith.constant 0 : i32
    return %c0_i32, %c0_i32_0 : i32, i32
  }
  func.func @transform_14(%arg0: i32) -> (i32, i32) {
    %c0_i32 = arith.constant 0 : i32
    %c0_i32_0 = arith.constant 0 : i32
    %c0_i32_1 = arith.constant 0 : i32
    return %c0_i32, %c0_i32_0 : i32, i32
  }
  func.func @transform_15(%arg0: i32) -> (i32, i32) {
    %c0_i32 = arith.constant 0 : i32
    %c0_i32_0 = arith.constant 0 : i32
    %c0_i32_1 = arith.constant 0 : i32
    return %c0_i32, %c0_i32_0 : i32, i32
  }
  func.func @transform_16(%arg0: i32) -> (i32, i32) {
    %c0_i32 = arith.constant 0 : i32
    %c0_i32_0 = arith.constant 0 : i32
    %c0_i32_1 = arith.constant 0 : i32
    return %c0_i32, %c0_i32_0 : i32, i32
  }
  func.func @transform_17(%arg0: i32) -> (i32, i32) {
    %c0_i32 = arith.constant 0 : i32
    %c0_i32_0 = arith.constant 0 : i32
    %c0_i32_1 = arith.constant 0 : i32
    return %c0_i32, %c0_i32_0 : i32, i32
  }
  func.func @transform_18(%arg0: i32) -> (i32, i32) {
    %c0_i32 = arith.constant 0 : i32
    %c0_i32_0 = arith.constant 0 : i32
    %c0_i32_1 = arith.constant 0 : i32
    return %c0_i32, %c0_i32_0 : i32, i32
  }
  func.func @transform_19(%arg0: i32) -> (i32, i32) {
    %c0_i32 = arith.constant 0 : i32
    %c0_i32_0 = arith.constant 0 : i32
    %c0_i32_1 = arith.constant 0 : i32
    return %c0_i32, %c0_i32_0 : i32, i32
  }
  func.func @transform_20(%arg0: i32) -> (i32, i32) {
    %c0_i32 = arith.constant 0 : i32
    %c0_i32_0 = arith.constant 0 : i32
    %c0_i32_1 = arith.constant 0 : i32
    return %c0_i32, %c0_i32_0 : i32, i32
  }
  func.func @transform_21(%arg0: i32) -> (i32, i32) {
    %c0_i32 = arith.constant 0 : i32
    %c0_i32_0 = arith.constant 0 : i32
    %c0_i32_1 = arith.constant 0 : i32
    return %c0_i32, %c0_i32_0 : i32, i32
  }
  func.func @transform_22(%arg0: i32) -> (i32, i32) {
    %c0_i32 = arith.constant 0 : i32
    %c0_i32_0 = arith.constant 0 : i32
    %c0_i32_1 = arith.constant 0 : i32
    return %c0_i32, %c0_i32_0 : i32, i32
  }
  func.func @transform_23(%arg0: i32) -> (i32, i32) {
    %c0_i32 = arith.constant 0 : i32
    %c0_i32_0 = arith.constant 0 : i32
    %c0_i32_1 = arith.constant 0 : i32
    return %c0_i32, %c0_i32_0 : i32, i32
  }
  func.func @transform_24(%arg0: i32) -> (i32, i32) {
    %c0_i32 = arith.constant 0 : i32
    %c0_i32_0 = arith.constant 0 : i32
    %c0_i32_1 = arith.constant 0 : i32
    return %c0_i32, %c0_i32_0 : i32, i32
  }
  func.func @transform_25(%arg0: i32) -> (i32, i32) {
    %c0_i32 = arith.constant 0 : i32
    %c0_i32_0 = arith.constant 0 : i32
    %c0_i32_1 = arith.constant 0 : i32
    return %c0_i32, %c0_i32_0 : i32, i32
  }
  func.func @transform_26(%arg0: i32) -> (i32, i32) {
    %c0_i32 = arith.constant 0 : i32
    %c0_i32_0 = arith.constant 0 : i32
    %c0_i32_1 = arith.constant 0 : i32
    return %c0_i32, %c0_i32_0 : i32, i32
  }
  func.func @transform_27(%arg0: i32) -> (i32, i32) {
    %c0_i32 = arith.constant 0 : i32
    %c0_i32_0 = arith.constant 0 : i32
    %c0_i32_1 = arith.constant 0 : i32
    return %c0_i32, %c0_i32_0 : i32, i32
  }
  func.func @transform_28(%arg0: i32) -> (i32, i32) {
    %c0_i32 = arith.constant 0 : i32
    %c0_i32_0 = arith.constant 0 : i32
    %c0_i32_1 = arith.constant 0 : i32
    return %c0_i32, %c0_i32_0 : i32, i32
  }
  func.func @transform_29(%arg0: i32) -> (i32, i32) {
    %c0_i32 = arith.constant 0 : i32
    %c0_i32_0 = arith.constant 0 : i32
    %c0_i32_1 = arith.constant 0 : i32
    return %c0_i32, %c0_i32_0 : i32, i32
  }
  func.func @transform_30(%arg0: i32) -> (i32, i32) {
    %c0_i32 = arith.constant 0 : i32
    %c0_i32_0 = arith.constant 0 : i32
    %c0_i32_1 = arith.constant 0 : i32
    return %c0_i32, %c0_i32_0 : i32, i32
  }
  func.func @transform_31(%arg0: i32) -> (i32, i32) {
    %c0_i32 = arith.constant 0 : i32
    %c0_i32_0 = arith.constant 0 : i32
    %c0_i32_1 = arith.constant 0 : i32
    return %c0_i32, %c0_i32_0 : i32, i32
  }
  func.func @transform_32(%arg0: i32) -> (i32, i32) {
    %c0_i32 = arith.constant 0 : i32
    %c0_i32_0 = arith.constant 0 : i32
    %c0_i32_1 = arith.constant 0 : i32
    return %c0_i32, %c0_i32_0 : i32, i32
  }
  func.func @transform_33(%arg0: i32) -> (i32, i32) {
    %c0_i32 = arith.constant 0 : i32
    %c0_i32_0 = arith.constant 0 : i32
    %c0_i32_1 = arith.constant 0 : i32
    return %c0_i32, %c0_i32_0 : i32, i32
  }
  func.func @transform_34(%arg0: i32) -> (i32, i32) {
    %c0_i32 = arith.constant 0 : i32
    %c0_i32_0 = arith.constant 0 : i32
    %c0_i32_1 = arith.constant 0 : i32
    return %c0_i32, %c0_i32_0 : i32, i32
  }
  func.func @transform_35(%arg0: i32) -> (i32, i32) {
    %c0_i32 = arith.constant 0 : i32
    %c0_i32_0 = arith.constant 0 : i32
    %c0_i32_1 = arith.constant 0 : i32
    return %c0_i32, %c0_i32_0 : i32, i32
  }
  func.func @transform_36(%arg0: i32) -> (i32, i32) {
    %c0_i32 = arith.constant 0 : i32
    %c0_i32_0 = arith.constant 0 : i32
    %c0_i32_1 = arith.constant 0 : i32
    return %c0_i32, %c0_i32_0 : i32, i32
  }
  func.func @transform_37(%arg0: i32) -> (i32, i32) {
    %c0_i32 = arith.constant 0 : i32
    %c0_i32_0 = arith.constant 0 : i32
    %c0_i32_1 = arith.constant 0 : i32
    return %c0_i32, %c0_i32_0 : i32, i32
  }
  func.func @transform_38(%arg0: i32) -> (i32, i32) {
    %c0_i32 = arith.constant 0 : i32
    %c0_i32_0 = arith.constant 0 : i32
    %c0_i32_1 = arith.constant 0 : i32
    return %c0_i32, %c0_i32_0 : i32, i32
  }
  func.func @transform_39(%arg0: i32) -> (i32, i32) {
    %c0_i32 = arith.constant 0 : i32
    %c0_i32_0 = arith.constant 0 : i32
    %c0_i32_1 = arith.constant 0 : i32
    return %c0_i32, %c0_i32_0 : i32, i32
  }
  func.func @transform_40(%arg0: i32) -> (i32, i32) {
    %c0_i32 = arith.constant 0 : i32
    %c0_i32_0 = arith.constant 0 : i32
    %c0_i32_1 = arith.constant 0 : i32
    return %c0_i32, %c0_i32_0 : i32, i32
  }
  func.func @transform_41(%arg0: i32) -> (i32, i32) {
    %c0_i32 = arith.constant 0 : i32
    %c0_i32_0 = arith.constant 0 : i32
    %c0_i32_1 = arith.constant 0 : i32
    return %c0_i32, %c0_i32_0 : i32, i32
  }
  func.func @transform_42(%arg0: i32) -> (i32, i32, i32) {
    %c0_i32 = arith.constant 0 : i32
    %c0_i32_0 = arith.constant 0 : i32
    %c0_i32_1 = arith.constant 0 : i32
    return %arg0, %c0_i32, %c0_i32_0 : i32, i32, i32
  }
  func.func @transform_43(%arg0: i32) -> (i32, i32, i32) {
    %c0_i32 = arith.constant 0 : i32
    %c0_i32_0 = arith.constant 0 : i32
    %c0_i32_1 = arith.constant 0 : i32
    return %arg0, %c0_i32, %c0_i32_0 : i32, i32, i32
  }
}

module attributes {stable_mosaic.version = 11 : i64} {
  func.func @_dechand_kernel(%arg0: i32, %arg1: memref<1x4x128xf32, #tpu.memory_space<vmem>>, %arg2: memref<1x8x128xbf16, #tpu.memory_space<vmem>>, %arg3: memref<384x128xbf16, #tpu.memory_space<vmem>>, %arg4: memref<1x128xf32, #tpu.memory_space<vmem>>, %arg5: memref<384x128xbf16, #tpu.memory_space<vmem>>, %arg6: memref<1x128xf32, #tpu.memory_space<vmem>>, %arg7: memref<128x128xbf16, #tpu.memory_space<vmem>>, %arg8: memref<1x128xf32, #tpu.memory_space<vmem>>, %arg9: memref<384x128xbf16, #tpu.memory_space<vmem>>, %arg10: memref<1x128xf32, #tpu.memory_space<vmem>>, %arg11: memref<128x128xbf16, #tpu.memory_space<vmem>>, %arg12: memref<1x128xf32, #tpu.memory_space<vmem>>, %arg13: memref<384x256xbf16, #tpu.memory_space<vmem>>, %arg14: memref<1x256xf32, #tpu.memory_space<vmem>>, %arg15: memref<384x128xbf16, #tpu.memory_space<vmem>>, %arg16: memref<1x128xf32, #tpu.memory_space<vmem>>, %arg17: memref<384x128xbf16, #tpu.memory_space<vmem>>, %arg18: memref<1x128xf32, #tpu.memory_space<vmem>>, %arg19: memref<256x128xbf16, #tpu.memory_space<vmem>>, %arg20: memref<1x128xf32, #tpu.memory_space<vmem>>, %arg21: memref<1x8x128xf32, #tpu.memory_space<vmem>>) attributes {dimension_semantics = [#tpu.dimension_semantics<parallel>], iteration_bounds = array<i64: 2>, scalar_prefetch = 0 : i64, scratch_operands = 0 : i64, tpu.core_type = #tpu.core_type<tc>, window_params = [{transform_indices = @transform_0, window_bounds = array<i64: 1, 4, 128>}, {transform_indices = @transform_1, window_bounds = array<i64: 1, 8, 128>}, {pipeline_mode = #tpu.pipeline_mode<synchronous>, transform_indices = @transform_2, window_bounds = array<i64: 384, 128>}, {pipeline_mode = #tpu.pipeline_mode<synchronous>, transform_indices = @transform_3, window_bounds = array<i64: 1, 128>}, {pipeline_mode = #tpu.pipeline_mode<synchronous>, transform_indices = @transform_4, window_bounds = array<i64: 384, 128>}, {pipeline_mode = #tpu.pipeline_mode<synchronous>, transform_indices = @transform_5, window_bounds = array<i64: 1, 128>}, {pipeline_mode = #tpu.pipeline_mode<synchronous>, transform_indices = @transform_6, window_bounds = array<i64: 128, 128>}, {pipeline_mode = #tpu.pipeline_mode<synchronous>, transform_indices = @transform_7, window_bounds = array<i64: 1, 128>}, {pipeline_mode = #tpu.pipeline_mode<synchronous>, transform_indices = @transform_8, window_bounds = array<i64: 384, 128>}, {pipeline_mode = #tpu.pipeline_mode<synchronous>, transform_indices = @transform_9, window_bounds = array<i64: 1, 128>}, {pipeline_mode = #tpu.pipeline_mode<synchronous>, transform_indices = @transform_10, window_bounds = array<i64: 128, 128>}, {pipeline_mode = #tpu.pipeline_mode<synchronous>, transform_indices = @transform_11, window_bounds = array<i64: 1, 128>}, {pipeline_mode = #tpu.pipeline_mode<synchronous>, transform_indices = @transform_12, window_bounds = array<i64: 384, 256>}, {pipeline_mode = #tpu.pipeline_mode<synchronous>, transform_indices = @transform_13, window_bounds = array<i64: 1, 256>}, {pipeline_mode = #tpu.pipeline_mode<synchronous>, transform_indices = @transform_14, window_bounds = array<i64: 384, 128>}, {pipeline_mode = #tpu.pipeline_mode<synchronous>, transform_indices = @transform_15, window_bounds = array<i64: 1, 128>}, {pipeline_mode = #tpu.pipeline_mode<synchronous>, transform_indices = @transform_16, window_bounds = array<i64: 384, 128>}, {pipeline_mode = #tpu.pipeline_mode<synchronous>, transform_indices = @transform_17, window_bounds = array<i64: 1, 128>}, {pipeline_mode = #tpu.pipeline_mode<synchronous>, transform_indices = @transform_18, window_bounds = array<i64: 256, 128>}, {pipeline_mode = #tpu.pipeline_mode<synchronous>, transform_indices = @transform_19, window_bounds = array<i64: 1, 128>}, {transform_indices = @transform_20, window_bounds = array<i64: 1, 8, 128>}]} {
    %c0 = arith.constant 0 : index
    %c0_0 = arith.constant 0 : index
    %c0_1 = arith.constant 0 : index
    %0 = vector.load %arg1[%c0, %c0_0, %c0_1] : memref<1x4x128xf32, #tpu.memory_space<vmem>>, vector<1x4x128xf32>
    %1 = vector.shape_cast %0 : vector<1x4x128xf32> to vector<4x128xf32>
    %2 = arith.truncf %1 : vector<4x128xf32> to vector<4x128xbf16>
    %cst = arith.constant 0.000000e+00 : bf16
    %3 = vector.broadcast %cst : bf16 to vector<1x128xbf16>
    %4 = tpu.concatenate %3, %2, %3 in 0 : vector<1x128xbf16>, vector<4x128xbf16>, vector<1x128xbf16> -> vector<6x128xbf16>
    %5 = vector.extract_strided_slice %4 {offsets = [0, 0], sizes = [4, 128], strides = [1, 1]} : vector<6x128xbf16> to vector<4x128xbf16>
    %6 = vector.extract_strided_slice %4 {offsets = [1, 0], sizes = [4, 128], strides = [1, 1]} : vector<6x128xbf16> to vector<4x128xbf16>
    %7 = vector.extract_strided_slice %4 {offsets = [2, 0], sizes = [4, 128], strides = [1, 1]} : vector<6x128xbf16> to vector<4x128xbf16>
    %8 = tpu.concatenate %5, %6, %7 in 1 : vector<4x128xbf16>, vector<4x128xbf16>, vector<4x128xbf16> -> vector<4x384xbf16>
    %c0_2 = arith.constant 0 : index
    %c0_3 = arith.constant 0 : index
    %9 = vector.load %arg3[%c0_2, %c0_3] : memref<384x128xbf16, #tpu.memory_space<vmem>>, vector<384x128xbf16>
    %cst_4 = arith.constant dense<0.000000e+00> : vector<4x128xf32>
    %10 = tpu.matmul %8, %9, %cst_4 {dimension_numbers = #tpu.dot_dimension_numbers<[1], [0], [0], [1], [0, 0, 1, 1], [], []>} : vector<4x384xbf16>, vector<384x128xbf16>, vector<4x128xf32> -> vector<4x128xf32>
    %c0_5 = arith.constant 0 : index
    %c0_6 = arith.constant 0 : index
    %11 = vector.load %arg4[%c0_5, %c0_6] : memref<1x128xf32, #tpu.memory_space<vmem>>, vector<1x128xf32>
    %12 = vector.broadcast %11 : vector<1x128xf32> to vector<4x128xf32>
    %13 = arith.addf %10, %12 : vector<4x128xf32>
    %cst_7 = arith.constant 0.000000e+00 : f32
    %14 = vector.broadcast %cst_7 : f32 to vector<4x128xf32>
    %15 = arith.maximumf %13, %14 : vector<4x128xf32>
    %cst_8 = arith.constant 0.000000e+00 : f32
    %16 = vector.broadcast %cst_8 : f32 to vector<4x128xf32>
    %17 = arith.maximumf %15, %16 : vector<4x128xf32>
    %18 = arith.truncf %17 : vector<4x128xf32> to vector<4x128xbf16>
    %cst_9 = arith.constant 0.000000e+00 : bf16
    %19 = vector.broadcast %cst_9 : bf16 to vector<3x128xbf16>
    %20 = tpu.concatenate %19, %18, %19 in 0 : vector<3x128xbf16>, vector<4x128xbf16>, vector<3x128xbf16> -> vector<10x128xbf16>
    %21 = vector.extract_strided_slice %20 {offsets = [0, 0], sizes = [4, 128], strides = [1, 1]} : vector<10x128xbf16> to vector<4x128xbf16>
    %22 = vector.extract_strided_slice %20 {offsets = [3, 0], sizes = [4, 128], strides = [1, 1]} : vector<10x128xbf16> to vector<4x128xbf16>
    %23 = vector.extract_strided_slice %20 {offsets = [6, 0], sizes = [4, 128], strides = [1, 1]} : vector<10x128xbf16> to vector<4x128xbf16>
    %24 = tpu.concatenate %21, %22, %23 in 1 : vector<4x128xbf16>, vector<4x128xbf16>, vector<4x128xbf16> -> vector<4x384xbf16>
    %c0_10 = arith.constant 0 : index
    %c0_11 = arith.constant 0 : index
    %25 = vector.load %arg5[%c0_10, %c0_11] : memref<384x128xbf16, #tpu.memory_space<vmem>>, vector<384x128xbf16>
    %cst_12 = arith.constant dense<0.000000e+00> : vector<4x128xf32>
    %26 = tpu.matmul %24, %25, %cst_12 {dimension_numbers = #tpu.dot_dimension_numbers<[1], [0], [0], [1], [0, 0, 1, 1], [], []>} : vector<4x384xbf16>, vector<384x128xbf16>, vector<4x128xf32> -> vector<4x128xf32>
    %c0_13 = arith.constant 0 : index
    %c0_14 = arith.constant 0 : index
    %27 = vector.load %arg6[%c0_13, %c0_14] : memref<1x128xf32, #tpu.memory_space<vmem>>, vector<1x128xf32>
    %28 = vector.broadcast %27 : vector<1x128xf32> to vector<4x128xf32>
    %29 = arith.addf %26, %28 : vector<4x128xf32>
    %cst_15 = arith.constant 0.000000e+00 : f32
    %30 = vector.broadcast %cst_15 : f32 to vector<4x128xf32>
    %31 = arith.maximumf %29, %30 : vector<4x128xf32>
    %32 = arith.truncf %31 : vector<4x128xf32> to vector<4x128xbf16>
    %c0_16 = arith.constant 0 : index
    %c0_17 = arith.constant 0 : index
    %33 = vector.load %arg7[%c0_16, %c0_17] : memref<128x128xbf16, #tpu.memory_space<vmem>>, vector<128x128xbf16>
    %cst_18 = arith.constant dense<0.000000e+00> : vector<4x128xf32>
    %34 = tpu.matmul %32, %33, %cst_18 {dimension_numbers = #tpu.dot_dimension_numbers<[1], [0], [0], [1], [0, 0, 1, 1], [], []>} : vector<4x128xbf16>, vector<128x128xbf16>, vector<4x128xf32> -> vector<4x128xf32>
    %c0_19 = arith.constant 0 : index
    %c0_20 = arith.constant 0 : index
    %35 = vector.load %arg8[%c0_19, %c0_20] : memref<1x128xf32, #tpu.memory_space<vmem>>, vector<1x128xf32>
    %36 = vector.broadcast %35 : vector<1x128xf32> to vector<4x128xf32>
    %37 = arith.addf %34, %36 : vector<4x128xf32>
    %38 = arith.addf %15, %37 : vector<4x128xf32>
    %cst_21 = arith.constant 0.000000e+00 : f32
    %39 = vector.broadcast %cst_21 : f32 to vector<4x128xf32>
    %40 = arith.maximumf %38, %39 : vector<4x128xf32>
    %41 = arith.truncf %40 : vector<4x128xf32> to vector<4x128xbf16>
    %cst_22 = arith.constant 0.000000e+00 : bf16
    %42 = vector.broadcast %cst_22 : bf16 to vector<1x128xbf16>
    %43 = tpu.concatenate %42, %41, %42 in 0 : vector<1x128xbf16>, vector<4x128xbf16>, vector<1x128xbf16> -> vector<6x128xbf16>
    %44 = vector.extract_strided_slice %43 {offsets = [0, 0], sizes = [4, 128], strides = [1, 1]} : vector<6x128xbf16> to vector<4x128xbf16>
    %45 = vector.extract_strided_slice %43 {offsets = [1, 0], sizes = [4, 128], strides = [1, 1]} : vector<6x128xbf16> to vector<4x128xbf16>
    %46 = vector.extract_strided_slice %43 {offsets = [2, 0], sizes = [4, 128], strides = [1, 1]} : vector<6x128xbf16> to vector<4x128xbf16>
    %47 = tpu.concatenate %44, %45, %46 in 1 : vector<4x128xbf16>, vector<4x128xbf16>, vector<4x128xbf16> -> vector<4x384xbf16>
    %c0_23 = arith.constant 0 : index
    %c0_24 = arith.constant 0 : index
    %48 = vector.load %arg9[%c0_23, %c0_24] : memref<384x128xbf16, #tpu.memory_space<vmem>>, vector<384x128xbf16>
    %cst_25 = arith.constant dense<0.000000e+00> : vector<4x128xf32>
    %49 = tpu.matmul %47, %48, %cst_25 {dimension_numbers = #tpu.dot_dimension_numbers<[1], [0], [0], [1], [0, 0, 1, 1], [], []>} : vector<4x384xbf16>, vector<384x128xbf16>, vector<4x128xf32> -> vector<4x128xf32>
    %c0_26 = arith.constant 0 : index
    %c0_27 = arith.constant 0 : index
    %50 = vector.load %arg10[%c0_26, %c0_27] : memref<1x128xf32, #tpu.memory_space<vmem>>, vector<1x128xf32>
    %51 = vector.broadcast %50 : vector<1x128xf32> to vector<4x128xf32>
    %52 = arith.addf %49, %51 : vector<4x128xf32>
    %cst_28 = arith.constant 0.000000e+00 : f32
    %53 = vector.broadcast %cst_28 : f32 to vector<4x128xf32>
    %54 = arith.maximumf %52, %53 : vector<4x128xf32>
    %55 = arith.truncf %54 : vector<4x128xf32> to vector<4x128xbf16>
    %c0_29 = arith.constant 0 : index
    %c0_30 = arith.constant 0 : index
    %56 = vector.load %arg11[%c0_29, %c0_30] : memref<128x128xbf16, #tpu.memory_space<vmem>>, vector<128x128xbf16>
    %cst_31 = arith.constant dense<0.000000e+00> : vector<4x128xf32>
    %57 = tpu.matmul %55, %56, %cst_31 {dimension_numbers = #tpu.dot_dimension_numbers<[1], [0], [0], [1], [0, 0, 1, 1], [], []>} : vector<4x128xbf16>, vector<128x128xbf16>, vector<4x128xf32> -> vector<4x128xf32>
    %c0_32 = arith.constant 0 : index
    %c0_33 = arith.constant 0 : index
    %58 = vector.load %arg12[%c0_32, %c0_33] : memref<1x128xf32, #tpu.memory_space<vmem>>, vector<1x128xf32>
    %59 = vector.broadcast %58 : vector<1x128xf32> to vector<4x128xf32>
    %60 = arith.addf %57, %59 : vector<4x128xf32>
    %61 = arith.addf %38, %60 : vector<4x128xf32>
    %62 = arith.truncf %61 : vector<4x128xf32> to vector<4x128xbf16>
    %cst_34 = arith.constant 0.000000e+00 : bf16
    %63 = vector.broadcast %cst_34 : bf16 to vector<1x128xbf16>
    %64 = tpu.concatenate %63, %62, %63 in 0 : vector<1x128xbf16>, vector<4x128xbf16>, vector<1x128xbf16> -> vector<6x128xbf16>
    %65 = vector.extract_strided_slice %64 {offsets = [0, 0], sizes = [4, 128], strides = [1, 1]} : vector<6x128xbf16> to vector<4x128xbf16>
    %66 = vector.extract_strided_slice %64 {offsets = [1, 0], sizes = [4, 128], strides = [1, 1]} : vector<6x128xbf16> to vector<4x128xbf16>
    %67 = vector.extract_strided_slice %64 {offsets = [2, 0], sizes = [4, 128], strides = [1, 1]} : vector<6x128xbf16> to vector<4x128xbf16>
    %68 = tpu.concatenate %65, %66, %67 in 1 : vector<4x128xbf16>, vector<4x128xbf16>, vector<4x128xbf16> -> vector<4x384xbf16>
    %c0_35 = arith.constant 0 : index
    %c0_36 = arith.constant 0 : index
    %69 = vector.load %arg13[%c0_35, %c0_36] : memref<384x256xbf16, #tpu.memory_space<vmem>>, vector<384x256xbf16>
    %cst_37 = arith.constant dense<0.000000e+00> : vector<4x256xf32>
    %70 = tpu.matmul %68, %69, %cst_37 {dimension_numbers = #tpu.dot_dimension_numbers<[1], [0], [0], [1], [0, 0, 1, 1], [], []>} : vector<4x384xbf16>, vector<384x256xbf16>, vector<4x256xf32> -> vector<4x256xf32>
    %c0_38 = arith.constant 0 : index
    %c0_39 = arith.constant 0 : index
    %71 = vector.load %arg14[%c0_38, %c0_39] : memref<1x256xf32, #tpu.memory_space<vmem>>, vector<1x256xf32>
    %72 = vector.broadcast %71 : vector<1x256xf32> to vector<4x256xf32>
    %73 = arith.addf %70, %72 : vector<4x256xf32>
    %74 = tpu.iota {dimensions = array<i32: 0>} : vector<8x4xi32>
    %75 = tpu.iota {dimensions = array<i32: 1>} : vector<8x4xi32>
    %c2_i32 = arith.constant 2 : i32
    %76 = vector.broadcast %c2_i32 : i32 to vector<8x4xi32>
    %77 = arith.muli %76, %75 : vector<8x4xi32>
    %78 = arith.cmpi eq, %74, %77 : vector<8x4xi32>
    %79 = arith.extui %78 : vector<8x4xi1> to vector<8x4xi32>
    %80 = arith.sitofp %79 : vector<8x4xi32> to vector<8x4xf32>
    %c2_i32_40 = arith.constant 2 : i32
    %81 = vector.broadcast %c2_i32_40 : i32 to vector<8x4xi32>
    %82 = arith.muli %81, %75 : vector<8x4xi32>
    %c1_i32 = arith.constant 1 : i32
    %83 = vector.broadcast %c1_i32 : i32 to vector<8x4xi32>
    %84 = arith.addi %82, %83 : vector<8x4xi32>
    %85 = arith.cmpi eq, %74, %84 : vector<8x4xi32>
    %86 = arith.extui %85 : vector<8x4xi1> to vector<8x4xi32>
    %87 = arith.sitofp %86 : vector<8x4xi32> to vector<8x4xf32>
    %88 = vector.extract_strided_slice %73 {offsets = [0, 0], sizes = [4, 128], strides = [1, 1]} : vector<4x256xf32> to vector<4x128xf32>
    %cst_41 = arith.constant dense<0.000000e+00> : vector<8x128xf32>
    %89 = tpu.matmul %80, %88, %cst_41 {dimension_numbers = #tpu.dot_dimension_numbers<[1], [0], [0], [1], [0, 0, 1, 1], [], []>} : vector<8x4xf32>, vector<4x128xf32>, vector<8x128xf32> -> vector<8x128xf32>
    %90 = vector.extract_strided_slice %73 {offsets = [0, 128], sizes = [4, 128], strides = [1, 1]} : vector<4x256xf32> to vector<4x128xf32>
    %cst_42 = arith.constant dense<0.000000e+00> : vector<8x128xf32>
    %91 = tpu.matmul %87, %90, %cst_42 {dimension_numbers = #tpu.dot_dimension_numbers<[1], [0], [0], [1], [0, 0, 1, 1], [], []>} : vector<8x4xf32>, vector<4x128xf32>, vector<8x128xf32> -> vector<8x128xf32>
    %92 = arith.addf %89, %91 : vector<8x128xf32>
    %93 = arith.truncf %92 : vector<8x128xf32> to vector<8x128xbf16>
    %cst_43 = arith.constant 0.000000e+00 : bf16
    %94 = vector.broadcast %cst_43 : bf16 to vector<1x128xbf16>
    %95 = tpu.concatenate %94, %93, %94 in 0 : vector<1x128xbf16>, vector<8x128xbf16>, vector<1x128xbf16> -> vector<10x128xbf16>
    %96 = vector.extract_strided_slice %95 {offsets = [0, 0], sizes = [8, 128], strides = [1, 1]} : vector<10x128xbf16> to vector<8x128xbf16>
    %97 = vector.extract_strided_slice %95 {offsets = [1, 0], sizes = [8, 128], strides = [1, 1]} : vector<10x128xbf16> to vector<8x128xbf16>
    %98 = vector.extract_strided_slice %95 {offsets = [2, 0], sizes = [8, 128], strides = [1, 1]} : vector<10x128xbf16> to vector<8x128xbf16>
    %99 = tpu.concatenate %96, %97, %98 in 1 : vector<8x128xbf16>, vector<8x128xbf16>, vector<8x128xbf16> -> vector<8x384xbf16>
    %c0_44 = arith.constant 0 : index
    %c0_45 = arith.constant 0 : index
    %100 = vector.load %arg15[%c0_44, %c0_45] : memref<384x128xbf16, #tpu.memory_space<vmem>>, vector<384x128xbf16>
    %cst_46 = arith.constant dense<0.000000e+00> : vector<8x128xf32>
    %101 = tpu.matmul %99, %100, %cst_46 {dimension_numbers = #tpu.dot_dimension_numbers<[1], [0], [0], [1], [0, 0, 1, 1], [], []>} : vector<8x384xbf16>, vector<384x128xbf16>, vector<8x128xf32> -> vector<8x128xf32>
    %c0_47 = arith.constant 0 : index
    %c0_48 = arith.constant 0 : index
    %102 = vector.load %arg16[%c0_47, %c0_48] : memref<1x128xf32, #tpu.memory_space<vmem>>, vector<1x128xf32>
    %103 = vector.broadcast %102 : vector<1x128xf32> to vector<8x128xf32>
    %104 = arith.addf %101, %103 : vector<8x128xf32>
    %cst_49 = arith.constant 0.000000e+00 : f32
    %105 = vector.broadcast %cst_49 : f32 to vector<8x128xf32>
    %106 = arith.maximumf %104, %105 : vector<8x128xf32>
    %107 = arith.truncf %106 : vector<8x128xf32> to vector<8x128xbf16>
    %cst_50 = arith.constant 0.000000e+00 : bf16
    %108 = vector.broadcast %cst_50 : bf16 to vector<1x128xbf16>
    %109 = tpu.concatenate %108, %107, %108 in 0 : vector<1x128xbf16>, vector<8x128xbf16>, vector<1x128xbf16> -> vector<10x128xbf16>
    %110 = vector.extract_strided_slice %109 {offsets = [0, 0], sizes = [8, 128], strides = [1, 1]} : vector<10x128xbf16> to vector<8x128xbf16>
    %111 = vector.extract_strided_slice %109 {offsets = [1, 0], sizes = [8, 128], strides = [1, 1]} : vector<10x128xbf16> to vector<8x128xbf16>
    %112 = vector.extract_strided_slice %109 {offsets = [2, 0], sizes = [8, 128], strides = [1, 1]} : vector<10x128xbf16> to vector<8x128xbf16>
    %113 = tpu.concatenate %110, %111, %112 in 1 : vector<8x128xbf16>, vector<8x128xbf16>, vector<8x128xbf16> -> vector<8x384xbf16>
    %c0_51 = arith.constant 0 : index
    %c0_52 = arith.constant 0 : index
    %114 = vector.load %arg17[%c0_51, %c0_52] : memref<384x128xbf16, #tpu.memory_space<vmem>>, vector<384x128xbf16>
    %cst_53 = arith.constant dense<0.000000e+00> : vector<8x128xf32>
    %115 = tpu.matmul %113, %114, %cst_53 {dimension_numbers = #tpu.dot_dimension_numbers<[1], [0], [0], [1], [0, 0, 1, 1], [], []>} : vector<8x384xbf16>, vector<384x128xbf16>, vector<8x128xf32> -> vector<8x128xf32>
    %c0_54 = arith.constant 0 : index
    %c0_55 = arith.constant 0 : index
    %116 = vector.load %arg18[%c0_54, %c0_55] : memref<1x128xf32, #tpu.memory_space<vmem>>, vector<1x128xf32>
    %117 = vector.broadcast %116 : vector<1x128xf32> to vector<8x128xf32>
    %118 = arith.addf %115, %117 : vector<8x128xf32>
    %c0_56 = arith.constant 0 : index
    %c0_57 = arith.constant 0 : index
    %c0_58 = arith.constant 0 : index
    %119 = vector.load %arg2[%c0_56, %c0_57, %c0_58] : memref<1x8x128xbf16, #tpu.memory_space<vmem>>, vector<1x8x128xbf16>
    %120 = vector.shape_cast %119 : vector<1x8x128xbf16> to vector<8x128xbf16>
    %121 = arith.extf %120 : vector<8x128xbf16> to vector<8x128xf32>
    %122 = tpu.concatenate %118, %121 in 1 : vector<8x128xf32>, vector<8x128xf32> -> vector<8x256xf32>
    %123 = arith.truncf %122 : vector<8x256xf32> to vector<8x256xbf16>
    %c0_59 = arith.constant 0 : index
    %c0_60 = arith.constant 0 : index
    %124 = vector.load %arg19[%c0_59, %c0_60] : memref<256x128xbf16, #tpu.memory_space<vmem>>, vector<256x128xbf16>
    %cst_61 = arith.constant dense<0.000000e+00> : vector<8x128xf32>
    %125 = tpu.matmul %123, %124, %cst_61 {dimension_numbers = #tpu.dot_dimension_numbers<[1], [0], [0], [1], [0, 0, 1, 1], [], []>} : vector<8x256xbf16>, vector<256x128xbf16>, vector<8x128xf32> -> vector<8x128xf32>
    %c0_62 = arith.constant 0 : index
    %c0_63 = arith.constant 0 : index
    %126 = vector.load %arg20[%c0_62, %c0_63] : memref<1x128xf32, #tpu.memory_space<vmem>>, vector<1x128xf32>
    %127 = vector.broadcast %126 : vector<1x128xf32> to vector<8x128xf32>
    %128 = arith.addf %125, %127 : vector<8x128xf32>
    %c0_64 = arith.constant 0 : index
    %c0_65 = arith.constant 0 : index
    %c0_66 = arith.constant 0 : index
    %129 = vector.load %arg21[%c0_64, %c0_65, %c0_66] : memref<1x8x128xf32, #tpu.memory_space<vmem>>, vector<1x8x128xf32>
    %130 = vector.shape_cast %129 : vector<1x8x128xf32> to vector<8x128xf32>
    %131 = vector.shape_cast %128 : vector<8x128xf32> to vector<1x8x128xf32>
    tpu.vector_store %arg21[%c0_64, %c0_65, %c0_66], %131 {strides = array<i32>} : memref<1x8x128xf32, #tpu.memory_space<vmem>>, vector<1x8x128xf32>,
    return
  }
  func.func @transform_0(%arg0: i32) -> (i32, i32, i32) {
    %c0_i32 = arith.constant 0 : i32
    %c0_i32_0 = arith.constant 0 : i32
    %c0_i32_1 = arith.constant 0 : i32
    return %arg0, %c0_i32, %c0_i32_0 : i32, i32, i32
  }
  func.func @transform_1(%arg0: i32) -> (i32, i32, i32) {
    %c0_i32 = arith.constant 0 : i32
    %c0_i32_0 = arith.constant 0 : i32
    %c0_i32_1 = arith.constant 0 : i32
    return %arg0, %c0_i32, %c0_i32_0 : i32, i32, i32
  }
  func.func @transform_2(%arg0: i32) -> (i32, i32) {
    %c0_i32 = arith.constant 0 : i32
    %c0_i32_0 = arith.constant 0 : i32
    %c0_i32_1 = arith.constant 0 : i32
    return %c0_i32, %c0_i32_0 : i32, i32
  }
  func.func @transform_3(%arg0: i32) -> (i32, i32) {
    %c0_i32 = arith.constant 0 : i32
    %c0_i32_0 = arith.constant 0 : i32
    %c0_i32_1 = arith.constant 0 : i32
    return %c0_i32, %c0_i32_0 : i32, i32
  }
  func.func @transform_4(%arg0: i32) -> (i32, i32) {
    %c0_i32 = arith.constant 0 : i32
    %c0_i32_0 = arith.constant 0 : i32
    %c0_i32_1 = arith.constant 0 : i32
    return %c0_i32, %c0_i32_0 : i32, i32
  }
  func.func @transform_5(%arg0: i32) -> (i32, i32) {
    %c0_i32 = arith.constant 0 : i32
    %c0_i32_0 = arith.constant 0 : i32
    %c0_i32_1 = arith.constant 0 : i32
    return %c0_i32, %c0_i32_0 : i32, i32
  }
  func.func @transform_6(%arg0: i32) -> (i32, i32) {
    %c0_i32 = arith.constant 0 : i32
    %c0_i32_0 = arith.constant 0 : i32
    %c0_i32_1 = arith.constant 0 : i32
    return %c0_i32, %c0_i32_0 : i32, i32
  }
  func.func @transform_7(%arg0: i32) -> (i32, i32) {
    %c0_i32 = arith.constant 0 : i32
    %c0_i32_0 = arith.constant 0 : i32
    %c0_i32_1 = arith.constant 0 : i32
    return %c0_i32, %c0_i32_0 : i32, i32
  }
  func.func @transform_8(%arg0: i32) -> (i32, i32) {
    %c0_i32 = arith.constant 0 : i32
    %c0_i32_0 = arith.constant 0 : i32
    %c0_i32_1 = arith.constant 0 : i32
    return %c0_i32, %c0_i32_0 : i32, i32
  }
  func.func @transform_9(%arg0: i32) -> (i32, i32) {
    %c0_i32 = arith.constant 0 : i32
    %c0_i32_0 = arith.constant 0 : i32
    %c0_i32_1 = arith.constant 0 : i32
    return %c0_i32, %c0_i32_0 : i32, i32
  }
  func.func @transform_10(%arg0: i32) -> (i32, i32) {
    %c0_i32 = arith.constant 0 : i32
    %c0_i32_0 = arith.constant 0 : i32
    %c0_i32_1 = arith.constant 0 : i32
    return %c0_i32, %c0_i32_0 : i32, i32
  }
  func.func @transform_11(%arg0: i32) -> (i32, i32) {
    %c0_i32 = arith.constant 0 : i32
    %c0_i32_0 = arith.constant 0 : i32
    %c0_i32_1 = arith.constant 0 : i32
    return %c0_i32, %c0_i32_0 : i32, i32
  }
  func.func @transform_12(%arg0: i32) -> (i32, i32) {
    %c0_i32 = arith.constant 0 : i32
    %c0_i32_0 = arith.constant 0 : i32
    %c0_i32_1 = arith.constant 0 : i32
    return %c0_i32, %c0_i32_0 : i32, i32
  }
  func.func @transform_13(%arg0: i32) -> (i32, i32) {
    %c0_i32 = arith.constant 0 : i32
    %c0_i32_0 = arith.constant 0 : i32
    %c0_i32_1 = arith.constant 0 : i32
    return %c0_i32, %c0_i32_0 : i32, i32
  }
  func.func @transform_14(%arg0: i32) -> (i32, i32) {
    %c0_i32 = arith.constant 0 : i32
    %c0_i32_0 = arith.constant 0 : i32
    %c0_i32_1 = arith.constant 0 : i32
    return %c0_i32, %c0_i32_0 : i32, i32
  }
  func.func @transform_15(%arg0: i32) -> (i32, i32) {
    %c0_i32 = arith.constant 0 : i32
    %c0_i32_0 = arith.constant 0 : i32
    %c0_i32_1 = arith.constant 0 : i32
    return %c0_i32, %c0_i32_0 : i32, i32
  }
  func.func @transform_16(%arg0: i32) -> (i32, i32) {
    %c0_i32 = arith.constant 0 : i32
    %c0_i32_0 = arith.constant 0 : i32
    %c0_i32_1 = arith.constant 0 : i32
    return %c0_i32, %c0_i32_0 : i32, i32
  }
  func.func @transform_17(%arg0: i32) -> (i32, i32) {
    %c0_i32 = arith.constant 0 : i32
    %c0_i32_0 = arith.constant 0 : i32
    %c0_i32_1 = arith.constant 0 : i32
    return %c0_i32, %c0_i32_0 : i32, i32
  }
  func.func @transform_18(%arg0: i32) -> (i32, i32) {
    %c0_i32 = arith.constant 0 : i32
    %c0_i32_0 = arith.constant 0 : i32
    %c0_i32_1 = arith.constant 0 : i32
    return %c0_i32, %c0_i32_0 : i32, i32
  }
  func.func @transform_19(%arg0: i32) -> (i32, i32) {
    %c0_i32 = arith.constant 0 : i32
    %c0_i32_0 = arith.constant 0 : i32
    %c0_i32_1 = arith.constant 0 : i32
    return %c0_i32, %c0_i32_0 : i32, i32
  }
  func.func @transform_20(%arg0: i32) -> (i32, i32, i32) {
    %c0_i32 = arith.constant 0 : i32
    %c0_i32_0 = arith.constant 0 : i32
    %c0_i32_1 = arith.constant 0 : i32
    return %arg0, %c0_i32, %c0_i32_0 : i32, i32, i32
  }
}

module attributes {stable_mosaic.version = 11 : i64} {
  func.func @_decode_kernel(%arg0: i32, %arg1: memref<1x4x128xf32, #tpu.memory_space<vmem>>, %arg2: memref<1x8x128xf32, #tpu.memory_space<vmem>>, %arg3: memref<384x256xbf16, #tpu.memory_space<vmem>>, %arg4: memref<1x256xf32, #tpu.memory_space<vmem>>, %arg5: memref<768x128xbf16, #tpu.memory_space<vmem>>, %arg6: memref<1x128xf32, #tpu.memory_space<vmem>>, %arg7: memref<384x128xbf16, #tpu.memory_space<vmem>>, %arg8: memref<1x128xf32, #tpu.memory_space<vmem>>, %arg9: memref<128x128xbf16, #tpu.memory_space<vmem>>, %arg10: memref<1x128xf32, #tpu.memory_space<vmem>>, %arg11: memref<384x128xbf16, #tpu.memory_space<vmem>>, %arg12: memref<1x128xf32, #tpu.memory_space<vmem>>, %arg13: memref<128x128xbf16, #tpu.memory_space<vmem>>, %arg14: memref<1x128xf32, #tpu.memory_space<vmem>>, %arg15: memref<384x256xbf16, #tpu.memory_space<vmem>>, %arg16: memref<1x256xf32, #tpu.memory_space<vmem>>, %arg17: memref<384x128xbf16, #tpu.memory_space<vmem>>, %arg18: memref<1x128xf32, #tpu.memory_space<vmem>>, %arg19: memref<384x313xbf16, #tpu.memory_space<vmem>>, %arg20: memref<1x313xf32, #tpu.memory_space<vmem>>, %arg21: memref<1x16x313xf32, #tpu.memory_space<vmem>>) attributes {dimension_semantics = [#tpu.dimension_semantics<parallel>], iteration_bounds = array<i64: 2>, scalar_prefetch = 0 : i64, scratch_operands = 0 : i64, tpu.core_type = #tpu.core_type<tc>, window_params = [{transform_indices = @transform_0, window_bounds = array<i64: 1, 4, 128>}, {transform_indices = @transform_1, window_bounds = array<i64: 1, 8, 128>}, {pipeline_mode = #tpu.pipeline_mode<synchronous>, transform_indices = @transform_2, window_bounds = array<i64: 384, 256>}, {pipeline_mode = #tpu.pipeline_mode<synchronous>, transform_indices = @transform_3, window_bounds = array<i64: 1, 256>}, {pipeline_mode = #tpu.pipeline_mode<synchronous>, transform_indices = @transform_4, window_bounds = array<i64: 768, 128>}, {pipeline_mode = #tpu.pipeline_mode<synchronous>, transform_indices = @transform_5, window_bounds = array<i64: 1, 128>}, {pipeline_mode = #tpu.pipeline_mode<synchronous>, transform_indices = @transform_6, window_bounds = array<i64: 384, 128>}, {pipeline_mode = #tpu.pipeline_mode<synchronous>, transform_indices = @transform_7, window_bounds = array<i64: 1, 128>}, {pipeline_mode = #tpu.pipeline_mode<synchronous>, transform_indices = @transform_8, window_bounds = array<i64: 128, 128>}, {pipeline_mode = #tpu.pipeline_mode<synchronous>, transform_indices = @transform_9, window_bounds = array<i64: 1, 128>}, {pipeline_mode = #tpu.pipeline_mode<synchronous>, transform_indices = @transform_10, window_bounds = array<i64: 384, 128>}, {pipeline_mode = #tpu.pipeline_mode<synchronous>, transform_indices = @transform_11, window_bounds = array<i64: 1, 128>}, {pipeline_mode = #tpu.pipeline_mode<synchronous>, transform_indices = @transform_12, window_bounds = array<i64: 128, 128>}, {pipeline_mode = #tpu.pipeline_mode<synchronous>, transform_indices = @transform_13, window_bounds = array<i64: 1, 128>}, {pipeline_mode = #tpu.pipeline_mode<synchronous>, transform_indices = @transform_14, window_bounds = array<i64: 384, 256>}, {pipeline_mode = #tpu.pipeline_mode<synchronous>, transform_indices = @transform_15, window_bounds = array<i64: 1, 256>}, {pipeline_mode = #tpu.pipeline_mode<synchronous>, transform_indices = @transform_16, window_bounds = array<i64: 384, 128>}, {pipeline_mode = #tpu.pipeline_mode<synchronous>, transform_indices = @transform_17, window_bounds = array<i64: 1, 128>}, {pipeline_mode = #tpu.pipeline_mode<synchronous>, transform_indices = @transform_18, window_bounds = array<i64: 384, 313>}, {pipeline_mode = #tpu.pipeline_mode<synchronous>, transform_indices = @transform_19, window_bounds = array<i64: 1, 313>}, {transform_indices = @transform_20, window_bounds = array<i64: 1, 16, 313>}]} {
    %c0 = arith.constant 0 : index
    %c0_0 = arith.constant 0 : index
    %c0_1 = arith.constant 0 : index
    %0 = vector.load %arg1[%c0, %c0_0, %c0_1] : memref<1x4x128xf32, #tpu.memory_space<vmem>>, vector<1x4x128xf32>
    %1 = vector.shape_cast %0 : vector<1x4x128xf32> to vector<4x128xf32>
    %2 = arith.truncf %1 : vector<4x128xf32> to vector<4x128xbf16>
    %cst = arith.constant 0.000000e+00 : bf16
    %3 = vector.broadcast %cst : bf16 to vector<1x128xbf16>
    %4 = tpu.concatenate %3, %2, %3 in 0 : vector<1x128xbf16>, vector<4x128xbf16>, vector<1x128xbf16> -> vector<6x128xbf16>
    %5 = vector.extract_strided_slice %4 {offsets = [0, 0], sizes = [4, 128], strides = [1, 1]} : vector<6x128xbf16> to vector<4x128xbf16>
    %6 = vector.extract_strided_slice %4 {offsets = [1, 0], sizes = [4, 128], strides = [1, 1]} : vector<6x128xbf16> to vector<4x128xbf16>
    %7 = vector.extract_strided_slice %4 {offsets = [2, 0], sizes = [4, 128], strides = [1, 1]} : vector<6x128xbf16> to vector<4x128xbf16>
    %8 = tpu.concatenate %5, %6, %7 in 1 : vector<4x128xbf16>, vector<4x128xbf16>, vector<4x128xbf16> -> vector<4x384xbf16>
    %c0_2 = arith.constant 0 : index
    %c0_3 = arith.constant 0 : index
    %9 = vector.load %arg3[%c0_2, %c0_3] : memref<384x256xbf16, #tpu.memory_space<vmem>>, vector<384x256xbf16>
    %cst_4 = arith.constant dense<0.000000e+00> : vector<4x256xf32>
    %10 = tpu.matmul %8, %9, %cst_4 {dimension_numbers = #tpu.dot_dimension_numbers<[1], [0], [0], [1], [0, 0, 1, 1], [], []>} : vector<4x384xbf16>, vector<384x256xbf16>, vector<4x256xf32> -> vector<4x256xf32>
    %c0_5 = arith.constant 0 : index
    %c0_6 = arith.constant 0 : index
    %11 = vector.load %arg4[%c0_5, %c0_6] : memref<1x256xf32, #tpu.memory_space<vmem>>, vector<1x256xf32>
    %12 = vector.broadcast %11 : vector<1x256xf32> to vector<4x256xf32>
    %13 = arith.addf %10, %12 : vector<4x256xf32>
    %14 = tpu.iota {dimensions = array<i32: 0>} : vector<8x4xi32>
    %15 = tpu.iota {dimensions = array<i32: 1>} : vector<8x4xi32>
    %c2_i32 = arith.constant 2 : i32
    %16 = vector.broadcast %c2_i32 : i32 to vector<8x4xi32>
    %17 = arith.muli %16, %15 : vector<8x4xi32>
    %18 = arith.cmpi eq, %14, %17 : vector<8x4xi32>
    %19 = arith.extui %18 : vector<8x4xi1> to vector<8x4xi32>
    %20 = arith.sitofp %19 : vector<8x4xi32> to vector<8x4xf32>
    %c2_i32_7 = arith.constant 2 : i32
    %21 = vector.broadcast %c2_i32_7 : i32 to vector<8x4xi32>
    %22 = arith.muli %21, %15 : vector<8x4xi32>
    %c1_i32 = arith.constant 1 : i32
    %23 = vector.broadcast %c1_i32 : i32 to vector<8x4xi32>
    %24 = arith.addi %22, %23 : vector<8x4xi32>
    %25 = arith.cmpi eq, %14, %24 : vector<8x4xi32>
    %26 = arith.extui %25 : vector<8x4xi1> to vector<8x4xi32>
    %27 = arith.sitofp %26 : vector<8x4xi32> to vector<8x4xf32>
    %28 = vector.extract_strided_slice %13 {offsets = [0, 0], sizes = [4, 128], strides = [1, 1]} : vector<4x256xf32> to vector<4x128xf32>
    %cst_8 = arith.constant dense<0.000000e+00> : vector<8x128xf32>
    %29 = tpu.matmul %20, %28, %cst_8 {dimension_numbers = #tpu.dot_dimension_numbers<[1], [0], [0], [1], [0, 0, 1, 1], [], []>} : vector<8x4xf32>, vector<4x128xf32>, vector<8x128xf32> -> vector<8x128xf32>
    %30 = vector.extract_strided_slice %13 {offsets = [0, 128], sizes = [4, 128], strides = [1, 1]} : vector<4x256xf32> to vector<4x128xf32>
    %cst_9 = arith.constant dense<0.000000e+00> : vector<8x128xf32>
    %31 = tpu.matmul %27, %30, %cst_9 {dimension_numbers = #tpu.dot_dimension_numbers<[1], [0], [0], [1], [0, 0, 1, 1], [], []>} : vector<8x4xf32>, vector<4x128xf32>, vector<8x128xf32> -> vector<8x128xf32>
    %32 = arith.addf %29, %31 : vector<8x128xf32>
    %c0_10 = arith.constant 0 : index
    %c0_11 = arith.constant 0 : index
    %c0_12 = arith.constant 0 : index
    %33 = vector.load %arg2[%c0_10, %c0_11, %c0_12] : memref<1x8x128xf32, #tpu.memory_space<vmem>>, vector<1x8x128xf32>
    %34 = vector.shape_cast %33 : vector<1x8x128xf32> to vector<8x128xf32>
    %35 = tpu.concatenate %32, %34 in 1 : vector<8x128xf32>, vector<8x128xf32> -> vector<8x256xf32>
    %36 = arith.truncf %35 : vector<8x256xf32> to vector<8x256xbf16>
    %cst_13 = arith.constant 0.000000e+00 : bf16
    %37 = vector.broadcast %cst_13 : bf16 to vector<1x256xbf16>
    %38 = tpu.concatenate %37, %36, %37 in 0 : vector<1x256xbf16>, vector<8x256xbf16>, vector<1x256xbf16> -> vector<10x256xbf16>
    %39 = vector.extract_strided_slice %38 {offsets = [0, 0], sizes = [8, 256], strides = [1, 1]} : vector<10x256xbf16> to vector<8x256xbf16>
    %40 = vector.extract_strided_slice %38 {offsets = [1, 0], sizes = [8, 256], strides = [1, 1]} : vector<10x256xbf16> to vector<8x256xbf16>
    %41 = vector.extract_strided_slice %38 {offsets = [2, 0], sizes = [8, 256], strides = [1, 1]} : vector<10x256xbf16> to vector<8x256xbf16>
    %42 = tpu.concatenate %39, %40, %41 in 1 : vector<8x256xbf16>, vector<8x256xbf16>, vector<8x256xbf16> -> vector<8x768xbf16>
    %c0_14 = arith.constant 0 : index
    %c0_15 = arith.constant 0 : index
    %43 = vector.load %arg5[%c0_14, %c0_15] : memref<768x128xbf16, #tpu.memory_space<vmem>>, vector<768x128xbf16>
    %cst_16 = arith.constant dense<0.000000e+00> : vector<8x128xf32>
    %44 = tpu.matmul %42, %43, %cst_16 {dimension_numbers = #tpu.dot_dimension_numbers<[1], [0], [0], [1], [0, 0, 1, 1], [], []>} : vector<8x768xbf16>, vector<768x128xbf16>, vector<8x128xf32> -> vector<8x128xf32>
    %c0_17 = arith.constant 0 : index
    %c0_18 = arith.constant 0 : index
    %45 = vector.load %arg6[%c0_17, %c0_18] : memref<1x128xf32, #tpu.memory_space<vmem>>, vector<1x128xf32>
    %46 = vector.broadcast %45 : vector<1x128xf32> to vector<8x128xf32>
    %47 = arith.addf %44, %46 : vector<8x128xf32>
    %cst_19 = arith.constant 0.000000e+00 : f32
    %48 = vector.broadcast %cst_19 : f32 to vector<8x128xf32>
    %49 = arith.maximumf %47, %48 : vector<8x128xf32>
    %cst_20 = arith.constant 0.000000e+00 : f32
    %50 = vector.broadcast %cst_20 : f32 to vector<8x128xf32>
    %51 = arith.maximumf %49, %50 : vector<8x128xf32>
    %52 = arith.truncf %51 : vector<8x128xf32> to vector<8x128xbf16>
    %cst_21 = arith.constant 0.000000e+00 : bf16
    %53 = vector.broadcast %cst_21 : bf16 to vector<3x128xbf16>
    %54 = tpu.concatenate %53, %52, %53 in 0 : vector<3x128xbf16>, vector<8x128xbf16>, vector<3x128xbf16> -> vector<14x128xbf16>
    %55 = vector.extract_strided_slice %54 {offsets = [0, 0], sizes = [8, 128], strides = [1, 1]} : vector<14x128xbf16> to vector<8x128xbf16>
    %56 = vector.extract_strided_slice %54 {offsets = [3, 0], sizes = [8, 128], strides = [1, 1]} : vector<14x128xbf16> to vector<8x128xbf16>
    %57 = vector.extract_strided_slice %54 {offsets = [6, 0], sizes = [8, 128], strides = [1, 1]} : vector<14x128xbf16> to vector<8x128xbf16>
    %58 = tpu.concatenate %55, %56, %57 in 1 : vector<8x128xbf16>, vector<8x128xbf16>, vector<8x128xbf16> -> vector<8x384xbf16>
    %c0_22 = arith.constant 0 : index
    %c0_23 = arith.constant 0 : index
    %59 = vector.load %arg7[%c0_22, %c0_23] : memref<384x128xbf16, #tpu.memory_space<vmem>>, vector<384x128xbf16>
    %cst_24 = arith.constant dense<0.000000e+00> : vector<8x128xf32>
    %60 = tpu.matmul %58, %59, %cst_24 {dimension_numbers = #tpu.dot_dimension_numbers<[1], [0], [0], [1], [0, 0, 1, 1], [], []>} : vector<8x384xbf16>, vector<384x128xbf16>, vector<8x128xf32> -> vector<8x128xf32>
    %c0_25 = arith.constant 0 : index
    %c0_26 = arith.constant 0 : index
    %61 = vector.load %arg8[%c0_25, %c0_26] : memref<1x128xf32, #tpu.memory_space<vmem>>, vector<1x128xf32>
    %62 = vector.broadcast %61 : vector<1x128xf32> to vector<8x128xf32>
    %63 = arith.addf %60, %62 : vector<8x128xf32>
    %cst_27 = arith.constant 0.000000e+00 : f32
    %64 = vector.broadcast %cst_27 : f32 to vector<8x128xf32>
    %65 = arith.maximumf %63, %64 : vector<8x128xf32>
    %66 = arith.truncf %65 : vector<8x128xf32> to vector<8x128xbf16>
    %c0_28 = arith.constant 0 : index
    %c0_29 = arith.constant 0 : index
    %67 = vector.load %arg9[%c0_28, %c0_29] : memref<128x128xbf16, #tpu.memory_space<vmem>>, vector<128x128xbf16>
    %cst_30 = arith.constant dense<0.000000e+00> : vector<8x128xf32>
    %68 = tpu.matmul %66, %67, %cst_30 {dimension_numbers = #tpu.dot_dimension_numbers<[1], [0], [0], [1], [0, 0, 1, 1], [], []>} : vector<8x128xbf16>, vector<128x128xbf16>, vector<8x128xf32> -> vector<8x128xf32>
    %c0_31 = arith.constant 0 : index
    %c0_32 = arith.constant 0 : index
    %69 = vector.load %arg10[%c0_31, %c0_32] : memref<1x128xf32, #tpu.memory_space<vmem>>, vector<1x128xf32>
    %70 = vector.broadcast %69 : vector<1x128xf32> to vector<8x128xf32>
    %71 = arith.addf %68, %70 : vector<8x128xf32>
    %72 = arith.addf %49, %71 : vector<8x128xf32>
    %cst_33 = arith.constant 0.000000e+00 : f32
    %73 = vector.broadcast %cst_33 : f32 to vector<8x128xf32>
    %74 = arith.maximumf %72, %73 : vector<8x128xf32>
    %75 = arith.truncf %74 : vector<8x128xf32> to vector<8x128xbf16>
    %cst_34 = arith.constant 0.000000e+00 : bf16
    %76 = vector.broadcast %cst_34 : bf16 to vector<1x128xbf16>
    %77 = tpu.concatenate %76, %75, %76 in 0 : vector<1x128xbf16>, vector<8x128xbf16>, vector<1x128xbf16> -> vector<10x128xbf16>
    %78 = vector.extract_strided_slice %77 {offsets = [0, 0], sizes = [8, 128], strides = [1, 1]} : vector<10x128xbf16> to vector<8x128xbf16>
    %79 = vector.extract_strided_slice %77 {offsets = [1, 0], sizes = [8, 128], strides = [1, 1]} : vector<10x128xbf16> to vector<8x128xbf16>
    %80 = vector.extract_strided_slice %77 {offsets = [2, 0], sizes = [8, 128], strides = [1, 1]} : vector<10x128xbf16> to vector<8x128xbf16>
    %81 = tpu.concatenate %78, %79, %80 in 1 : vector<8x128xbf16>, vector<8x128xbf16>, vector<8x128xbf16> -> vector<8x384xbf16>
    %c0_35 = arith.constant 0 : index
    %c0_36 = arith.constant 0 : index
    %82 = vector.load %arg11[%c0_35, %c0_36] : memref<384x128xbf16, #tpu.memory_space<vmem>>, vector<384x128xbf16>
    %cst_37 = arith.constant dense<0.000000e+00> : vector<8x128xf32>
    %83 = tpu.matmul %81, %82, %cst_37 {dimension_numbers = #tpu.dot_dimension_numbers<[1], [0], [0], [1], [0, 0, 1, 1], [], []>} : vector<8x384xbf16>, vector<384x128xbf16>, vector<8x128xf32> -> vector<8x128xf32>
    %c0_38 = arith.constant 0 : index
    %c0_39 = arith.constant 0 : index
    %84 = vector.load %arg12[%c0_38, %c0_39] : memref<1x128xf32, #tpu.memory_space<vmem>>, vector<1x128xf32>
    %85 = vector.broadcast %84 : vector<1x128xf32> to vector<8x128xf32>
    %86 = arith.addf %83, %85 : vector<8x128xf32>
    %cst_40 = arith.constant 0.000000e+00 : f32
    %87 = vector.broadcast %cst_40 : f32 to vector<8x128xf32>
    %88 = arith.maximumf %86, %87 : vector<8x128xf32>
    %89 = arith.truncf %88 : vector<8x128xf32> to vector<8x128xbf16>
    %c0_41 = arith.constant 0 : index
    %c0_42 = arith.constant 0 : index
    %90 = vector.load %arg13[%c0_41, %c0_42] : memref<128x128xbf16, #tpu.memory_space<vmem>>, vector<128x128xbf16>
    %cst_43 = arith.constant dense<0.000000e+00> : vector<8x128xf32>
    %91 = tpu.matmul %89, %90, %cst_43 {dimension_numbers = #tpu.dot_dimension_numbers<[1], [0], [0], [1], [0, 0, 1, 1], [], []>} : vector<8x128xbf16>, vector<128x128xbf16>, vector<8x128xf32> -> vector<8x128xf32>
    %c0_44 = arith.constant 0 : index
    %c0_45 = arith.constant 0 : index
    %92 = vector.load %arg14[%c0_44, %c0_45] : memref<1x128xf32, #tpu.memory_space<vmem>>, vector<1x128xf32>
    %93 = vector.broadcast %92 : vector<1x128xf32> to vector<8x128xf32>
    %94 = arith.addf %91, %93 : vector<8x128xf32>
    %95 = arith.addf %72, %94 : vector<8x128xf32>
    %96 = arith.truncf %95 : vector<8x128xf32> to vector<8x128xbf16>
    %cst_46 = arith.constant 0.000000e+00 : bf16
    %97 = vector.broadcast %cst_46 : bf16 to vector<1x128xbf16>
    %98 = tpu.concatenate %97, %96, %97 in 0 : vector<1x128xbf16>, vector<8x128xbf16>, vector<1x128xbf16> -> vector<10x128xbf16>
    %99 = vector.extract_strided_slice %98 {offsets = [0, 0], sizes = [8, 128], strides = [1, 1]} : vector<10x128xbf16> to vector<8x128xbf16>
    %100 = vector.extract_strided_slice %98 {offsets = [1, 0], sizes = [8, 128], strides = [1, 1]} : vector<10x128xbf16> to vector<8x128xbf16>
    %101 = vector.extract_strided_slice %98 {offsets = [2, 0], sizes = [8, 128], strides = [1, 1]} : vector<10x128xbf16> to vector<8x128xbf16>
    %102 = tpu.concatenate %99, %100, %101 in 1 : vector<8x128xbf16>, vector<8x128xbf16>, vector<8x128xbf16> -> vector<8x384xbf16>
    %c0_47 = arith.constant 0 : index
    %c0_48 = arith.constant 0 : index
    %103 = vector.load %arg15[%c0_47, %c0_48] : memref<384x256xbf16, #tpu.memory_space<vmem>>, vector<384x256xbf16>
    %cst_49 = arith.constant dense<0.000000e+00> : vector<8x256xf32>
    %104 = tpu.matmul %102, %103, %cst_49 {dimension_numbers = #tpu.dot_dimension_numbers<[1], [0], [0], [1], [0, 0, 1, 1], [], []>} : vector<8x384xbf16>, vector<384x256xbf16>, vector<8x256xf32> -> vector<8x256xf32>
    %c0_50 = arith.constant 0 : index
    %c0_51 = arith.constant 0 : index
    %105 = vector.load %arg16[%c0_50, %c0_51] : memref<1x256xf32, #tpu.memory_space<vmem>>, vector<1x256xf32>
    %106 = vector.broadcast %105 : vector<1x256xf32> to vector<8x256xf32>
    %107 = arith.addf %104, %106 : vector<8x256xf32>
    %108 = tpu.iota {dimensions = array<i32: 0>} : vector<16x8xi32>
    %109 = tpu.iota {dimensions = array<i32: 1>} : vector<16x8xi32>
    %c2_i32_52 = arith.constant 2 : i32
    %110 = vector.broadcast %c2_i32_52 : i32 to vector<16x8xi32>
    %111 = arith.muli %110, %109 : vector<16x8xi32>
    %112 = arith.cmpi eq, %108, %111 : vector<16x8xi32>
    %113 = arith.extui %112 : vector<16x8xi1> to vector<16x8xi32>
    %114 = arith.sitofp %113 : vector<16x8xi32> to vector<16x8xf32>
    %c2_i32_53 = arith.constant 2 : i32
    %115 = vector.broadcast %c2_i32_53 : i32 to vector<16x8xi32>
    %116 = arith.muli %115, %109 : vector<16x8xi32>
    %c1_i32_54 = arith.constant 1 : i32
    %117 = vector.broadcast %c1_i32_54 : i32 to vector<16x8xi32>
    %118 = arith.addi %116, %117 : vector<16x8xi32>
    %119 = arith.cmpi eq, %108, %118 : vector<16x8xi32>
    %120 = arith.extui %119 : vector<16x8xi1> to vector<16x8xi32>
    %121 = arith.sitofp %120 : vector<16x8xi32> to vector<16x8xf32>
    %122 = vector.extract_strided_slice %107 {offsets = [0, 0], sizes = [8, 128], strides = [1, 1]} : vector<8x256xf32> to vector<8x128xf32>
    %cst_55 = arith.constant dense<0.000000e+00> : vector<16x128xf32>
    %123 = tpu.matmul %114, %122, %cst_55 {dimension_numbers = #tpu.dot_dimension_numbers<[1], [0], [0], [1], [0, 0, 1, 1], [], []>} : vector<16x8xf32>, vector<8x128xf32>, vector<16x128xf32> -> vector<16x128xf32>
    %124 = vector.extract_strided_slice %107 {offsets = [0, 128], sizes = [8, 128], strides = [1, 1]} : vector<8x256xf32> to vector<8x128xf32>
    %cst_56 = arith.constant dense<0.000000e+00> : vector<16x128xf32>
    %125 = tpu.matmul %121, %124, %cst_56 {dimension_numbers = #tpu.dot_dimension_numbers<[1], [0], [0], [1], [0, 0, 1, 1], [], []>} : vector<16x8xf32>, vector<8x128xf32>, vector<16x128xf32> -> vector<16x128xf32>
    %126 = arith.addf %123, %125 : vector<16x128xf32>
    %127 = arith.truncf %126 : vector<16x128xf32> to vector<16x128xbf16>
    %cst_57 = arith.constant 0.000000e+00 : bf16
    %128 = vector.broadcast %cst_57 : bf16 to vector<1x128xbf16>
    %129 = tpu.concatenate %128, %127, %128 in 0 : vector<1x128xbf16>, vector<16x128xbf16>, vector<1x128xbf16> -> vector<18x128xbf16>
    %130 = vector.extract_strided_slice %129 {offsets = [0, 0], sizes = [16, 128], strides = [1, 1]} : vector<18x128xbf16> to vector<16x128xbf16>
    %131 = vector.extract_strided_slice %129 {offsets = [1, 0], sizes = [16, 128], strides = [1, 1]} : vector<18x128xbf16> to vector<16x128xbf16>
    %132 = vector.extract_strided_slice %129 {offsets = [2, 0], sizes = [16, 128], strides = [1, 1]} : vector<18x128xbf16> to vector<16x128xbf16>
    %133 = tpu.concatenate %130, %131, %132 in 1 : vector<16x128xbf16>, vector<16x128xbf16>, vector<16x128xbf16> -> vector<16x384xbf16>
    %c0_58 = arith.constant 0 : index
    %c0_59 = arith.constant 0 : index
    %134 = vector.load %arg17[%c0_58, %c0_59] : memref<384x128xbf16, #tpu.memory_space<vmem>>, vector<384x128xbf16>
    %cst_60 = arith.constant dense<0.000000e+00> : vector<16x128xf32>
    %135 = tpu.matmul %133, %134, %cst_60 {dimension_numbers = #tpu.dot_dimension_numbers<[1], [0], [0], [1], [0, 0, 1, 1], [], []>} : vector<16x384xbf16>, vector<384x128xbf16>, vector<16x128xf32> -> vector<16x128xf32>
    %c0_61 = arith.constant 0 : index
    %c0_62 = arith.constant 0 : index
    %136 = vector.load %arg18[%c0_61, %c0_62] : memref<1x128xf32, #tpu.memory_space<vmem>>, vector<1x128xf32>
    %137 = vector.broadcast %136 : vector<1x128xf32> to vector<16x128xf32>
    %138 = arith.addf %135, %137 : vector<16x128xf32>
    %cst_63 = arith.constant 0.000000e+00 : f32
    %139 = vector.broadcast %cst_63 : f32 to vector<16x128xf32>
    %140 = arith.maximumf %138, %139 : vector<16x128xf32>
    %141 = arith.truncf %140 : vector<16x128xf32> to vector<16x128xbf16>
    %cst_64 = arith.constant 0.000000e+00 : bf16
    %142 = vector.broadcast %cst_64 : bf16 to vector<1x128xbf16>
    %143 = tpu.concatenate %142, %141, %142 in 0 : vector<1x128xbf16>, vector<16x128xbf16>, vector<1x128xbf16> -> vector<18x128xbf16>
    %144 = vector.extract_strided_slice %143 {offsets = [0, 0], sizes = [16, 128], strides = [1, 1]} : vector<18x128xbf16> to vector<16x128xbf16>
    %145 = vector.extract_strided_slice %143 {offsets = [1, 0], sizes = [16, 128], strides = [1, 1]} : vector<18x128xbf16> to vector<16x128xbf16>
    %146 = vector.extract_strided_slice %143 {offsets = [2, 0], sizes = [16, 128], strides = [1, 1]} : vector<18x128xbf16> to vector<16x128xbf16>
    %147 = tpu.concatenate %144, %145, %146 in 1 : vector<16x128xbf16>, vector<16x128xbf16>, vector<16x128xbf16> -> vector<16x384xbf16>
    %c0_65 = arith.constant 0 : index
    %c0_66 = arith.constant 0 : index
    %148 = vector.load %arg19[%c0_65, %c0_66] : memref<384x313xbf16, #tpu.memory_space<vmem>>, vector<384x313xbf16>
    %cst_67 = arith.constant dense<0.000000e+00> : vector<16x313xf32>
    %149 = tpu.matmul %147, %148, %cst_67 {dimension_numbers = #tpu.dot_dimension_numbers<[1], [0], [0], [1], [0, 0, 1, 1], [], []>} : vector<16x384xbf16>, vector<384x313xbf16>, vector<16x313xf32> -> vector<16x313xf32>
    %c0_68 = arith.constant 0 : index
    %c0_69 = arith.constant 0 : index
    %150 = vector.load %arg20[%c0_68, %c0_69] : memref<1x313xf32, #tpu.memory_space<vmem>>, vector<1x313xf32>
    %151 = vector.broadcast %150 : vector<1x313xf32> to vector<16x313xf32>
    %152 = arith.addf %149, %151 : vector<16x313xf32>
    %c0_70 = arith.constant 0 : index
    %c0_71 = arith.constant 0 : index
    %c0_72 = arith.constant 0 : index
    %153 = vector.load %arg21[%c0_70, %c0_71, %c0_72] : memref<1x16x313xf32, #tpu.memory_space<vmem>>, vector<1x16x313xf32>
    %154 = vector.shape_cast %153 : vector<1x16x313xf32> to vector<16x313xf32>
    %155 = vector.shape_cast %152 : vector<16x313xf32> to vector<1x16x313xf32>
    tpu.vector_store %arg21[%c0_70, %c0_71, %c0_72], %155 {strides = array<i32>} : memref<1x16x313xf32, #tpu.memory_space<vmem>>, vector<1x16x313xf32>,
    return
  }
  func.func @transform_0(%arg0: i32) -> (i32, i32, i32) {
    %c0_i32 = arith.constant 0 : i32
    %c0_i32_0 = arith.constant 0 : i32
    %c0_i32_1 = arith.constant 0 : i32
    return %arg0, %c0_i32, %c0_i32_0 : i32, i32, i32
  }
  func.func @transform_1(%arg0: i32) -> (i32, i32, i32) {
    %c0_i32 = arith.constant 0 : i32
    %c0_i32_0 = arith.constant 0 : i32
    %c0_i32_1 = arith.constant 0 : i32
    return %arg0, %c0_i32, %c0_i32_0 : i32, i32, i32
  }
  func.func @transform_2(%arg0: i32) -> (i32, i32) {
    %c0_i32 = arith.constant 0 : i32
    %c0_i32_0 = arith.constant 0 : i32
    %c0_i32_1 = arith.constant 0 : i32
    return %c0_i32, %c0_i32_0 : i32, i32
  }
  func.func @transform_3(%arg0: i32) -> (i32, i32) {
    %c0_i32 = arith.constant 0 : i32
    %c0_i32_0 = arith.constant 0 : i32
    %c0_i32_1 = arith.constant 0 : i32
    return %c0_i32, %c0_i32_0 : i32, i32
  }
  func.func @transform_4(%arg0: i32) -> (i32, i32) {
    %c0_i32 = arith.constant 0 : i32
    %c0_i32_0 = arith.constant 0 : i32
    %c0_i32_1 = arith.constant 0 : i32
    return %c0_i32, %c0_i32_0 : i32, i32
  }
  func.func @transform_5(%arg0: i32) -> (i32, i32) {
    %c0_i32 = arith.constant 0 : i32
    %c0_i32_0 = arith.constant 0 : i32
    %c0_i32_1 = arith.constant 0 : i32
    return %c0_i32, %c0_i32_0 : i32, i32
  }
  func.func @transform_6(%arg0: i32) -> (i32, i32) {
    %c0_i32 = arith.constant 0 : i32
    %c0_i32_0 = arith.constant 0 : i32
    %c0_i32_1 = arith.constant 0 : i32
    return %c0_i32, %c0_i32_0 : i32, i32
  }
  func.func @transform_7(%arg0: i32) -> (i32, i32) {
    %c0_i32 = arith.constant 0 : i32
    %c0_i32_0 = arith.constant 0 : i32
    %c0_i32_1 = arith.constant 0 : i32
    return %c0_i32, %c0_i32_0 : i32, i32
  }
  func.func @transform_8(%arg0: i32) -> (i32, i32) {
    %c0_i32 = arith.constant 0 : i32
    %c0_i32_0 = arith.constant 0 : i32
    %c0_i32_1 = arith.constant 0 : i32
    return %c0_i32, %c0_i32_0 : i32, i32
  }
  func.func @transform_9(%arg0: i32) -> (i32, i32) {
    %c0_i32 = arith.constant 0 : i32
    %c0_i32_0 = arith.constant 0 : i32
    %c0_i32_1 = arith.constant 0 : i32
    return %c0_i32, %c0_i32_0 : i32, i32
  }
  func.func @transform_10(%arg0: i32) -> (i32, i32) {
    %c0_i32 = arith.constant 0 : i32
    %c0_i32_0 = arith.constant 0 : i32
    %c0_i32_1 = arith.constant 0 : i32
    return %c0_i32, %c0_i32_0 : i32, i32
  }
  func.func @transform_11(%arg0: i32) -> (i32, i32) {
    %c0_i32 = arith.constant 0 : i32
    %c0_i32_0 = arith.constant 0 : i32
    %c0_i32_1 = arith.constant 0 : i32
    return %c0_i32, %c0_i32_0 : i32, i32
  }
  func.func @transform_12(%arg0: i32) -> (i32, i32) {
    %c0_i32 = arith.constant 0 : i32
    %c0_i32_0 = arith.constant 0 : i32
    %c0_i32_1 = arith.constant 0 : i32
    return %c0_i32, %c0_i32_0 : i32, i32
  }
  func.func @transform_13(%arg0: i32) -> (i32, i32) {
    %c0_i32 = arith.constant 0 : i32
    %c0_i32_0 = arith.constant 0 : i32
    %c0_i32_1 = arith.constant 0 : i32
    return %c0_i32, %c0_i32_0 : i32, i32
  }
  func.func @transform_14(%arg0: i32) -> (i32, i32) {
    %c0_i32 = arith.constant 0 : i32
    %c0_i32_0 = arith.constant 0 : i32
    %c0_i32_1 = arith.constant 0 : i32
    return %c0_i32, %c0_i32_0 : i32, i32
  }
  func.func @transform_15(%arg0: i32) -> (i32, i32) {
    %c0_i32 = arith.constant 0 : i32
    %c0_i32_0 = arith.constant 0 : i32
    %c0_i32_1 = arith.constant 0 : i32
    return %c0_i32, %c0_i32_0 : i32, i32
  }
  func.func @transform_16(%arg0: i32) -> (i32, i32) {
    %c0_i32 = arith.constant 0 : i32
    %c0_i32_0 = arith.constant 0 : i32
    %c0_i32_1 = arith.constant 0 : i32
    return %c0_i32, %c0_i32_0 : i32, i32
  }
  func.func @transform_17(%arg0: i32) -> (i32, i32) {
    %c0_i32 = arith.constant 0 : i32
    %c0_i32_0 = arith.constant 0 : i32
    %c0_i32_1 = arith.constant 0 : i32
    return %c0_i32, %c0_i32_0 : i32, i32
  }
  func.func @transform_18(%arg0: i32) -> (i32, i32) {
    %c0_i32 = arith.constant 0 : i32
    %c0_i32_0 = arith.constant 0 : i32
    %c0_i32_1 = arith.constant 0 : i32
    return %c0_i32, %c0_i32_0 : i32, i32
  }
  func.func @transform_19(%arg0: i32) -> (i32, i32) {
    %c0_i32 = arith.constant 0 : i32
    %c0_i32_0 = arith.constant 0 : i32
    %c0_i32_1 = arith.constant 0 : i32
    return %c0_i32, %c0_i32_0 : i32, i32
  }
  func.func @transform_20(%arg0: i32) -> (i32, i32, i32) {
    %c0_i32 = arith.constant 0 : i32
    %c0_i32_0 = arith.constant 0 : i32
    %c0_i32_1 = arith.constant 0 : i32
    return %arg0, %c0_i32, %c0_i32_0 : i32, i32, i32
  }
}

</mosaic_0001>

<bundles_post_ra>
// kernel: _lambda_.6
= control target key start
LH: loop header
LB: loop body
LE: loop exit
PB: predicated region body
PF: predicated region fallthrough
CT: control target
= control target key end

     0   :  { %11 = vsyncpa [#allocation5], 0  ;;  %s764_s0 = inlined_call_operand.vmem [shape: f32[8,128], index: 0, kind: input, shape index: {}]   ;;  %s765_s1 = inlined_call_operand.vmem [shape: f32[256,128], index: 1, kind: input, shape index: {}]   ;;  %s766_s2 = inlined_call_operand.vmem [shape: f32[1,256], index: 2, kind: input, shape index: {}]   ;;  %s767_s3 = inlined_call_operand.vmem [shape: f32[8,128], index: 3, kind: output, shape index: {0}]   ;;  %s768_s4 = inlined_call_operand.hbm [shape: f32[1,1], index: 4, kind: output, shape index: {1}]   ;;  %s769_s5 = inlined_call_operand.hbm [shape: f32[1,1], index: 5, kind: output, shape index: {2}]  }
   0x1   :  { %v47_v0 = vld [vmem:[%s765_s1 + $0x80] sm:$0xff]  ;;  %v48_v1 = vld [vmem:[%s765_s1 + $0x88] sm:$0xff]  ;;  %v49_v5 = vld [vmem:[%s765_s1 + $0x90] sm:$0xff] }
   0x2   :  { %v31_v2 = vld [vmem:[%s765_s1] sm:$0xff]  ;;  %v449_v3 = vpack.c.bf16 %v48_v1, %v47_v0  ;;  %v32_v4 = vld [vmem:[%s765_s1 + $0x8] sm:$0xff]  ;;  %v50_v6 = vld [vmem:[%s765_s1 + $0x98] sm:$0xff] }
   0x3   :  { %v451_v7 = vpack.c.bf16 %v32_v4, %v31_v2  ;;  %v453_v8 = vpack.c.bf16 %v50_v6, %v49_v5  ;;  %v33_v9 = vld [vmem:[%s765_s1 + $0x10] sm:$0xff]  ;;  %v34_v10 = vld [vmem:[%s765_s1 + $0x18] sm:$0xff]  ;;  %v51_v11 = vld [vmem:[%s765_s1 + $0xa0] sm:$0xff] }
   0x4   :  { %450 = vmatprep.subr.bf16.mxu0 %v449_v3  ;;  %482 = vmatprep.subr.bf16.mxu1 %v449_v3  ;;  %v52_v12 = vld [vmem:[%s765_s1 + $0xa8] sm:$0xff]  ;;  %v455_v13 = vpack.c.bf16 %v34_v10, %v33_v9  ;;  %v35_v15 = vld [vmem:[%s765_s1 + $0x20] sm:$0xff]  ;;  %v53_v17 = vld [vmem:[%s765_s1 + $0xb0] sm:$0xff] }
   0x5   :  { %452 = vmatpush3.bf16.xpose.msra.mxu0 %v451_v7  ;;  %484 = vmatpush3.bf16.msra.mxu1 %v451_v7  ;;  %v457_v14 = vpack.c.bf16 %v52_v12, %v51_v11  ;;  %v36_v16 = vld [vmem:[%s765_s1 + $0x28] sm:$0xff]  ;;  %v54_v18 = vld [vmem:[%s765_s1 + $0xb8] sm:$0xff]  ;;  %v650_v20 = vld [vmem:[%s764_s0] sm:$0xff] }
   0x6   :  { %454 = vmatprep.subr.bf16.mxu0 %v453_v8  ;;  %486 = vmatprep.subr.bf16.mxu1 %v453_v8  ;;  %v459_v19 = vpack.c.bf16 %v36_v16, %v35_v15  ;;  %v461_v21 = vpack.c.bf16 %v54_v18, %v53_v17  ;;  %v37_v22 = vld [vmem:[%s765_s1 + $0x30] sm:$0xff]  ;;  %v38_v23 = vld [vmem:[%s765_s1 + $0x38] sm:$0xff] }
   0x7   :  { %412 = vmatprep.mubr.f32.mxu0 %v650_v20 }
   0x9   :  { %488 = vmatpush3.bf16.msra.mxu1 %v455_v13 }
   0xa   :  { %490 = vmatprep.subr.bf16.mxu1 %v457_v14 }
   0xb   :  { %12 = vsyncpa [#allocation7], 0  ;;  %v55_v24 = vld [vmem:[%s765_s1 + $0xc0] sm:$0xff]  ;;  %v56_v25 = vld [vmem:[%s765_s1 + $0xc8] sm:$0xff]  ;;  %v463_v26 = vpack.c.bf16 %v38_v23, %v37_v22  ;;  %v23_v49 = vlaneseq  ;;  %v570_v10 = vmov 0.0   ;;  %v571_v17 = vmov 1.0  }
   0xc   :  { %v465_v27 = vpack.c.bf16 %v56_v25, %v55_v24  ;;  %v39_v28 = vld [vmem:[%s765_s1 + $0x40] sm:$0xff]  ;;  %v40_v29 = vld [vmem:[%s765_s1 + $0x48] sm:$0xff]  ;;  %v57_v30 = vld [vmem:[%s765_s1 + $0xd0] sm:$0xff]  ;;  %v572_v22 = vmov 1966171168   ;;  %vm334_vm7 = vcmask 1040384  }
   0xd   :  { %456 = vmatpush3.bf16.xpose.msra.mxu0 %v455_v13  ;;  %492 = vmatpush3.bf16.msra.mxu1 %v459_v19  ;;  %v58_v31 = vld [vmem:[%s765_s1 + $0xd8] sm:$0xff]  ;;  %v467_v32 = vpack.c.bf16 %v40_v29, %v39_v28  ;;  %v41_v34 = vld [vmem:[%s765_s1 + $0x50] sm:$0xff]  ;;  %v59_v36 = vld [vmem:[%s765_s1 + $0xe0] sm:$0xff]  ;;  %v708_v50 = vshrl.u32 %v23_v49, 7  ;;  %v150_v61 = vand.u32 127, %v23_v49  ;;  %vm719_vm4 = vcmp.lt.s32.totalorder %v23_v49, 256 }
   0xe   :  { %458 = vmatprep.subr.bf16.mxu0 %v457_v14  ;;  %494 = vmatprep.subr.bf16.mxu1 %v461_v21  ;;  %v469_v33 = vpack.c.bf16 %v58_v31, %v57_v30  ;;  %v42_v35 = vld [vmem:[%s765_s1 + $0x58] sm:$0xff]  ;;  %v60_v37 = vld [vmem:[%s765_s1 + $0xe8] sm:$0xff]  ;;  %v43_v40 = vld [vmem:[%s765_s1 + $0x60] sm:$0xff]  ;;  %27 = vst.msk [vmem:[#allocation2] sm:$0x3] %vm719_vm4, %v570_v10  ;;  %v276_v23 = vunpack.c.l.s4 %v572_v22  ;;  %vm28_vm8 = vcmask 0  }
   0xf   :  { %v471_v38 = vpack.c.bf16 %v42_v35, %v41_v34  ;;  %v473_v39 = vpack.c.bf16 %v60_v37, %v59_v36  ;;  %v44_v41 = vld [vmem:[%s765_s1 + $0x68] sm:$0xff]  ;;  %v61_v42 = vld [vmem:[%s765_s1 + $0xf0] sm:$0xff]  ;;  %v62_v43 = vld [vmem:[%s765_s1 + $0xf8] sm:$0xff]  ;;  %v67_v51 = vsub.s32 0, %v708_v50  ;;  %v71_v53 = vsub.s32 1, %v708_v50  ;;  %s573_s9 = smov [#allocation6]  }
  0x10   :  { %v475_v44 = vpack.c.bf16 %v44_v41, %v43_v40  ;;  %v477_v45 = vpack.c.bf16 %v62_v43, %v61_v42  ;;  %v45_v46 = vld [vmem:[%s765_s1 + $0x70] sm:$0xff]  ;;  %v46_v47 = vld [vmem:[%s765_s1 + $0x78] sm:$0xff]  ;;  %v63_v52 = vld [vmem:[%s766_s2] sm:$0x3]  ;;  %v151_v62 = vadd.s32 128, %v150_v61  ;;  %v277_v28 = vunpack.c.0.s8 %v276_v23  ;;  %s362_s10 = sshll.u32 %s573_s9, 4  ;;  %s363_s10 = int_to_ptr.vmem [resolvable:$true] %s362_s10 }
  0x11   :  { %496 = vmatpush3.bf16.msra.mxu1 %v463_v26  ;;  %v479_v48 = vpack.c.bf16 %v46_v47, %v45_v46  ;;  %v68_v54 = vrot.slane %v63_v52, %v67_v51  ;;  %v72_v55 = vrot.slane %v63_v52, %v71_v53  ;;  %29 = vst.msk [vmem:[#allocation3] sm:$0x1] %vm28_vm8, %v570_v10  ;;  %s522_s11 = scalar_lea.vmem %s363_s10, 16  ;;  %s526_s12 = scalar_lea.vmem %s363_s10, 32 }
  0x12   :  { %498 = vmatprep.subr.bf16.mxu1 %v465_v27  ;;  %p523_p0 = scmp.ne.s32.totalorder %s363_s10, %s522_s11  ;;  %p527_p1 = scmp.lt.s32.totalorder %s363_s10, %s363_s10 }
  0x13   :  { %p528_p2 = scmp.lt.s32.totalorder %s526_s12, %s522_s11 }
  0x15   :  { %460 = vmatpush3.bf16.xpose.msra.mxu0 %v459_v19  ;;  %500 = vmatpush3.bf16.msra.mxu1 %v467_v32  ;;  %p529_p3 = por %p528_p2, %p527_p1 }
  0x16   :  { %462 = vmatprep.subr.bf16.mxu0 %v461_v21  ;;  %502 = vmatprep.subr.bf16.mxu1 %v469_v33 }
  0x17   :  { %p530_p4 = pnand %p529_p3, %p523_p0 }
  0x19   :  { %504 = vmatpush3.bf16.msra.mxu1 %v471_v38 }
  0x1a   :  { %506 = vmatprep.subr.bf16.mxu1 %v473_v39 }
  0x1d   :  { %464 = vmatpush3.bf16.xpose.msra.mxu0 %v463_v26  ;;  %508 = vmatpush3.bf16.msra.mxu1 %v475_v44 }
  0x1e   :  { %466 = vmatprep.subr.bf16.mxu0 %v465_v27  ;;  %510 = vmatprep.subr.bf16.mxu1 %v477_v45 }
  0x21   :  { %512 = vmatpush3.bf16.msra.mxu1 %v479_v48 }
  0x25   :  { %468 = vmatpush3.bf16.xpose.msra.mxu0 %v467_v32 }
  0x26   :  { %470 = vmatprep.subr.bf16.mxu0 %v469_v33  ;;  %v280_v33 = vsub.s32 %v277_v28, %v708_v50 }
  0x2d   :  { %472 = vmatpush3.bf16.xpose.msra.mxu0 %v471_v38  ;;  %v257_v38 = vld [vmem:[#allocation2] sm:$0x3] }
  0x2e   :  { %474 = vmatprep.subr.bf16.mxu0 %v473_v39 }
  0x35   :  { %476 = vmatpush3.bf16.xpose.msra.mxu0 %v475_v44 }
  0x36   :  { %478 = vmatprep.subr.bf16.mxu0 %v477_v45 }
  0x3d   :  { %480 = vmatpush3.bf16.xpose.msra.mxu0 %v479_v48 }
  0x44   :  { %413 = vmatmul.mubr.f32.vlgmr.msra.gmra.mrb[0].mxu0 %v650_v20 }
 0x117   :  { %v141_v56 = vpop.f32.mrb[0].mxu0 }
 0x118   :  { %v142_v57 = vadd.f32 %v141_v56, %v68_v54  ;;  %v143_v58 = vpop.f32.mrb[1].mxu0 }
 0x119   :  { %v144_v59 = vadd.f32 %v143_v58, %v72_v55 }
 0x11b   :  { %v146_v60 = vmax.f32 %v142_v57, %v144_v59 }
 0x11d   :  { %147 = vmax.xlane.f32.xlu0 %v146_v60 }
 0x1aa   :  { %v148_v63 = vpop.xlane.xlu0 %147 }
 0x1ab   :  { %vm152_vm0 = vcmp.eq.f32.partialorder %v142_v57, %v148_v63  ;;  %vm153_vm1 = vcmp.eq.f32.partialorder %v144_v59, %v148_v63 }
 0x1ac   :  { %v154_v0 = vsel %vm152_vm0, %v150_v61, 256  ;;  %v155_v1 = vsel %vm153_vm1, %v151_v62, 256 }
 0x1ad   :  { %vm156_vm2 = vcmp.lt.s32.totalorder %v154_v0, %v155_v1 }
 0x1ae   :  { %v157_v2 = vsel %vm156_vm2, %v154_v0, %v155_v1 }
 0x1af   :  { %v159_v3 = vshra.s32 %v157_v2, 16  ;;  %v158_v5 = vand.u32 65535, %v157_v2 }
 0x1b1   :  { %v161_v4 = vcvt.s32.f32 %v159_v3  ;;  %v160_v7 = vcvt.s32.f32 %v158_v5 }
 0x1b3   :  { %162 = vmin.xlane.f32.xlu0 %v161_v4 }
 0x240   :  { %v163_v6 = vpop.xlane.xlu0 %162 }
 0x241   :  { %vm164_vm3 = vcmp.eq.f32.partialorder %v161_v4, %v163_v6  ;;  %v169_v11 = vcvt.f32.s32 %v163_v6 }
 0x242   :  { %v165_v8 = vsel %vm164_vm3, %v160_v7, inf }
 0x243   :  { %166 = vmin.xlane.f32.xlu1 %v165_v8  ;;  %v170_v13 = vshll.u32 %v169_v11, 16 }
 0x2d0   :  { %v167_v12 = vpop.xlane.xlu1 %166 }
 0x2d1   :  { %v168_v14 = vcvt.f32.s32 %v167_v12 }
 0x2d3   :  { %v171_v15 = vadd.s32 %v170_v13, %v168_v14 }
 0x2d5   :  { %vm173_vm5 = vcmp.eq.s32.totalorder %v151_v62, %v171_v15  ;;  %vm172_vm6 = vcmp.eq.s32.totalorder %v150_v61, %v171_v15 }
 0x2d6   :  { %v377_v16 = vsel %vm173_vm5, 1.0, %v570_v10  ;;  %378 = vmatprep.mubr.msk.f32.mxu1 %vm173_vm5, %v571_v17  ;;  %v376_v18 = vsel %vm172_vm6, 1.0, %v570_v10 }
 0x2d7   :  { %v266_v19 = vrot.slane %v377_v16, 4  ;;  %379 = vmatmul.mubr.msk.f32.vlgmr.msra.gmra.mrb[0].mxu1 %vm172_vm6, %v571_v17  ;;  %v260_v21 = vrot.slane %v376_v18, 4 }
 0x2d9   :  { %v267_v24 = vadd.f32 %v377_v16, %v266_v19  ;;  %v261_v25 = vadd.f32 %v376_v18, %v260_v21 }
 0x2db   :  { %v268_v26 = vrot.slane %v267_v24, 2  ;;  %v262_v27 = vrot.slane %v261_v25, 2 }
 0x2dd   :  { %v269_v29 = vadd.f32 %v268_v26, %v267_v24  ;;  %v263_v30 = vadd.f32 %v262_v27, %v261_v25 }
 0x2df   :  { %v270_v31 = vrot.slane %v269_v29, 1  ;;  %v264_v32 = vrot.slane %v263_v30, 1 }
 0x2e1   :  { %v271_v34 = vadd.f32 %v270_v31, %v269_v29  ;;  %v265_v35 = vadd.f32 %v264_v32, %v263_v30 }
 0x2e3   :  { %v274_v36 = vcombine.low %v265_v35, %v271_v34 }
 0x2e5   :  { %v281_v37 = vrot.slane %v274_v36, %v280_v33 }
 0x2e7   :  { %v288_v39 = vrot.slane %v281_v37, %v280_v33 }
 0x2e9   :  { %v290_v40 = vadd.f32 %v288_v39, %v257_v38 }
 0x2eb   :  { %295 = vst.msk [vmem:[#allocation2] sm:$0x3] %vm719_vm4, %v290_v40 }
 0x2f2   :  { %v317_v41 = vld [vmem:[#allocation2] sm:$0x3] }
 0x2f3   :  { %v318_v42 = vmul.f32 0.125, %v317_v41 }
 0x2f5   :  { %v319_v43 = vadd.f32 1e-07, %v318_v42 }
 0x2f7   :  { %518 = vlog2.f32 %v319_v43 }
 0x301   :  { %v519_v44 = vpop.eup %518 }
 0x302   :  { %v321_v45 = vmul.f32 0.6931472, %v519_v44 }
 0x304   :  { %v322_v46 = vmul.f32 %v321_v45, %v318_v42 }
 0x306   :  { %v327_v47 = vrot.slane %v322_v46, %v67_v51  ;;  %v331_v48 = vrot.slane %v322_v46, %v71_v53 }
 0x308   :  { %v335_v49 = vsel %vm334_vm7, %v327_v47, 0.0  ;;  %v336_v52 = vsel %vm334_vm7, %v331_v48, 0.0 }
 0x309   :  { %v337_v54 = vadd.f32 %v336_v52, %v335_v49 }
 0x30b   :  { %338 = vadd.xlane.f32.xlu0 %v337_v54 }
 0x398   :  { %v339_v55 = vpop.xlane.xlu0 %338 }
 0x399   :  { %v340_v56 = vsub.f32 0.0, %v339_v55 }
 0x39b   :  { %v341_v57 = vmul.f32 1.442695, %v340_v56 }
 0x39d   :  { %520 = vpow2.f32 %v341_v57 }
 0x3a7   :  { %v521_v58 = vpop.eup %520 }
 0x3a8   :  { %343 = vst.msk [vmem:[#allocation6] sm:$0x1] %vm28_vm8, %v521_v58 }
 0x3aa   :  { %v446_v59 = vpop.f32.mrb[0].mxu1 }
 0x3ab   :  { %v447_v60 = vpop.f32.mrb[1].mxu1 }
 0x3ac   :  { %v448_v51 = vadd.f32 %v447_v60, %v446_v59 }
 0x3ae   :  { %248 = vst [vmem:[%s767_s3] sm:$0xff] %v448_v51  ;;  %v296_v50 = vsub.f32 %v650_v20, %v448_v51 }
 0x3b0   :  { %v298_v53 = vmul.f32 %v296_v50, %v296_v50 }
 0x3b2   :  { %299 = vadd.xlane.f32.xlu1 %v298_v53 }
 0x3b3   :  { %533 = shalt.err (!%p530_p4)
}
 0x3b4   :  { %s534_s15 = scalar_lea.hbm %s769_s5, 16 }
 0x3b5   :  { %p535_p5 = scmp.ne.s32.totalorder %s769_s5, %s534_s15  ;;  %p538_p6 = scmp.lt.u32.totalorder %s534_s15, %s769_s5 }
 0x3b7   :  { %p540_p7 = pnand %p538_p6, %p535_p5 }
 0x3b9   :  { %543 = shalt.err (!%p540_p7)
}
 0x3ba   :  { %365 = dma.vmem_to_hbm [thread:$0]  %s363_s10, 16, %s769_s5, [#allocation7]   ;;  %v307_v2 = vld [vmem:[#allocation3] sm:$0x1] }
 0x3bb   :  { %s574_s21 = smov [#allocation4]  }
 0x3bc   :  { %s352_s22 = sshll.u32 %s574_s21, 4  ;;  %s353_s22 = int_to_ptr.vmem [resolvable:$true] %s352_s22 }
 0x3bd   :  { %s544_s23 = scalar_lea.vmem %s353_s22, 16  ;;  %s548_s5 = scalar_lea.vmem %s353_s22, 32 }
 0x3be   :  { %p545_p8 = scmp.ne.s32.totalorder %s353_s22, %s544_s23  ;;  %p549_p9 = scmp.lt.s32.totalorder %s353_s22, %s353_s22 }
 0x3bf   :  { %p550_p10 = scmp.lt.s32.totalorder %s548_s5, %s544_s23 }
 0x3c1   :  { %p551_p11 = por %p550_p10, %p549_p9 }
 0x3c3   :  { %p552_p12 = pnand %p551_p11, %p545_p8 }
 0x43f   :  { %v300_v20 = vpop.xlane.xlu1 %299 }
 0x440   :  { %v301_v61 = vrot.slane %v300_v20, 4 }
 0x442   :  { %v302_v62 = vadd.f32 %v301_v61, %v300_v20 }
 0x444   :  { %v303_v63 = vrot.slane %v302_v62, 2 }
 0x446   :  { %v304_v0 = vadd.f32 %v303_v63, %v302_v62 }
 0x448   :  { %v305_v1 = vrot.slane %v304_v0, 1 }
 0x44a   :  { %v306_v3 = vadd.f32 %v305_v1, %v304_v0 }
 0x44c   :  { %v308_v4 = vadd.f32 %v307_v2, %v306_v3 }
 0x44e   :  { %310 = vst.msk [vmem:[#allocation3] sm:$0x1] %vm28_vm8, %v308_v4 }
 0x455   :  { %v314_v5 = vld [vmem:[#allocation3] sm:$0x1] }
 0x456   :  { %v315_v6 = vmul.f32 0.0009765625, %v314_v5 }
 0x458   :  { %316 = vst.msk [vmem:[#allocation4] sm:$0x1] %vm28_vm8, %v315_v6 }
 0x459   :  { %555 = shalt.err (!%p552_p12)
}
 0x45a   :  { %s556_s26 = scalar_lea.hbm %s768_s4, 16 }
 0x45b   :  { %p557_p13 = scmp.ne.s32.totalorder %s768_s4, %s556_s26  ;;  %p560_p0 = scmp.lt.u32.totalorder %s556_s26, %s768_s4 }
 0x45d   :  { %p562_p1 = pnand %p560_p0, %p557_p13 }
 0x45f   :  { %565 = shalt.err (!%p562_p1)
}
 0x460   :  { %355 = dma.vmem_to_hbm [thread:$0]  %s353_s22, 16, %s768_s4, [#allocation5]  }
 0x461   :  { %566 = dma.done.wait [#allocation5], 16  }
 0x462   :  { %567 = vsyncadd [#allocation5], 4294967280 }
 0x463   :  { %568 = dma.done.wait [#allocation7], 16  }
 0x464   :  { %569 = vsyncadd [#allocation7], 4294967280 }
 0x465   :  { %374 = vsyncpa [#allocation5], 1 }
 0x466   :  { %375 = vsyncpa [#allocation7], 1 }

// kernel: _lambda_.8
= control target key start
LH: loop header
LB: loop body
LE: loop exit
PB: predicated region body
PF: predicated region fallthrough
CT: control target
= control target key end

     0   :  { %11 = vsyncpa [#allocation5], 0  ;;  %s847_s0 = inlined_call_operand.vmem [shape: f32[16,128], index: 0, kind: input, shape index: {}]   ;;  %s848_s1 = inlined_call_operand.vmem [shape: f32[256,128], index: 1, kind: input, shape index: {}]   ;;  %s849_s2 = inlined_call_operand.vmem [shape: f32[1,256], index: 2, kind: input, shape index: {}]   ;;  %s850_s3 = inlined_call_operand.vmem [shape: f32[16,128], index: 3, kind: output, shape index: {0}]   ;;  %s851_s4 = inlined_call_operand.hbm [shape: f32[1,1], index: 4, kind: output, shape index: {1}]   ;;  %s852_s5 = inlined_call_operand.hbm [shape: f32[1,1], index: 5, kind: output, shape index: {2}]  }
   0x1   :  { %v48_v0 = vld [vmem:[%s848_s1 + $0x80] sm:$0xff]  ;;  %v49_v1 = vld [vmem:[%s848_s1 + $0x88] sm:$0xff]  ;;  %v50_v5 = vld [vmem:[%s848_s1 + $0x90] sm:$0xff] }
   0x2   :  { %v32_v2 = vld [vmem:[%s848_s1] sm:$0xff]  ;;  %v515_v3 = vpack.c.bf16 %v49_v1, %v48_v0  ;;  %v33_v4 = vld [vmem:[%s848_s1 + $0x8] sm:$0xff]  ;;  %v51_v6 = vld [vmem:[%s848_s1 + $0x98] sm:$0xff] }
   0x3   :  { %v517_v7 = vpack.c.bf16 %v33_v4, %v32_v2  ;;  %v519_v8 = vpack.c.bf16 %v51_v6, %v50_v5  ;;  %v34_v9 = vld [vmem:[%s848_s1 + $0x10] sm:$0xff]  ;;  %v35_v10 = vld [vmem:[%s848_s1 + $0x18] sm:$0xff]  ;;  %v52_v11 = vld [vmem:[%s848_s1 + $0xa0] sm:$0xff] }
   0x4   :  { %516 = vmatprep.subr.bf16.mxu0 %v515_v3  ;;  %548 = vmatprep.subr.bf16.mxu1 %v515_v3  ;;  %v53_v12 = vld [vmem:[%s848_s1 + $0xa8] sm:$0xff]  ;;  %v521_v13 = vpack.c.bf16 %v35_v10, %v34_v9  ;;  %v36_v15 = vld [vmem:[%s848_s1 + $0x20] sm:$0xff]  ;;  %v54_v17 = vld [vmem:[%s848_s1 + $0xb0] sm:$0xff] }
   0x5   :  { %518 = vmatpush3.bf16.xpose.msra.mxu0 %v517_v7  ;;  %550 = vmatpush3.bf16.msra.mxu1 %v517_v7  ;;  %v523_v14 = vpack.c.bf16 %v53_v12, %v52_v11  ;;  %v37_v16 = vld [vmem:[%s848_s1 + $0x28] sm:$0xff]  ;;  %v55_v18 = vld [vmem:[%s848_s1 + $0xb8] sm:$0xff]  ;;  %v716_v20 = vld [vmem:[%s847_s0] sm:$0xff] }
   0x6   :  { %520 = vmatprep.subr.bf16.mxu0 %v519_v8  ;;  %552 = vmatprep.subr.bf16.mxu1 %v519_v8  ;;  %v525_v19 = vpack.c.bf16 %v37_v16, %v36_v15  ;;  %v527_v21 = vpack.c.bf16 %v55_v18, %v54_v17  ;;  %v38_v22 = vld [vmem:[%s848_s1 + $0x30] sm:$0xff]  ;;  %v39_v23 = vld [vmem:[%s848_s1 + $0x38] sm:$0xff] }
   0x7   :  { %473 = vmatprep.mubr.f32.mxu0 %v716_v20 }
   0x9   :  { %554 = vmatpush3.bf16.msra.mxu1 %v521_v13 }
   0xa   :  { %556 = vmatprep.subr.bf16.mxu1 %v523_v14 }
   0xb   :  { %12 = vsyncpa [#allocation7], 0  ;;  %v56_v24 = vld [vmem:[%s848_s1 + $0xc0] sm:$0xff]  ;;  %v57_v25 = vld [vmem:[%s848_s1 + $0xc8] sm:$0xff]  ;;  %v529_v26 = vpack.c.bf16 %v39_v23, %v38_v22  ;;  %v23_v50 = vlaneseq  ;;  %vm391_vm13 = vcmask 1040384   ;;  %vm28_vm14 = vcmask 0  }
   0xc   :  { %v531_v27 = vpack.c.bf16 %v57_v25, %v56_v24  ;;  %v40_v28 = vld [vmem:[%s848_s1 + $0x40] sm:$0xff]  ;;  %v41_v29 = vld [vmem:[%s848_s1 + $0x48] sm:$0xff]  ;;  %v58_v30 = vld [vmem:[%s848_s1 + $0xd0] sm:$0xff] }
   0xd   :  { %522 = vmatpush3.bf16.xpose.msra.mxu0 %v521_v13  ;;  %558 = vmatpush3.bf16.msra.mxu1 %v525_v19  ;;  %v59_v31 = vld [vmem:[%s848_s1 + $0xd8] sm:$0xff]  ;;  %v533_v32 = vpack.c.bf16 %v41_v29, %v40_v28  ;;  %v42_v34 = vld [vmem:[%s848_s1 + $0x50] sm:$0xff]  ;;  %v60_v36 = vld [vmem:[%s848_s1 + $0xe0] sm:$0xff]  ;;  %v781_v51 = vshrl.u32 %v23_v50, 7  ;;  %v160_v3 = vand.u32 127, %v23_v50  ;;  %vm792_vm8 = vcmp.lt.s32.totalorder %v23_v50, 256 }
   0xe   :  { %524 = vmatprep.subr.bf16.mxu0 %v523_v14  ;;  %560 = vmatprep.subr.bf16.mxu1 %v527_v21  ;;  %v535_v33 = vpack.c.bf16 %v59_v31, %v58_v30  ;;  %v43_v35 = vld [vmem:[%s848_s1 + $0x58] sm:$0xff]  ;;  %v61_v37 = vld [vmem:[%s848_s1 + $0xe8] sm:$0xff]  ;;  %v44_v40 = vld [vmem:[%s848_s1 + $0x60] sm:$0xff] }
   0xf   :  { %v537_v38 = vpack.c.bf16 %v43_v35, %v42_v34  ;;  %v539_v39 = vpack.c.bf16 %v61_v37, %v60_v36  ;;  %v45_v41 = vld [vmem:[%s848_s1 + $0x68] sm:$0xff]  ;;  %v62_v42 = vld [vmem:[%s848_s1 + $0xf0] sm:$0xff]  ;;  %v63_v43 = vld [vmem:[%s848_s1 + $0xf8] sm:$0xff]  ;;  %v68_v52 = vsub.s32 0, %v781_v51  ;;  %v72_v54 = vsub.s32 1, %v781_v51 }
  0x10   :  { %v541_v44 = vpack.c.bf16 %v45_v41, %v44_v40  ;;  %v543_v45 = vpack.c.bf16 %v63_v43, %v62_v42  ;;  %v46_v46 = vld [vmem:[%s848_s1 + $0x70] sm:$0xff]  ;;  %v47_v47 = vld [vmem:[%s848_s1 + $0x78] sm:$0xff]  ;;  %v776_v49 = vld [vmem:[%s847_s0 + $0x8] sm:$0xff]  ;;  %v161_v4 = vadd.s32 128, %v160_v3  ;;  %v637_v37 = vmov 1.0  }
  0x11   :  { %562 = vmatpush3.bf16.msra.mxu1 %v529_v26  ;;  %v545_v48 = vpack.c.bf16 %v47_v47, %v46_v46  ;;  %v64_v53 = vld [vmem:[%s849_s2] sm:$0x3]  ;;  %v638_v47 = vmov 1966171168  }
  0x12   :  { %564 = vmatprep.subr.bf16.mxu1 %v531_v27  ;;  %v69_v55 = vrot.slane %v64_v53, %v68_v52  ;;  %v73_v56 = vrot.slane %v64_v53, %v72_v54 }
  0x15   :  { %526 = vmatpush3.bf16.xpose.msra.mxu0 %v525_v19  ;;  %566 = vmatpush3.bf16.msra.mxu1 %v533_v32 }
  0x16   :  { %528 = vmatprep.subr.bf16.mxu0 %v527_v21  ;;  %568 = vmatprep.subr.bf16.mxu1 %v535_v33 }
  0x19   :  { %570 = vmatpush3.bf16.msra.mxu1 %v537_v38 }
  0x1a   :  { %572 = vmatprep.subr.bf16.mxu1 %v539_v39 }
  0x1d   :  { %530 = vmatpush3.bf16.xpose.msra.mxu0 %v529_v26  ;;  %574 = vmatpush3.bf16.msra.mxu1 %v541_v44 }
  0x1e   :  { %532 = vmatprep.subr.bf16.mxu0 %v531_v27  ;;  %576 = vmatprep.subr.bf16.mxu1 %v543_v45  ;;  %v636_v27 = vmov 0.0  }
  0x1f   :  { %27 = vst.msk [vmem:[#allocation2] sm:$0x3] %vm792_vm8, %v636_v27 }
  0x20   :  { %29 = vst.msk [vmem:[#allocation3] sm:$0x1] %vm28_vm14, %v636_v27 }
  0x21   :  { %578 = vmatpush3.bf16.msra.mxu1 %v545_v48 }
  0x25   :  { %534 = vmatpush3.bf16.xpose.msra.mxu0 %v533_v32 }
  0x26   :  { %536 = vmatprep.subr.bf16.mxu0 %v535_v33 }
  0x2d   :  { %538 = vmatpush3.bf16.xpose.msra.mxu0 %v537_v38 }
  0x2e   :  { %540 = vmatprep.subr.bf16.mxu0 %v539_v39 }
  0x35   :  { %542 = vmatpush3.bf16.xpose.msra.mxu0 %v541_v44 }
  0x36   :  { %544 = vmatprep.subr.bf16.mxu0 %v543_v45 }
  0x3d   :  { %546 = vmatpush3.bf16.xpose.msra.mxu0 %v545_v48  ;;  %v327_v48 = vunpack.c.l.s4 %v638_v47 }
  0x44   :  { %474 = vmatmul.mubr.f32.vlgmr.msra.gmra.mrb[0].mxu0 %v716_v20 }
  0x45   :  { %475 = vmatprep.mubr.f32.mxu0 %v776_v49 }
  0x48   :  { %476 = vmatmul.mubr.f32.gmra.mrb[2].mxu0 %v776_v49 }
 0x117   :  { %v142_v57 = vpop.f32.mrb[0].mxu0 }
 0x118   :  { %v143_v58 = vadd.f32 %v142_v57, %v69_v55  ;;  %v144_v59 = vpop.f32.mrb[1].mxu0  ;;  %v328_v57 = vunpack.c.0.s8 %v327_v48 }
 0x119   :  { %v145_v60 = vadd.f32 %v144_v59, %v73_v56 }
 0x11b   :  { %v148_v61 = vpop.f32.mrb[2].mxu0  ;;  %v153_v62 = vmax.f32 %v143_v58, %v145_v60 }
 0x11c   :  { %v149_v63 = vadd.f32 %v148_v61, %v69_v55  ;;  %v150_v0 = vpop.f32.mrb[3].mxu0 }
 0x11d   :  { %v151_v1 = vadd.f32 %v150_v0, %v73_v56  ;;  %154 = vmax.xlane.f32.xlu0 %v153_v62  ;;  %v331_v62 = vsub.s32 %v328_v57, %v781_v51 }
 0x11f   :  { %v156_v2 = vmax.f32 %v149_v63, %v151_v1 }
 0x121   :  { %157 = vmax.xlane.f32.xlu0 %v156_v2 }
 0x1aa   :  { %v155_v5 = vpop.xlane.xlu0 %154 }
 0x1ab   :  { %vm162_vm0 = vcmp.eq.f32.partialorder %v143_v58, %v155_v5  ;;  %vm163_vm1 = vcmp.eq.f32.partialorder %v145_v60, %v155_v5 }
 0x1ac   :  { %v166_v6 = vsel %vm162_vm0, %v160_v3, 256  ;;  %v167_v7 = vsel %vm163_vm1, %v161_v4, 256 }
 0x1ad   :  { %vm170_vm2 = vcmp.lt.s32.totalorder %v166_v6, %v167_v7 }
 0x1ae   :  { %v158_v8 = vpop.xlane.xlu0 %157  ;;  %v171_v9 = vsel %vm170_vm2, %v166_v6, %v167_v7 }
 0x1af   :  { %vm164_vm3 = vcmp.eq.f32.partialorder %v149_v63, %v158_v8  ;;  %vm165_vm4 = vcmp.eq.f32.partialorder %v151_v1, %v158_v8  ;;  %v173_v10 = vshra.s32 %v171_v9, 16  ;;  %v172_v17 = vand.u32 65535, %v171_v9 }
 0x1b0   :  { %v168_v11 = vsel %vm164_vm3, %v160_v3, 256  ;;  %v169_v12 = vsel %vm165_vm4, %v161_v4, 256 }
 0x1b1   :  { %vm186_vm5 = vcmp.lt.s32.totalorder %v168_v11, %v169_v12  ;;  %v175_v13 = vcvt.s32.f32 %v173_v10  ;;  %v174_v19 = vcvt.s32.f32 %v172_v17 }
 0x1b2   :  { %v187_v14 = vsel %vm186_vm5, %v168_v11, %v169_v12 }
 0x1b3   :  { %176 = vmin.xlane.f32.xlu1 %v175_v13  ;;  %v189_v15 = vshra.s32 %v187_v14, 16  ;;  %v188_v21 = vand.u32 65535, %v187_v14 }
 0x1b5   :  { %v191_v16 = vcvt.s32.f32 %v189_v15  ;;  %v190_v24 = vcvt.s32.f32 %v188_v21 }
 0x1b7   :  { %192 = vmin.xlane.f32.xlu1 %v191_v16 }
 0x240   :  { %v177_v18 = vpop.xlane.xlu1 %176 }
 0x241   :  { %vm178_vm6 = vcmp.eq.f32.partialorder %v175_v13, %v177_v18  ;;  %v183_v28 = vcvt.f32.s32 %v177_v18 }
 0x242   :  { %v179_v22 = vsel %vm178_vm6, %v174_v19, inf }
 0x243   :  { %180 = vmin.xlane.f32.xlu0 %v179_v22  ;;  %v184_v30 = vshll.u32 %v183_v28, 16 }
 0x244   :  { %v193_v23 = vpop.xlane.xlu1 %192 }
 0x245   :  { %vm194_vm7 = vcmp.eq.f32.partialorder %v191_v16, %v193_v23  ;;  %v199_v31 = vcvt.f32.s32 %v193_v23 }
 0x246   :  { %v195_v25 = vsel %vm194_vm7, %v190_v24, inf }
 0x247   :  { %196 = vmin.xlane.f32.xlu1 %v195_v25  ;;  %v200_v35 = vshll.u32 %v199_v31, 16 }
 0x2d0   :  { %v181_v29 = vpop.xlane.xlu0 %180 }
 0x2d1   :  { %v182_v32 = vcvt.f32.s32 %v181_v29 }
 0x2d3   :  { %v185_v33 = vadd.s32 %v184_v30, %v182_v32 }
 0x2d4   :  { %v197_v34 = vpop.xlane.xlu1 %196 }
 0x2d5   :  { %v198_v36 = vcvt.f32.s32 %v197_v34  ;;  %vm203_vm9 = vcmp.eq.s32.totalorder %v161_v4, %v185_v33  ;;  %vm202_vm10 = vcmp.eq.s32.totalorder %v160_v3, %v185_v33 }
 0x2d6   :  { %437 = vmatprep.mubr.msk.f32.mxu1 %vm203_vm9, %v637_v37  ;;  %v434_v39 = vsel %vm203_vm9, 1.0, %v636_v27  ;;  %v433_v41 = vsel %vm202_vm10, 1.0, %v636_v27 }
 0x2d7   :  { %v201_v38 = vadd.s32 %v200_v35, %v198_v36  ;;  %438 = vmatmul.mubr.msk.f32.vlgmr.msra.gmra.mrb[0].mxu1 %vm202_vm10, %v637_v37  ;;  %v364_v35 = vld [vmem:[#allocation3] sm:$0x1] }
 0x2d9   :  { %vm205_vm11 = vcmp.eq.s32.totalorder %v161_v4, %v201_v38  ;;  %vm204_vm12 = vcmp.eq.s32.totalorder %v160_v3, %v201_v38  ;;  %v304_v3 = vld [vmem:[#allocation2] sm:$0x3] }
 0x2da   :  { %v436_v40 = vsel %vm205_vm11, 1.0, %v636_v27  ;;  %439 = vmatprep.mubr.msk.f32.mxu1 %vm205_vm11, %v637_v37  ;;  %v435_v42 = vsel %vm204_vm12, 1.0, %v636_v27 }
 0x2db   :  { %v316_v43 = vadd.f32 %v436_v40, %v434_v39  ;;  %440 = vmatmul.mubr.msk.f32.gmra.mrb[2].mxu1 %vm204_vm12, %v637_v37  ;;  %v309_v44 = vadd.f32 %v435_v42, %v433_v41 }
 0x2dd   :  { %v317_v45 = vrot.slane %v316_v43, 4  ;;  %v310_v46 = vrot.slane %v309_v44, 4 }
 0x2df   :  { %v318_v50 = vadd.f32 %v317_v45, %v316_v43  ;;  %v311_v53 = vadd.f32 %v310_v46, %v309_v44 }
 0x2e1   :  { %v319_v55 = vrot.slane %v318_v50, 2  ;;  %v312_v56 = vrot.slane %v311_v53, 2 }
 0x2e3   :  { %v320_v58 = vadd.f32 %v319_v55, %v318_v50  ;;  %v313_v59 = vadd.f32 %v312_v56, %v311_v53 }
 0x2e5   :  { %v321_v60 = vrot.slane %v320_v58, 1  ;;  %v314_v61 = vrot.slane %v313_v59, 1 }
 0x2e7   :  { %v322_v63 = vadd.f32 %v321_v60, %v320_v58  ;;  %v315_v0 = vadd.f32 %v314_v61, %v313_v59 }
 0x2e9   :  { %v325_v1 = vcombine.low %v315_v0, %v322_v63 }
 0x2eb   :  { %v332_v2 = vrot.slane %v325_v1, %v331_v62 }
 0x2ed   :  { %v339_v4 = vrot.slane %v332_v2, %v331_v62 }
 0x2ef   :  { %v341_v5 = vadd.f32 %v339_v4, %v304_v3 }
 0x2f1   :  { %346 = vst.msk [vmem:[#allocation2] sm:$0x3] %vm792_vm8, %v341_v5 }
 0x2f8   :  { %v374_v6 = vld [vmem:[#allocation2] sm:$0x3] }
 0x2f9   :  { %v375_v7 = vmul.f32 0.0625, %v374_v6 }
 0x2fb   :  { %v376_v8 = vadd.f32 1e-07, %v375_v7 }
 0x2fd   :  { %584 = vlog2.f32 %v376_v8 }
 0x307   :  { %v585_v9 = vpop.eup %584 }
 0x308   :  { %v378_v10 = vmul.f32 0.6931472, %v585_v9 }
 0x30a   :  { %v379_v11 = vmul.f32 %v378_v10, %v375_v7 }
 0x30c   :  { %v384_v15 = vrot.slane %v379_v11, %v68_v52  ;;  %v388_v16 = vrot.slane %v379_v11, %v72_v54 }
 0x30e   :  { %v392_v23 = vsel %vm391_vm13, %v384_v15, 0.0  ;;  %v393_v24 = vsel %vm391_vm13, %v388_v16, 0.0 }
 0x30f   :  { %v394_v54 = vadd.f32 %v393_v24, %v392_v23 }
 0x3aa   :  { %v509_v12 = vpop.f32.mrb[0].mxu1 }
 0x3ab   :  { %v510_v13 = vpop.f32.mrb[1].mxu1 }
 0x3ac   :  { %v511_v14 = vadd.f32 %v510_v13, %v509_v12 }
 0x3ae   :  { %289 = vst [vmem:[%s850_s3] sm:$0xff] %v511_v14  ;;  %v512_v17 = vpop.f32.mrb[2].mxu1  ;;  %v347_v18 = vsub.f32 %v716_v20, %v511_v14 }
 0x3af   :  { %v513_v19 = vpop.f32.mrb[3].mxu1 }
 0x3b0   :  { %v514_v21 = vadd.f32 %v513_v19, %v512_v17  ;;  %v351_v22 = vmul.f32 %v347_v18, %v347_v18 }
 0x3b2   :  { %290 = vst [vmem:[%s850_s3 + $0x8] sm:$0xff] %v514_v21  ;;  %353 = vadd.xlane.f32.xlu0 %v351_v22  ;;  %v348_v51 = vsub.f32 %v776_v49, %v514_v21  ;;  %s639_s3 = smov [#allocation6]  }
 0x3b3   :  { %s419_s14 = sshll.u32 %s639_s3, 4  ;;  %s420_s14 = int_to_ptr.vmem [resolvable:$true] %s419_s14 }
 0x3b4   :  { %v352_v52 = vmul.f32 %v348_v51, %v348_v51  ;;  %s588_s15 = scalar_lea.vmem %s420_s14, 16  ;;  %s592_s16 = scalar_lea.vmem %s420_s14, 32 }
 0x3b5   :  { %p589_p0 = scmp.ne.s32.totalorder %s420_s14, %s588_s15  ;;  %p593_p1 = scmp.lt.s32.totalorder %s420_s14, %s420_s14 }
 0x3b6   :  { %355 = vadd.xlane.f32.xlu1 %v352_v52  ;;  %395 = vadd.xlane.f32.xlu0 %v394_v54  ;;  %p594_p2 = scmp.lt.s32.totalorder %s592_s16, %s588_s15 }
 0x3b8   :  { %p595_p3 = por %p594_p2, %p593_p1 }
 0x3ba   :  { %p596_p4 = pnand %p595_p3, %p589_p0 }
 0x43f   :  { %v354_v20 = vpop.xlane.xlu0 %353 }
 0x443   :  { %v356_v25 = vpop.xlane.xlu1 %355  ;;  %v396_v26 = vpop.xlane.xlu0 %395 }
 0x444   :  { %v357_v28 = vadd.f32 %v356_v25, %v354_v20  ;;  %v397_v29 = vsub.f32 0.0, %v396_v26 }
 0x446   :  { %v358_v30 = vrot.slane %v357_v28, 4  ;;  %v398_v31 = vmul.f32 1.442695, %v397_v29 }
 0x448   :  { %v359_v32 = vadd.f32 %v358_v30, %v357_v28  ;;  %586 = vpow2.f32 %v398_v31 }
 0x44a   :  { %v360_v33 = vrot.slane %v359_v32, 2 }
 0x44c   :  { %v361_v34 = vadd.f32 %v360_v33, %v359_v32 }
 0x44e   :  { %v362_v49 = vrot.slane %v361_v34, 1 }
 0x450   :  { %v363_v36 = vadd.f32 %v362_v49, %v361_v34 }
 0x452   :  { %v587_v37 = vpop.eup %586  ;;  %v365_v38 = vadd.f32 %v364_v35, %v363_v36 }
 0x453   :  { %400 = vst.msk [vmem:[#allocation6] sm:$0x1] %vm28_vm14, %v587_v37 }
 0x454   :  { %367 = vst.msk [vmem:[#allocation3] sm:$0x1] %vm28_vm14, %v365_v38 }
 0x455   :  { %599 = shalt.err (!%p596_p4)
}
 0x456   :  { %s600_s19 = scalar_lea.hbm %s852_s5, 16 }
 0x457   :  { %p601_p5 = scmp.ne.s32.totalorder %s852_s5, %s600_s19  ;;  %p604_p6 = scmp.lt.u32.totalorder %s600_s19, %s852_s5 }
 0x459   :  { %p606_p7 = pnand %p604_p6, %p601_p5 }
 0x45b   :  { %609 = shalt.err (!%p606_p7)
}
 0x45c   :  { %422 = dma.vmem_to_hbm [thread:$0]  %s420_s14, 16, %s852_s5, [#allocation7]   ;;  %v371_v27 = vld [vmem:[#allocation3] sm:$0x1] }
 0x45d   :  { %s640_s26 = smov [#allocation4]   ;;  %v372_v39 = vmul.f32 0.00048828125, %v371_v27 }
 0x45e   :  { %s409_s27 = sshll.u32 %s640_s26, 4  ;;  %s410_s27 = int_to_ptr.vmem [resolvable:$true] %s409_s27 }
 0x45f   :  { %373 = vst.msk [vmem:[#allocation4] sm:$0x1] %vm28_vm14, %v372_v39  ;;  %s610_s28 = scalar_lea.vmem %s410_s27, 16  ;;  %s614_s29 = scalar_lea.vmem %s410_s27, 32 }
 0x460   :  { %p611_p8 = scmp.ne.s32.totalorder %s410_s27, %s610_s28  ;;  %p615_p9 = scmp.lt.s32.totalorder %s410_s27, %s410_s27 }
 0x461   :  { %p616_p10 = scmp.lt.s32.totalorder %s614_s29, %s610_s28 }
 0x463   :  { %p617_p11 = por %p616_p10, %p615_p9 }
 0x465   :  { %p618_p12 = pnand %p617_p11, %p611_p8 }
 0x467   :  { %621 = shalt.err (!%p618_p12)
}
 0x468   :  { %s622_s7 = scalar_lea.hbm %s851_s4, 16 }
 0x469   :  { %p623_p13 = scmp.ne.s32.totalorder %s851_s4, %s622_s7  ;;  %p626_p0 = scmp.lt.u32.totalorder %s622_s7, %s851_s4 }
 0x46b   :  { %p628_p1 = pnand %p626_p0, %p623_p13 }
 0x46d   :  { %631 = shalt.err (!%p628_p1)
}
 0x46e   :  { %412 = dma.vmem_to_hbm [thread:$0]  %s410_s27, 16, %s851_s4, [#allocation5]  }
 0x46f   :  { %632 = dma.done.wait [#allocation5], 16  }
 0x470   :  { %633 = vsyncadd [#allocation5], 4294967280 }
 0x471   :  { %634 = dma.done.wait [#allocation7], 16  }
 0x472   :  { %635 = vsyncadd [#allocation7], 4294967280 }
 0x473   :  { %431 = vsyncpa [#allocation5], 1 }
 0x474   :  { %432 = vsyncpa [#allocation7], 1 }

// kernel: _lambda_.7
= control target key start
LH: loop header
LB: loop body
LE: loop exit
PB: predicated region body
PF: predicated region fallthrough
CT: control target
= control target key end

     0   :  { %s4930_s0 = inlined_call_operand.vmem [shape: f32[2,4,128], index: 0, kind: input, shape index: {}]   ;;  %s4931_s1 = inlined_call_operand.vmem [shape: bf16[2,8,128], index: 1, kind: input, shape index: {}]   ;;  %s4932_s2 = inlined_call_operand.vmem [shape: bf16[384,128], index: 2, kind: input, shape index: {}]   ;;  %s4933_s3 = inlined_call_operand.vmem [shape: f32[1,128], index: 3, kind: input, shape index: {}]   ;;  %s4934_s4 = inlined_call_operand.vmem [shape: bf16[384,128], index: 4, kind: input, shape index: {}]   ;;  %s4935_s5 = inlined_call_operand.vmem [shape: f32[1,128], index: 5, kind: input, shape index: {}]   ;;  %s4936_s6 = inlined_call_operand.vmem [shape: bf16[128,128], index: 6, kind: input, shape index: {}]   ;;  %s4937_s7 = inlined_call_operand.vmem [shape: f32[1,128], index: 7, kind: input, shape index: {}]   ;;  %s4938_s8 = inlined_call_operand.vmem [shape: bf16[384,128], index: 8, kind: input, shape index: {}]   ;;  %s4939_s9 = inlined_call_operand.vmem [shape: f32[1,128], index: 9, kind: input, shape index: {}]   ;;  %s4940_s10 = inlined_call_operand.vmem [shape: bf16[128,128], index: 10, kind: input, shape index: {}]   ;;  %s4941_s11 = inlined_call_operand.vmem [shape: f32[1,128], index: 11, kind: input, shape index: {}]   ;;  %s4942_s12 = inlined_call_operand.vmem [shape: bf16[384,256], index: 12, kind: input, shape index: {}]   ;;  %s4943_s13 = inlined_call_operand.vmem [shape: f32[1,256], index: 13, kind: input, shape index: {}]   ;;  %s4944_s14 = inlined_call_operand.vmem [shape: bf16[384,128], index: 14, kind: input, shape index: {}]   ;;  %s4945_s15 = inlined_call_operand.vmem [shape: f32[1,128], index: 15, kind: input, shape index: {}]   ;;  %s4946_s16 = inlined_call_operand.vmem [shape: bf16[384,128], index: 16, kind: input, shape index: {}]   ;;  %s4947_s17 = inlined_call_operand.vmem [shape: f32[1,128], index: 17, kind: input, shape index: {}]   ;;  %s4948_s18 = inlined_call_operand.vmem [shape: bf16[256,128], index: 18, kind: input, shape index: {}]   ;;  %s4949_s19 = inlined_call_operand.vmem [shape: f32[1,128], index: 19, kind: input, shape index: {}]   ;;  %s4950_s20 = inlined_call_operand.vmem [shape: f32[2,8,128], index: 20, kind: output, shape index: {}]  }
   0x1   :  { %4953 = sst [smem:[#allocation2_spill]] %s4930_s0 }
   0x2   :  { %4954 = sst [smem:[#allocation3_spill]] %s4931_s1  ;;  %s4146_s1 = smov 0  }
   0x3   :  { %4955 = sst [smem:[#allocation4_spill]] %s4932_s2 }
   0x4   :  { %4956 = sst [smem:[#allocation5_spill]] %s4933_s3 }
   0x5   :  { %4957 = sst [smem:[#allocation6_spill]] %s4934_s4 }
   0x6 LB: > { %s3213_s22 = sadd.s32 4294967295, %s4036_s1   ;;  %p3217_p0 = scmp.ge.s32.totalorder %s4036_s1, 1  ;;  %s4036_s1 = sphi %s4146_s1, %s30_s1  }
   0x7   : > { %p570_p1 = scmp.lt.s32.totalorder %s4036_s1, 3 }
   0x9   : > { %p571_p2 = pnand %p3217_p0, %p570_p1 }
   0xa   : > { %s4958_s2 = sld [smem:[#allocation4_spill]] (!%p571_p2)  ;;  %v4038_v2 = vmov (!%p571_p2), 0.0   ;;  %vm4039_vm0 = vmmov (!%p571_p2), 0   ;;  %p630_p3 = scmp.lt.s32.totalorder (!%p571_p2), %s3213_s22, 1  ;;  %vm653_vm1 = vcmask (!%p571_p2), 1040384   ;;  %vm657_vm5 = vcmask (!%p571_p2), 1042432  }
   0xb   : > { %574 = sbr.rel (%p571_p2) target bundleno = 2386 (0x952), region = 100  ;;  %3637 = vmatprep.subr.bf16.mxu1 (!%p571_p2), %v4038_v2  ;;  %3653 = vmatprep.mubr.msk.bf16.mxu1 (!%p571_p2), %vm4039_vm0, %v4038_v2  ;;  %s4959_s27 = sld [smem:[#allocation2_spill]] (!%p571_p2)  ;;  %vm654_vm2 = vsmask.f32 (!%p571_p2), 256  ;;  %vm658_vm3 = vsmask.f32 (!%p571_p2), 2304 }
   0xc   : > { %vm4245_vm4 = vmand (!%p571_p2), %vm653_vm1, %vm654_vm2  ;;  %s4962_s30 = sld [smem:[#allocation6_spill]] (!%p571_p2)  ;;  %vm963_vm7 = vcmask (!%p571_p2), 1041408   ;;  %vm964_vm8 = vsmask.f32 (!%p571_p2), 1280  ;;  %vm967_vm9 = vcmask (!%p571_p2), 1043456   ;;  %vm2208_vm15 = vcmask (!%p571_p2), 31744  }
   0xd   : > { %vm4256_vm6 = vmand (!%p571_p2), %vm657_vm5, %vm658_vm3  ;;  %vm968_vm10 = vsmask.f32 (!%p571_p2), 3328  ;;  %v3944_v32 = vld [vmem:[%s4942_s12 + $0x110] ss:$8 sps:$4 sm:$0xff] (!%p571_p2)   ;;  %vm2372_vm1 = vcmask (!%p571_p2), 1044480   ;;  %v4016_v28 = vld [vmem:[%s4948_s18 + $0x8] sm:$0xff] (!%p571_p2)  }
   0xe   : > { %vm965_vm11 = vmand (!%p571_p2), %vm963_vm7, %vm964_vm8  ;;  %vm2373_vm2 = vsmask.f32 (!%p571_p2), 4352 }
   0xf   : > { %vm969_vm12 = vmand (!%p571_p2), %vm967_vm9, %vm968_vm10 }
  0x10   : > { %v3805_v0 = vld [vmem:[%s4958_s2 + $0x40] sm:$0xff] (!%p571_p2)   ;;  %v3808_v4 = vld [vmem:[%s4958_s2 + $0x48] sm:$0xff] (!%p571_p2)   ;;  %v3811_v7 = vld [vmem:[%s4958_s2 + $0x50] sm:$0xff] (!%p571_p2)  }
  0x11   : > { %v3806_v1 = vld [vmem:[%s4958_s2] sm:$0xff] (!%p571_p2)   ;;  %3438 = vmatprep.subr.bf16.mxu0 (!%p571_p2), %v3805_v0  ;;  %v3809_v5 = vld [vmem:[%s4958_s2 + $0x8] sm:$0xff] (!%p571_p2)   ;;  %v3812_v8 = vld [vmem:[%s4958_s2 + $0x10] sm:$0xff] (!%p571_p2)  }
  0x12   : > { %v3807_v3 = vld [vmem:[%s4958_s2 + $0x80] sm:$0xff]   ;;  %3439 = vmatpush3.bf16.msra.mxu0 %v3806_v1  ;;  %v3810_v6 = vld [vmem:[%s4958_s2 + $0x88] sm:$0xff]   ;;  %v3813_v9 = vld [vmem:[%s4958_s2 + $0x90] sm:$0xff]   ;;  %s4970_s22 = smov (!%p630_p3, %s3213_s22), 1 }
  0x13   : > { %3638 = vmatpush3.bf16.msra.mxu1 %v3807_v3  ;;  %3440 = vmatprep.subr.bf16.mxu0 %v3808_v4  ;;  %v3814_v10 = vld [vmem:[%s4958_s2 + $0x58] sm:$0xff]   ;;  %v3817_v13 = vld [vmem:[%s4958_s2 + $0x60] sm:$0xff]   ;;  %v3820_v16 = vld [vmem:[%s4958_s2 + $0x68] sm:$0xff]   ;;  %s3218_s29 = sshll.u32 %s4970_s22, 2 }
  0x14   : > { %3639 = vmatprep.subr.bf16.mxu1 %v4038_v2  ;;  %v3815_v11 = vld [vmem:[%s4958_s2 + $0x18] sm:$0xff]   ;;  %v3818_v14 = vld [vmem:[%s4958_s2 + $0x20] sm:$0xff]   ;;  %v3821_v17 = vld [vmem:[%s4958_s2 + $0x28] sm:$0xff]   ;;  %s633_s28 = scalar_lea.vmem %s4959_s27, %s3218_s29  ;;  %s4968_s27 = sld [smem:[#allocation3_spill]] }
  0x15   : > { %v3816_v12 = vld [vmem:[%s4958_s2 + $0x98] sm:$0xff]   ;;  %v3819_v15 = vld [vmem:[%s4958_s2 + $0xa0] sm:$0xff]   ;;  %v3822_v18 = vld [vmem:[%s4958_s2 + $0xa8] sm:$0xff]  }
  0x16   : > { %3441 = vmatpush3.bf16.msra.mxu0 %v3809_v5  ;;  %v3823_v19 = vld [vmem:[%s4958_s2 + $0x70] sm:$0xff]   ;;  %v643_v22 = vld [vmem:[%s633_s28] sm:$0xf]  ;;  %v3826_v23 = vld [vmem:[%s4958_s2 + $0x78] sm:$0xff]   ;;  %s4965_s28 = sld [smem:[#allocation5_spill]] }
  0x17   : > { %3640 = vmatpush3.bf16.msra.mxu1 %v3810_v6  ;;  %3442 = vmatprep.subr.bf16.mxu0 %v3811_v7  ;;  %v3824_v20 = vld [vmem:[%s4958_s2 + $0x30] sm:$0xff]   ;;  %v644_v24 = vpack.c.bf16 %v643_v22, %v643_v22  ;;  %v3827_v25 = vld [vmem:[%s4958_s2 + $0x38] sm:$0xff]   ;;  %v3830_v31 = vld [vmem:[%s4962_s30 + $0x40] sm:$0xff]  }
  0x18   : > { %3641 = vmatprep.subr.bf16.mxu1 %v4038_v2  ;;  %v3825_v21 = vld [vmem:[%s4958_s2 + $0xb0] sm:$0xff]   ;;  %v3828_v29 = vld [vmem:[%s4958_s2 + $0xb8] sm:$0xff]   ;;  %v3829_v34 = vld [vmem:[%s4962_s30 + $0x80] sm:$0xff]  }
  0x19   : > { %v646_v26 = vshrl.u32 %v644_v24, 16  ;;  %v649_v27 = vshll.u32 %v644_v24, 16  ;;  %v3831_v40 = vld [vmem:[%s4962_s30 + $0x88] sm:$0xff]   ;;  %v3832_v42 = vld [vmem:[%s4962_s30] sm:$0xff]   ;;  %v3834_v45 = vld [vmem:[%s4962_s30 + $0x90] sm:$0xff]  }
  0x1a   : > { %3443 = vmatpush3.bf16.msra.mxu0 %v3812_v8  ;;  %v3833_v44 = vld [vmem:[%s4962_s30 + $0x48] sm:$0xff]   ;;  %v3836_v47 = vld [vmem:[%s4962_s30 + $0x50] sm:$0xff]   ;;  %v3837_v48 = vld [vmem:[%s4962_s30 + $0x98] sm:$0xff]  }
  0x1b   : > { %3642 = vmatpush3.bf16.msra.mxu1 %v3813_v9  ;;  %3444 = vmatprep.subr.bf16.mxu0 %v3814_v10  ;;  %v648_v30 = vrot.slane %v646_v26, 7  ;;  %v3835_v46 = vld [vmem:[%s4962_s30 + $0x8] sm:$0xff]   ;;  %v3838_v49 = vld [vmem:[%s4962_s30 + $0x10] sm:$0xff]   ;;  %v3839_v50 = vld [vmem:[%s4962_s30 + $0x58] sm:$0xff]  }
  0x1c   : > { %3643 = vmatprep.subr.bf16.mxu1 %v4038_v2  ;;  %v3840_v51 = vld [vmem:[%s4962_s30 + $0xa0] sm:$0xff]   ;;  %v3841_v52 = vld [vmem:[%s4962_s30 + $0x18] sm:$0xff]   ;;  %v3843_v54 = vld [vmem:[%s4962_s30 + $0xa8] sm:$0xff]  }
  0x1d   : > { %v651_v33 = vor.u32 %v649_v27, %v648_v30  ;;  %v3842_v53 = vld [vmem:[%s4962_s30 + $0x60] sm:$0xff]   ;;  %v3845_v56 = vld [vmem:[%s4962_s30 + $0x68] sm:$0xff]   ;;  %v3846_v57 = vld [vmem:[%s4962_s30 + $0xb0] sm:$0xff]  }
  0x1e   : > { %3445 = vmatpush3.bf16.msra.mxu0 %v3815_v11  ;;  %v3844_v55 = vld [vmem:[%s4962_s30 + $0x20] sm:$0xff]   ;;  %v3847_v58 = vld [vmem:[%s4962_s30 + $0x28] sm:$0xff]   ;;  %v3848_v59 = vld [vmem:[%s4962_s30 + $0x70] sm:$0xff]  }
  0x1f   : > { %3644 = vmatpush3.bf16.msra.mxu1 %v3816_v12  ;;  %3446 = vmatprep.subr.bf16.mxu0 %v3817_v13  ;;  %v656_v35 = vsel %vm4245_vm4, 0, %v651_v33  ;;  %v3849_v60 = vld [vmem:[%s4962_s30 + $0xb8] sm:$0xff]   ;;  %v3850_v61 = vld [vmem:[%s4962_s30 + $0x30] sm:$0xff]   ;;  %v3221_v7 = vld [vmem:[%s4965_s28] ss:$0 sm:$0xff]  ;;  %s637_s28 = scalar_lea.vmem %s4968_s27, %s3218_s29  ;;  %s3220_s29 = sshll.u32 %s4970_s22, 3 }
  0x20   : > { %3645 = vmatprep.subr.bf16.mxu1 %v4038_v2  ;;  %v660_v36 = vsel %vm4256_vm6, %v656_v35, 0  ;;  %v3851_v62 = vld [vmem:[%s4962_s30 + $0x78] sm:$0xff]   ;;  %v3853_v30 = vld [vmem:[%s4936_s6] sm:$0xff]   ;;  %v3855_v33 = vld [vmem:[%s4936_s6 + $0x10] sm:$0xff]   ;;  %s641_s3 = scalar_lea.vmem %s4950_s20, %s3220_s29 }
  0x21   : > { %v662_v37 = vshrl.u32 %v660_v36, 16  ;;  %v664_v38 = vshll.u32 %v660_v36, 16  ;;  %v670_v39 = vrot.slane %v660_v36, 1  ;;  %v3852_v63 = vld [vmem:[%s4962_s30 + $0x38] sm:$0xff]   ;;  %v3857_v35 = vld [vmem:[%s4936_s6 + $0x20] sm:$0xff]   ;;  %vm4737_vm3 = vmand %vm2372_vm1, %vm2373_vm2 }
  0x22   : > { %3447 = vmatpush3.bf16.msra.mxu0 %v3818_v14 }
  0x23   : > { %3646 = vmatpush3.bf16.msra.mxu1 %v3819_v15  ;;  %3448 = vmatprep.subr.bf16.mxu0 %v3820_v16  ;;  %v666_v41 = vrot.slane %v664_v38, 1  ;;  %v3860_v38 = vld [vmem:[%s4936_s6 + $0x38] sm:$0xff]  }
  0x24   : > { %3647 = vmatprep.subr.bf16.mxu1 %v4038_v2 }
  0x25   : > { %v667_v43 = vor.u32 %v666_v41, %v662_v37  ;;  %v3859_v37 = vld [vmem:[%s4936_s6 + $0x30] sm:$0xff]   ;;  %v3865_v41 = vld [vmem:[%s4938_s8 + $0x48] sm:$0xff]  }
  0x26   : > { %3449 = vmatpush3.bf16.msra.mxu0 %v3821_v17 }
  0x27   : > { %3648 = vmatpush3.bf16.msra.mxu1 %v3822_v18  ;;  %3450 = vmatprep.subr.bf16.mxu0 %v3823_v19 }
  0x28   : > { %3649 = vmatprep.subr.bf16.mxu1 %v4038_v2  ;;  %903 = vmatprep.mubr.bf16.mxu0 %v667_v43 }
  0x2a   : > { %3451 = vmatpush3.bf16.msra.mxu0 %v3824_v20 }
  0x2b   : > { %3650 = vmatpush3.bf16.msra.mxu1 %v3825_v21  ;;  %3452 = vmatprep.subr.bf16.mxu0 %v3826_v23 }
  0x2c   : > { %3651 = vmatprep.subr.bf16.mxu1 %v4038_v2 }
  0x2e   : > { %3453 = vmatpush3.bf16.msra.mxu0 %v3827_v25 }
  0x2f   : > { %3652 = vmatpush3.bf16.msra.mxu1 %v3828_v29  ;;  %3469 = vmatprep.subr.bf16.mxu0 %v3830_v31  ;;  %v3854_v31 = vld [vmem:[%s4936_s6 + $0x8] sm:$0xff]  }
  0x30   : > { %3657 = vmatprep.subr.bf16.mxu1 %v4038_v2 }
  0x31   : > { %904 = vmatmul.mubr.bf16.vlgmr.msra.gmra.mrb[0].mxu0 %v660_v36  ;;  %v3858_v36 = vld [vmem:[%s4936_s6 + $0x28] sm:$0xff]  }
  0x32   : > { %3654 = vmatmul.mubr.bf16.vlgmr.msra.gmra.mrb[0].mxu1 %v670_v39  ;;  %3470 = vmatpush3.bf16.msra.mxu0 %v3832_v42  ;;  %v3862_v39 = vld [vmem:[%s4938_s8 + $0x40] sm:$0xff]   ;;  %v3867_v42 = vld [vmem:[%s4938_s8 + $0x8] sm:$0xff]  }
  0x33   : > { %3658 = vmatpush3.bf16.msra.mxu1 %v3829_v34  ;;  %3673 = vmatprep.mubr.msk.bf16.mxu1 %vm4039_vm0, %v4038_v2  ;;  %v3856_v34 = vld [vmem:[%s4936_s6 + $0x18] sm:$0xff]  }
  0x34   : > { %3659 = vmatprep.subr.bf16.mxu1 %v4038_v2  ;;  %3471 = vmatprep.subr.bf16.mxu0 %v3833_v44 }
  0x36   : > { %3472 = vmatpush3.bf16.msra.mxu0 %v3835_v46 }
  0x37   : > { %3660 = vmatpush3.bf16.msra.mxu1 %v3831_v40  ;;  %3473 = vmatprep.subr.bf16.mxu0 %v3836_v47  ;;  %v3864_v40 = vld [vmem:[%s4938_s8] sm:$0xff]  }
  0x38   : > { %3661 = vmatprep.subr.bf16.mxu1 %v4038_v2 }
  0x3a   : > { %3474 = vmatpush3.bf16.msra.mxu0 %v3838_v49 }
  0x3b   : > { %3662 = vmatpush3.bf16.msra.mxu1 %v3834_v45  ;;  %3475 = vmatprep.subr.bf16.mxu0 %v3839_v50 }
  0x3c   : > { %3663 = vmatprep.subr.bf16.mxu1 %v4038_v2 }
  0x3e   : > { %3476 = vmatpush3.bf16.msra.mxu0 %v3841_v52 }
  0x3f   : > { %3664 = vmatpush3.bf16.msra.mxu1 %v3837_v48  ;;  %3477 = vmatprep.subr.bf16.mxu0 %v3842_v53  ;;  %v3246_v48 = vld [vmem:[%s4935_s5] ss:$0 sm:$0xff] }
  0x40   : > { %3665 = vmatprep.subr.bf16.mxu1 %v4038_v2 }
  0x42   : > { %3478 = vmatpush3.bf16.msra.mxu0 %v3844_v55 }
  0x43   : > { %3666 = vmatpush3.bf16.msra.mxu1 %v3840_v51  ;;  %3479 = vmatprep.subr.bf16.mxu0 %v3845_v56  ;;  %v3861_v56 = vld [vmem:[%s4938_s8 + $0x80] sm:$0xff]  }
  0x44   : > { %3667 = vmatprep.subr.bf16.mxu1 %v4038_v2 }
  0x46   : > { %3480 = vmatpush3.bf16.msra.mxu0 %v3847_v58  ;;  %v3863_v58 = vld [vmem:[%s4938_s8 + $0x88] sm:$0xff]  }
  0x47   : > { %3668 = vmatpush3.bf16.msra.mxu1 %v3843_v54  ;;  %3481 = vmatprep.subr.bf16.mxu0 %v3848_v59  ;;  %v3866_v59 = vld [vmem:[%s4938_s8 + $0x90] sm:$0xff]  }
  0x48   : > { %3669 = vmatprep.subr.bf16.mxu1 %v4038_v2 }
  0x4a   : > { %3482 = vmatpush3.bf16.msra.mxu0 %v3850_v61  ;;  %v3869_v61 = vld [vmem:[%s4938_s8 + $0x98] sm:$0xff]  }
  0x4b   : > { %3670 = vmatpush3.bf16.msra.mxu1 %v3846_v57  ;;  %3483 = vmatprep.subr.bf16.mxu0 %v3851_v62  ;;  %v3870_v62 = vld [vmem:[%s4938_s8 + $0x10] sm:$0xff]  }
  0x4c   : > { %3671 = vmatprep.subr.bf16.mxu1 %v4038_v2 }
  0x4e   : > { %3484 = vmatpush3.bf16.msra.mxu0 %v3852_v63  ;;  %v3871_v63 = vld [vmem:[%s4938_s8 + $0x58] sm:$0xff]  }
  0x4f   : > { %3672 = vmatpush3.bf16.msra.mxu1 %v3849_v60  ;;  %3677 = vmatprep.subr.bf16.mxu0 %v4038_v2  ;;  %v3868_v60 = vld [vmem:[%s4938_s8 + $0x50] sm:$0xff]  }
  0x50   : > { %3509 = vmatprep.subr.bf16.mxu1 %v3862_v39  ;;  %v3888_v39 = vld [vmem:[%s4940_s10 + $0x18] sm:$0xff]  }
 0x104   : > { %v3454_v5 = vpop.f32.mrb[0].mxu0 }
 0x105   : > { %v945_v0 = vpop.f32.mrb[0].mxu1  ;;  %v3455_v6 = vpop.f32.mrb[1].mxu0 }
 0x106   : > { %v3655_v1 = vpop.f32.mrb[1].mxu1  ;;  %v3456_v8 = vadd.f32 %v3455_v6, %v3454_v5  ;;  %v3457_v9 = vpop.f32.mrb[2].mxu0  ;;  %v3876_v5 = vld [vmem:[%s4938_s8 + $0x20] sm:$0xff]   ;;  %v3877_v6 = vld [vmem:[%s4938_s8 + $0x68] sm:$0xff]  }
 0x107   : > { %v948_v3 = vpop.f32.mrb[2].mxu1  ;;  %v3458_v10 = vpop.f32.mrb[3].mxu0  ;;  %v3873_v1 = vld [vmem:[%s4938_s8 + $0x18] sm:$0xff]   ;;  %v3880_v9 = vld [vmem:[%s4938_s8 + $0x70] sm:$0xff]  }
 0x108   : > { %v3656_v4 = vpop.f32.mrb[3].mxu1  ;;  %v906_v11 = vadd.f32 %v3456_v8, %v3221_v7  ;;  %v3874_v3 = vld [vmem:[%s4938_s8 + $0x60] sm:$0xff]   ;;  %v3878_v7 = vld [vmem:[%s4938_s8 + $0xb0] sm:$0xff]   ;;  %v3879_v8 = vld [vmem:[%s4938_s8 + $0x28] sm:$0xff]  }
 0x109   : > { %v3875_v4 = vld [vmem:[%s4938_s8 + $0xa8] sm:$0xff]   ;;  %v3881_v10 = vld [vmem:[%s4938_s8 + $0xb8] sm:$0xff]  }
 0x10a   : > { %v4347_v12 = vadd.f32 %v945_v0, %v906_v11  ;;  %v3872_v0 = vld [vmem:[%s4938_s8 + $0xa0] sm:$0xff]   ;;  %v3882_v11 = vld [vmem:[%s4938_s8 + $0x30] sm:$0xff]  }
 0x10c   : > { %v951_v13 = vmax.f32 %v4347_v12, 0.0 }
 0x10e   : > { %v952_v14 = vmax.f32 %v951_v13, 0.0 }
 0x110   : > { %v953_v15 = vpack.c.bf16 %v952_v14, %v952_v14  ;;  %v3883_v14 = vld [vmem:[%s4938_s8 + $0x78] sm:$0xff]  }
 0x112   : > { %v955_v16 = vshrl.u32 %v953_v15, 16  ;;  %v958_v17 = vshll.u32 %v953_v15, 16  ;;  %v3884_v15 = vld [vmem:[%s4938_s8 + $0x38] sm:$0xff]  }
 0x114   : > { %v957_v18 = vrot.slane %v955_v16, 6  ;;  %v960_v19 = vrot.slane %v958_v17, 7  ;;  %v3271_v16 = vld [vmem:[%s4937_s7] ss:$0 sm:$0xff] }
 0x116   : > { %v961_v20 = vor.u32 %v960_v19, %v957_v18 }
 0x118   : > { %v966_v21 = vsel %vm965_vm11, 0, %v961_v20 }
 0x119   : > { %v970_v22 = vsel %vm969_vm12, %v966_v21, 0 }
 0x11a   : > { %v981_v23 = vrot.slane %v970_v22, 3  ;;  %v972_v24 = vshrl.u32 %v970_v22, 16  ;;  %v975_v25 = vshll.u32 %v970_v22, 16 }
 0x11c   : > { %3674 = vmatmul.mubr.bf16.vlgmr.msra.gmra.mrb[4].mxu1 %v981_v23  ;;  %v974_v26 = vrot.slane %v972_v24, 1  ;;  %v977_v27 = vrot.slane %v975_v25, 2 }
 0x11d   : > { %3510 = vmatpush3.bf16.msra.mxu1 %v3864_v40  ;;  %v3889_v40 = vld [vmem:[%s4940_s10 + $0x20] sm:$0xff]  }
 0x11e   : > { %v978_v29 = vor.u32 %v977_v27, %v974_v26  ;;  %3511 = vmatprep.subr.bf16.mxu1 %v3865_v41  ;;  %v3890_v41 = vld [vmem:[%s4940_s10 + $0x28] sm:$0xff]  }
 0x120   : > { %1214 = vmatprep.mubr.bf16.mxu0 %v978_v29 }
 0x121   : > { %1215 = vmatmul.mubr.bf16.vlgmr.msra.gmra.mrb[4].mxu0 %v970_v22  ;;  %3512 = vmatpush3.bf16.msra.mxu1 %v3867_v42  ;;  %v3891_v42 = vld [vmem:[%s4940_s10 + $0x30] sm:$0xff]  }
 0x122   : > { %3678 = vmatpush3.bf16.msra.mxu0 %v3853_v30  ;;  %3693 = vmatprep.mubr.msk.bf16.mxu0 %vm4039_vm0, %v4038_v2 }
 0x123   : > { %3679 = vmatprep.subr.bf16.mxu0 %v4038_v2  ;;  %3513 = vmatprep.subr.bf16.mxu1 %v3868_v60  ;;  %v3919_v60 = vld [vmem:[%s4942_s12 + $0x84] ss:$8 sps:$4 sm:$0xff]  }
 0x125   : > { %3514 = vmatpush3.bf16.msra.mxu1 %v3870_v62  ;;  %v3922_v62 = vld [vmem:[%s4942_s12 + $0x94] ss:$8 sps:$4 sm:$0xff]  }
 0x126   : > { %3680 = vmatpush3.bf16.msra.mxu0 %v3854_v31  ;;  %3515 = vmatprep.subr.bf16.mxu1 %v3871_v63  ;;  %v3920_v63 = vld [vmem:[%s4942_s12 + $0x90] ss:$8 sps:$4 sm:$0xff]  }
 0x127   : > { %3681 = vmatprep.subr.bf16.mxu0 %v4038_v2 }
 0x129   : > { %3516 = vmatpush3.bf16.msra.mxu1 %v3873_v1  ;;  %v3923_v1 = vld [vmem:[%s4942_s12 + $0xa0] ss:$8 sps:$4 sm:$0xff]  }
 0x12a   : > { %3682 = vmatpush3.bf16.msra.mxu0 %v3855_v33  ;;  %3517 = vmatprep.subr.bf16.mxu1 %v3874_v3 }
 0x12b   : > { %3683 = vmatprep.subr.bf16.mxu0 %v4038_v2 }
 0x12d   : > { %3518 = vmatpush3.bf16.msra.mxu1 %v3876_v5 }
 0x12e   : > { %3684 = vmatpush3.bf16.msra.mxu0 %v3856_v34  ;;  %3519 = vmatprep.subr.bf16.mxu1 %v3877_v6 }
 0x12f   : > { %3685 = vmatprep.subr.bf16.mxu0 %v4038_v2 }
 0x131   : > { %3520 = vmatpush3.bf16.msra.mxu1 %v3879_v8  ;;  %v3280_v8 = vld [vmem:[%s4939_s9] ss:$0 sm:$0xff] }
 0x132   : > { %3686 = vmatpush3.bf16.msra.mxu0 %v3857_v35  ;;  %3521 = vmatprep.subr.bf16.mxu1 %v3880_v9 }
 0x133   : > { %3687 = vmatprep.subr.bf16.mxu0 %v4038_v2 }
 0x135   : > { %3522 = vmatpush3.bf16.msra.mxu1 %v3882_v11 }
 0x136   : > { %3688 = vmatpush3.bf16.msra.mxu0 %v3858_v36  ;;  %3523 = vmatprep.subr.bf16.mxu1 %v3883_v14  ;;  %v3885_v36 = vld [vmem:[%s4940_s10] sm:$0xff]  }
 0x137   : > { %3689 = vmatprep.subr.bf16.mxu0 %v4038_v2 }
 0x139   : > { %3524 = vmatpush3.bf16.msra.mxu1 %v3884_v15 }
 0x13a   : > { %3690 = vmatpush3.bf16.msra.mxu0 %v3859_v37  ;;  %3717 = vmatprep.subr.bf16.mxu1 %v4038_v2  ;;  %v3886_v37 = vld [vmem:[%s4940_s10 + $0x8] sm:$0xff]  }
 0x13b   : > { %3691 = vmatprep.subr.bf16.mxu0 %v4038_v2 }
 0x13e   : > { %3692 = vmatpush3.bf16.msra.mxu0 %v3860_v38  ;;  %v3887_v38 = vld [vmem:[%s4940_s10 + $0x10] sm:$0xff]  }
 0x13f   : > { %3697 = vmatprep.subr.bf16.mxu0 %v4038_v2 }
 0x1ef   : > { %v1256_v43 = vpop.f32.mrb[4].mxu1 }
 0x1f0   : > { %v3675_v44 = vpop.f32.mrb[5].mxu1 }
 0x1f1   : > { %v1259_v45 = vpop.f32.mrb[6].mxu1  ;;  %v3893_v44 = vld [vmem:[%s4942_s12] ss:$8 sps:$4 sm:$0xff]  }
 0x1f2   : > { %v3676_v46 = vpop.f32.mrb[7].mxu1  ;;  %v3895_v45 = vld [vmem:[%s4942_s12 + $0x4] ss:$8 sps:$4 sm:$0xff]  }
 0x1f3   : > { %v3898_v46 = vld [vmem:[%s4942_s12 + $0x14] ss:$8 sps:$4 sm:$0xff]  }
 0x1f4   : > { %v3485_v47 = vpop.f32.mrb[4].mxu0 }
 0x1f5   : > { %v3486_v49 = vpop.f32.mrb[5].mxu0 }
 0x1f6   : > { %v3487_v50 = vadd.f32 %v3486_v49, %v3485_v47  ;;  %v3488_v51 = vpop.f32.mrb[6].mxu0  ;;  %v3896_v47 = vld [vmem:[%s4942_s12 + $0x10] ss:$8 sps:$4 sm:$0xff]   ;;  %v3899_v49 = vld [vmem:[%s4942_s12 + $0x20] ss:$8 sps:$4 sm:$0xff]  }
 0x1f7   : > { %v3489_v52 = vpop.f32.mrb[7].mxu0  ;;  %v3902_v51 = vld [vmem:[%s4942_s12 + $0x30] ss:$8 sps:$4 sm:$0xff]  }
 0x1f8   : > { %v1217_v53 = vadd.f32 %v3487_v50, %v3246_v48  ;;  %v3901_v48 = vld [vmem:[%s4942_s12 + $0x24] ss:$8 sps:$4 sm:$0xff]   ;;  %v3904_v50 = vld [vmem:[%s4942_s12 + $0x34] ss:$8 sps:$4 sm:$0xff]  }
 0x1f9   : > { %v3907_v52 = vld [vmem:[%s4942_s12 + $0x44] ss:$8 sps:$4 sm:$0xff]  }
 0x1fa   : > { %v1257_v54 = vadd.f32 %v1256_v43, %v1217_v53  ;;  %v3892_v43 = vld [vmem:[%s4940_s10 + $0x38] sm:$0xff]   ;;  %v3905_v53 = vld [vmem:[%s4942_s12 + $0x40] ss:$8 sps:$4 sm:$0xff]  }
 0x1fc   : > { %v1262_v55 = vmax.f32 %v1257_v54, 0.0  ;;  %v3910_v54 = vld [vmem:[%s4942_s12 + $0x54] ss:$8 sps:$4 sm:$0xff]  }
 0x1fe   : > { %v1263_v57 = vpack.c.bf16 %v1262_v55, %v1262_v55  ;;  %v3908_v55 = vld [vmem:[%s4942_s12 + $0x50] ss:$8 sps:$4 sm:$0xff]  }
 0x200   : > { %3694 = vmatmul.mubr.bf16.vlgmr.msra.gmra.mrb[8].mxu0 %v1263_v57  ;;  %v3911_v57 = vld [vmem:[%s4942_s12 + $0x60] ss:$8 sps:$4 sm:$0xff]  }
 0x201   : > { %3698 = vmatpush3.bf16.msra.mxu0 %v3861_v56  ;;  %3713 = vmatprep.mubr.msk.bf16.mxu0 %vm4039_vm0, %v4038_v2  ;;  %v3913_v56 = vld [vmem:[%s4942_s12 + $0x64] ss:$8 sps:$4 sm:$0xff]  }
 0x202   : > { %3699 = vmatprep.subr.bf16.mxu0 %v4038_v2 }
 0x205   : > { %3700 = vmatpush3.bf16.msra.mxu0 %v3863_v58  ;;  %v3916_v58 = vld [vmem:[%s4942_s12 + $0x74] ss:$8 sps:$4 sm:$0xff]  }
 0x206   : > { %3701 = vmatprep.subr.bf16.mxu0 %v4038_v2 }
 0x209   : > { %3702 = vmatpush3.bf16.msra.mxu0 %v3866_v59  ;;  %v3914_v59 = vld [vmem:[%s4942_s12 + $0x70] ss:$8 sps:$4 sm:$0xff]  }
 0x20a   : > { %3703 = vmatprep.subr.bf16.mxu0 %v4038_v2 }
 0x20d   : > { %3704 = vmatpush3.bf16.msra.mxu0 %v3869_v61  ;;  %v3917_v61 = vld [vmem:[%s4942_s12 + $0x80] ss:$8 sps:$4 sm:$0xff]  }
 0x20e   : > { %3705 = vmatprep.subr.bf16.mxu0 %v4038_v2 }
 0x211   : > { %3706 = vmatpush3.bf16.msra.mxu0 %v3872_v0  ;;  %v3925_v0 = vld [vmem:[%s4942_s12 + $0xa4] ss:$8 sps:$4 sm:$0xff]  }
 0x212   : > { %3707 = vmatprep.subr.bf16.mxu0 %v4038_v2 }
 0x215   : > { %3708 = vmatpush3.bf16.msra.mxu0 %v3875_v4 }
 0x216   : > { %3709 = vmatprep.subr.bf16.mxu0 %v4038_v2 }
 0x219   : > { %3710 = vmatpush3.bf16.msra.mxu0 %v3878_v7 }
 0x21a   : > { %3711 = vmatprep.subr.bf16.mxu0 %v4038_v2 }
 0x21d   : > { %3712 = vmatpush3.bf16.msra.mxu0 %v3881_v10 }
 0x21e   : > { %2114 = vmatprep.subr.bf16.mxu0 %v3895_v45 }
 0x2d3   : > { %v1369_v17 = vpop.f32.mrb[8].mxu0 }
 0x2d4   : > { %v1370_v18 = vadd.f32 %v3271_v16, %v1369_v17  ;;  %v3695_v19 = vpop.f32.mrb[9].mxu0 }
 0x2d5   : > { %v1372_v20 = vpop.f32.mrb[10].mxu0  ;;  %v3928_v19 = vld [vmem:[%s4942_s12 + $0xb4] ss:$8 sps:$4 sm:$0xff]  }
 0x2d6   : > { %v4477_v21 = vadd.f32 %v1370_v18, %v951_v13  ;;  %v3696_v22 = vpop.f32.mrb[11].mxu0  ;;  %v3926_v20 = vld [vmem:[%s4942_s12 + $0xb0] ss:$8 sps:$4 sm:$0xff]  }
 0x2d7   : > { %v3931_v22 = vld [vmem:[%s4942_s12 + $0xc4] ss:$8 sps:$4 sm:$0xff]  }
 0x2d8   : > { %v1376_v23 = vmax.f32 %v4477_v21, 0.0 }
 0x2da   : > { %v1377_v24 = vpack.c.bf16 %v1376_v23, %v1376_v23  ;;  %v3929_v23 = vld [vmem:[%s4942_s12 + $0xc0] ss:$8 sps:$4 sm:$0xff]  }
 0x2dc   : > { %v1379_v25 = vshrl.u32 %v1377_v24, 16  ;;  %v1382_v27 = vshll.u32 %v1377_v24, 16  ;;  %v3934_v24 = vld [vmem:[%s4942_s12 + $0xd4] ss:$8 sps:$4 sm:$0xff]  }
 0x2de   : > { %v1381_v26 = vrot.slane %v1379_v25, 7  ;;  %v3932_v25 = vld [vmem:[%s4942_s12 + $0xd0] ss:$8 sps:$4 sm:$0xff]  }
 0x2e0   : > { %v1384_v29 = vor.u32 %v1382_v27, %v1381_v26  ;;  %v3937_v26 = vld [vmem:[%s4942_s12 + $0xe4] ss:$8 sps:$4 sm:$0xff]   ;;  %v3935_v27 = vld [vmem:[%s4942_s12 + $0xe0] ss:$8 sps:$4 sm:$0xff]  }
 0x2e2   : > { %v1386_v30 = vsel %vm4245_vm4, 0, %v1384_v29  ;;  %v3940_v29 = vld [vmem:[%s4942_s12 + $0xf4] ss:$8 sps:$4 sm:$0xff]  }
 0x2e3   : > { %v1387_v31 = vsel %vm4256_vm6, %v1386_v30, 0  ;;  %v3938_v30 = vld [vmem:[%s4942_s12 + $0xf0] ss:$8 sps:$4 sm:$0xff]  }
 0x2e4   : > { %v1397_v33 = vrot.slane %v1387_v31, 1  ;;  %v1391_v34 = vshll.u32 %v1387_v31, 16  ;;  %v1389_v12 = vshrl.u32 %v1387_v31, 16 }
 0x2e6   : > { %3714 = vmatmul.mubr.bf16.vlgmr.msra.gmra.mrb[12].mxu0 %v1397_v33  ;;  %v1393_v13 = vrot.slane %v1391_v34, 1  ;;  %v3305_v33 = vld [vmem:[%s4941_s11] ss:$0 sm:$0xff] }
 0x2e7   : > { %2115 = vmatpush1.bf16.msra.mxu0 %v3893_v44 }
 0x2e8   : > { %v1394_v35 = vor.u32 %v1393_v13, %v1389_v12  ;;  %2116 = vmatprep.subr.bf16.mxu0 %v3898_v46 }
 0x2ea   : > { %1630 = vmatprep.mubr.bf16.mxu1 %v1394_v35 }
 0x2eb   : > { %1631 = vmatmul.mubr.bf16.vlgmr.msra.gmra.mrb[8].mxu1 %v1387_v31  ;;  %2117 = vmatpush1.bf16.msra.mxu0 %v3896_v47  ;;  %v3943_v31 = vld [vmem:[%s4942_s12 + $0x104] ss:$8 sps:$4 sm:$0xff]  }
 0x2ec   : > { %3718 = vmatpush3.bf16.msra.mxu1 %v3885_v36  ;;  %3733 = vmatprep.mubr.msk.bf16.mxu1 %vm4039_vm0, %v4038_v2 }
 0x2ed   : > { %3719 = vmatprep.subr.bf16.mxu1 %v4038_v2  ;;  %2118 = vmatprep.subr.bf16.mxu0 %v3901_v48 }
 0x2ef   : > { %2119 = vmatpush1.bf16.msra.mxu0 %v3899_v49  ;;  %v3946_v49 = vld [vmem:[%s4942_s12 + $0x114] ss:$8 sps:$4 sm:$0xff]  }
 0x2f0   : > { %3720 = vmatpush3.bf16.msra.mxu1 %v3886_v37  ;;  %2120 = vmatprep.subr.bf16.mxu0 %v3904_v50  ;;  %v4040_v50 = vmov 0  }
 0x2f1   : > { %3721 = vmatprep.subr.bf16.mxu1 %v4038_v2 }
 0x2f3   : > { %2121 = vmatpush1.bf16.msra.mxu0 %v3902_v51  ;;  %v3949_v51 = vld [vmem:[%s4942_s12 + $0x124] ss:$8 sps:$4 sm:$0xff]  }
 0x2f4   : > { %3722 = vmatpush3.bf16.msra.mxu1 %v3887_v38  ;;  %2122 = vmatprep.subr.bf16.mxu0 %v3907_v52  ;;  %v3947_v52 = vld [vmem:[%s4942_s12 + $0x120] ss:$8 sps:$4 sm:$0xff]  }
 0x2f5   : > { %3723 = vmatprep.subr.bf16.mxu1 %v4038_v2 }
 0x2f7   : > { %2123 = vmatpush1.bf16.msra.mxu0 %v3905_v53  ;;  %v3952_v53 = vld [vmem:[%s4942_s12 + $0x134] ss:$8 sps:$4 sm:$0xff]  }
 0x2f8   : > { %3724 = vmatpush3.bf16.msra.mxu1 %v3888_v39  ;;  %2124 = vmatprep.subr.bf16.mxu0 %v3910_v54  ;;  %v3950_v54 = vld [vmem:[%s4942_s12 + $0x130] ss:$8 sps:$4 sm:$0xff]  }
 0x2f9   : > { %3725 = vmatprep.subr.bf16.mxu1 %v4038_v2 }
 0x2fb   : > { %2125 = vmatpush1.bf16.msra.mxu0 %v3908_v55  ;;  %v3955_v55 = vld [vmem:[%s4942_s12 + $0x144] ss:$8 sps:$4 sm:$0xff]  }
 0x2fc   : > { %3726 = vmatpush3.bf16.msra.mxu1 %v3889_v40  ;;  %2126 = vmatprep.subr.bf16.mxu0 %v3913_v56  ;;  %v3953_v56 = vld [vmem:[%s4942_s12 + $0x140] ss:$8 sps:$4 sm:$0xff]  }
 0x2fd   : > { %3727 = vmatprep.subr.bf16.mxu1 %v4038_v2 }
 0x2ff   : > { %2127 = vmatpush1.bf16.msra.mxu0 %v3911_v57  ;;  %v3958_v57 = vld [vmem:[%s4942_s12 + $0x154] ss:$8 sps:$4 sm:$0xff]  }
 0x300   : > { %3728 = vmatpush3.bf16.msra.mxu1 %v3890_v41  ;;  %2128 = vmatprep.subr.bf16.mxu0 %v3916_v58  ;;  %v3956_v58 = vld [vmem:[%s4942_s12 + $0x150] ss:$8 sps:$4 sm:$0xff]  }
 0x301   : > { %3729 = vmatprep.subr.bf16.mxu1 %v4038_v2 }
 0x303   : > { %2129 = vmatpush1.bf16.msra.mxu0 %v3914_v59  ;;  %v3961_v59 = vld [vmem:[%s4942_s12 + $0x164] ss:$8 sps:$4 sm:$0xff]  }
 0x304   : > { %3730 = vmatpush3.bf16.msra.mxu1 %v3891_v42  ;;  %2130 = vmatprep.subr.bf16.mxu0 %v3919_v60  ;;  %v3959_v60 = vld [vmem:[%s4942_s12 + $0x160] ss:$8 sps:$4 sm:$0xff]  }
 0x305   : > { %3731 = vmatprep.subr.bf16.mxu1 %v4038_v2 }
 0x307   : > { %2131 = vmatpush1.bf16.msra.mxu0 %v3917_v61  ;;  %v3964_v61 = vld [vmem:[%s4942_s12 + $0x174] ss:$8 sps:$4 sm:$0xff]  }
 0x308   : > { %3732 = vmatpush3.bf16.msra.mxu1 %v3892_v43  ;;  %2132 = vmatprep.subr.bf16.mxu0 %v3922_v62  ;;  %v3962_v62 = vld [vmem:[%s4942_s12 + $0x170] ss:$8 sps:$4 sm:$0xff]  }
 0x309   : > { %3742 = vmatprep.subr.mxu1 %v4038_v2 }
 0x30b   : > { %2133 = vmatpush1.bf16.msra.mxu0 %v3920_v63 }
 0x30c   : > { %2134 = vmatprep.subr.bf16.mxu0 %v3925_v0  ;;  %v1864_v0 = vlaneseq }
 0x30f   : > { %2135 = vmatpush1.bf16.msra.mxu0 %v3923_v1  ;;  %v2199_v1 = vand.u32 127, %v1864_v0 }
 0x310   : > { %2136 = vmatprep.subr.bf16.mxu0 %v3928_v19 }
 0x313   : > { %2137 = vmatpush1.bf16.msra.mxu0 %v3926_v20 }
 0x314   : > { %2138 = vmatprep.subr.bf16.mxu0 %v3931_v22  ;;  %v3966_v22 = vld [vmem:[%s4944_s14] sm:$0xff]  }
 0x317   : > { %2139 = vmatpush1.bf16.msra.mxu0 %v3929_v23 }
 0x318   : > { %2140 = vmatprep.subr.bf16.mxu0 %v3934_v24  ;;  %v3967_v24 = vld [vmem:[%s4944_s14 + $0x48] sm:$0xff]  }
 0x31b   : > { %2141 = vmatpush1.bf16.msra.mxu0 %v3932_v25  ;;  %v3968_v25 = vld [vmem:[%s4944_s14 + $0x8] sm:$0xff]  }
 0x31c   : > { %2142 = vmatprep.subr.bf16.mxu0 %v3937_v26  ;;  %v3969_v26 = vld [vmem:[%s4944_s14 + $0x50] sm:$0xff]  }
 0x31f   : > { %2143 = vmatpush1.bf16.msra.mxu0 %v3935_v27  ;;  %v3970_v27 = vld [vmem:[%s4944_s14 + $0x10] sm:$0xff]  }
 0x320   : > { %2144 = vmatprep.subr.bf16.mxu0 %v3940_v29  ;;  %v3971_v29 = vld [vmem:[%s4944_s14 + $0x58] sm:$0xff]  }
 0x323   : > { %2145 = vmatpush1.bf16.msra.mxu0 %v3938_v30  ;;  %v3972_v30 = vld [vmem:[%s4944_s14 + $0x18] sm:$0xff]  }
 0x324   : > { %2155 = vmatprep.subr.bf16.mxu0 %v3943_v31  ;;  %v3973_v31 = vld [vmem:[%s4944_s14 + $0x60] sm:$0xff]  }
 0x3b9   : > { %v1672_v3 = vpop.f32.mrb[12].mxu0 }
 0x3ba   : > { %v3715_v4 = vpop.f32.mrb[13].mxu0 }
 0x3bb   : > { %v1675_v5 = vpop.f32.mrb[14].mxu0  ;;  %v2200_v4 = vmul.u32 2, %v2199_v1  ;;  %v3993_v1 = vld [vmem:[%s4946_s16 + $0x48] sm:$0xff]  }
 0x3bc   : > { %v3716_v6 = vpop.f32.mrb[15].mxu0 }
 0x3bd   : > { %v1862_v6 = vld [vmem:[%s4943_s13] sm:$0x3] }
 0x3be   : > { %v3525_v7 = vpop.f32.mrb[8].mxu1 }
 0x3bf   : > { %v3526_v9 = vpop.f32.mrb[9].mxu1 }
 0x3c0   : > { %v3527_v10 = vadd.f32 %v3526_v9, %v3525_v7  ;;  %v3528_v11 = vpop.f32.mrb[10].mxu1 }
 0x3c1   : > { %v3529_v14 = vpop.f32.mrb[11].mxu1 }
 0x3c2   : > { %v1633_v15 = vadd.f32 %v3527_v10, %v3280_v8  ;;  %v2204_v8 = vadd.s32 1, %v2200_v4 }
 0x3c4   : > { %v1673_v16 = vadd.f32 %v1672_v3, %v1633_v15  ;;  %v1865_v3 = vshrl.u32 %v1864_v0, 7  ;;  %v3992_v0 = vld [vmem:[%s4946_s16] sm:$0xff]  }
 0x3c6   : > { %v1678_v17 = vmax.f32 %v1673_v16, 0.0  ;;  %v1866_v5 = vsub.s32 0, %v1865_v3  ;;  %v1870_v7 = vsub.s32 1, %v1865_v3  ;;  %vm2201_vm13 = vcmp.eq.s32.totalorder %v1865_v3, %v2200_v4  ;;  %v3995_v4 = vld [vmem:[%s4946_s16 + $0x8] sm:$0xff]  }
 0x3c7   : > { %vm2205_vm14 = vcmp.eq.s32.totalorder %v1865_v3, %v2204_v8  ;;  %v3362_v16 = vsel %vm2201_vm13, 1.0, %v4038_v2  ;;  %v3991_v3 = vld [vmem:[%s4946_s16 + $0x88] sm:$0xff]   ;;  %v3997_v8 = vld [vmem:[%s4946_s16 + $0x98] sm:$0xff]  }
 0x3c8   : > { %v1679_v18 = vpack.c.bf16 %v1678_v17, %v1678_v17  ;;  %v1867_v9 = vrot.slane %v1862_v6, %v1866_v5  ;;  %v1871_v10 = vrot.slane %v1862_v6, %v1870_v7  ;;  %v3965_v17 = vld [vmem:[%s4944_s14 + $0x40] sm:$0xff]   ;;  %v3363_v20 = vsel %vm2205_vm14, 1.0, %v4038_v2  ;;  %v3996_v5 = vld [vmem:[%s4946_s16 + $0x50] sm:$0xff]  }
 0x3c9   : > { %v3994_v6 = vld [vmem:[%s4946_s16 + $0x90] sm:$0xff]  }
 0x3ca   : > { %3734 = vmatmul.mubr.bf16.vlgmr.msra.gmra.mrb[12].mxu1 %v1679_v18  ;;  %v3998_v7 = vld [vmem:[%s4946_s16 + $0x10] sm:$0xff]  }
 0x3cb   : > { %3744 = vmatprep.mubr.msk.f32.mxu1 %vm4039_vm0, %v4038_v2 }
 0x49d   : > { %v1785_v34 = vpop.f32.mrb[12].mxu1 }
 0x49e   : > { %v1786_v12 = vadd.f32 %v3305_v33, %v1785_v34  ;;  %v3735_v13 = vpop.f32.mrb[13].mxu1  ;;  %v3974_v33 = vld [vmem:[%s4944_s14 + $0x20] sm:$0xff]   ;;  %v3975_v34 = vld [vmem:[%s4944_s14 + $0x68] sm:$0xff]  }
 0x49f   : > { %v1788_v35 = vpop.f32.mrb[14].mxu1  ;;  %v3977_v13 = vld [vmem:[%s4944_s14 + $0x70] sm:$0xff]  }
 0x4a0   : > { %v1791_v36 = vadd.f32 %v1786_v12, %v4477_v21  ;;  %v3736_v37 = vpop.f32.mrb[15].mxu1  ;;  %v3941_v21 = vld [vmem:[%s4942_s12 + $0x100] ss:$8 sps:$4 sm:$0xff]   ;;  %v3978_v35 = vld [vmem:[%s4944_s14 + $0x30] sm:$0xff]  }
 0x4a1   : > { %v3976_v12 = vld [vmem:[%s4944_s14 + $0x28] sm:$0xff]   ;;  %v3980_v37 = vld [vmem:[%s4944_s14 + $0x38] sm:$0xff]  }
 0x4a2   : > { %v1792_v38 = vpack.c.bf16 %v1791_v36, %v1791_v36  ;;  %v3979_v36 = vld [vmem:[%s4944_s14 + $0x78] sm:$0xff]  }
 0x4a4   : > { %v1794_v39 = vshrl.u32 %v1792_v38, 16  ;;  %v1797_v41 = vshll.u32 %v1792_v38, 16 }
 0x4a6   : > { %v1796_v40 = vrot.slane %v1794_v39, 7 }
 0x4a8   : > { %v1799_v42 = vor.u32 %v1797_v41, %v1796_v40 }
 0x4aa   : > { %v1801_v43 = vsel %vm4245_vm4, 0, %v1799_v42 }
 0x4ab   : > { %v1802_v44 = vsel %vm4256_vm6, %v1801_v43, 0 }
 0x4ac   : > { %v1806_v45 = vshll.u32 %v1802_v44, 16  ;;  %v1804_v46 = vshrl.u32 %v1802_v44, 16  ;;  %v1812_v63 = vrot.slane %v1802_v44, 1 }
 0x4ae   : > { %v1808_v47 = vrot.slane %v1806_v45, 1 }
 0x4b0   : > { %v1809_v48 = vor.u32 %v1808_v47, %v1804_v46 }
 0x4b2   : > { %2146 = vmatprep.mubr.bf16.mxu0 %v1809_v48  ;;  %v4017_v48 = vld [vmem:[%s4948_s18 + $0x50] sm:$0xff]  }
 0x4b3   : > { %2147 = vmatmul.mubr.bf16.vlgmr.msra.gmra.mrb[16].mxu0 %v1802_v44 }
 0x4b4   : > { %2156 = vmatpush1.bf16.msra.mxu0 %v3941_v21  ;;  %2187 = vmatprep.mubr.bf16.mxu0 %v4040_v50 }
 0x4b5   : > { %2157 = vmatprep.subr.bf16.mxu0 %v3946_v49 }
 0x4b8   : > { %2158 = vmatpush1.bf16.msra.mxu0 %v3944_v32 }
 0x4b9   : > { %2159 = vmatprep.subr.bf16.mxu0 %v3949_v51 }
 0x4bc   : > { %2160 = vmatpush1.bf16.msra.mxu0 %v3947_v52 }
 0x4bd   : > { %2161 = vmatprep.subr.bf16.mxu0 %v3952_v53  ;;  %v3981_v53 = vld [vmem:[%s4944_s14 + $0x80] sm:$0xff]  }
 0x4c0   : > { %2162 = vmatpush1.bf16.msra.mxu0 %v3950_v54  ;;  %v3982_v54 = vld [vmem:[%s4944_s14 + $0x88] sm:$0xff]  }
 0x4c1   : > { %2163 = vmatprep.subr.bf16.mxu0 %v3955_v55  ;;  %v3983_v55 = vld [vmem:[%s4944_s14 + $0x90] sm:$0xff]  }
 0x4c4   : > { %2164 = vmatpush1.bf16.msra.mxu0 %v3953_v56  ;;  %v3984_v56 = vld [vmem:[%s4944_s14 + $0x98] sm:$0xff]  }
 0x4c5   : > { %2165 = vmatprep.subr.bf16.mxu0 %v3958_v57  ;;  %v3985_v57 = vld [vmem:[%s4944_s14 + $0xa0] sm:$0xff]  }
 0x4c8   : > { %2166 = vmatpush1.bf16.msra.mxu0 %v3956_v58  ;;  %v3986_v58 = vld [vmem:[%s4944_s14 + $0xa8] sm:$0xff]  }
 0x4c9   : > { %2167 = vmatprep.subr.bf16.mxu0 %v3961_v59  ;;  %v3987_v59 = vld [vmem:[%s4944_s14 + $0xb0] sm:$0xff]  }
 0x4cc   : > { %2168 = vmatpush1.bf16.msra.mxu0 %v3959_v60  ;;  %v3988_v60 = vld [vmem:[%s4944_s14 + $0xb8] sm:$0xff]  }
 0x4cd   : > { %2169 = vmatprep.subr.bf16.mxu0 %v3964_v61 }
 0x4d0   : > { %2170 = vmatpush1.bf16.msra.mxu0 %v3962_v62  ;;  %v3989_v62 = vld [vmem:[%s4946_s16 + $0x80] sm:$0xff]  }
 0x4d1   : > { %3737 = vmatprep.subr.mxu0 %v4038_v2 }
 0x4d3   : > { %2188 = vmatmul.mubr.bf16.vlgmr.msra.gmra.mrb[16].mxu0 %v1812_v63  ;;  %v3990_v63 = vld [vmem:[%s4946_s16 + $0x40] sm:$0xff]  }
 0x4d4   : > { %3739 = vmatprep.mubr.msk.f32.mxu0 %vm4039_vm0, %v4038_v2 }
 0x5a6   : > { %v2189_v11 = vpop.f32.mrb[16].mxu0 }
 0x5a7   : > { %v3787_v14 = vadd.f32 %v2189_v11, %v1867_v9  ;;  %v2191_v15 = vpop.f32.mrb[17].mxu0  ;;  %v3999_v9 = vld [vmem:[%s4946_s16 + $0x58] sm:$0xff]  }
 0x5a8   : > { %v3788_v18 = vadd.f32 %v2191_v15, %v1871_v10  ;;  %v2193_v19 = vpop.f32.mrb[18].mxu0  ;;  %v4000_v10 = vld [vmem:[%s4946_s16 + $0xa0] sm:$0xff]   ;;  %v4001_v11 = vld [vmem:[%s4946_s16 + $0x18] sm:$0xff]   ;;  %v4003_v15 = vld [vmem:[%s4946_s16 + $0xa8] sm:$0xff]  }
 0x5a9   : > { %v2194_v23 = vpop.f32.mrb[19].mxu0  ;;  %3743 = vmatpush3.msk.msra.mxu1 %vm967_vm9, %v3787_v14  ;;  %v4002_v14 = vld [vmem:[%s4946_s16 + $0x60] sm:$0xff]   ;;  %v4007_v19 = vld [vmem:[%s4946_s16 + $0x28] sm:$0xff]  }
 0x5aa   : > { %3738 = vmatpush3.msk.msra.mxu0 %vm967_vm9, %v3788_v18  ;;  %3745 = vmatmul.mubr.msk.f32.vlgmr.msra.gmra.mrb[16].mxu1 %vm2208_vm15, %v3362_v16  ;;  %v4004_v16 = vld [vmem:[%s4946_s16 + $0x20] sm:$0xff]   ;;  %v4006_v18 = vld [vmem:[%s4946_s16 + $0xb0] sm:$0xff]  }
 0x5ab   : > { %3740 = vmatmul.mubr.msk.f32.vlgmr.msra.gmra.mrb[20].mxu0 %vm2208_vm15, %v3363_v20  ;;  %3553 = vmatprep.subr.bf16.mxu1 %v3965_v17  ;;  %v4005_v17 = vld [vmem:[%s4946_s16 + $0x68] sm:$0xff]   ;;  %v4008_v20 = vld [vmem:[%s4946_s16 + $0x70] sm:$0xff]  }
 0x5ac   : > { %3554 = vmatpush3.bf16.msra.mxu1 %v3966_v22  ;;  %3767 = vmatprep.subr.bf16.mxu0 %v4038_v2  ;;  %v4009_v22 = vld [vmem:[%s4946_s16 + $0xb8] sm:$0xff]   ;;  %v4010_v23 = vld [vmem:[%s4946_s16 + $0x30] sm:$0xff]  }
 0x5ad   : > { %3555 = vmatprep.subr.bf16.mxu1 %v3967_v24  ;;  %3783 = vmatprep.mubr.msk.bf16.mxu0 %vm4039_vm0, %v4038_v2  ;;  %v4011_v24 = vld [vmem:[%s4946_s16 + $0x78] sm:$0xff]  }
 0x5ae   : > { %3768 = vmatpush3.bf16.msra.mxu0 %v3989_v62  ;;  %v4028_v62 = vld [vmem:[%s4948_s18 + $0x38] sm:$0xff]  }
 0x5af   : > { %3769 = vmatprep.subr.bf16.mxu0 %v4038_v2 }
 0x5b0   : > { %3556 = vmatpush3.bf16.msra.mxu1 %v3968_v25  ;;  %v4013_v25 = vld [vmem:[%s4948_s18 + $0x40] sm:$0xff]  }
 0x5b1   : > { %3557 = vmatprep.subr.bf16.mxu1 %v3969_v26 }
 0x5b2   : > { %3770 = vmatpush3.bf16.msra.mxu0 %v3991_v3 }
 0x5b3   : > { %3771 = vmatprep.subr.bf16.mxu0 %v4038_v2 }
 0x5b4   : > { %3558 = vmatpush3.bf16.msra.mxu1 %v3970_v27 }
 0x5b5   : > { %3559 = vmatprep.subr.bf16.mxu1 %v3971_v29 }
 0x5b6   : > { %3772 = vmatpush3.bf16.msra.mxu0 %v3994_v6  ;;  %v3393_v6 = vld [vmem:[%s4947_s17] ss:$0 sm:$0xff] }
 0x5b7   : > { %3773 = vmatprep.subr.bf16.mxu0 %v4038_v2 }
 0x5b8   : > { %3560 = vmatpush3.bf16.msra.mxu1 %v3972_v30 }
 0x5b9   : > { %3561 = vmatprep.subr.bf16.mxu1 %v3973_v31 }
 0x5ba   : > { %3774 = vmatpush3.bf16.msra.mxu0 %v3997_v8 }
 0x5bb   : > { %3775 = vmatprep.subr.bf16.mxu0 %v4038_v2 }
 0x5bc   : > { %3562 = vmatpush3.bf16.msra.mxu1 %v3974_v33  ;;  %v3368_v33 = vld [vmem:[%s4945_s15] ss:$0 sm:$0xff] }
 0x5bd   : > { %3563 = vmatprep.subr.bf16.mxu1 %v3975_v34 }
 0x5be   : > { %3776 = vmatpush3.bf16.msra.mxu0 %v4000_v10 }
 0x5bf   : > { %3777 = vmatprep.subr.bf16.mxu0 %v4038_v2 }
 0x5c0   : > { %3564 = vmatpush3.bf16.msra.mxu1 %v3976_v12 }
 0x5c1   : > { %3565 = vmatprep.subr.bf16.mxu1 %v3977_v13 }
 0x5c2   : > { %3778 = vmatpush3.bf16.msra.mxu0 %v4003_v15 }
 0x5c3   : > { %3779 = vmatprep.subr.bf16.mxu0 %v4038_v2 }
 0x5c4   : > { %3566 = vmatpush3.bf16.msra.mxu1 %v3978_v35 }
 0x5c5   : > { %3567 = vmatprep.subr.bf16.mxu1 %v3979_v36 }
 0x5c6   : > { %3780 = vmatpush3.bf16.msra.mxu0 %v4006_v18 }
 0x5c7   : > { %3781 = vmatprep.subr.bf16.mxu0 %v4038_v2 }
 0x5c8   : > { %3568 = vmatpush3.bf16.msra.mxu1 %v3980_v37 }
 0x5c9   : > { %3747 = vmatprep.subr.bf16.mxu1 %v4038_v2 }
 0x5ca   : > { %3782 = vmatpush3.bf16.msra.mxu0 %v4009_v22 }
 0x67d   : > { %v2358_v38 = vpop.f32.mrb[16].mxu1 }
 0x67e   : > { %v2282_v39 = vpop.f32.mrb[20].mxu0  ;;  %v3746_v40 = vpop.f32.mrb[17].mxu1 }
 0x67f   : > { %v2359_v41 = vadd.f32 %v2358_v38, %v2282_v39  ;;  %v3741_v42 = vpop.f32.mrb[21].mxu0 }
 0x681   : > { %v2362_v43 = vpack.c.bf16 %v2359_v41, %v2359_v41 }
 0x683   : > { %v2364_v44 = vshrl.u32 %v2362_v43, 16  ;;  %v2367_v46 = vshll.u32 %v2362_v43, 16 }
 0x685   : > { %v2366_v45 = vrot.slane %v2364_v44, 7 }
 0x687   : > { %v2369_v47 = vor.u32 %v2367_v46, %v2366_v45 }
 0x689   : > { %v2371_v21 = vsel %vm4245_vm4, 0, %v2369_v47 }
 0x68a   : > { %v2375_v49 = vsel %vm4737_vm3, %v2371_v21, 0 }
 0x68b   : > { %v2379_v32 = vshll.u32 %v2375_v49, 16  ;;  %v2377_v50 = vshrl.u32 %v2375_v49, 16  ;;  %v2385_v61 = vrot.slane %v2375_v49, 1 }
 0x68d   : > { %v2381_v51 = vrot.slane %v2379_v32, 1 }
 0x68f   : > { %v2382_v52 = vor.u32 %v2381_v51, %v2377_v50  ;;  %v4014_v50 = vld [vmem:[%s4948_s18] sm:$0xff]   ;;  %v4015_v51 = vld [vmem:[%s4948_s18 + $0x48] sm:$0xff]  }
 0x691   : > { %2618 = vmatprep.mubr.bf16.mxu1 %v2382_v52  ;;  %v4018_v52 = vld [vmem:[%s4948_s18 + $0x10] sm:$0xff]  }
 0x692   : > { %2619 = vmatmul.mubr.bf16.vlgmr.msra.gmra.mrb[20].mxu1 %v2375_v49 }
 0x693   : > { %3748 = vmatpush3.bf16.msra.mxu1 %v3981_v53  ;;  %3763 = vmatprep.mubr.msk.bf16.mxu1 %vm4039_vm0, %v4038_v2  ;;  %v4019_v53 = vld [vmem:[%s4948_s18 + $0x58] sm:$0xff]  }
 0x694   : > { %3749 = vmatprep.subr.bf16.mxu1 %v4038_v2 }
 0x697   : > { %3750 = vmatpush3.bf16.msra.mxu1 %v3982_v54  ;;  %v4020_v54 = vld [vmem:[%s4948_s18 + $0x18] sm:$0xff]  }
 0x698   : > { %3751 = vmatprep.subr.bf16.mxu1 %v4038_v2 }
 0x69b   : > { %3752 = vmatpush3.bf16.msra.mxu1 %v3983_v55  ;;  %v4021_v55 = vld [vmem:[%s4948_s18 + $0x60] sm:$0xff]  }
 0x69c   : > { %3753 = vmatprep.subr.bf16.mxu1 %v4038_v2 }
 0x69f   : > { %3754 = vmatpush3.bf16.msra.mxu1 %v3984_v56  ;;  %v4022_v56 = vld [vmem:[%s4948_s18 + $0x20] sm:$0xff]  }
 0x6a0   : > { %3755 = vmatprep.subr.bf16.mxu1 %v4038_v2 }
 0x6a3   : > { %3756 = vmatpush3.bf16.msra.mxu1 %v3985_v57  ;;  %v4023_v57 = vld [vmem:[%s4948_s18 + $0x68] sm:$0xff]  }
 0x6a4   : > { %3757 = vmatprep.subr.bf16.mxu1 %v4038_v2 }
 0x6a7   : > { %3758 = vmatpush3.bf16.msra.mxu1 %v3986_v58  ;;  %v4024_v58 = vld [vmem:[%s4948_s18 + $0x28] sm:$0xff]  }
 0x6a8   : > { %3759 = vmatprep.subr.bf16.mxu1 %v4038_v2 }
 0x6ab   : > { %3760 = vmatpush3.bf16.msra.mxu1 %v3987_v59  ;;  %v4025_v59 = vld [vmem:[%s4948_s18 + $0x70] sm:$0xff]  }
 0x6ac   : > { %3761 = vmatprep.subr.bf16.mxu1 %v4038_v2  ;;  %v4012_v2 = vld [vmem:[%s4946_s16 + $0x38] sm:$0xff]  }
 0x6af   : > { %3762 = vmatpush3.bf16.msra.mxu1 %v3988_v60  ;;  %v4026_v60 = vld [vmem:[%s4948_s18 + $0x30] sm:$0xff]  }
 0x6b0   : > { %3584 = vmatprep.subr.bf16.mxu1 %v3990_v63  ;;  %v4029_v63 = vld [vmem:[%s637_s28] ss:$0 sps:$4 sm:$0xff]  }
 0x6b2   : > { %3764 = vmatmul.mubr.bf16.vlgmr.msra.gmra.mrb[24].mxu1 %v2385_v61  ;;  %v4027_v61 = vld [vmem:[%s4948_s18 + $0x78] sm:$0xff]  }
 0x6b3   : > { %3585 = vmatpush3.bf16.msra.mxu1 %v3992_v0 }
 0x6b4   : > { %3586 = vmatprep.subr.bf16.mxu1 %v3993_v1 }
 0x6b7   : > { %3587 = vmatpush3.bf16.msra.mxu1 %v3995_v4 }
 0x6b8   : > { %3588 = vmatprep.subr.bf16.mxu1 %v3996_v5 }
 0x6bb   : > { %3589 = vmatpush3.bf16.msra.mxu1 %v3998_v7 }
 0x6bc   : > { %3590 = vmatprep.subr.bf16.mxu1 %v3999_v9 }
 0x6bf   : > { %3591 = vmatpush3.bf16.msra.mxu1 %v4001_v11 }
 0x6c0   : > { %3592 = vmatprep.subr.bf16.mxu1 %v4002_v14 }
 0x6c3   : > { %3593 = vmatpush3.bf16.msra.mxu1 %v4004_v16 }
 0x6c4   : > { %3594 = vmatprep.subr.bf16.mxu1 %v4005_v17  ;;  %v3419_v17 = vld [vmem:[%s4949_s19] ss:$0 sm:$0xff] }
 0x6c7   : > { %3595 = vmatpush3.bf16.msra.mxu1 %v4007_v19 }
 0x6c8   : > { %3596 = vmatprep.subr.bf16.mxu1 %v4008_v20 }
 0x6cb   : > { %3597 = vmatpush3.bf16.msra.mxu1 %v4010_v23 }
 0x6cc   : > { %3598 = vmatprep.subr.bf16.mxu1 %v4011_v24 }
 0x6cf   : > { %3599 = vmatpush3.bf16.msra.mxu1 %v4012_v2 }
 0x6d0   : > { %3615 = vmatprep.subr.bf16.mxu1 %v4013_v25 }
 0x765   : > { %v3569_v26 = vpop.f32.mrb[20].mxu1 }
 0x766   : > { %v3570_v27 = vpop.f32.mrb[21].mxu1 }
 0x767   : > { %v3571_v29 = vadd.f32 %v3570_v27, %v3569_v26  ;;  %v3572_v30 = vpop.f32.mrb[22].mxu1 }
 0x768   : > { %v3573_v31 = vpop.f32.mrb[23].mxu1 }
 0x769   : > { %v2621_v34 = vadd.f32 %v3571_v29, %v3368_v33 }
 0x785   : > { %v2660_v12 = vpop.f32.mrb[24].mxu1 }
 0x786   : > { %v2661_v13 = vadd.f32 %v2660_v12, %v2621_v34  ;;  %v3765_v35 = vpop.f32.mrb[25].mxu1 }
 0x787   : > { %v2663_v36 = vpop.f32.mrb[26].mxu1 }
 0x788   : > { %v2666_v37 = vmax.f32 %v2661_v13, 0.0  ;;  %v3766_v38 = vpop.f32.mrb[27].mxu1 }
 0x78a   : > { %v2667_v39 = vpack.c.bf16 %v2666_v37, %v2666_v37 }
 0x78c   : > { %v2669_v40 = vshrl.u32 %v2667_v39, 16  ;;  %v2672_v42 = vshll.u32 %v2667_v39, 16 }
 0x78e   : > { %v2671_v41 = vrot.slane %v2669_v40, 7 }
 0x790   : > { %v2674_v43 = vor.u32 %v2672_v42, %v2671_v41 }
 0x792   : > { %v2676_v44 = vsel %vm4245_vm4, 0, %v2674_v43 }
 0x793   : > { %v2677_v45 = vsel %vm4737_vm3, %v2676_v44, 0 }
 0x794   : > { %v2687_v46 = vrot.slane %v2677_v45, 1  ;;  %v2681_v47 = vshll.u32 %v2677_v45, 16  ;;  %v2679_v21 = vshrl.u32 %v2677_v45, 16 }
 0x796   : > { %3784 = vmatmul.mubr.bf16.vlgmr.msra.gmra.mrb[24].mxu0 %v2687_v46  ;;  %v2683_v49 = vrot.slane %v2681_v47, 1 }
 0x798   : > { %v2684_v32 = vor.u32 %v2683_v49, %v2679_v21 }
 0x79a   : > { %2920 = vmatprep.mubr.bf16.mxu1 %v2684_v32 }
 0x79b   : > { %2921 = vmatmul.mubr.bf16.vlgmr.msra.gmra.mrb[28].mxu1 %v2677_v45 }
 0x79c   : > { %3616 = vmatpush3.bf16.msra.mxu1 %v4014_v50  ;;  %3139 = vmatprep.mubr.bf16.mxu1 %v4029_v63 }
 0x79d   : > { %3617 = vmatprep.subr.bf16.mxu1 %v4015_v51 }
 0x7a0   : > { %3618 = vmatpush3.bf16.msra.mxu1 %v4016_v28 }
 0x7a1   : > { %3619 = vmatprep.subr.bf16.mxu1 %v4017_v48 }
 0x7a4   : > { %3620 = vmatpush3.bf16.msra.mxu1 %v4018_v52 }
 0x7a5   : > { %3621 = vmatprep.subr.bf16.mxu1 %v4019_v53 }
 0x7a8   : > { %3622 = vmatpush3.bf16.msra.mxu1 %v4020_v54 }
 0x7a9   : > { %3623 = vmatprep.subr.bf16.mxu1 %v4021_v55 }
 0x7ac   : > { %3624 = vmatpush3.bf16.msra.mxu1 %v4022_v56 }
 0x7ad   : > { %3625 = vmatprep.subr.bf16.mxu1 %v4023_v57 }
 0x7b0   : > { %3626 = vmatpush3.bf16.msra.mxu1 %v4024_v58 }
 0x7b1   : > { %3627 = vmatprep.subr.bf16.mxu1 %v4025_v59 }
 0x7b4   : > { %3628 = vmatpush3.bf16.msra.mxu1 %v4026_v60 }
 0x7b5   : > { %3629 = vmatprep.subr.bf16.mxu1 %v4027_v61 }
 0x7b8   : > { %3630 = vmatpush3.bf16.msra.mxu1 %v4028_v62 }
 0x869   : > { %v2962_v0 = vpop.f32.mrb[24].mxu0 }
 0x86a   : > { %v3785_v1 = vpop.f32.mrb[25].mxu0 }
 0x86b   : > { %v2965_v3 = vpop.f32.mrb[26].mxu0 }
 0x86c   : > { %v3786_v4 = vpop.f32.mrb[27].mxu0 }
 0x86e   : > { %v3600_v5 = vpop.f32.mrb[28].mxu1 }
 0x86f   : > { %v3601_v7 = vpop.f32.mrb[29].mxu1 }
 0x870   : > { %v3602_v8 = vadd.f32 %v3601_v7, %v3600_v5  ;;  %v3603_v9 = vpop.f32.mrb[30].mxu1 }
 0x871   : > { %v3604_v10 = vpop.f32.mrb[31].mxu1 }
 0x872   : > { %v2923_v11 = vadd.f32 %v3602_v8, %v3393_v6 }
 0x874   : > { %v2963_v14 = vadd.f32 %v2962_v0, %v2923_v11 }
 0x876   : > { %v2970_v15 = vpack.c.bf16 %v2963_v14, %v2963_v14 }
 0x878   : > { %3140 = vmatmul.mubr.bf16.vlgmr.msra.gmra.mrb[32].mxu1 %v2970_v15 }
 0x94b   : > { %v3631_v16 = vpop.f32.mrb[32].mxu1 }
 0x94c   : > { %v3632_v18 = vpop.f32.mrb[33].mxu1 }
 0x94d   : > { %v3633_v19 = vadd.f32 %v3632_v18, %v3631_v16  ;;  %v3634_v20 = vpop.f32.mrb[34].mxu1 }
 0x94e   : > { %v3635_v22 = vpop.f32.mrb[35].mxu1 }
 0x94f   : > { %v3142_v23 = vadd.f32 %v3633_v19, %v3419_v17 }
 0x951   : > { %3147 = vst [vmem:[%s641_s3] sm:$0xff] %v3142_v23 }
 0x952 PF: > { %s30_s1 = sadd.s32 1, %s4036_s1  }
 0x953   : > { %p27_p4 = scmp.ge.s32.totalorder %s30_s1, 4  }
 0x955   :  { %29 = sbr.rel (!%p27_p4) target bundleno = 6 (0x6), region = 133 }

// kernel: _lambda_.9
= control target key start
LH: loop header
LB: loop body
LE: loop exit
PB: predicated region body
PF: predicated region fallthrough
CT: control target
= control target key end

     0   :  { %s6850_s0 = inlined_call_operand.vmem [shape: f32[2,4,128], index: 0, kind: input, shape index: {}]   ;;  %s6851_s1 = inlined_call_operand.vmem [shape: f32[2,8,128], index: 1, kind: input, shape index: {}]   ;;  %s6852_s2 = inlined_call_operand.vmem [shape: bf16[384,256], index: 2, kind: input, shape index: {}]   ;;  %s6853_s3 = inlined_call_operand.vmem [shape: f32[1,256], index: 3, kind: input, shape index: {}]   ;;  %s6854_s4 = inlined_call_operand.vmem [shape: bf16[768,128], index: 4, kind: input, shape index: {}]   ;;  %s6855_s5 = inlined_call_operand.vmem [shape: f32[1,128], index: 5, kind: input, shape index: {}]   ;;  %s6856_s6 = inlined_call_operand.vmem [shape: bf16[384,128], index: 6, kind: input, shape index: {}]   ;;  %s6857_s7 = inlined_call_operand.vmem [shape: f32[1,128], index: 7, kind: input, shape index: {}]   ;;  %s6858_s8 = inlined_call_operand.vmem [shape: bf16[128,128], index: 8, kind: input, shape index: {}]   ;;  %s6859_s9 = inlined_call_operand.vmem [shape: f32[1,128], index: 9, kind: input, shape index: {}]   ;;  %s6860_s10 = inlined_call_operand.vmem [shape: bf16[384,128], index: 10, kind: input, shape index: {}]   ;;  %s6861_s11 = inlined_call_operand.vmem [shape: f32[1,128], index: 11, kind: input, shape index: {}]   ;;  %s6862_s12 = inlined_call_operand.vmem [shape: bf16[128,128], index: 12, kind: input, shape index: {}]   ;;  %s6863_s13 = inlined_call_operand.vmem [shape: f32[1,128], index: 13, kind: input, shape index: {}]   ;;  %s6864_s14 = inlined_call_operand.vmem [shape: bf16[384,256], index: 14, kind: input, shape index: {}]   ;;  %s6865_s15 = inlined_call_operand.vmem [shape: f32[1,256], index: 15, kind: input, shape index: {}]   ;;  %s6866_s16 = inlined_call_operand.vmem [shape: bf16[384,128], index: 16, kind: input, shape index: {}]   ;;  %s6867_s17 = inlined_call_operand.vmem [shape: f32[1,128], index: 17, kind: input, shape index: {}]   ;;  %s6868_s18 = inlined_call_operand.vmem [shape: bf16[384,313], index: 18, kind: input, shape index: {}]   ;;  %s6869_s19 = inlined_call_operand.vmem [shape: f32[1,313], index: 19, kind: input, shape index: {}]   ;;  %s6870_s20 = inlined_call_operand.hbm [shape: f32[2,16,313], index: 20, kind: output, shape index: {}]  }
   0x1   :  { %6882 = sst [smem:[#allocation12_spill]] %s6850_s0 }
   0x2   :  { %6883 = sst [smem:[#allocation13_spill]] %s6851_s1 }
   0x3   :  { %6884 = sst [smem:[#allocation14_spill]] %s6852_s2 }
   0x4   :  { %6885 = sst [smem:[#allocation15_spill]] %s6853_s3 }
   0x5   :  { %6886 = sst [smem:[#allocation16_spill]] %s6854_s4 }
   0x6   :  { %6887 = sst [smem:[#allocation17_spill]] %s6869_s19 }
   0x7   :  { %6888 = sst [smem:[#allocation18_spill]] %s6870_s20 }
   0x8   :  { %25 = vsyncpa [#allocation3], 0 }
   0x9   :  { %27 = vsyncpa [#allocation3 + $0x1], 0  ;;  %s5609_s1 = smov 0   ;;  %s5611_s22 = smov 0  }
   0xa   :  { %s5613_s23 = smov 0   ;;  %s5615_s24 = smov 0  }
   0xb LB: > { %6889 = sst [smem:[#allocation5_spill]] %s5484_s1  ;;  %s5630_s2 = sadd.s32 4294967295, %s5496_s24   ;;  %s5496_s24 = sphi %s5615_s24, %s6913_s24   ;;  %s5492_s23 = sphi %s5613_s23, %s6915_s23   ;;  %s5488_s22 = sphi %s5611_s22, %s6917_s22   ;;  %s5484_s1 = sphi %s5609_s1, %s6916_s1  }
   0xc   : > { %6890 = sst [smem:[#allocation6_spill]] %s5492_s23  ;;  %s4299_s25 = sadd.s32 4294967294, %s5496_s24  }
   0xd   : > { %6891 = sst [smem:[#allocation7_spill]] %s5496_s24  ;;  %s5634_s3 = sadd.s32 1, %s5496_s24  }
   0xe   : > { %6892 = sst [smem:[#allocation8_spill]] %s5634_s3  ;;  %s470_s26 = sadd.s32 1, %s5492_s23 }
   0xf   : > { %s467_s27 = ssub.s32 %s5496_s24, %s5634_s3  ;;  %p480_p0 = scmp.ne.s32.totalorder %s5492_s23, %s5488_s22 }
  0x10   : > { %p468_p1 = scmp.eq.s32.totalorder %s467_s27, 0  ;;  %p481_p2 = scmp.eq.s32.totalorder %s5630_s2, 1 }
  0x11   : > { %p486_p3 = scmp.ne.s32.totalorder %s5488_s22, %s5484_s1  ;;  %p487_p4 = scmp.eq.s32.totalorder %s4299_s25, 1 }
  0x12   : > { %s5645_s28 = scalar_select %p468_p1, %s5492_s23, %s470_s26  }
  0x13   : > { %p5647_p5 = por %p481_p2, %p480_p0  ;;  %p5651_p6 = por %p487_p4, %p486_p3 }
  0x14   : > { %6893 = sst [smem:[#allocation9_spill]] %s5645_s28  ;;  %p4302_p7 = scmp.ge.s32.totalorder %s5496_s24, 1 }
  0x15   : > { %s6894_s4 = scalar_select %p5647_p5, 1, 0 }
  0x16   : > { %s6896_s29 = scalar_select %p5651_p6, 1, 0 }
  0x17   : > { %6895 = sst [smem:[#allocation10_spill]] %s6894_s4  ;;  %p573_p8 = scmp.lt.s32.totalorder %s5496_s24, 3 }
  0x18   : > { %6897 = sst [smem:[#allocation11_spill]] %s6896_s29 }
  0x19   : > { %p574_p9 = pnand %p4302_p7, %p573_p8 }
  0x1a   : > { %s6898_s21 = sld [smem:[#allocation14_spill]] (!%p574_p9)  ;;  %p634_p10 = scmp.lt.s32.totalorder (!%p574_p9), %s5630_s2, 1  ;;  %vm653_vm0 = vcmask (!%p574_p9), 1040384   ;;  %vm654_vm1 = vsmask.f32 (!%p574_p9), 256  ;;  %vm657_vm2 = vcmask (!%p574_p9), 1042432  }
  0x1b   : > { %577 = sbr.rel (%p574_p9) target bundleno = 2809 (0xaf9), region = 100  ;;  %s6899_s24 = sld [smem:[#allocation12_spill]] (!%p574_p9)  ;;  %vm658_vm3 = vsmask.f32 (!%p574_p9), 2304  ;;  %vm5713_vm4 = vmand (!%p574_p9), %vm653_vm0, %vm654_vm1  ;;  %v5498_v51 = vmov (!%p574_p9), 0   ;;  %v5499_v63 = vmov (!%p574_p9), 0.0  }
  0x1c   : > { %vm659_vm5 = vmand (!%p574_p9), %vm657_vm2, %vm658_vm3  ;;  %vm5500_vm6 = vmmov (!%p574_p9), 0   ;;  %s6902_s25 = sld [smem:[#allocation16_spill]] (!%p574_p9)  ;;  %s6903_s28 = sld [smem:[#allocation15_spill]] (!%p574_p9)  ;;  %vm1070_vm8 = vcmask (!%p574_p9), 1043456   ;;  %vm1066_vm9 = vcmask (!%p574_p9), 31744   ;;  %vm1241_vm11 = vcmask (!%p574_p9), 1044480  }
  0x1d   : > { %s6904_s27 = sld [smem:[#allocation13_spill]] (!%p574_p9)  ;;  %vm1242_vm12 = vsmask.f32 (!%p574_p9), 4352  ;;  %vm1791_vm14 = vcmask (!%p574_p9), 1041408   ;;  %vm1792_vm15 = vsmask.f32 (!%p574_p9), 1280 }
  0x1e   : > { %vm5917_vm13 = vmand (!%p574_p9), %vm1241_vm11, %vm1242_vm12  ;;  %vm1795_vm0 = vcmask (!%p574_p9), 1045504   ;;  %vm1796_vm1 = vsmask.f32 (!%p574_p9), 5376  ;;  %s5013_s30 = smul.u32 (!%p574_p9), 768, %s5630_s2  ;;  %s6909_s4 = sld [smem:[#allocation18_spill]] (!%p574_p9) }
  0x1f   : > { %vm1793_vm2 = vmand (!%p574_p9), %vm1791_vm14, %vm1792_vm15  ;;  %s5501_s29 = smov (!%p574_p9), [#allocation2]  }
  0x20   : > { %v5058_v0 = vld [vmem:[%s6898_s21 + $0x4] ss:$8 sps:$4 sm:$0xff] (!%p574_p9)   ;;  %v5060_v1 = vld [vmem:[%s6898_s21] ss:$8 sps:$4 sm:$0xff] (!%p574_p9)   ;;  %v5061_v2 = vld [vmem:[%s6898_s21 + $0x14] ss:$8 sps:$4 sm:$0xff] (!%p574_p9)  }
  0x21   : > { %972 = vmatprep.subr.bf16.mxu0 (!%p574_p9), %v5058_v0  ;;  %v5063_v3 = vld [vmem:[%s6898_s21 + $0x10] ss:$8 sps:$4 sm:$0xff] (!%p574_p9)   ;;  %v5064_v4 = vld [vmem:[%s6898_s21 + $0x24] ss:$8 sps:$4 sm:$0xff] (!%p574_p9)   ;;  %v5066_v5 = vld [vmem:[%s6898_s21 + $0x20] ss:$8 sps:$4 sm:$0xff] (!%p574_p9)  }
  0x22   : > { %973 = vmatpush1.bf16.msra.mxu0 %v5060_v1  ;;  %v5067_v6 = vld [vmem:[%s6898_s21 + $0x34] ss:$8 sps:$4 sm:$0xff]   ;;  %v5069_v7 = vld [vmem:[%s6898_s21 + $0x30] ss:$8 sps:$4 sm:$0xff]   ;;  %s5683_s3 = scalar_select %p634_p10, %s5630_s2, 1  ;;  %v5130_v0 = vld [vmem:[%s6902_s25 + $0x40] sm:$0xff]  }
  0x23   : > { %974 = vmatprep.subr.bf16.mxu0 %v5061_v2  ;;  %v5070_v8 = vld [vmem:[%s6898_s21 + $0x44] ss:$8 sps:$4 sm:$0xff]   ;;  %v5072_v9 = vld [vmem:[%s6898_s21 + $0x40] ss:$8 sps:$4 sm:$0xff]   ;;  %v5073_v10 = vld [vmem:[%s6898_s21 + $0x54] ss:$8 sps:$4 sm:$0xff]   ;;  %4634 = vmatprep.subr.bf16.mxu1 %v5130_v0 }
  0x24   : > { %s4303_s0 = sshll.u32 %s5683_s3, 2  ;;  %v5075_v11 = vld [vmem:[%s6898_s21 + $0x50] ss:$8 sps:$4 sm:$0xff]   ;;  %v5076_v12 = vld [vmem:[%s6898_s21 + $0x64] ss:$8 sps:$4 sm:$0xff]   ;;  %s4304_s26 = sshll.u32 %s5683_s3, 3  ;;  %vm1797_vm3 = vmand %vm1795_vm0, %vm1796_vm1 }
  0x25   : > { %s637_s20 = scalar_lea.vmem %s6899_s24, %s4303_s0  ;;  %v5078_v15 = vld [vmem:[%s6898_s21 + $0x60] ss:$8 sps:$4 sm:$0xff]   ;;  %v5079_v16 = vld [vmem:[%s6898_s21 + $0x74] ss:$8 sps:$4 sm:$0xff]   ;;  %v5081_v20 = vld [vmem:[%s6898_s21 + $0x70] ss:$8 sps:$4 sm:$0xff]   ;;  %s641_s1 = scalar_lea.vmem %s6904_s27, %s4304_s26 }
  0x26   : > { %975 = vmatpush1.bf16.msra.mxu0 %v5063_v3  ;;  %v643_v13 = vld [vmem:[%s637_s20] sm:$0xf]  ;;  %v5082_v22 = vld [vmem:[%s6898_s21 + $0x84] ss:$8 sps:$4 sm:$0xff]   ;;  %v5085_v27 = vld [vmem:[%s6898_s21 + $0x94] ss:$8 sps:$4 sm:$0xff]   ;;  %s6804_s3 = scalar_lea.hbm %s6909_s4, %s5013_s30 }
  0x27   : > { %976 = vmatprep.subr.bf16.mxu0 %v5064_v4  ;;  %v644_v14 = vpack.c.bf16 %v643_v13, %v643_v13  ;;  %v5084_v25 = vld [vmem:[%s6898_s21 + $0x80] ss:$8 sps:$4 sm:$0xff]   ;;  %v5087_v30 = vld [vmem:[%s6898_s21 + $0x90] ss:$8 sps:$4 sm:$0xff]   ;;  %v5088_v32 = vld [vmem:[%s6898_s21 + $0xa4] ss:$8 sps:$4 sm:$0xff]  }
  0x28   : > { %v5090_v35 = vld [vmem:[%s6898_s21 + $0xa0] ss:$8 sps:$4 sm:$0xff]   ;;  %v5091_v36 = vld [vmem:[%s6898_s21 + $0xb4] ss:$8 sps:$4 sm:$0xff]   ;;  %v5093_v37 = vld [vmem:[%s6898_s21 + $0xb0] ss:$8 sps:$4 sm:$0xff]  }
  0x29   : > { %v646_v17 = vshrl.u32 %v644_v14, 16  ;;  %v649_v18 = vshll.u32 %v644_v14, 16  ;;  %v5094_v38 = vld [vmem:[%s6898_s21 + $0xc4] ss:$8 sps:$4 sm:$0xff]   ;;  %v5096_v39 = vld [vmem:[%s6898_s21 + $0xc0] ss:$8 sps:$4 sm:$0xff]  }
  0x2a   : > { %977 = vmatpush1.bf16.msra.mxu0 %v5066_v5  ;;  %v5097_v40 = vld [vmem:[%s6898_s21 + $0xd4] ss:$8 sps:$4 sm:$0xff]   ;;  %v5099_v41 = vld [vmem:[%s6898_s21 + $0xd0] ss:$8 sps:$4 sm:$0xff]   ;;  %v5100_v42 = vld [vmem:[%s6898_s21 + $0xe4] ss:$8 sps:$4 sm:$0xff]  }
  0x2b   : > { %978 = vmatprep.subr.bf16.mxu0 %v5067_v6  ;;  %v648_v19 = vrot.slane %v646_v17, 7  ;;  %v5102_v43 = vld [vmem:[%s6898_s21 + $0xe0] ss:$8 sps:$4 sm:$0xff]   ;;  %v5103_v44 = vld [vmem:[%s6898_s21 + $0xf4] ss:$8 sps:$4 sm:$0xff]   ;;  %s631_s26 = sand.u32 1, %s5488_s22  }
  0x2c   : > { %v5105_v45 = vld [vmem:[%s6898_s21 + $0xf0] ss:$8 sps:$4 sm:$0xff]   ;;  %v5108_v46 = vld [vmem:[%s6898_s21 + $0x104] ss:$8 sps:$4 sm:$0xff]   ;;  %v5106_v47 = vld [vmem:[%s6898_s21 + $0x100] ss:$8 sps:$4 sm:$0xff]  }
  0x2d   : > { %v651_v23 = vor.u32 %v649_v18, %v648_v19  ;;  %v5111_v48 = vld [vmem:[%s6898_s21 + $0x114] ss:$8 sps:$4 sm:$0xff]   ;;  %v5109_v49 = vld [vmem:[%s6898_s21 + $0x110] ss:$8 sps:$4 sm:$0xff]   ;;  %v5114_v50 = vld [vmem:[%s6898_s21 + $0x124] ss:$8 sps:$4 sm:$0xff]  }
  0x2e   : > { %979 = vmatpush1.bf16.msra.mxu0 %v5069_v7  ;;  %v5112_v52 = vld [vmem:[%s6898_s21 + $0x120] ss:$8 sps:$4 sm:$0xff]   ;;  %v5117_v53 = vld [vmem:[%s6898_s21 + $0x134] ss:$8 sps:$4 sm:$0xff]   ;;  %v5115_v54 = vld [vmem:[%s6898_s21 + $0x130] ss:$8 sps:$4 sm:$0xff]  }
  0x2f   : > { %980 = vmatprep.subr.bf16.mxu0 %v5070_v8  ;;  %v656_v24 = vsel %vm5713_vm4, 0, %v651_v23  ;;  %v5120_v55 = vld [vmem:[%s6898_s21 + $0x144] ss:$8 sps:$4 sm:$0xff]   ;;  %v5118_v56 = vld [vmem:[%s6898_s21 + $0x140] ss:$8 sps:$4 sm:$0xff]   ;;  %v5134_v4 = vld [vmem:[%s6902_s25 + $0x50] sm:$0xff]  }
  0x30   : > { %v5725_v26 = vsel %vm659_vm5, %v656_v24, 0  ;;  %v5123_v57 = vld [vmem:[%s6898_s21 + $0x154] ss:$8 sps:$4 sm:$0xff]   ;;  %v5121_v58 = vld [vmem:[%s6898_s21 + $0x150] ss:$8 sps:$4 sm:$0xff]   ;;  %v5131_v1 = vld [vmem:[%s6902_s25] sm:$0xff]  }
  0x31   : > { %v662_v28 = vshrl.u32 %v5725_v26, 16  ;;  %v664_v29 = vshll.u32 %v5725_v26, 16  ;;  %v670_v31 = vrot.slane %v5725_v26, 1  ;;  %v5126_v59 = vld [vmem:[%s6898_s21 + $0x164] ss:$8 sps:$4 sm:$0xff]   ;;  %4635 = vmatpush3.bf16.msra.mxu1 %v5131_v1  ;;  %v5135_v5 = vld [vmem:[%s6902_s25 + $0x10] sm:$0xff]  }
  0x32   : > { %981 = vmatpush1.bf16.msra.mxu0 %v5072_v9  ;;  %v5124_v60 = vld [vmem:[%s6898_s21 + $0x160] ss:$8 sps:$4 sm:$0xff]   ;;  %v5129_v61 = vld [vmem:[%s6898_s21 + $0x174] ss:$8 sps:$4 sm:$0xff]   ;;  %v5127_v62 = vld [vmem:[%s6898_s21 + $0x170] ss:$8 sps:$4 sm:$0xff]  }
  0x33   : > { %982 = vmatprep.subr.bf16.mxu0 %v5073_v10  ;;  %v666_v33 = vrot.slane %v664_v29, 1  ;;  %v5132_v2 = vld [vmem:[%s6902_s25 + $0x48] sm:$0xff]   ;;  %v5136_v6 = vld [vmem:[%s6902_s25 + $0x58] sm:$0xff]   ;;  %v5138_v8 = vld [vmem:[%s6902_s25 + $0x60] sm:$0xff]   ;;  %vm3031_vm5 = vcmask 64512   ;;  %s6907_s27 = sld [smem:[#allocation17_spill]] }
  0x34   : > { %v5133_v3 = vld [vmem:[%s6902_s25 + $0x8] sm:$0xff]   ;;  %4636 = vmatprep.subr.bf16.mxu1 %v5132_v2  ;;  %v5137_v7 = vld [vmem:[%s6902_s25 + $0x18] sm:$0xff]   ;;  %v5139_v9 = vld [vmem:[%s6902_s25 + $0x20] sm:$0xff]  }
  0x35   : > { %v667_v34 = vor.u32 %v666_v33, %v662_v28  ;;  %4637 = vmatpush3.bf16.msra.mxu1 %v5133_v3  ;;  %v5140_v10 = vld [vmem:[%s6902_s25 + $0x68] sm:$0xff]   ;;  %v720_v17 = vld [vmem:[%s6903_s28] sm:$0x3]  ;;  %v5151_v0 = vld [vmem:[%s6902_s25 + $0x90] sm:$0xff]   ;;  %s6809_s28 = scalar_lea.sflag [#allocation3], %s631_s26 }
  0x36   : > { %983 = vmatpush1.bf16.msra.mxu0 %v5075_v11  ;;  %4638 = vmatprep.subr.bf16.mxu1 %v5134_v4  ;;  %v5141_v11 = vld [vmem:[%s6902_s25 + $0x28] sm:$0xff]   ;;  %v5152_v1 = vld [vmem:[%s6902_s25 + $0xd8] sm:$0xff]   ;;  %v5154_v3 = vld [vmem:[%s6902_s25 + $0xe0] sm:$0xff]  }
  0x37   : > { %984 = vmatprep.subr.bf16.mxu0 %v5076_v12  ;;  %1004 = vmatprep.mubr.bf16.mxu0 %v667_v34  ;;  %v722_v12 = vlaneseq  ;;  %v5143_v34 = vld [vmem:[%s6902_s25 + $0x30] sm:$0xff]   ;;  %v5153_v2 = vld [vmem:[%s6902_s25 + $0x98] sm:$0xff]   ;;  %v5155_v4 = vld [vmem:[%s6902_s25 + $0xa0] sm:$0xff]  }
  0x39   : > { %4639 = vmatpush3.bf16.msra.mxu1 %v5135_v5  ;;  %v1057_v13 = vand.u32 127, %v722_v12  ;;  %v5863_v14 = vshrl.u32 %v722_v12, 7  ;;  %v5156_v5 = vld [vmem:[%s6902_s25 + $0xe8] sm:$0xff]  }
  0x3a   : > { %985 = vmatpush1.bf16.msra.mxu0 %v5078_v15  ;;  %4640 = vmatprep.subr.bf16.mxu1 %v5136_v6  ;;  %v5157_v6 = vld [vmem:[%s6902_s25 + $0xa8] sm:$0xff]  }
  0x3b   : > { %986 = vmatprep.subr.bf16.mxu0 %v5079_v16  ;;  %v5865_v15 = vmul.u32 2, %v1057_v13  ;;  %v5868_v16 = vsub.s32 1, %v5863_v14  ;;  %v5877_v19 = vsub.s32 0, %v5863_v14  ;;  %v5162_v13 = vld [vmem:[%s6902_s25 + $0x140] sm:$0xff]  }
  0x3d   : > { %4641 = vmatpush3.bf16.msra.mxu1 %v5137_v7  ;;  %v5874_v18 = vadd.s32 1, %v5865_v15  ;;  %vm1059_vm10 = vcmp.eq.s32.totalorder %v5863_v14, %v5865_v15  ;;  %v5158_v7 = vld [vmem:[%s6902_s25 + $0xf0] sm:$0xff]  }
  0x3e   : > { %987 = vmatpush1.bf16.msra.mxu0 %v5081_v20  ;;  %4642 = vmatprep.subr.bf16.mxu1 %v5138_v8  ;;  %v729_v20 = vrot.slane %v720_v17, %v5868_v16  ;;  %v5159_v8 = vld [vmem:[%s6902_s25 + $0xb0] sm:$0xff]  }
  0x3f   : > { %988 = vmatprep.subr.bf16.mxu0 %v5082_v22  ;;  %vm1063_vm7 = vcmp.eq.s32.totalorder %v5863_v14, %v5874_v18  ;;  %v725_v22 = vrot.slane %v720_v17, %v5877_v19 }
  0x41   : > { %4643 = vmatpush3.bf16.msra.mxu1 %v5139_v9 }
  0x42   : > { %989 = vmatpush1.bf16.msra.mxu0 %v5084_v25  ;;  %4644 = vmatprep.subr.bf16.mxu1 %v5140_v10  ;;  %v5160_v10 = vld [vmem:[%s6902_s25 + $0xf8] sm:$0xff]  }
  0x43   : > { %990 = vmatprep.subr.bf16.mxu0 %v5085_v27  ;;  %v5884_v27 = vsel %vm1063_vm7, 1.0, %v5499_v63 }
  0x45   : > { %4645 = vmatpush3.bf16.msra.mxu1 %v5141_v11  ;;  %v5161_v11 = vld [vmem:[%s6902_s25 + $0xb8] sm:$0xff]  }
  0x46   : > { %991 = vmatpush1.bf16.msra.mxu0 %v5087_v30  ;;  %v5893_v30 = vsel %vm1059_vm10, 1.0, %v5499_v63  ;;  %vm3220_vm10 = vcmask 1046528  }
  0x47   : > { %992 = vmatprep.subr.bf16.mxu0 %v5088_v32  ;;  %v5142_v32 = vld [vmem:[%s6902_s25 + $0x70] sm:$0xff]  }
  0x48   : > { %4646 = vmatprep.subr.bf16.mxu1 %v5142_v32  ;;  %v5170_v32 = vld [vmem:[%s6902_s25 + $0x160] sm:$0xff]  }
  0x49   : > { %4647 = vmatpush3.bf16.msra.mxu1 %v5143_v34  ;;  %v5172_v34 = vld [vmem:[%s6902_s25 + $0x168] sm:$0xff]  }
  0x4a   : > { %993 = vmatpush1.bf16.msra.mxu0 %v5090_v35 }
  0x4b   : > { %994 = vmatprep.subr.bf16.mxu0 %v5091_v36  ;;  %v5144_v36 = vld [vmem:[%s6902_s25 + $0x78] sm:$0xff]  }
  0x4c   : > { %4648 = vmatprep.subr.bf16.mxu1 %v5144_v36  ;;  %v5174_v36 = vld [vmem:[%s6902_s25 + $0x170] sm:$0xff]  }
  0x4e   : > { %995 = vmatpush1.bf16.msra.mxu0 %v5093_v37 }
  0x4f   : > { %996 = vmatprep.subr.bf16.mxu0 %v5094_v38 }
  0x52   : > { %997 = vmatpush1.bf16.msra.mxu0 %v5096_v39  ;;  %v5145_v39 = vld [vmem:[%s6902_s25 + $0x38] sm:$0xff]  }
  0x53   : > { %998 = vmatprep.subr.bf16.mxu0 %v5097_v40  ;;  %4649 = vmatpush3.bf16.msra.mxu1 %v5145_v39  ;;  %v5177_v39 = vld [vmem:[%s6902_s25 + $0x138] sm:$0xff]  }
  0x56   : > { %999 = vmatpush1.bf16.msra.mxu0 %v5099_v41  ;;  %v5146_v41 = vld [vmem:[%s6902_s25 + $0xc0] sm:$0xff]  }
  0x57   : > { %1000 = vmatprep.subr.bf16.mxu0 %v5100_v42  ;;  %4656 = vmatprep.subr.bf16.mxu1 %v5146_v41  ;;  %v5178_v41 = vld [vmem:[%s6856_s6 + $0x80] sm:$0xff]  }
  0x5a   : > { %1001 = vmatpush1.bf16.msra.mxu0 %v5102_v43  ;;  %v5293_v43 = vld [vmem:[%s6864_s14 + $0x110] ss:$8 sps:$4 sm:$0xff]  }
  0x5b   : > { %1002 = vmatprep.subr.bf16.mxu0 %v5103_v44 }
  0x5e   : > { %1003 = vmatpush1.bf16.msra.mxu0 %v5105_v45 }
  0x5f   : > { %1013 = vmatprep.subr.bf16.mxu0 %v5108_v46 }
  0x61   : > { %1005 = vmatmul.mubr.bf16.vlgmr.msra.gmra.mrb[0].mxu0 %v5725_v26 }
  0x62   : > { %1014 = vmatpush1.bf16.msra.mxu0 %v5106_v47  ;;  %1045 = vmatprep.mubr.bf16.mxu0 %v5498_v51 }
  0x63   : > { %1015 = vmatprep.subr.bf16.mxu0 %v5111_v48 }
  0x66   : > { %1016 = vmatpush1.bf16.msra.mxu0 %v5109_v49 }
  0x67   : > { %1017 = vmatprep.subr.bf16.mxu0 %v5114_v50 }
  0x6a   : > { %1018 = vmatpush1.bf16.msra.mxu0 %v5112_v52 }
  0x6b   : > { %1019 = vmatprep.subr.bf16.mxu0 %v5117_v53 }
  0x6e   : > { %1020 = vmatpush1.bf16.msra.mxu0 %v5115_v54 }
  0x6f   : > { %1021 = vmatprep.subr.bf16.mxu0 %v5120_v55 }
  0x72   : > { %1022 = vmatpush1.bf16.msra.mxu0 %v5118_v56  ;;  %v5147_v56 = vld [vmem:[%s6902_s25 + $0x80] sm:$0xff]  }
  0x73   : > { %1023 = vmatprep.subr.bf16.mxu0 %v5123_v57 }
  0x76   : > { %1024 = vmatpush1.bf16.msra.mxu0 %v5121_v58 }
  0x77   : > { %1025 = vmatprep.subr.bf16.mxu0 %v5126_v59  ;;  %v5148_v59 = vld [vmem:[%s6902_s25 + $0xc8] sm:$0xff]  }
  0x7a   : > { %1026 = vmatpush1.bf16.msra.mxu0 %v5124_v60 }
  0x7b   : > { %1027 = vmatprep.subr.bf16.mxu0 %v5129_v61  ;;  %v5149_v61 = vld [vmem:[%s6902_s25 + $0x88] sm:$0xff]  }
  0x7e   : > { %1028 = vmatpush1.bf16.msra.mxu0 %v5127_v62  ;;  %v5150_v62 = vld [vmem:[%s6902_s25 + $0xd0] sm:$0xff]  }
  0x7f   : > { %4848 = vmatprep.subr.mxu0 %v5499_v63 }
  0x81   : > { %1046 = vmatmul.mubr.bf16.vlgmr.msra.gmra.mrb[0].mxu0 %v670_v31  ;;  %v1220_v31 = vld [vmem:[%s641_s1] sm:$0xff]  ;;  %s5012_s1 = smul.u32 48, %s631_s26 }
  0x82   : > { %4850 = vmatprep.mubr.msk.f32.mxu0 %vm5500_vm6, %v5499_v63  ;;  %v1222_v33 = vpack.c.bf16 %v1220_v31, %v1220_v31  ;;  %v5169_v31 = vld [vmem:[%s6902_s25 + $0x118] sm:$0xff]  }
  0x83   : > { %s633_s24 = scalar_lea.vmem [#allocation2], %s5012_s1 }
  0x84   : > { %v1231_v35 = vshrl.u32 %v1222_v33, 16  ;;  %v1234_v38 = vshll.u32 %v1222_v33, 16  ;;  %v5171_v33 = vld [vmem:[%s6902_s25 + $0x120] sm:$0xff]   ;;  %s4225_s0 = sshll.u32 %s633_s24, 4  ;;  %s6798_s0 = int_to_ptr.vmem [resolvable:$true] %s4225_s0 }
  0x85   : > { %s5434_s23 = scalar_lea.vmem %s6798_s0, 768 }
  0x86   : > { %v1233_v37 = vrot.slane %v1231_v35, 7  ;;  %v5173_v35 = vld [vmem:[%s6902_s25 + $0x128] sm:$0xff]   ;;  %p5435_p11 = scmp.ne.s32.totalorder %s6798_s0, %s5434_s23 }
  0x88   : > { %v1236_v40 = vor.u32 %v1234_v38, %v1233_v37  ;;  %v5175_v37 = vld [vmem:[%s6902_s25 + $0x130] sm:$0xff]   ;;  %v5176_v38 = vld [vmem:[%s6902_s25 + $0x178] sm:$0xff]   ;;  %p5436_p12 = pnand %p5435_p11, %p5647_p5 }
  0x8a   : > { %v1240_v42 = vsel %vm5713_vm4, 0, %v1236_v40  ;;  %p5437_p13 = pneg %p5436_p12 }
  0x8b   : > { %v1245_v44 = vsel %vm5917_vm13, %v1240_v42, 0  ;;  %v5179_v42 = vld [vmem:[%s6856_s6 + $0x40] sm:$0xff]  }
  0x8c   : > { %1691 = vmatprep.mubr.bf16.mxu1 %v1245_v44  ;;  %v1256_v46 = vshll.u32 %v1245_v44, 16  ;;  %v1254_v50 = vshrl.u32 %v1245_v44, 16 }
  0x8e   : > { %v1258_v52 = vrot.slane %v1256_v46, 1  ;;  %v5180_v46 = vld [vmem:[%s6856_s6 + $0x88] sm:$0xff]  }
  0x90   : > { %v1259_v57 = vor.u32 %v1258_v52, %v1254_v50  ;;  %v5186_v50 = vld [vmem:[%s6856_s6 + $0x98] sm:$0xff]   ;;  %v5187_v52 = vld [vmem:[%s6856_s6 + $0x10] sm:$0xff]  }
 0x154   : > { %v1047_v23 = vpop.f32.mrb[0].mxu0 }
 0x155   : > { %v1049_v24 = vpop.f32.mrb[1].mxu0  ;;  %v4988_v29 = vadd.f32 %v1047_v23, %v725_v22  ;;  %v1265_v22 = vrot.slane %v1245_v44, 1  ;;  %v5181_v44 = vld [vmem:[%s6856_s6] sm:$0xff]  }
 0x156   : > { %v4989_v25 = vadd.f32 %v1049_v24, %v729_v20  ;;  %v1051_v26 = vpop.f32.mrb[2].mxu0  ;;  %v5163_v20 = vld [vmem:[%s6902_s25 + $0x100] sm:$0xff]   ;;  %v5164_v24 = vld [vmem:[%s6902_s25 + $0x148] sm:$0xff]  }
 0x157   : > { %v1052_v28 = vpop.f32.mrb[3].mxu0  ;;  %v5166_v26 = vld [vmem:[%s6902_s25 + $0x150] sm:$0xff]  }
 0x158   : > { %4849 = vmatpush3.msk.msra.mxu0 %vm1070_vm8, %v4989_v25  ;;  %v5165_v25 = vld [vmem:[%s6902_s25 + $0x108] sm:$0xff]   ;;  %v5167_v28 = vld [vmem:[%s6902_s25 + $0x110] sm:$0xff]  }
 0x159   : > { %4851 = vmatmul.mubr.msk.f32.vlgmr.msra.gmra.mrb[4].mxu0 %vm1066_vm9, %v5884_v27  ;;  %4853 = vmatprep.subr.mxu0 %v5499_v63 }
 0x15a   : > { %4854 = vmatpush3.msk.msra.mxu0 %vm1070_vm8, %v4988_v29  ;;  %4855 = vmatprep.mubr.msk.f32.mxu0 %vm5500_vm6, %v5499_v63  ;;  %v5168_v29 = vld [vmem:[%s6902_s25 + $0x158] sm:$0xff]  }
 0x15b   : > { %4700 = vmatprep.subr.bf16.mxu0 %v5179_v42 }
 0x161   : > { %4856 = vmatmul.mubr.msk.f32.vlgmr.msra.gmra.mrb[4].mxu0 %vm1066_vm9, %v5893_v30  ;;  %vm3204_vm9 = vsmask.f32 7424 }
 0x162   : > { %4701 = vmatpush3.bf16.msra.mxu0 %v5181_v44 }
 0x234   : > { %v1216_v45 = vpop.f32.mrb[4].mxu0 }
 0x235   : > { %v1221_v47 = vpack.c.bf16 %v1216_v45, %v1216_v45  ;;  %v4857_v48 = vpop.f32.mrb[5].mxu0  ;;  %v5182_v45 = vld [vmem:[%s6856_s6 + $0x48] sm:$0xff]  }
 0x236   : > { %4702 = vmatprep.subr.bf16.mxu0 %v5182_v45  ;;  %v5184_v48 = vld [vmem:[%s6856_s6 + $0x8] sm:$0xff]  }
 0x237   : > { %v1224_v49 = vshrl.u32 %v1221_v47, 16  ;;  %v1227_v54 = vshll.u32 %v1221_v47, 16  ;;  %v5183_v47 = vld [vmem:[%s6856_s6 + $0x90] sm:$0xff]   ;;  %4703 = vmatpush3.bf16.msra.mxu0 %v5184_v48  ;;  %v5202_v48 = vld [vmem:[%s6858_s8] sm:$0xff]  }
 0x239   : > { %v1226_v53 = vrot.slane %v1224_v49, 7  ;;  %v5185_v49 = vld [vmem:[%s6856_s6 + $0x50] sm:$0xff]  }
 0x23a   : > { %4704 = vmatprep.subr.bf16.mxu0 %v5185_v49  ;;  %v5203_v49 = vld [vmem:[%s6858_s8 + $0x8] sm:$0xff]  }
 0x23b   : > { %v1229_v55 = vor.u32 %v1227_v54, %v1226_v53  ;;  %4705 = vmatpush3.bf16.msra.mxu0 %v5187_v52  ;;  %v5188_v53 = vld [vmem:[%s6856_s6 + $0x58] sm:$0xff]   ;;  %v5189_v54 = vld [vmem:[%s6856_s6 + $0xa0] sm:$0xff]  }
 0x23c   : > { %4706 = vmatprep.subr.bf16.mxu0 %v5188_v53  ;;  %v5205_v52 = vld [vmem:[%s6858_s8 + $0x18] sm:$0xff]   ;;  %v5206_v53 = vld [vmem:[%s6858_s8 + $0x20] sm:$0xff]  }
 0x23d   : > { %v1239_v58 = vsel %vm5713_vm4, 0, %v1229_v55  ;;  %v5190_v55 = vld [vmem:[%s6856_s6 + $0x18] sm:$0xff]  }
 0x23e   : > { %v5933_v60 = vsel %vm5917_vm13, %v1239_v58, 0  ;;  %v5193_v58 = vld [vmem:[%s6856_s6 + $0x20] sm:$0xff]  }
 0x23f   : > { %1692 = vmatmul.mubr.bf16.vlgmr.msra.gmra.mrb[0].mxu1 %v5933_v60  ;;  %v1249_v9 = vshll.u32 %v5933_v60, 16  ;;  %v1247_v17 = vshrl.u32 %v5933_v60, 16  ;;  %v1264_v40 = vrot.slane %v5933_v60, 1  ;;  %4707 = vmatpush3.bf16.msra.mxu0 %v5190_v55  ;;  %v5195_v60 = vld [vmem:[%s6856_s6 + $0xb0] sm:$0xff]  }
 0x240   : > { %4657 = vmatpush3.bf16.msra.mxu1 %v5147_v56  ;;  %1731 = vmatprep.mubr.bf16.mxu1 %v1259_v57  ;;  %v5191_v56 = vld [vmem:[%s6856_s6 + $0x60] sm:$0xff]   ;;  %v5192_v57 = vld [vmem:[%s6856_s6 + $0xa8] sm:$0xff]   ;;  %v5208_v55 = vld [vmem:[%s6858_s8 + $0x30] sm:$0xff]  }
 0x241   : > { %4658 = vmatprep.subr.bf16.mxu1 %v5148_v59  ;;  %v1251_v12 = vrot.slane %v1249_v9, 1  ;;  %4708 = vmatprep.subr.bf16.mxu0 %v5191_v56  ;;  %v5194_v59 = vld [vmem:[%s6856_s6 + $0x68] sm:$0xff]   ;;  %v4359_v9 = vld [vmem:[%s6855_s5] ss:$0 sm:$0xff]  ;;  %v5209_v56 = vld [vmem:[%s6858_s8 + $0x38] sm:$0xff]  }
 0x243   : > { %v1252_v23 = vor.u32 %v1251_v12, %v1247_v17  ;;  %4709 = vmatpush3.bf16.msra.mxu0 %v5193_v58  ;;  %v5213_v58 = vld [vmem:[%s6860_s10] sm:$0xff]  }
 0x244   : > { %4659 = vmatpush3.bf16.msra.mxu1 %v5149_v61  ;;  %v5196_v61 = vld [vmem:[%s6856_s6 + $0x28] sm:$0xff]   ;;  %4710 = vmatprep.subr.bf16.mxu0 %v5194_v59 }
 0x245   : > { %4660 = vmatprep.subr.bf16.mxu1 %v5150_v62  ;;  %v5197_v62 = vld [vmem:[%s6856_s6 + $0x70] sm:$0xff]   ;;  %v5214_v59 = vld [vmem:[%s6860_s10 + $0x48] sm:$0xff]  }
 0x247   : > { %4711 = vmatpush3.bf16.msra.mxu0 %v5196_v61 }
 0x248   : > { %4661 = vmatpush3.bf16.msra.mxu1 %v5151_v0  ;;  %v5198_v0 = vld [vmem:[%s6856_s6 + $0xb8] sm:$0xff]   ;;  %4712 = vmatprep.subr.bf16.mxu0 %v5197_v62 }
 0x249   : > { %4662 = vmatprep.subr.bf16.mxu1 %v5152_v1  ;;  %v5199_v1 = vld [vmem:[%s6856_s6 + $0x30] sm:$0xff]  }
 0x24b   : > { %4713 = vmatpush3.bf16.msra.mxu0 %v5199_v1 }
 0x24c   : > { %4663 = vmatpush3.bf16.msra.mxu1 %v5153_v2  ;;  %v5200_v2 = vld [vmem:[%s6856_s6 + $0x78] sm:$0xff]  }
 0x24d   : > { %4664 = vmatprep.subr.bf16.mxu1 %v5154_v3  ;;  %v5201_v3 = vld [vmem:[%s6856_s6 + $0x38] sm:$0xff]   ;;  %4714 = vmatprep.subr.bf16.mxu0 %v5200_v2 }
 0x24f   : > { %4715 = vmatpush3.bf16.msra.mxu0 %v5201_v3  ;;  %v4408_v3 = vld [vmem:[%s6857_s7] ss:$0 sm:$0xff] }
 0x250   : > { %4665 = vmatpush3.bf16.msra.mxu1 %v5155_v4  ;;  %4878 = vmatprep.subr.bf16.mxu0 %v5499_v63 }
 0x251   : > { %4666 = vmatprep.subr.bf16.mxu1 %v5156_v5 }
 0x254   : > { %4667 = vmatpush3.bf16.msra.mxu1 %v5157_v6 }
 0x255   : > { %4668 = vmatprep.subr.bf16.mxu1 %v5158_v7 }
 0x258   : > { %4669 = vmatpush3.bf16.msra.mxu1 %v5159_v8 }
 0x259   : > { %4670 = vmatprep.subr.bf16.mxu1 %v5160_v10 }
 0x25c   : > { %4671 = vmatpush3.bf16.msra.mxu1 %v5161_v11 }
 0x25d   : > { %4678 = vmatprep.subr.bf16.mxu1 %v5162_v13 }
 0x25f   : > { %1732 = vmatmul.mubr.bf16.vlgmr.msra.gmra.mrb[4].mxu1 %v1252_v23 }
 0x260   : > { %4679 = vmatpush3.bf16.msra.mxu1 %v5163_v20  ;;  %1771 = vmatprep.mubr.bf16.mxu1 %v1265_v22 }
 0x261   : > { %4680 = vmatprep.subr.bf16.mxu1 %v5164_v24 }
 0x264   : > { %4681 = vmatpush3.bf16.msra.mxu1 %v5165_v25 }
 0x265   : > { %4682 = vmatprep.subr.bf16.mxu1 %v5166_v26 }
 0x268   : > { %4683 = vmatpush3.bf16.msra.mxu1 %v5167_v28 }
 0x269   : > { %4684 = vmatprep.subr.bf16.mxu1 %v5168_v29 }
 0x26c   : > { %4685 = vmatpush3.bf16.msra.mxu1 %v5169_v31 }
 0x26d   : > { %4686 = vmatprep.subr.bf16.mxu1 %v5170_v32 }
 0x270   : > { %4687 = vmatpush3.bf16.msra.mxu1 %v5171_v33 }
 0x271   : > { %4688 = vmatprep.subr.bf16.mxu1 %v5172_v34 }
 0x274   : > { %4689 = vmatpush3.bf16.msra.mxu1 %v5173_v35 }
 0x275   : > { %4690 = vmatprep.subr.bf16.mxu1 %v5174_v36 }
 0x278   : > { %4691 = vmatpush3.bf16.msra.mxu1 %v5175_v37 }
 0x279   : > { %4692 = vmatprep.subr.bf16.mxu1 %v5176_v38 }
 0x27c   : > { %4693 = vmatpush3.bf16.msra.mxu1 %v5177_v39 }
 0x27d   : > { %4858 = vmatprep.subr.bf16.mxu1 %v5499_v63 }
 0x27f   : > { %1772 = vmatmul.mubr.bf16.vlgmr.msra.gmra.mrb[8].mxu1 %v1264_v40 }
 0x280   : > { %4874 = vmatprep.mubr.msk.bf16.mxu1 %vm5500_vm6, %v5499_v63  ;;  %4859 = vmatpush3.bf16.msra.mxu1 %v5178_v41 }
 0x281   : > { %4860 = vmatprep.subr.bf16.mxu1 %v5499_v63 }
 0x284   : > { %4861 = vmatpush3.bf16.msra.mxu1 %v5180_v46 }
 0x285   : > { %4862 = vmatprep.subr.bf16.mxu1 %v5499_v63 }
 0x288   : > { %4863 = vmatpush3.bf16.msra.mxu1 %v5183_v47 }
 0x289   : > { %4864 = vmatprep.subr.bf16.mxu1 %v5499_v63 }
 0x28c   : > { %4865 = vmatpush3.bf16.msra.mxu1 %v5186_v50  ;;  %v5204_v50 = vld [vmem:[%s6858_s8 + $0x10] sm:$0xff]  }
 0x28d   : > { %4866 = vmatprep.subr.bf16.mxu1 %v5499_v63 }
 0x290   : > { %4867 = vmatpush3.bf16.msra.mxu1 %v5189_v54  ;;  %v5207_v54 = vld [vmem:[%s6858_s8 + $0x28] sm:$0xff]  }
 0x291   : > { %4868 = vmatprep.subr.bf16.mxu1 %v5499_v63 }
 0x294   : > { %4869 = vmatpush3.bf16.msra.mxu1 %v5192_v57  ;;  %v5211_v57 = vld [vmem:[%s6860_s10 + $0x40] sm:$0xff]  }
 0x295   : > { %4870 = vmatprep.subr.bf16.mxu1 %v5499_v63 }
 0x298   : > { %4871 = vmatpush3.bf16.msra.mxu1 %v5195_v60  ;;  %v5216_v60 = vld [vmem:[%s6860_s10 + $0x8] sm:$0xff]  }
 0x299   : > { %4872 = vmatprep.subr.bf16.mxu1 %v5499_v63 }
 0x29c   : > { %4873 = vmatpush3.bf16.msra.mxu1 %v5198_v0 }
 0x29d   : > { %4740 = vmatprep.subr.bf16.mxu1 %v5211_v57 }
 0x312   : > { %v4650_v4 = vpop.f32.mrb[0].mxu1 }
 0x313   : > { %v4651_v5 = vpop.f32.mrb[1].mxu1 }
 0x314   : > { %v4652_v6 = vadd.f32 %v4651_v5, %v4650_v4  ;;  %v4653_v7 = vpop.f32.mrb[2].mxu1 }
 0x315   : > { %v4654_v8 = vpop.f32.mrb[3].mxu1 }
 0x316   : > { %v1694_v12 = vadd.f32 %v4652_v6, %v4359_v9 }
 0x332   : > { %v4672_v10 = vpop.f32.mrb[4].mxu1 }
 0x333   : > { %v4673_v11 = vpop.f32.mrb[5].mxu1 }
 0x334   : > { %v4674_v13 = vadd.f32 %v4673_v11, %v4672_v10  ;;  %v4675_v17 = vpop.f32.mrb[6].mxu1  ;;  %v5210_v11 = vld [vmem:[%s6860_s10 + $0x80] sm:$0xff]  }
 0x335   : > { %v4676_v20 = vpop.f32.mrb[7].mxu1  ;;  %v5215_v17 = vld [vmem:[%s6860_s10 + $0x90] sm:$0xff]  }
 0x336   : > { %v1734_v22 = vadd.f32 %v4674_v13, %v1694_v12  ;;  %v5212_v13 = vld [vmem:[%s6860_s10 + $0x88] sm:$0xff]   ;;  %v5217_v20 = vld [vmem:[%s6860_s10 + $0x50] sm:$0xff]  }
 0x352   : > { %v4694_v23 = vpop.f32.mrb[8].mxu1 }
 0x353   : > { %v4695_v24 = vpop.f32.mrb[9].mxu1 }
 0x354   : > { %v4696_v25 = vadd.f32 %v4695_v24, %v4694_v23  ;;  %v4697_v26 = vpop.f32.mrb[10].mxu1  ;;  %v5219_v23 = vld [vmem:[%s6860_s10 + $0x10] sm:$0xff]   ;;  %v5220_v24 = vld [vmem:[%s6860_s10 + $0x58] sm:$0xff]  }
 0x355   : > { %v4698_v28 = vpop.f32.mrb[11].mxu1  ;;  %v5222_v26 = vld [vmem:[%s6860_s10 + $0x18] sm:$0xff]  }
 0x356   : > { %v6112_v29 = vadd.f32 %v4696_v25, %v1734_v22  ;;  %v5218_v22 = vld [vmem:[%s6860_s10 + $0x98] sm:$0xff]   ;;  %v5221_v25 = vld [vmem:[%s6860_s10 + $0xa0] sm:$0xff]  }
 0x357   : > { %v5223_v28 = vld [vmem:[%s6860_s10 + $0x60] sm:$0xff]  }
 0x358   : > { %v1779_v31 = vmax.f32 %v6112_v29, 0.0 }
 0x35a   : > { %v1780_v32 = vmax.f32 %v1779_v31, 0.0 }
 0x35c   : > { %v1781_v33 = vpack.c.bf16 %v1780_v32, %v1780_v32  ;;  %v5224_v32 = vld [vmem:[%s6860_s10 + $0xa8] sm:$0xff]  }
 0x35e   : > { %v1783_v34 = vshrl.u32 %v1781_v33, 16  ;;  %v1786_v35 = vshll.u32 %v1781_v33, 16  ;;  %v5225_v33 = vld [vmem:[%s6860_s10 + $0x20] sm:$0xff]  }
 0x360   : > { %v1785_v36 = vrot.slane %v1783_v34, 6  ;;  %v1788_v37 = vrot.slane %v1786_v35, 7  ;;  %v5226_v34 = vld [vmem:[%s6860_s10 + $0x68] sm:$0xff]   ;;  %v5227_v35 = vld [vmem:[%s6860_s10 + $0xb0] sm:$0xff]  }
 0x362   : > { %v1789_v38 = vor.u32 %v1788_v37, %v1785_v36  ;;  %v5228_v36 = vld [vmem:[%s6860_s10 + $0x28] sm:$0xff]   ;;  %v5229_v37 = vld [vmem:[%s6860_s10 + $0x70] sm:$0xff]  }
 0x364   : > { %v1794_v39 = vsel %vm1793_vm2, 0, %v1789_v38  ;;  %v5230_v38 = vld [vmem:[%s6860_s10 + $0xb8] sm:$0xff]  }
 0x365   : > { %v1798_v40 = vsel %vm1797_vm3, %v1794_v39, 0  ;;  %v5231_v39 = vld [vmem:[%s6860_s10 + $0x30] sm:$0xff]  }
 0x366   : > { %v1809_v41 = vrot.slane %v1798_v40, 3  ;;  %v1800_v42 = vshrl.u32 %v1798_v40, 16  ;;  %v1803_v44 = vshll.u32 %v1798_v40, 16 }
 0x368   : > { %4875 = vmatmul.mubr.bf16.vlgmr.msra.gmra.mrb[12].mxu1 %v1809_v41  ;;  %v1802_v45 = vrot.slane %v1800_v42, 1  ;;  %v1805_v46 = vrot.slane %v1803_v44, 2  ;;  %v5233_v41 = vld [vmem:[%s6860_s10 + $0x38] sm:$0xff]   ;;  %v4433_v42 = vld [vmem:[%s6859_s9] ss:$0 sm:$0xff] }
 0x369   : > { %4741 = vmatpush3.bf16.msra.mxu1 %v5213_v58 }
 0x36a   : > { %v1806_v47 = vor.u32 %v1805_v46, %v1802_v45  ;;  %4742 = vmatprep.subr.bf16.mxu1 %v5214_v59 }
 0x36c   : > { %2042 = vmatprep.mubr.bf16.mxu0 %v1806_v47 }
 0x36d   : > { %2043 = vmatmul.mubr.bf16.vlgmr.msra.gmra.mrb[8].mxu0 %v1798_v40  ;;  %4743 = vmatpush3.bf16.msra.mxu1 %v5216_v60  ;;  %v5232_v40 = vld [vmem:[%s6860_s10 + $0x78] sm:$0xff]  }
 0x36e   : > { %4879 = vmatpush3.bf16.msra.mxu0 %v5202_v48  ;;  %4894 = vmatprep.mubr.msk.bf16.mxu0 %vm5500_vm6, %v5499_v63 }
 0x36f   : > { %4880 = vmatprep.subr.bf16.mxu0 %v5499_v63  ;;  %4744 = vmatprep.subr.bf16.mxu1 %v5217_v20  ;;  %v5256_v20 = vld [vmem:[%s6864_s14 + $0x44] ss:$8 sps:$4 sm:$0xff]  }
 0x371   : > { %4745 = vmatpush3.bf16.msra.mxu1 %v5219_v23  ;;  %v5259_v23 = vld [vmem:[%s6864_s14 + $0x54] ss:$8 sps:$4 sm:$0xff]  }
 0x372   : > { %4881 = vmatpush3.bf16.msra.mxu0 %v5203_v49  ;;  %4746 = vmatprep.subr.bf16.mxu1 %v5220_v24  ;;  %v5257_v24 = vld [vmem:[%s6864_s14 + $0x50] ss:$8 sps:$4 sm:$0xff]  }
 0x373   : > { %4882 = vmatprep.subr.bf16.mxu0 %v5499_v63 }
 0x375   : > { %4747 = vmatpush3.bf16.msra.mxu1 %v5222_v26  ;;  %v5260_v26 = vld [vmem:[%s6864_s14 + $0x60] ss:$8 sps:$4 sm:$0xff]  }
 0x376   : > { %4883 = vmatpush3.bf16.msra.mxu0 %v5204_v50  ;;  %4748 = vmatprep.subr.bf16.mxu1 %v5223_v28  ;;  %v5265_v28 = vld [vmem:[%s6864_s14 + $0x74] ss:$8 sps:$4 sm:$0xff]  }
 0x377   : > { %4884 = vmatprep.subr.bf16.mxu0 %v5499_v63 }
 0x379   : > { %4749 = vmatpush3.bf16.msra.mxu1 %v5225_v33  ;;  %v5268_v33 = vld [vmem:[%s6864_s14 + $0x84] ss:$8 sps:$4 sm:$0xff]  }
 0x37a   : > { %4885 = vmatpush3.bf16.msra.mxu0 %v5205_v52  ;;  %4750 = vmatprep.subr.bf16.mxu1 %v5226_v34  ;;  %v5266_v34 = vld [vmem:[%s6864_s14 + $0x80] ss:$8 sps:$4 sm:$0xff]  }
 0x37b   : > { %4886 = vmatprep.subr.bf16.mxu0 %v5499_v63 }
 0x37d   : > { %4751 = vmatpush3.bf16.msra.mxu1 %v5228_v36  ;;  %v5269_v36 = vld [vmem:[%s6864_s14 + $0x90] ss:$8 sps:$4 sm:$0xff]  }
 0x37e   : > { %4887 = vmatpush3.bf16.msra.mxu0 %v5206_v53  ;;  %4752 = vmatprep.subr.bf16.mxu1 %v5229_v37  ;;  %v5274_v37 = vld [vmem:[%s6864_s14 + $0xa4] ss:$8 sps:$4 sm:$0xff]  }
 0x37f   : > { %4888 = vmatprep.subr.bf16.mxu0 %v5499_v63 }
 0x381   : > { %4753 = vmatpush3.bf16.msra.mxu1 %v5231_v39 }
 0x382   : > { %4889 = vmatpush3.bf16.msra.mxu0 %v5207_v54  ;;  %4754 = vmatprep.subr.bf16.mxu1 %v5232_v40 }
 0x383   : > { %4890 = vmatprep.subr.bf16.mxu0 %v5499_v63 }
 0x385   : > { %4755 = vmatpush3.bf16.msra.mxu1 %v5233_v41 }
 0x386   : > { %4891 = vmatpush3.bf16.msra.mxu0 %v5208_v55  ;;  %4918 = vmatprep.subr.bf16.mxu1 %v5499_v63 }
 0x387   : > { %4892 = vmatprep.subr.bf16.mxu0 %v5499_v63 }
 0x38a   : > { %4893 = vmatpush3.bf16.msra.mxu0 %v5209_v56 }
 0x38b   : > { %4898 = vmatprep.subr.bf16.mxu0 %v5499_v63 }
 0x43b   : > { %v2084_v61 = vpop.f32.mrb[12].mxu1 }
 0x43c   : > { %v4876_v62 = vpop.f32.mrb[13].mxu1 }
 0x43d   : > { %v2087_v0 = vpop.f32.mrb[14].mxu1  ;;  %v5234_v62 = vld [vmem:[%s6862_s12] sm:$0xff]  }
 0x43e   : > { %v4877_v1 = vpop.f32.mrb[15].mxu1  ;;  %v5235_v0 = vld [vmem:[%s6862_s12 + $0x8] sm:$0xff]  }
 0x43f   : > { %v5236_v1 = vld [vmem:[%s6862_s12 + $0x10] sm:$0xff]  }
 0x440   : > { %v4716_v2 = vpop.f32.mrb[8].mxu0 }
 0x441   : > { %v4717_v4 = vpop.f32.mrb[9].mxu0 }
 0x442   : > { %v4718_v5 = vadd.f32 %v4717_v4, %v4716_v2  ;;  %v4719_v6 = vpop.f32.mrb[10].mxu0  ;;  %v5237_v2 = vld [vmem:[%s6862_s12 + $0x18] sm:$0xff]   ;;  %v5239_v4 = vld [vmem:[%s6862_s12 + $0x28] sm:$0xff]  }
 0x443   : > { %v4720_v7 = vpop.f32.mrb[11].mxu0  ;;  %v5241_v6 = vld [vmem:[%s6862_s12 + $0x38] sm:$0xff]  }
 0x444   : > { %v2045_v8 = vadd.f32 %v4718_v5, %v4408_v3  ;;  %v5238_v3 = vld [vmem:[%s6862_s12 + $0x20] sm:$0xff]   ;;  %v5240_v5 = vld [vmem:[%s6862_s12 + $0x30] sm:$0xff]  }
 0x445   : > { %v5242_v7 = vld [vmem:[%s6864_s14] ss:$8 sps:$4 sm:$0xff]  }
 0x446   : > { %v2085_v9 = vadd.f32 %v2084_v61, %v2045_v8  ;;  %v5244_v8 = vld [vmem:[%s6864_s14 + $0x4] ss:$8 sps:$4 sm:$0xff]  }
 0x448   : > { %v2090_v10 = vmax.f32 %v2085_v9, 0.0  ;;  %v5247_v9 = vld [vmem:[%s6864_s14 + $0x14] ss:$8 sps:$4 sm:$0xff]  }
 0x44a   : > { %v2091_v12 = vpack.c.bf16 %v2090_v10, %v2090_v10  ;;  %v5245_v10 = vld [vmem:[%s6864_s14 + $0x10] ss:$8 sps:$4 sm:$0xff]  }
 0x44c   : > { %4895 = vmatmul.mubr.bf16.vlgmr.msra.gmra.mrb[12].mxu0 %v2091_v12  ;;  %v5248_v12 = vld [vmem:[%s6864_s14 + $0x20] ss:$8 sps:$4 sm:$0xff]  }
 0x44d   : > { %4899 = vmatpush3.bf16.msra.mxu0 %v5210_v11  ;;  %4914 = vmatprep.mubr.msk.bf16.mxu0 %vm5500_vm6, %v5499_v63  ;;  %v5250_v11 = vld [vmem:[%s6864_s14 + $0x24] ss:$8 sps:$4 sm:$0xff]  }
 0x44e   : > { %4900 = vmatprep.subr.bf16.mxu0 %v5499_v63 }
 0x451   : > { %4901 = vmatpush3.bf16.msra.mxu0 %v5212_v13  ;;  %v5253_v13 = vld [vmem:[%s6864_s14 + $0x34] ss:$8 sps:$4 sm:$0xff]  }
 0x452   : > { %4902 = vmatprep.subr.bf16.mxu0 %v5499_v63 }
 0x455   : > { %4903 = vmatpush3.bf16.msra.mxu0 %v5215_v17  ;;  %v5251_v17 = vld [vmem:[%s6864_s14 + $0x30] ss:$8 sps:$4 sm:$0xff]  }
 0x456   : > { %4904 = vmatprep.subr.bf16.mxu0 %v5499_v63 }
 0x459   : > { %4905 = vmatpush3.bf16.msra.mxu0 %v5218_v22  ;;  %v5254_v22 = vld [vmem:[%s6864_s14 + $0x40] ss:$8 sps:$4 sm:$0xff]  }
 0x45a   : > { %4906 = vmatprep.subr.bf16.mxu0 %v5499_v63 }
 0x45d   : > { %4907 = vmatpush3.bf16.msra.mxu0 %v5221_v25  ;;  %v5262_v25 = vld [vmem:[%s6864_s14 + $0x64] ss:$8 sps:$4 sm:$0xff]  }
 0x45e   : > { %4908 = vmatprep.subr.bf16.mxu0 %v5499_v63 }
 0x461   : > { %4909 = vmatpush3.bf16.msra.mxu0 %v5224_v32  ;;  %v5263_v32 = vld [vmem:[%s6864_s14 + $0x70] ss:$8 sps:$4 sm:$0xff]  }
 0x462   : > { %4910 = vmatprep.subr.bf16.mxu0 %v5499_v63 }
 0x465   : > { %4911 = vmatpush3.bf16.msra.mxu0 %v5227_v35  ;;  %v5271_v35 = vld [vmem:[%s6864_s14 + $0x94] ss:$8 sps:$4 sm:$0xff]  }
 0x466   : > { %4912 = vmatprep.subr.bf16.mxu0 %v5499_v63 }
 0x469   : > { %4913 = vmatpush3.bf16.msra.mxu0 %v5230_v38  ;;  %v5272_v38 = vld [vmem:[%s6864_s14 + $0xa0] ss:$8 sps:$4 sm:$0xff]  }
 0x46a   : > { %2942 = vmatprep.subr.bf16.mxu0 %v5244_v8 }
 0x51f   : > { %v2197_v44 = vpop.f32.mrb[12].mxu0 }
 0x520   : > { %v2198_v45 = vadd.f32 %v4433_v42, %v2197_v44  ;;  %v4896_v46 = vpop.f32.mrb[13].mxu0 }
 0x521   : > { %v2200_v47 = vpop.f32.mrb[14].mxu0 }
 0x522   : > { %v6241_v48 = vadd.f32 %v2198_v45, %v1779_v31  ;;  %v4897_v49 = vpop.f32.mrb[15].mxu0  ;;  %v4442_v45 = vld [vmem:[%s6861_s11] ss:$0 sm:$0xff] }
 0x524   : > { %v2204_v50 = vmax.f32 %v6241_v48, 0.0 }
 0x526   : > { %v2205_v52 = vpack.c.bf16 %v2204_v50, %v2204_v50 }
 0x528   : > { %v2207_v53 = vshrl.u32 %v2205_v52, 16  ;;  %v2210_v55 = vshll.u32 %v2205_v52, 16 }
 0x52a   : > { %v2209_v54 = vrot.slane %v2207_v53, 7 }
 0x52c   : > { %v2212_v56 = vor.u32 %v2210_v55, %v2209_v54 }
 0x52e   : > { %v2214_v57 = vsel %vm5713_vm4, 0, %v2212_v56  ;;  %v5277_v56 = vld [vmem:[%s6864_s14 + $0xb4] ss:$8 sps:$4 sm:$0xff]  }
 0x52f   : > { %v2215_v58 = vsel %vm5917_vm13, %v2214_v57, 0  ;;  %v5275_v57 = vld [vmem:[%s6864_s14 + $0xb0] ss:$8 sps:$4 sm:$0xff]  }
 0x530   : > { %v2225_v59 = vrot.slane %v2215_v58, 1  ;;  %v2219_v60 = vshll.u32 %v2215_v58, 16  ;;  %v2217_v29 = vshrl.u32 %v2215_v58, 16 }
 0x532   : > { %4915 = vmatmul.mubr.bf16.vlgmr.msra.gmra.mrb[16].mxu0 %v2225_v59  ;;  %v2221_v31 = vrot.slane %v2219_v60, 1  ;;  %v5278_v59 = vld [vmem:[%s6864_s14 + $0xc0] ss:$8 sps:$4 sm:$0xff]   ;;  %v5283_v60 = vld [vmem:[%s6864_s14 + $0xd4] ss:$8 sps:$4 sm:$0xff]  }
 0x533   : > { %2943 = vmatpush1.bf16.msra.mxu0 %v5242_v7 }
 0x534   : > { %v2222_v61 = vor.u32 %v2221_v31, %v2217_v29  ;;  %2944 = vmatprep.subr.bf16.mxu0 %v5247_v9  ;;  %v5281_v29 = vld [vmem:[%s6864_s14 + $0xd0] ss:$8 sps:$4 sm:$0xff]   ;;  %v5286_v31 = vld [vmem:[%s6864_s14 + $0xe4] ss:$8 sps:$4 sm:$0xff]  }
 0x536   : > { %2458 = vmatprep.mubr.bf16.mxu1 %v2222_v61  ;;  %v5284_v61 = vld [vmem:[%s6864_s14 + $0xe0] ss:$8 sps:$4 sm:$0xff]  }
 0x537   : > { %2459 = vmatmul.mubr.bf16.vlgmr.msra.gmra.mrb[16].mxu1 %v2215_v58  ;;  %2945 = vmatpush1.bf16.msra.mxu0 %v5245_v10  ;;  %v5280_v58 = vld [vmem:[%s6864_s14 + $0xc4] ss:$8 sps:$4 sm:$0xff]  }
 0x538   : > { %4919 = vmatpush3.bf16.msra.mxu1 %v5234_v62  ;;  %4934 = vmatprep.mubr.msk.bf16.mxu1 %vm5500_vm6, %v5499_v63  ;;  %v5289_v62 = vld [vmem:[%s6864_s14 + $0xf4] ss:$8 sps:$4 sm:$0xff]  }
 0x539   : > { %4920 = vmatprep.subr.bf16.mxu1 %v5499_v63  ;;  %2946 = vmatprep.subr.bf16.mxu0 %v5250_v11 }
 0x53b   : > { %2947 = vmatpush1.bf16.msra.mxu0 %v5248_v12 }
 0x53c   : > { %4921 = vmatpush3.bf16.msra.mxu1 %v5235_v0  ;;  %2948 = vmatprep.subr.bf16.mxu0 %v5253_v13  ;;  %v5287_v0 = vld [vmem:[%s6864_s14 + $0xf0] ss:$8 sps:$4 sm:$0xff]  }
 0x53d   : > { %4922 = vmatprep.subr.bf16.mxu1 %v5499_v63 }
 0x53f   : > { %2949 = vmatpush1.bf16.msra.mxu0 %v5251_v17 }
 0x540   : > { %4923 = vmatpush3.bf16.msra.mxu1 %v5236_v1  ;;  %2950 = vmatprep.subr.bf16.mxu0 %v5256_v20  ;;  %v5292_v1 = vld [vmem:[%s6864_s14 + $0x104] ss:$8 sps:$4 sm:$0xff]  }
 0x541   : > { %4924 = vmatprep.subr.bf16.mxu1 %v5499_v63 }
 0x543   : > { %2951 = vmatpush1.bf16.msra.mxu0 %v5254_v22 }
 0x544   : > { %4925 = vmatpush3.bf16.msra.mxu1 %v5237_v2  ;;  %2952 = vmatprep.subr.bf16.mxu0 %v5259_v23  ;;  %v4467_v2 = vld [vmem:[%s6863_s13] ss:$0 sm:$0xff] }
 0x545   : > { %4926 = vmatprep.subr.bf16.mxu1 %v5499_v63 }
 0x547   : > { %2953 = vmatpush1.bf16.msra.mxu0 %v5257_v24 }
 0x548   : > { %4927 = vmatpush3.bf16.msra.mxu1 %v5238_v3  ;;  %2954 = vmatprep.subr.bf16.mxu0 %v5262_v25 }
 0x549   : > { %4928 = vmatprep.subr.bf16.mxu1 %v5499_v63 }
 0x54b   : > { %2955 = vmatpush1.bf16.msra.mxu0 %v5260_v26  ;;  %v5295_v26 = vld [vmem:[%s6864_s14 + $0x114] ss:$8 sps:$4 sm:$0xff]  }
 0x54c   : > { %4929 = vmatpush3.bf16.msra.mxu1 %v5239_v4  ;;  %2956 = vmatprep.subr.bf16.mxu0 %v5265_v28  ;;  %v5298_v28 = vld [vmem:[%s6864_s14 + $0x124] ss:$8 sps:$4 sm:$0xff]  }
 0x54d   : > { %4930 = vmatprep.subr.bf16.mxu1 %v5499_v63 }
 0x54f   : > { %2957 = vmatpush1.bf16.msra.mxu0 %v5263_v32  ;;  %v5296_v32 = vld [vmem:[%s6864_s14 + $0x120] ss:$8 sps:$4 sm:$0xff]  }
 0x550   : > { %4931 = vmatpush3.bf16.msra.mxu1 %v5240_v5  ;;  %2958 = vmatprep.subr.bf16.mxu0 %v5268_v33  ;;  %v5301_v33 = vld [vmem:[%s6864_s14 + $0x134] ss:$8 sps:$4 sm:$0xff]  }
 0x551   : > { %4932 = vmatprep.subr.bf16.mxu1 %v5499_v63 }
 0x553   : > { %2959 = vmatpush1.bf16.msra.mxu0 %v5266_v34  ;;  %v5299_v34 = vld [vmem:[%s6864_s14 + $0x130] ss:$8 sps:$4 sm:$0xff]  }
 0x554   : > { %4933 = vmatpush3.bf16.msra.mxu1 %v5241_v6  ;;  %2960 = vmatprep.subr.bf16.mxu0 %v5271_v35  ;;  %v5304_v35 = vld [vmem:[%s6864_s14 + $0x144] ss:$8 sps:$4 sm:$0xff]  }
 0x557   : > { %2961 = vmatpush1.bf16.msra.mxu0 %v5269_v36  ;;  %v5302_v36 = vld [vmem:[%s6864_s14 + $0x140] ss:$8 sps:$4 sm:$0xff]  }
 0x558   : > { %2962 = vmatprep.subr.bf16.mxu0 %v5274_v37  ;;  %v5307_v37 = vld [vmem:[%s6864_s14 + $0x154] ss:$8 sps:$4 sm:$0xff]  }
 0x55b   : > { %2963 = vmatpush1.bf16.msra.mxu0 %v5272_v38  ;;  %v5305_v38 = vld [vmem:[%s6864_s14 + $0x150] ss:$8 sps:$4 sm:$0xff]  }
 0x55c   : > { %2964 = vmatprep.subr.bf16.mxu0 %v5277_v56 }
 0x55f   : > { %2965 = vmatpush1.bf16.msra.mxu0 %v5275_v57  ;;  %v5314_v57 = vld [vmem:[%s6866_s16 + $0x40] sm:$0xff]  }
 0x560   : > { %2966 = vmatprep.subr.bf16.mxu0 %v5280_v58  ;;  %v5315_v58 = vld [vmem:[%s6866_s16] sm:$0xff]  }
 0x563   : > { %2967 = vmatpush1.bf16.msra.mxu0 %v5278_v59  ;;  %v5316_v59 = vld [vmem:[%s6866_s16 + $0x48] sm:$0xff]  }
 0x564   : > { %2968 = vmatprep.subr.bf16.mxu0 %v5283_v60  ;;  %v5319_v60 = vld [vmem:[%s6866_s16 + $0x10] sm:$0xff]  }
 0x567   : > { %2969 = vmatpush1.bf16.msra.mxu0 %v5281_v29  ;;  %v5320_v29 = vld [vmem:[%s6866_s16 + $0x58] sm:$0xff]  }
 0x568   : > { %2970 = vmatprep.subr.bf16.mxu0 %v5286_v31  ;;  %v5321_v31 = vld [vmem:[%s6866_s16 + $0x18] sm:$0xff]  }
 0x56b   : > { %2971 = vmatpush1.bf16.msra.mxu0 %v5284_v61  ;;  %v5322_v61 = vld [vmem:[%s6866_s16 + $0x60] sm:$0xff]  }
 0x56c   : > { %2972 = vmatprep.subr.bf16.mxu0 %v5289_v62  ;;  %v5323_v62 = vld [vmem:[%s6866_s16 + $0x20] sm:$0xff]  }
 0x56f   : > { %2973 = vmatpush1.bf16.msra.mxu0 %v5287_v0  ;;  %v5324_v0 = vld [vmem:[%s6866_s16 + $0x68] sm:$0xff]  }
 0x570   : > { %2983 = vmatprep.subr.bf16.mxu0 %v5292_v1  ;;  %v5325_v1 = vld [vmem:[%s6866_s16 + $0x28] sm:$0xff]  }
 0x605   : > { %v2500_v39 = vpop.f32.mrb[16].mxu0 }
 0x606   : > { %v4916_v40 = vpop.f32.mrb[17].mxu0 }
 0x607   : > { %v2503_v41 = vpop.f32.mrb[18].mxu0  ;;  %v5308_v40 = vld [vmem:[%s6864_s14 + $0x160] ss:$8 sps:$4 sm:$0xff]  }
 0x608   : > { %v4917_v42 = vpop.f32.mrb[19].mxu0  ;;  %v5313_v41 = vld [vmem:[%s6864_s14 + $0x174] ss:$8 sps:$4 sm:$0xff]  }
 0x609   : > { %v5311_v42 = vld [vmem:[%s6864_s14 + $0x170] ss:$8 sps:$4 sm:$0xff]  }
 0x60a   : > { %v4756_v44 = vpop.f32.mrb[16].mxu1 }
 0x60b   : > { %v4757_v46 = vpop.f32.mrb[17].mxu1 }
 0x60c   : > { %v4758_v47 = vadd.f32 %v4757_v46, %v4756_v44  ;;  %v4759_v49 = vpop.f32.mrb[18].mxu1  ;;  %v3024_v46 = vadd.s32 8, %v5863_v14 }
 0x60d   : > { %v4760_v50 = vpop.f32.mrb[19].mxu1 }
 0x60e   : > { %v2461_v52 = vadd.f32 %v4758_v47, %v4442_v45  ;;  %v2690_v45 = vld [vmem:[%s6865_s15] sm:$0x3]  ;;  %vm3028_vm7 = vcmp.eq.s32.totalorder %v3024_v46, %v5874_v18  ;;  %vm3025_vm8 = vcmp.eq.s32.totalorder %v3024_v46, %v5865_v15  ;;  %v5318_v15 = vld [vmem:[%s6866_s16 + $0x50] sm:$0xff]  }
 0x60f   : > { %v2699_v47 = vrot.slane %v2690_v45, %v5868_v16  ;;  %v2695_v49 = vrot.slane %v2690_v45, %v5877_v19  ;;  %v4525_v56 = vsel %vm3028_vm7, 1.0, %v5499_v63  ;;  %v4524_v18 = vsel %vm3025_vm8, 1.0, %v5499_v63  ;;  %v5341_v45 = vld [vmem:[%s6868_s18 + $0x18] ss:$12 sps:$4 sm:$0xff]   ;;  %v5346_v46 = vld [vmem:[%s6868_s18 + $0x34] ss:$12 sps:$4 sm:$0xff]  }
 0x610   : > { %v2501_v53 = vadd.f32 %v2500_v39, %v2461_v52  ;;  %v5310_v39 = vld [vmem:[%s6864_s14 + $0x164] ss:$8 sps:$4 sm:$0xff]  }
 0x612   : > { %v2506_v54 = vmax.f32 %v2501_v53, 0.0 }
 0x614   : > { %v2507_v55 = vpack.c.bf16 %v2506_v54, %v2506_v54 }
 0x616   : > { %4935 = vmatmul.mubr.bf16.vlgmr.msra.gmra.mrb[20].mxu1 %v2507_v55 }
 0x617   : > { %4940 = vmatprep.mubr.msk.f32.mxu1 %vm3031_vm5, %v5884_v27 }
 0x6e9   : > { %v2613_v3 = vpop.f32.mrb[20].mxu1 }
 0x6ea   : > { %v2614_v4 = vadd.f32 %v4467_v2, %v2613_v3  ;;  %v4936_v5 = vpop.f32.mrb[21].mxu1  ;;  %v5326_v2 = vld [vmem:[%s6866_s16 + $0x70] sm:$0xff]  }
 0x6eb   : > { %v2616_v6 = vpop.f32.mrb[22].mxu1  ;;  %v5327_v3 = vld [vmem:[%s6866_s16 + $0x30] sm:$0xff]   ;;  %v5329_v5 = vld [vmem:[%s6866_s16 + $0x38] sm:$0xff]  }
 0x6ec   : > { %v2619_v7 = vadd.f32 %v2614_v4, %v6241_v48  ;;  %v4937_v8 = vpop.f32.mrb[23].mxu1  ;;  %v5290_v48 = vld [vmem:[%s6864_s14 + $0x100] ss:$8 sps:$4 sm:$0xff]   ;;  %v5328_v4 = vld [vmem:[%s6866_s16 + $0x78] sm:$0xff]  }
 0x6ee   : > { %v2620_v9 = vpack.c.bf16 %v2619_v7, %v2619_v7 }
 0x6f0   : > { %v2622_v10 = vshrl.u32 %v2620_v9, 16  ;;  %v2625_v12 = vshll.u32 %v2620_v9, 16 }
 0x6f2   : > { %v2624_v11 = vrot.slane %v2622_v10, 7 }
 0x6f4   : > { %v2627_v13 = vor.u32 %v2625_v12, %v2624_v11 }
 0x6f6   : > { %v2629_v17 = vsel %vm5713_vm4, 0, %v2627_v13 }
 0x6f7   : > { %v2630_v20 = vsel %vm5917_vm13, %v2629_v17, 0 }
 0x6f8   : > { %v2634_v22 = vshll.u32 %v2630_v20, 16  ;;  %v2632_v23 = vshrl.u32 %v2630_v20, 16  ;;  %v2640_v44 = vrot.slane %v2630_v20, 1 }
 0x6fa   : > { %v2636_v24 = vrot.slane %v2634_v22, 1 }
 0x6fc   : > { %v2637_v25 = vor.u32 %v2636_v24, %v2632_v23 }
 0x6fe   : > { %2974 = vmatprep.mubr.bf16.mxu0 %v2637_v25 }
 0x6ff   : > { %2975 = vmatmul.mubr.bf16.vlgmr.msra.gmra.mrb[20].mxu0 %v2630_v20 }
 0x700   : > { %2984 = vmatpush1.bf16.msra.mxu0 %v5290_v48  ;;  %3015 = vmatprep.mubr.bf16.mxu0 %v5498_v51 }
 0x701   : > { %2985 = vmatprep.subr.bf16.mxu0 %v5295_v26  ;;  %v5330_v26 = vld [vmem:[%s6866_s16 + $0x80] sm:$0xff]  }
 0x704   : > { %2986 = vmatpush1.bf16.msra.mxu0 %v5293_v43 }
 0x705   : > { %2987 = vmatprep.subr.bf16.mxu0 %v5298_v28  ;;  %v5331_v28 = vld [vmem:[%s6866_s16 + $0x88] sm:$0xff]  }
 0x708   : > { %2988 = vmatpush1.bf16.msra.mxu0 %v5296_v32  ;;  %v5332_v32 = vld [vmem:[%s6866_s16 + $0x90] sm:$0xff]  }
 0x709   : > { %2989 = vmatprep.subr.bf16.mxu0 %v5301_v33  ;;  %v5333_v33 = vld [vmem:[%s6866_s16 + $0x98] sm:$0xff]  }
 0x70c   : > { %2990 = vmatpush1.bf16.msra.mxu0 %v5299_v34  ;;  %v5334_v34 = vld [vmem:[%s6866_s16 + $0xa0] sm:$0xff]  }
 0x70d   : > { %2991 = vmatprep.subr.bf16.mxu0 %v5304_v35  ;;  %v5335_v35 = vld [vmem:[%s6866_s16 + $0xa8] sm:$0xff]  }
 0x710   : > { %2992 = vmatpush1.bf16.msra.mxu0 %v5302_v36  ;;  %v5336_v36 = vld [vmem:[%s6866_s16 + $0xb0] sm:$0xff]  }
 0x711   : > { %2993 = vmatprep.subr.bf16.mxu0 %v5307_v37  ;;  %v5337_v37 = vld [vmem:[%s6866_s16 + $0xb8] sm:$0xff]  }
 0x714   : > { %2994 = vmatpush1.bf16.msra.mxu0 %v5305_v38  ;;  %v5340_v38 = vld [vmem:[%s6868_s18 + $0x4] ss:$12 sps:$4 sm:$0xff]  }
 0x715   : > { %2995 = vmatprep.subr.bf16.mxu0 %v5310_v39 }
 0x718   : > { %2996 = vmatpush1.bf16.msra.mxu0 %v5308_v40 }
 0x719   : > { %2997 = vmatprep.subr.bf16.mxu0 %v5313_v41  ;;  %v5338_v41 = vld [vmem:[%s6868_s18] ss:$12 sps:$4 sm:$0xff]  }
 0x71c   : > { %2998 = vmatpush1.bf16.msra.mxu0 %v5311_v42  ;;  %v5343_v42 = vld [vmem:[%s6868_s18 + $0x1c] ss:$12 sps:$4 sm:$0xff]  }
 0x71f   : > { %3016 = vmatmul.mubr.bf16.vlgmr.msra.gmra.mrb[20].mxu0 %v2640_v44 }
 0x7f2   : > { %v3017_v50 = vpop.f32.mrb[20].mxu0 }
 0x7f3   : > { %v3019_v52 = vpop.f32.mrb[21].mxu0  ;;  %v4990_v27 = vadd.f32 %v3017_v50, %v2695_v49  ;;  %v5349_v49 = vld [vmem:[%s6868_s18 + $0x4c] ss:$12 sps:$4 sm:$0xff]   ;;  %v5347_v50 = vld [vmem:[%s6868_s18 + $0x48] ss:$12 sps:$4 sm:$0xff]  }
 0x7f4   : > { %v4991_v53 = vadd.f32 %v3019_v52, %v2699_v47  ;;  %v3021_v54 = vpop.f32.mrb[22].mxu0  ;;  %v5344_v47 = vld [vmem:[%s6868_s18 + $0x30] ss:$12 sps:$4 sm:$0xff]   ;;  %v5350_v52 = vld [vmem:[%s6868_s18 + $0x60] ss:$12 sps:$4 sm:$0xff]  }
 0x7f5   : > { %v3022_v55 = vpop.f32.mrb[23].mxu0  ;;  %v5355_v54 = vld [vmem:[%s6868_s18 + $0x7c] ss:$12 sps:$4 sm:$0xff]  }
 0x7f6   : > { %4938 = vmatprep.subr.mxu1 %v4991_v53  ;;  %v5365_v55 = vld [vmem:[%s6868_s18 + $0xc8] ss:$12 sps:$4 sm:$0xff]  }
 0x7f7   : > { %4939 = vmatpush3.msra.mxu1 %v4991_v53  ;;  %v5352_v53 = vld [vmem:[%s6868_s18 + $0x64] ss:$12 sps:$4 sm:$0xff]   ;;  %4817 = vmatprep.subr.bf16.mxu0 %v5365_v55 }
 0x7f8   : > { %4941 = vmatmul.mubr.msk.f32.vlgmr.msra.gmra.mrb[24].mxu1 %vm3031_vm5, %v4525_v56  ;;  %4943 = vmatprep.subr.mxu1 %v4990_v27  ;;  %v5366_v56 = vld [vmem:[%s6868_s18 + $0x8] ss:$12 sps:$4 sm:$0xff]  }
 0x7f9   : > { %4944 = vmatpush3.msra.mxu1 %v4990_v27  ;;  %4945 = vmatprep.mubr.msk.f32.mxu1 %vm3031_vm5, %v5893_v30  ;;  %v5317_v30 = vld [vmem:[%s6866_s16 + $0x8] sm:$0xff]   ;;  %v5353_v27 = vld [vmem:[%s6868_s18 + $0x78] ss:$12 sps:$4 sm:$0xff]  }
 0x7fa   : > { %4786 = vmatprep.subr.bf16.mxu1 %v5314_v57  ;;  %v5370_v57 = vld [vmem:[%s6868_s18 + $0xe0] ss:$12 sps:$4 sm:$0xff]   ;;  %4818 = vmatpush3.bf16.msra.mxu0 %v5366_v56 }
 0x7fb   : > { %4819 = vmatprep.subr.bf16.mxu0 %v5370_v57 }
 0x800   : > { %4946 = vmatmul.mubr.msk.f32.vlgmr.msra.gmra.mrb[24].mxu1 %vm3031_vm5, %v4524_v18  ;;  %v5358_v18 = vld [vmem:[%s6868_s18 + $0x94] ss:$12 sps:$4 sm:$0xff]  }
 0x801   : > { %4787 = vmatpush3.bf16.msra.mxu1 %v5315_v58  ;;  %v5371_v58 = vld [vmem:[%s6868_s18 + $0x20] ss:$12 sps:$4 sm:$0xff]  }
 0x802   : > { %4788 = vmatprep.subr.bf16.mxu1 %v5316_v59  ;;  %v5375_v59 = vld [vmem:[%s6868_s18 + $0xf8] ss:$12 sps:$4 sm:$0xff]   ;;  %4820 = vmatpush3.bf16.msra.mxu0 %v5371_v58 }
 0x803   : > { %4821 = vmatprep.subr.bf16.mxu0 %v5375_v59 }
 0x805   : > { %4789 = vmatpush3.bf16.msra.mxu1 %v5317_v30  ;;  %v5356_v30 = vld [vmem:[%s6868_s18 + $0x90] ss:$12 sps:$4 sm:$0xff]  }
 0x806   : > { %4790 = vmatprep.subr.bf16.mxu1 %v5318_v15  ;;  %v5361_v15 = vld [vmem:[%s6868_s18 + $0xac] ss:$12 sps:$4 sm:$0xff]  }
 0x809   : > { %4791 = vmatpush3.bf16.msra.mxu1 %v5319_v60  ;;  %v5359_v60 = vld [vmem:[%s6868_s18 + $0xa8] ss:$12 sps:$4 sm:$0xff]  }
 0x80a   : > { %4792 = vmatprep.subr.bf16.mxu1 %v5320_v29  ;;  %v5364_v29 = vld [vmem:[%s6868_s18 + $0xc4] ss:$12 sps:$4 sm:$0xff]  }
 0x80d   : > { %4793 = vmatpush3.bf16.msra.mxu1 %v5321_v31  ;;  %v5362_v31 = vld [vmem:[%s6868_s18 + $0xc0] ss:$12 sps:$4 sm:$0xff]  }
 0x80e   : > { %4794 = vmatprep.subr.bf16.mxu1 %v5322_v61  ;;  %v5369_v61 = vld [vmem:[%s6868_s18 + $0xdc] ss:$12 sps:$4 sm:$0xff]  }
 0x811   : > { %4795 = vmatpush3.bf16.msra.mxu1 %v5323_v62  ;;  %v5367_v62 = vld [vmem:[%s6868_s18 + $0xd8] ss:$12 sps:$4 sm:$0xff]  }
 0x812   : > { %4796 = vmatprep.subr.bf16.mxu1 %v5324_v0  ;;  %v5374_v0 = vld [vmem:[%s6868_s18 + $0xf4] ss:$12 sps:$4 sm:$0xff]  }
 0x815   : > { %4797 = vmatpush3.bf16.msra.mxu1 %v5325_v1  ;;  %v5372_v1 = vld [vmem:[%s6868_s18 + $0xf0] ss:$12 sps:$4 sm:$0xff]  }
 0x816   : > { %4798 = vmatprep.subr.bf16.mxu1 %v5326_v2  ;;  %v5376_v2 = vld [vmem:[%s6868_s18 + $0x38] ss:$12 sps:$4 sm:$0xff]  }
 0x817   : > { %4822 = vmatpush3.bf16.msra.mxu0 %v5376_v2  ;;  %v5410_v2 = vld [vmem:[%s6868_s18 + $0x1b0] ss:$12 sps:$4 sm:$0xff]  }
 0x819   : > { %4799 = vmatpush3.bf16.msra.mxu1 %v5327_v3  ;;  %v5379_v3 = vld [vmem:[%s6868_s18 + $0x10c] ss:$12 sps:$4 sm:$0xff]  }
 0x81a   : > { %4800 = vmatprep.subr.bf16.mxu1 %v5328_v4  ;;  %v5380_v4 = vld [vmem:[%s6868_s18 + $0x110] ss:$12 sps:$4 sm:$0xff]  }
 0x81b   : > { %4823 = vmatprep.subr.bf16.mxu0 %v5380_v4  ;;  %v5414_v4 = vld [vmem:[%s6868_s18 + $0x1c8] ss:$12 sps:$4 sm:$0xff]  }
 0x81d   : > { %4801 = vmatpush3.bf16.msra.mxu1 %v5329_v5  ;;  %v5377_v5 = vld [vmem:[%s6868_s18 + $0x108] ss:$12 sps:$4 sm:$0xff]  }
 0x81e   : > { %4948 = vmatprep.subr.bf16.mxu1 %v5499_v63 }
 0x8d3   : > { %v4947_v6 = vpop.f32.mrb[24].mxu1 }
 0x8d4   : > { %v3183_v7 = vpop.f32.mrb[25].mxu1 }
 0x8d5   : > { %v3192_v8 = vpack.c.bf16 %v4947_v6, %v3183_v7  ;;  %v5381_v6 = vld [vmem:[%s6868_s18 + $0x50] ss:$12 sps:$4 sm:$0xff]  }
 0x8d6   : > { %4824 = vmatpush3.bf16.msra.mxu0 %v5381_v6  ;;  %v5384_v7 = vld [vmem:[%s6868_s18 + $0x124] ss:$12 sps:$4 sm:$0xff]  }
 0x8d7   : > { %v3194_v9 = vshrl.u32 %v3192_v8, 16  ;;  %v3197_v11 = vshll.u32 %v3192_v8, 16  ;;  %v5385_v8 = vld [vmem:[%s6868_s18 + $0x128] ss:$12 sps:$4 sm:$0xff]   ;;  %v5420_v6 = vld [vmem:[%s6868_s18 + $0x1e4] ss:$12 sps:$4 sm:$0xff]  }
 0x8d8   : > { %4825 = vmatprep.subr.bf16.mxu0 %v5385_v8  ;;  %v5421_v8 = vld [vmem:[%s6868_s18 + $0x1e8] ss:$12 sps:$4 sm:$0xff]  }
 0x8d9   : > { %v3196_v10 = vrot.slane %v3194_v9, 7  ;;  %v5382_v9 = vld [vmem:[%s6868_s18 + $0x120] ss:$12 sps:$4 sm:$0xff]  }
 0x8db   : > { %v3199_v12 = vor.u32 %v3197_v11, %v3196_v10  ;;  %v3203_v13 = vsel %vm5713_vm4, %v3196_v10, 0  ;;  %v5386_v10 = vld [vmem:[%s6868_s18 + $0x68] ss:$12 sps:$4 sm:$0xff]  }
 0x8dc   : > { %v3213_v20 = vshll.u32 %v3203_v13, 16  ;;  %v3222_v40 = vrot.slane %v3203_v13, 1  ;;  %4826 = vmatpush3.bf16.msra.mxu0 %v5386_v10  ;;  %v5389_v11 = vld [vmem:[%s6868_s18 + $0x13c] ss:$12 sps:$4 sm:$0xff]   ;;  %v5387_v13 = vld [vmem:[%s6868_s18 + $0x138] ss:$12 sps:$4 sm:$0xff]  }
 0x8dd   : > { %v3202_v17 = vsel %vm5713_vm4, 0, %v3199_v12  ;;  %v5390_v12 = vld [vmem:[%s6868_s18 + $0x140] ss:$12 sps:$4 sm:$0xff]   ;;  %v5422_v10 = vld [vmem:[%s6868_s18 + $0x1f8] ss:$12 sps:$4 sm:$0xff]  }
 0x8de   : > { %v3208_v22 = vshll.u32 %v3202_v17, 16  ;;  %v3206_v23 = vshrl.u32 %v3202_v17, 16  ;;  %v3215_v48 = vrot.slane %v3213_v20, 1  ;;  %v3221_v39 = vrot.slane %v3202_v17, 1  ;;  %4827 = vmatprep.subr.bf16.mxu0 %v5390_v12  ;;  %v5394_v20 = vld [vmem:[%s6868_s18 + $0x154] ss:$12 sps:$4 sm:$0xff]  }
 0x8df   : > { %v5428_v12 = vld [vmem:[%s6868_s18 + $0x214] ss:$12 sps:$4 sm:$0xff]  }
 0x8e0   : > { %v3210_v24 = vrot.slane %v3208_v22, 1  ;;  %v3223_v44 = vsel %vm3220_vm10, %v3221_v39, %v3222_v40  ;;  %v5395_v22 = vld [vmem:[%s6868_s18 + $0x158] ss:$12 sps:$4 sm:$0xff]  }
 0x8e2   : > { %v3211_v25 = vor.u32 %v3210_v24, %v3206_v23  ;;  %v5392_v23 = vld [vmem:[%s6868_s18 + $0x150] ss:$12 sps:$4 sm:$0xff]   ;;  %v5396_v24 = vld [vmem:[%s6868_s18 + $0x98] ss:$12 sps:$4 sm:$0xff]  }
 0x8e4   : > { %v3216_v43 = vsel %vm3204_vm9, %v3211_v25, %v3215_v48  ;;  %v5399_v25 = vld [vmem:[%s6868_s18 + $0x16c] ss:$12 sps:$4 sm:$0xff]   ;;  %v5400_v48 = vld [vmem:[%s6868_s18 + $0x170] ss:$12 sps:$4 sm:$0xff]  }
 0x8e5   : > { %3456 = vmatprep.mubr.bf16.mxu1 %v3216_v43  ;;  %v5401_v43 = vld [vmem:[%s6868_s18 + $0xb0] ss:$12 sps:$4 sm:$0xff]  }
 0x8e6   : > { %3457 = vmatmul.mubr.bf16.vlgmr.msra.gmra.mrb[28].mxu1 %v3202_v17  ;;  %v5391_v17 = vld [vmem:[%s6868_s18 + $0x80] ss:$12 sps:$4 sm:$0xff]  }
 0x8e7   : > { %4949 = vmatpush3.bf16.msra.mxu1 %v5330_v26  ;;  %4964 = vmatprep.mubr.msk.bf16.mxu1 %vm5500_vm6, %v5499_v63  ;;  %v5397_v26 = vld [vmem:[%s6868_s18 + $0x168] ss:$12 sps:$4 sm:$0xff]  }
 0x8e8   : > { %4950 = vmatprep.subr.bf16.mxu1 %v5499_v63  ;;  %4828 = vmatpush3.bf16.msra.mxu0 %v5391_v17  ;;  %v5429_v17 = vld [vmem:[%s6868_s18 + $0x218] ss:$12 sps:$4 sm:$0xff]  }
 0x8e9   : > { %4829 = vmatprep.subr.bf16.mxu0 %v5395_v22  ;;  %v5430_v22 = vld [vmem:[%s6868_s18 + $0x228] ss:$12 sps:$4 sm:$0xff]  }
 0x8eb   : > { %4951 = vmatpush3.bf16.msra.mxu1 %v5331_v28  ;;  %v5404_v28 = vld [vmem:[%s6868_s18 + $0x184] ss:$12 sps:$4 sm:$0xff]  }
 0x8ec   : > { %4952 = vmatprep.subr.bf16.mxu1 %v5499_v63  ;;  %4830 = vmatpush3.bf16.msra.mxu0 %v5396_v24 }
 0x8ed   : > { %4831 = vmatprep.subr.bf16.mxu0 %v5400_v48 }
 0x8ef   : > { %4953 = vmatpush3.bf16.msra.mxu1 %v5332_v32 }
 0x8f0   : > { %4954 = vmatprep.subr.bf16.mxu1 %v5499_v63  ;;  %4832 = vmatpush3.bf16.msra.mxu0 %v5401_v43 }
 0x8f1   : > { %4968 = vmatprep.subr.bf16.mxu0 %v5499_v63 }
 0x8f3   : > { %4955 = vmatpush3.bf16.msra.mxu1 %v5333_v33 }
 0x8f4   : > { %4956 = vmatprep.subr.bf16.mxu1 %v5499_v63 }
 0x8f7   : > { %4957 = vmatpush3.bf16.msra.mxu1 %v5334_v34 }
 0x8f8   : > { %4958 = vmatprep.subr.bf16.mxu1 %v5499_v63 }
 0x8fb   : > { %4959 = vmatpush3.bf16.msra.mxu1 %v5335_v35 }
 0x8fc   : > { %4960 = vmatprep.subr.bf16.mxu1 %v5499_v63 }
 0x8ff   : > { %4961 = vmatpush3.bf16.msra.mxu1 %v5336_v36 }
 0x900   : > { %4962 = vmatprep.subr.bf16.mxu1 %v5499_v63 }
 0x903   : > { %4963 = vmatpush3.bf16.msra.mxu1 %v5337_v37 }
 0x904   : > { %4036 = vmatprep.subr.bf16.mxu1 %v5340_v38  ;;  %v4530_v38 = vld [vmem:[%s6867_s17] ss:$0 sm:$0xff] }
 0x906   : > { %4965 = vmatmul.mubr.bf16.vlgmr.msra.gmra.mrb[32].mxu1 %v3223_v44 }
 0x907   : > { %4037 = vmatpush1.bf16.msra.mxu1 %v5338_v41 }
 0x908   : > { %4038 = vmatprep.subr.bf16.mxu1 %v5343_v42 }
 0x90b   : > { %4039 = vmatpush1.bf16.msra.mxu1 %v5341_v45 }
 0x90c   : > { %4040 = vmatprep.subr.bf16.mxu1 %v5346_v46 }
 0x90f   : > { %4041 = vmatpush1.bf16.msra.mxu1 %v5344_v47 }
 0x910   : > { %4042 = vmatprep.subr.bf16.mxu1 %v5349_v49 }
 0x913   : > { %4043 = vmatpush1.bf16.msra.mxu1 %v5347_v50 }
 0x914   : > { %4044 = vmatprep.subr.bf16.mxu1 %v5352_v53 }
 0x917   : > { %4045 = vmatpush1.bf16.msra.mxu1 %v5350_v52 }
 0x918   : > { %4046 = vmatprep.subr.bf16.mxu1 %v5355_v54 }
 0x91b   : > { %4047 = vmatpush1.bf16.msra.mxu1 %v5353_v27 }
 0x91c   : > { %4048 = vmatprep.subr.bf16.mxu1 %v5358_v18 }
 0x91f   : > { %4049 = vmatpush1.bf16.msra.mxu1 %v5356_v30 }
 0x920   : > { %4050 = vmatprep.subr.bf16.mxu1 %v5361_v15 }
 0x923   : > { %4051 = vmatpush1.bf16.msra.mxu1 %v5359_v60 }
 0x924   : > { %4052 = vmatprep.subr.bf16.mxu1 %v5364_v29  ;;  %v5402_v29 = vld [vmem:[%s6868_s18 + $0x180] ss:$12 sps:$4 sm:$0xff]  }
 0x927   : > { %4053 = vmatpush1.bf16.msra.mxu1 %v5362_v31  ;;  %v5405_v31 = vld [vmem:[%s6868_s18 + $0x188] ss:$12 sps:$4 sm:$0xff]  }
 0x928   : > { %4054 = vmatprep.subr.bf16.mxu1 %v5369_v61  ;;  %v5408_v61 = vld [vmem:[%s6868_s18 + $0x19c] ss:$12 sps:$4 sm:$0xff]  }
 0x92b   : > { %4055 = vmatpush1.bf16.msra.mxu1 %v5367_v62  ;;  %v5406_v62 = vld [vmem:[%s6868_s18 + $0x198] ss:$12 sps:$4 sm:$0xff]  }
 0x92c   : > { %4056 = vmatprep.subr.bf16.mxu1 %v5374_v0  ;;  %v5409_v0 = vld [vmem:[%s6868_s18 + $0x1a0] ss:$12 sps:$4 sm:$0xff]  }
 0x92f   : > { %4057 = vmatpush1.bf16.msra.mxu1 %v5372_v1  ;;  %v5412_v1 = vld [vmem:[%s6868_s18 + $0x1b4] ss:$12 sps:$4 sm:$0xff]  }
 0x930   : > { %4058 = vmatprep.subr.bf16.mxu1 %v5379_v3  ;;  %v5413_v3 = vld [vmem:[%s6868_s18 + $0x1b8] ss:$12 sps:$4 sm:$0xff]  }
 0x933   : > { %4059 = vmatpush1.bf16.msra.mxu1 %v5377_v5  ;;  %v5417_v5 = vld [vmem:[%s6868_s18 + $0x1d0] ss:$12 sps:$4 sm:$0xff]  }
 0x934   : > { %4060 = vmatprep.subr.bf16.mxu1 %v5384_v7  ;;  %v5418_v7 = vld [vmem:[%s6868_s18 + $0x1e0] ss:$12 sps:$4 sm:$0xff]  }
 0x937   : > { %4061 = vmatpush1.bf16.msra.mxu1 %v5382_v9  ;;  %v5424_v9 = vld [vmem:[%s6868_s18 + $0x1fc] ss:$12 sps:$4 sm:$0xff]  }
 0x938   : > { %4062 = vmatprep.subr.bf16.mxu1 %v5389_v11  ;;  %v5425_v11 = vld [vmem:[%s6868_s18 + $0x200] ss:$12 sps:$4 sm:$0xff]  }
 0x93b   : > { %4063 = vmatpush1.bf16.msra.mxu1 %v5387_v13  ;;  %v5426_v13 = vld [vmem:[%s6868_s18 + $0x210] ss:$12 sps:$4 sm:$0xff]  }
 0x93c   : > { %4064 = vmatprep.subr.bf16.mxu1 %v5394_v20  ;;  %v5432_v20 = vld [vmem:[%s6868_s18 + $0x22c] ss:$12 sps:$4 sm:$0xff]  }
 0x93f   : > { %4065 = vmatpush1.bf16.msra.mxu1 %v5392_v23  ;;  %v5433_v23 = vld [vmem:[%s6868_s18 + $0x230] ss:$12 sps:$4 sm:$0xff]  }
 0x940   : > { %4066 = vmatprep.subr.bf16.mxu1 %v5399_v25 }
 0x943   : > { %4067 = vmatpush1.bf16.msra.mxu1 %v5397_v26 }
 0x944   : > { %4079 = vmatprep.subr.bf16.mxu1 %v5404_v28 }
 0x9b9   : > { %v4802_v32 = vpop.f32.mrb[28].mxu1 }
 0x9ba   : > { %v4803_v33 = vpop.f32.mrb[29].mxu1 }
 0x9bb   : > { %v4804_v34 = vadd.f32 %v4803_v33, %v4802_v32  ;;  %v4805_v35 = vpop.f32.mrb[30].mxu1 }
 0x9bc   : > { %v4806_v36 = vpop.f32.mrb[31].mxu1 }
 0x9bd   : > { %v4807_v37 = vadd.f32 %v4806_v36, %v4805_v35  ;;  %v3459_v39 = vadd.f32 %v4804_v34, %v4530_v38  ;;  %v3635_v35 = vld [vmem:[%s6907_s27] sm:$0x7]  ;;  %s5438_s27 = sshll.u32 %s5501_s29, 4  ;;  %s5439_s27 = int_to_ptr.vmem [resolvable:$false] %s5438_s27 }
 0x9be   : > { %s5440_s1 = scalar_lea.vmem %s5439_s27, 1536  ;;  %p5441_p0 = scmp.lt.s32.totalorder %s6798_s0, %s5439_s27 }
 0x9bf   : > { %v3462_v44 = vadd.f32 %v4807_v37, %v4530_v38  ;;  %v3640_v37 = vrot.slane %v3635_v35, %v5877_v19  ;;  %v3644_v38 = vrot.slane %v3635_v35, %v5868_v16  ;;  %p5442_p1 = scmp.lt.s32.totalorder %s5440_s1, %s5434_s23 }
 0x9c1   : > { %p5443_p2 = por %p5442_p1, %p5441_p0 }
 0x9c3   : > { %p5444_p3 = pnand %p5443_p2, %p5437_p13 }
 0x9d9   : > { %v3499_v40 = vpop.f32.mrb[32].mxu1 }
 0x9da   : > { %v3500_v41 = vadd.f32 %v3499_v40, %v3459_v39  ;;  %v4966_v42 = vpop.f32.mrb[33].mxu1 }
 0x9db   : > { %v3502_v45 = vpop.f32.mrb[34].mxu1 }
 0x9dc   : > { %v3503_v46 = vadd.f32 %v3502_v45, %v3462_v44  ;;  %v4967_v47 = vpop.f32.mrb[35].mxu1  ;;  %v3506_v49 = vmax.f32 %v3500_v41, 0.0 }
 0x9de   : > { %v3507_v50 = vmax.f32 %v3503_v46, 0.0 }
 0x9e0   : > { %v3508_v52 = vpack.c.bf16 %v3507_v50, %v3506_v49 }
 0x9e2   : > { %v3510_v53 = vshrl.u32 %v3508_v52, 16  ;;  %v3513_v55 = vshll.u32 %v3508_v52, 16 }
 0x9e4   : > { %v3512_v54 = vrot.slane %v3510_v53, 7 }
 0x9e6   : > { %v3515_v56 = vor.u32 %v3513_v55, %v3512_v54  ;;  %v6694_v27 = vsel %vm5713_vm4, %v3512_v54, 0 }
 0x9e7   : > { %v3528_v58 = vshll.u32 %v6694_v27, 16  ;;  %v3536_v25 = vrot.slane %v6694_v27, 1 }
 0x9e8   : > { %v6698_v57 = vsel %vm5713_vm4, 0, %v3515_v56  ;;  %vm4206_vm4 = vcmask 465920  }
 0x9e9   : > { %v3523_v18 = vshll.u32 %v6698_v57, 16  ;;  %v3521_v59 = vshrl.u32 %v6698_v57, 16  ;;  %v3530_v60 = vrot.slane %v3528_v58, 1  ;;  %v3535_v24 = vrot.slane %v6698_v57, 1 }
 0x9eb   : > { %v3525_v30 = vrot.slane %v3523_v18, 1  ;;  %v3537_v48 = vsel %vm3220_vm10, %v3535_v24, %v3536_v25 }
 0x9ed   : > { %v3526_v15 = vor.u32 %v3525_v30, %v3521_v59 }
 0x9ef   : > { %v3531_v21 = vsel %vm3204_vm9, %v3526_v15, %v3530_v60 }
 0x9f0   : > { %4068 = vmatprep.mubr.bf16.mxu1 %v3531_v21  ;;  %4154 = vmatprep.mubr.bf16.mxu0 %v3531_v21 }
 0x9f1   : > { %4069 = vmatmul.mubr.bf16.vlgmr.msra.gmra.mrb[36].mxu1 %v6698_v57  ;;  %4155 = vmatmul.mubr.bf16.vlgmr.msra.gmra.mrb[24].mxu0 %v6698_v57 }
 0x9f2   : > { %4080 = vmatpush1.bf16.msra.mxu1 %v5402_v29  ;;  %4969 = vmatpush3.bf16.msra.mxu0 %v5405_v31 }
 0x9f3   : > { %4081 = vmatprep.subr.bf16.mxu1 %v5408_v61  ;;  %4970 = vmatprep.subr.bf16.mxu0 %v5499_v63 }
 0x9f4   : > { %4111 = vmatprep.mubr.bf16.mxu1 %v5498_v51  ;;  %4984 = vmatprep.mubr.msk.bf16.mxu0 %vm5500_vm6, %v5499_v63  ;;  %v5416_v51 = vld [vmem:[%s6868_s18 + $0x1cc] ss:$12 sps:$4 sm:$0xff]  }
 0x9f6   : > { %4082 = vmatpush1.bf16.msra.mxu1 %v5406_v62  ;;  %4971 = vmatpush3.bf16.msra.mxu0 %v5409_v0 }
 0x9f7   : > { %4083 = vmatprep.subr.bf16.mxu1 %v5412_v1  ;;  %4972 = vmatprep.subr.bf16.mxu0 %v5499_v63 }
 0x9fa   : > { %4084 = vmatpush1.bf16.msra.mxu1 %v5410_v2  ;;  %4973 = vmatpush3.bf16.msra.mxu0 %v5413_v3 }
 0x9fb   : > { %4085 = vmatprep.subr.bf16.mxu1 %v5416_v51  ;;  %4974 = vmatprep.subr.bf16.mxu0 %v5499_v63 }
 0x9fe   : > { %4086 = vmatpush1.bf16.msra.mxu1 %v5414_v4  ;;  %4975 = vmatpush3.bf16.msra.mxu0 %v5417_v5 }
 0x9ff   : > { %4087 = vmatprep.subr.bf16.mxu1 %v5420_v6  ;;  %4976 = vmatprep.subr.bf16.mxu0 %v5499_v63 }
 0xa02   : > { %4088 = vmatpush1.bf16.msra.mxu1 %v5418_v7  ;;  %4977 = vmatpush3.bf16.msra.mxu0 %v5421_v8 }
 0xa03   : > { %4089 = vmatprep.subr.bf16.mxu1 %v5424_v9  ;;  %4978 = vmatprep.subr.bf16.mxu0 %v5499_v63 }
 0xa06   : > { %4090 = vmatpush1.bf16.msra.mxu1 %v5422_v10  ;;  %4979 = vmatpush3.bf16.msra.mxu0 %v5425_v11 }
 0xa07   : > { %4091 = vmatprep.subr.bf16.mxu1 %v5428_v12  ;;  %4980 = vmatprep.subr.bf16.mxu0 %v5499_v63 }
 0xa0a   : > { %4092 = vmatpush1.bf16.msra.mxu1 %v5426_v13  ;;  %4981 = vmatpush3.bf16.msra.mxu0 %v5429_v17 }
 0xa0b   : > { %4093 = vmatprep.subr.bf16.mxu1 %v5432_v20  ;;  %4982 = vmatprep.subr.bf16.mxu0 %v5499_v63  ;;  %v3647_v63 = vsub.s32 2, %v5863_v14 }
 0xa0d   : > { %v3648_v36 = vrot.slane %v3635_v35, %v3647_v63 }
 0xa0e   : > { %4094 = vmatpush1.bf16.msra.mxu1 %v5430_v22  ;;  %4983 = vmatpush3.bf16.msra.mxu0 %v5433_v23 }
 0xa11   : > { %4112 = vmatmul.mubr.bf16.vlgmr.msra.gmra.mrb[36].mxu1 %v3537_v48  ;;  %4985 = vmatmul.mubr.bf16.vlgmr.msra.gmra.mrb[28].mxu0 %v3537_v48 }
 0xac4   : > { %v4833_v26 = vpop.f32.mrb[24].mxu0 }
 0xac5   : > { %v4834_v43 = vpop.f32.mrb[25].mxu0 }
 0xac6   : > { %v4835_v28 = vadd.f32 %v4834_v43, %v4833_v26  ;;  %v4836_v32 = vpop.f32.mrb[26].mxu0 }
 0xac7   : > { %v4837_v33 = vpop.f32.mrb[27].mxu0 }
 0xac8   : > { %v4838_v34 = vadd.f32 %v4837_v33, %v4836_v32  ;;  %v4157_v39 = vadd.f32 %v4835_v28, %v3648_v36 }
 0xaca   : > { %v4160_v46 = vadd.f32 %v4838_v34, %v3648_v36 }
 0xae4   : > { %v4113_v40 = vpop.f32.mrb[36].mxu1  ;;  %v4197_v41 = vpop.f32.mrb[28].mxu0 }
 0xae5   : > { %v4992_v14 = vadd.f32 %v4113_v40, %v3640_v37  ;;  %v4198_v42 = vadd.f32 %v4197_v41, %v4157_v39  ;;  %v4115_v44 = vpop.f32.mrb[37].mxu1  ;;  %v4986_v45 = vpop.f32.mrb[29].mxu0 }
 0xae6   : > { %v4993_v47 = vadd.f32 %v4115_v44, %v3644_v38  ;;  %v4117_v49 = vpop.f32.mrb[38].mxu1  ;;  %v4200_v50 = vpop.f32.mrb[30].mxu0 }
 0xae7   : > { %4204 = vst [vmem:[%s633_s24] sm:$0xff] %v4992_v14  ;;  %4207 = vst.msk [vmem:[%s633_s24 + $0x10] sm:$0xff] %vm4206_vm4, %v4198_v42  ;;  %v4994_v16 = vadd.f32 %v4117_v49, %v3640_v37  ;;  %v4201_v19 = vadd.f32 %v4200_v50, %v4160_v46  ;;  %v4119_v52 = vpop.f32.mrb[39].mxu1  ;;  %v4987_v53 = vpop.f32.mrb[31].mxu0 }
 0xae8   : > { %4205 = vst [vmem:[%s633_s24 + $0x8] sm:$0xff] %v4993_v47  ;;  %v4995_v54 = vadd.f32 %v4119_v52, %v3644_v38 }
 0xae9   : > { %4208 = vst [vmem:[%s633_s24 + $0x18] sm:$0xff] %v4994_v16  ;;  %4210 = vst.msk [vmem:[%s633_s24 + $0x28] sm:$0xff] %vm4206_vm4, %v4201_v19 }
 0xaea   : > { %4209 = vst [vmem:[%s633_s24 + $0x20] sm:$0xff] %v4995_v54 }
 0xaeb   : > { %5447 = shalt.err (!%p5444_p3)
}
 0xaec   : > { %s5448_s26 = scalar_lea.hbm %s6804_s3, 768  ;;  %s5452_s2 = scalar_lea.hbm %s6909_s4, 1536 }
 0xaed   : > { %p5449_p4 = scmp.ne.s32.totalorder %s6804_s3, %s5448_s26  ;;  %p5453_p9 = scmp.lt.u32.totalorder %s6804_s3, %s6909_s4 }
 0xaee   : > { %p5454_p10 = scmp.lt.u32.totalorder %s5452_s2, %s5448_s26  ;;  %p5456_p12 = scmp.lt.u32.totalorder %s5448_s26, %s6804_s3 }
 0xaef   : > { %p5450_p7 = pnand %p5449_p4, %p5647_p5 }
 0xaf0   : > { %p5455_p11 = por %p5454_p10, %p5453_p9 }
 0xaf1   : > { %p5451_p8 = pneg %p5450_p7 }
 0xaf2   : > { %p5457_p13 = por %p5456_p12, %p5455_p11 }
 0xaf4   : > { %p5458_p0 = pnand %p5457_p13, %p5451_p8 }
 0xaf6   : > { %5461 = shalt.err (!%p5458_p0)
}
 0xaf7   : > { %s5502_s23 = smov 384   ;;  %s5503_s27 = smov 24  }
 0xaf8   : > { %5014 = dma.vmem_to_hbm [thread:$0]  (%p5647_p5), %s6798_s0, 768, %s6804_s3, %s6809_s28, %s5502_s23, %s5502_s23, %s5503_s27  }
 0xaf9 PF: > { %s6910_s1 = sld [smem:[#allocation7_spill]]  ;;  %s6911_s30 = sld [smem:[#allocation5_spill]] }
 0xaff   : > { %p5020_p1 = scmp.ge.s32.totalorder %s6910_s1, 2  ;;  %s4240_s20 = sand.u32 1, %s6911_s30  }
 0xb00   : > { %s4241_s26 = scalar_lea.sflag [#allocation3], %s4240_s20 }
 0xb01   : > { %p5017_p2 = pnand %p5020_p1, %p5651_p6 }
 0xb03   : > { %5479 = dma.done.wait (!%p5017_p2), %s4241_s26, 768  }
 0xb04   : > { %5481 = vsyncadd (!%p5017_p2), %s4241_s26, 4294966528  ;;  %s6913_s24 = sld [smem:[#allocation8_spill]]  ;;  %s6914_s2 = sld [smem:[#allocation6_spill]] }
 0xb05   : > { %s6915_s23 = sld [smem:[#allocation9_spill]]  ;;  %s6916_s1 = smov %s5488_s22 }
 0xb0a   : > { %p30_p3 = scmp.ge.s32.totalorder %s6913_s24, 4   ;;  %s6917_s22 = smov %s6914_s2 }
 0xb0c   :  { %32 = sbr.rel (!%p30_p3) target bundleno = 11 (0xb), region = 138 }
 0xb13   :  { %4246 = vsyncpa [#allocation3], 1 }
 0xb14   :  { %4248 = vsyncpa [#allocation3 + $0x1], 1 }

// kernel: _lambda_.5
= control target key start
LH: loop header
LB: loop body
LE: loop exit
PB: predicated region body
PF: predicated region fallthrough
CT: control target
= control target key end

     0   :  { %s11590_s6 = smov 1   ;;  %s11591_s10 = smov 2   ;;  %s12855_s0 = inlined_call_operand.smem [shape: u32[44], index: -1, kind: input, shape index: {}] }
   0x1   :  { %s11684_s5 = sld [smem:[%s12855_s0]]   ;;  %s11592_s14 = smov 3  }
   0x2   :  { %s11689_s9 = sld [smem:[%s12855_s0 + %s11590_s6]]   ;;  %s11593_s18 = smov 4  }
   0x3   :  { %s11694_s13 = sld [smem:[%s12855_s0 + %s11591_s10]]   ;;  %s11594_s22 = smov 5  }
   0x4   :  { %s11699_s17 = sld [smem:[%s12855_s0 + %s11592_s14]]   ;;  %s11595_s26 = smov 6  }
   0x5   :  { %s11704_s21 = sld [smem:[%s12855_s0 + %s11593_s18]]   ;;  %s11596_s30 = smov 7  }
   0x6   :  { %s11709_s25 = sld [smem:[%s12855_s0 + %s11594_s22]]   ;;  %s11597_s4 = smov 8  }
   0x7   :  { %12895 = sst [smem:[#allocation68_spill]] %s11684_s5  ;;  %s11598_s10 = smov 9  }
   0x8   :  { %12896 = sst [smem:[#allocation69_spill]] %s11689_s9  ;;  %s11599_s15 = smov 10  }
   0x9   :  { %12897 = sst [smem:[#allocation70_spill]] %s11694_s13  ;;  %s11600_s20 = smov 11  }
   0xa   :  { %s11714_s29 = sld [smem:[%s12855_s0 + %s11595_s26]]   ;;  %s11601_s26 = smov 12  }
   0xb   :  { %12898 = sst [smem:[#allocation71_spill]] %s11704_s21  ;;  %s11602_s1 = smov 13  }
   0xc   :  { %s11719_s3 = sld [smem:[%s12855_s0 + %s11596_s30]]   ;;  %s11603_s7 = smov 14  }
   0xd   :  { %s11724_s8 = sld [smem:[%s12855_s0 + %s11597_s4]]   ;;  %s11605_s22 = smov 16  }
   0xe   :  { %s11729_s14 = sld [smem:[%s12855_s0 + %s11598_s10]]   ;;  %s11606_s28 = smov 17  }
   0xf   :  { %s11734_s19 = sld [smem:[%s12855_s0 + %s11599_s15]]   ;;  %s11604_s15 = smov 15  }
  0x10   :  { %12899 = sst [smem:[#allocation72_spill]] %s11714_s29 }
  0x11   :  { %s11739_s24 = sld [smem:[%s12855_s0 + %s11600_s20]]  }
  0x12   :  { %12900 = sst [smem:[#allocation73_spill]] %s11719_s3 }
  0x13   :  { %12901 = sst [smem:[#allocation74_spill]] %s11724_s8 }
  0x14   :  { %s11744_s30 = sld [smem:[%s12855_s0 + %s11601_s26]]  }
  0x15   :  { %12902 = sst [smem:[#allocation75_spill]] %s11734_s19 }
  0x16   :  { %s11749_s6 = sld [smem:[%s12855_s0 + %s11602_s1]]  }
  0x17   :  { %s11754_s12 = sld [smem:[%s12855_s0 + %s11603_s7]]   ;;  %s11607_s7 = smov 18  }
  0x18   :  { %s11759_s20 = sld [smem:[%s12855_s0 + %s11604_s15]]   ;;  %s11608_s15 = smov 19  }
  0x19   :  { %s11764_s27 = sld [smem:[%s12855_s0 + %s11605_s22]]   ;;  %s11609_s22 = smov 20  }
  0x1a   :  { %12903 = sst [smem:[#allocation76_spill]] %s11744_s30 }
  0x1b   :  { %s11769_s4 = sld [smem:[%s12855_s0 + %s11606_s28]]   ;;  %s11610_s28 = smov 21  }
  0x1c   :  { %12904 = sst [smem:[#allocation77_spill]] %s11749_s6 }
  0x1d   :  { %12905 = sst [smem:[#allocation78_spill]] %s11754_s12 }
  0x1e   :  { %s11774_s9 = sld [smem:[%s12855_s0 + %s11607_s7]]   ;;  %s11611_s7 = smov 22  }
  0x1f   :  { %12906 = sst [smem:[#allocation79_spill]] %s11764_s27 }
  0x20   :  { %s11779_s5 = sld [smem:[%s12855_s0 + %s11608_s15]]   ;;  %s11612_s15 = smov 23  }
  0x21   :  { %12907 = sst [smem:[#allocation80_spill]] %s11769_s4 }
  0x22   :  { %s11784_s27 = sld [smem:[%s12855_s0 + %s11609_s22]]   ;;  %s11613_s22 = smov 24  }
  0x23   :  { %s11789_s12 = sld [smem:[%s12855_s0 + %s11610_s28]]   ;;  %s11614_s28 = smov 25  }
  0x24   :  { %12908 = sst [smem:[#allocation81_spill]] %s11774_s9 }
  0x25   :  { %s11794_s9 = sld [smem:[%s12855_s0 + %s11611_s7]]   ;;  %s11615_s7 = smov 26  }
  0x26   :  { %12909 = sst [smem:[#allocation82_spill]] %s11779_s5 }
  0x27   :  { %s11799_s5 = sld [smem:[%s12855_s0 + %s11612_s15]]   ;;  %s11616_s15 = smov 27  }
  0x28   :  { %s11804_s30 = sld [smem:[%s12855_s0 + %s11613_s22]]   ;;  %s11617_s22 = smov 28  }
  0x29   :  { %12910 = sst [smem:[#allocation83_spill]] %s11789_s12 }
  0x2a   :  { %s11809_s12 = sld [smem:[%s12855_s0 + %s11614_s28]]   ;;  %s11618_s28 = smov 29  }
  0x2b   :  { %12911 = sst [smem:[#allocation84_spill]] %s11794_s9 }
  0x2c   :  { %s11814_s19 = sld [smem:[%s12855_s0 + %s11615_s7]]   ;;  %s11619_s7 = smov 30  }
  0x2d   :  { %12912 = sst [smem:[#allocation85_spill]] %s11799_s5 }
  0x2e   :  { %s11819_s5 = sld [smem:[%s12855_s0 + %s11616_s15]]   ;;  %s11620_s15 = smov 31  }
  0x2f   :  { %s11824_s8 = sld [smem:[%s12855_s0 + %s11617_s22]]   ;;  %s11621_s22 = smov 32  }
  0x30   :  { %12913 = sst [smem:[#allocation86_spill]] %s11809_s12 }
  0x31   :  { %s11829_s12 = sld [smem:[%s12855_s0 + %s11618_s28]]   ;;  %s11622_s28 = smov 33  }
  0x32   :  { %s11834_s29 = sld [smem:[%s12855_s0 + %s11619_s7]]   ;;  %s11623_s7 = smov 34  }
  0x33   :  { %s11849_s21 = sld [smem:[%s12855_s0 + %s11622_s28]]   ;;  %s11626_s28 = smov 37  }
  0x34   :  { %12914 = sst [smem:[#allocation87_spill]] %s11819_s5 }
  0x35   :  { %12915 = sst [smem:[#allocation88_spill]] %s11824_s8 }
  0x36   :  { %s11839_s5 = sld [smem:[%s12855_s0 + %s11620_s15]]   ;;  %s11624_s15 = smov 35  }
  0x37   :  { %s11844_s8 = sld [smem:[%s12855_s0 + %s11621_s22]]   ;;  %s11625_s22 = smov 36  }
  0x38   :  { %12916 = sst [smem:[#allocation89_spill]] %s11834_s29 }
  0x39   :  { %12919 = sst [smem:[#allocation92_spill]] %s11849_s21 }
  0x3a   :  { %s11854_s29 = sld [smem:[%s12855_s0 + %s11623_s7]]   ;;  %s11627_s7 = smov 38  }
  0x3b   :  { %s11859_s13 = sld [smem:[%s12855_s0 + %s11624_s15]]   ;;  %s11628_s15 = smov 39  }
  0x3c   :  { %12917 = sst [smem:[#allocation90_spill]] %s11839_s5 }
  0x3d   :  { %12918 = sst [smem:[#allocation91_spill]] %s11844_s8 }
  0x3e   :  { %s11864_s8 = sld [smem:[%s12855_s0 + %s11625_s22]]   ;;  %s11629_s22 = smov 40  }
  0x3f   :  { %s11869_s21 = sld [smem:[%s12855_s0 + %s11626_s28]]   ;;  %s11630_s28 = smov 41  }
  0x40   :  { %12920 = sst [smem:[#allocation93_spill]] %s11854_s29 }
  0x41   :  { %12921 = sst [smem:[#allocation94_spill]] %s11859_s13 }
  0x42   :  { %s11874_s29 = sld [smem:[%s12855_s0 + %s11627_s7]]   ;;  %s11631_s7 = smov 42  }
  0x43   :  { %s11879_s13 = sld [smem:[%s12855_s0 + %s11628_s15]]   ;;  %s11632_s15 = smov 43  }
  0x44   :  { %12922 = sst [smem:[#allocation95_spill]] %s11864_s8 }
  0x45   :  { %12923 = sst [smem:[#allocation96_spill]] %s11869_s21 }
  0x46   :  { %s11884_s8 = sld [smem:[%s12855_s0 + %s11629_s22]]  }
  0x47   :  { %s11889_s21 = sld [smem:[%s12855_s0 + %s11630_s28]]  }
  0x48   :  { %12924 = sst [smem:[#allocation97_spill]] %s11874_s29 }
  0x49   :  { %12925 = sst [smem:[#allocation98_spill]] %s11879_s13 }
  0x4a   :  { %s11894_s29 = sld [smem:[%s12855_s0 + %s11631_s7]]  }
  0x4b   :  { %s11899_s13 = sld [smem:[%s12855_s0 + %s11632_s15]]  }
  0x4c   :  { %93 = vsyncpa [#allocation3], 0 }
  0x4d   :  { %94 = vsyncpa [#allocation5], 0 }
  0x4e   :  { %95 = vsyncpa [#allocation8], 0 }
  0x4f   :  { %96 = vsyncpa [#allocation11], 0 }
  0x50   :  { %97 = vsyncpa [#allocation14], 0 }
  0x51   :  { %98 = vsyncpa [#allocation17], 0 }
  0x52   :  { %99 = vsyncpa [#allocation20], 0 }
  0x53   :  { %100 = vsyncpa [#allocation23], 0 }
  0x54   :  { %101 = vsyncpa [#allocation26], 0 }
  0x55   :  { %102 = vsyncpa [#allocation29], 0 }
  0x56   :  { %103 = vsyncpa [#allocation32], 0 }
  0x57   :  { %104 = vsyncpa [#allocation35], 0 }
  0x58   :  { %105 = vsyncpa [#allocation38], 0 }
  0x59   :  { %106 = vsyncpa [#allocation41], 0 }
  0x5a   :  { %107 = vsyncpa [#allocation44], 0 }
  0x5b   :  { %108 = vsyncpa [#allocation47], 0 }
  0x5c   :  { %109 = vsyncpa [#allocation50], 0  ;;  %s11901_s22 = smov 0  }
  0x5d LB: > { %s12926_s9 = sld [smem:[#allocation84_spill]]  ;;  %s12927_s6 = sld [smem:[#allocation77_spill]]  ;;  %s11588_s22 = sphi %s11901_s22, %s115_s22  }
  0x5e   : > { %s12928_s5 = sld [smem:[#allocation90_spill]]  ;;  %s12929_s4 = sld [smem:[#allocation80_spill]] }
  0x5f   : > { %s12930_s3 = sld [smem:[#allocation73_spill]]  ;;  %s11907_s0 = sadd.s32 4294967295, %s11588_s22  }
  0x60   : > { %p8435_p0 = scmp.ge.s32.totalorder %s11588_s22, 1  ;;  %p1064_p1 = scmp.lt.s32.totalorder %s11588_s22, 3 }
  0x62   : > { %p11911_p2 = pnand %p8435_p0, %p1064_p1 }
  0x63   : > { %p10073_p3 = scmp.eq.s32.totalorder (!%p11911_p2), %s11907_s0, 0  ;;  %s11633_s26 = smov (!%p11911_p2), [#allocation4]  }
  0x64   : > { %1068 = sbr.rel (%p11911_p2) target bundleno = 877 (0x36d), region = 12  ;;  %s1090_s28 = sshll.u32 (!%p11911_p2), %s11633_s26, 4  ;;  %s1091_s28 = int_to_ptr.vmem [resolvable:$true] %s1090_s28 }
  0x65   : > { %s11634_s1 = smov (!%p11911_p2), [#allocation7]   ;;  %s10682_s7 = scalar_lea.hbm (!%p11911_p2), %s11699_s17, 16 }
  0x66   : > { %s1114_s2 = sshll.u32 (!%p11911_p2), %s11634_s1, 4  ;;  %p10683_p4 = scmp.ne.s32.totalorder (!%p11911_p2), %s11699_s17, %s10682_s7  ;;  %s1115_s2 = int_to_ptr.vmem [resolvable:$true] %s1114_s2 }
  0x67   : > { %p10688_p7 = scmp.lt.u32.totalorder (!%p11911_p2), %s10682_s7, %s11699_s17 }
  0x68   : > { %p10684_p5 = pnand (!%p11911_p2), %p10683_p4, %p10073_p3 }
  0x6a   : > { %p10685_p6 = pneg (!%p11911_p2), %p10684_p5 }
  0x6c   : > { %p10690_p8 = pnand %p10688_p7, %p10685_p6 }
  0x6e   : > { %10693 = shalt.err (!%p10690_p8)
}
  0x6f   : > { %s10694_s10 = scalar_lea.vmem %s1091_s28, 16  ;;  %s10700_s11 = scalar_lea.vmem %s1091_s28, 32 }
  0x70   : > { %p10695_p9 = scmp.ne.s32.totalorder %s1091_s28, %s10694_s10  ;;  %p10701_p12 = scmp.lt.s32.totalorder %s1091_s28, %s1091_s28 }
  0x71   : > { %p10702_p13 = scmp.lt.s32.totalorder %s10700_s11, %s10694_s10 }
  0x72   : > { %p10696_p10 = pnand %p10695_p9, %p10073_p3 }
  0x73   : > { %p10703_p0 = por %p10702_p13, %p10701_p12 }
  0x74   : > { %p10697_p11 = pneg %p10696_p10 }
  0x76   : > { %p10704_p1 = pnand %p10703_p0, %p10697_p11 }
  0x78   : > { %10707 = shalt.err (!%p10704_p1)
}
  0x79   : > { %9948 = dma.hbm_to_vmem [thread:$0]  (%p10073_p3), %s11699_s17, 16, %s1091_s28, [#allocation5]  }
  0x7a   : > { %s10708_s15 = scalar_lea.hbm %s11709_s25, 16 }
  0x7b   : > { %p10709_p4 = scmp.ne.s32.totalorder %s11709_s25, %s10708_s15  ;;  %p10714_p7 = scmp.lt.u32.totalorder %s10708_s15, %s11709_s25 }
  0x7d   : > { %p10710_p5 = pnand %p10709_p4, %p10073_p3 }
  0x7f   : > { %p10711_p6 = pneg %p10710_p5 }
  0x81   : > { %p10716_p8 = pnand %p10714_p7, %p10711_p6 }
  0x83   : > { %10719 = shalt.err (!%p10716_p8)
}
  0x84   : > { %s10720_s16 = scalar_lea.vmem %s1115_s2, 16  ;;  %s10726_s18 = scalar_lea.vmem %s1115_s2, 32 }
  0x85   : > { %p10721_p9 = scmp.ne.s32.totalorder %s1115_s2, %s10720_s16  ;;  %p10727_p12 = scmp.lt.s32.totalorder %s1115_s2, %s1115_s2 }
  0x86   : > { %p10728_p13 = scmp.lt.s32.totalorder %s10726_s18, %s10720_s16 }
  0x87   : > { %p10722_p10 = pnand %p10721_p9, %p10073_p3 }
  0x88   : > { %p10729_p0 = por %p10728_p13, %p10727_p12 }
  0x89   : > { %p10723_p11 = pneg %p10722_p10 }
  0x8b   : > { %p10730_p1 = pnand %p10729_p0, %p10723_p11 }
  0x8d   : > { %10733 = shalt.err (!%p10730_p1)
}
  0x8e   : > { %9952 = dma.hbm_to_vmem [thread:$0]  (%p10073_p3), %s11709_s25, 16, %s1115_s2, [#allocation8]  }
  0x8f   : > { %s11635_s26 = smov [#allocation10]   ;;  %s11636_s1 = smov [#allocation13]  }
  0x90   : > { %s1138_s28 = sshll.u32 %s11635_s26, 4  ;;  %s1162_s7 = sshll.u32 %s11636_s1, 4  ;;  %s1139_s28 = int_to_ptr.vmem [resolvable:$true] %s1138_s28  ;;  %s1163_s7 = int_to_ptr.vmem [resolvable:$true] %s1162_s7 }
  0x91   : > { %s10734_s10 = scalar_lea.hbm %s12930_s3, 16 }
  0x92   : > { %p10735_p4 = scmp.ne.s32.totalorder %s12930_s3, %s10734_s10  ;;  %p10740_p7 = scmp.lt.u32.totalorder %s10734_s10, %s12930_s3 }
  0x94   : > { %p10736_p5 = pnand %p10735_p4, %p10073_p3 }
  0x96   : > { %p10737_p6 = pneg %p10736_p5 }
  0x98   : > { %p10742_p8 = pnand %p10740_p7, %p10737_p6 }
  0x9a   : > { %10745 = shalt.err (!%p10742_p8)
}
  0x9b   : > { %s10746_s11 = scalar_lea.vmem %s1139_s28, 16  ;;  %s10752_s2 = scalar_lea.vmem %s1139_s28, 32 }
  0x9c   : > { %p10747_p9 = scmp.ne.s32.totalorder %s1139_s28, %s10746_s11  ;;  %p10753_p12 = scmp.lt.s32.totalorder %s1139_s28, %s1139_s28 }
  0x9d   : > { %p10754_p13 = scmp.lt.s32.totalorder %s10752_s2, %s10746_s11 }
  0x9e   : > { %p10748_p10 = pnand %p10747_p9, %p10073_p3 }
  0x9f   : > { %p10755_p0 = por %p10754_p13, %p10753_p12 }
  0xa0   : > { %p10749_p11 = pneg %p10748_p10 }
  0xa2   : > { %p10756_p1 = pnand %p10755_p0, %p10749_p11 }
  0xa4   : > { %10759 = shalt.err (!%p10756_p1)
}
  0xa5   : > { %9956 = dma.hbm_to_vmem [thread:$0]  (%p10073_p3), %s12930_s3, 16, %s1139_s28, [#allocation11]  }
  0xa6   : > { %s10760_s15 = scalar_lea.hbm %s11729_s14, 16 }
  0xa7   : > { %p10761_p4 = scmp.ne.s32.totalorder %s11729_s14, %s10760_s15  ;;  %p10766_p7 = scmp.lt.u32.totalorder %s10760_s15, %s11729_s14 }
  0xa9   : > { %p10762_p5 = pnand %p10761_p4, %p10073_p3 }
  0xab   : > { %p10763_p6 = pneg %p10762_p5 }
  0xad   : > { %p10768_p8 = pnand %p10766_p7, %p10763_p6 }
  0xaf   : > { %10771 = shalt.err (!%p10768_p8)
}
  0xb0   : > { %s10772_s16 = scalar_lea.vmem %s1163_s7, 16  ;;  %s10778_s18 = scalar_lea.vmem %s1163_s7, 32 }
  0xb1   : > { %p10773_p9 = scmp.ne.s32.totalorder %s1163_s7, %s10772_s16  ;;  %p10779_p12 = scmp.lt.s32.totalorder %s1163_s7, %s1163_s7 }
  0xb2   : > { %p10780_p13 = scmp.lt.s32.totalorder %s10778_s18, %s10772_s16 }
  0xb3   : > { %p10774_p10 = pnand %p10773_p9, %p10073_p3 }
  0xb4   : > { %p10781_p0 = por %p10780_p13, %p10779_p12 }
  0xb5   : > { %p10775_p11 = pneg %p10774_p10 }
  0xb7   : > { %p10782_p1 = pnand %p10781_p0, %p10775_p11 }
  0xb9   : > { %10785 = shalt.err (!%p10782_p1)
}
  0xba   : > { %9960 = dma.hbm_to_vmem [thread:$0]  (%p10073_p3), %s11729_s14, 16, %s1163_s7, [#allocation14]  }
  0xbb   : > { %s11637_s26 = smov [#allocation16]   ;;  %s11638_s1 = smov [#allocation19]  }
  0xbc   : > { %s1186_s28 = sshll.u32 %s11637_s26, 4  ;;  %s1210_s10 = sshll.u32 %s11638_s1, 4  ;;  %s1187_s28 = int_to_ptr.vmem [resolvable:$true] %s1186_s28  ;;  %s1211_s10 = int_to_ptr.vmem [resolvable:$true] %s1210_s10 }
  0xbd   : > { %s10786_s11 = scalar_lea.hbm %s11739_s24, 16 }
  0xbe   : > { %p10787_p4 = scmp.ne.s32.totalorder %s11739_s24, %s10786_s11  ;;  %p10792_p7 = scmp.lt.u32.totalorder %s10786_s11, %s11739_s24 }
  0xc0   : > { %p10788_p5 = pnand %p10787_p4, %p10073_p3 }
  0xc2   : > { %p10789_p6 = pneg %p10788_p5 }
  0xc4   : > { %p10794_p8 = pnand %p10792_p7, %p10789_p6 }
  0xc6   : > { %10797 = shalt.err (!%p10794_p8)
}
  0xc7   : > { %s10798_s2 = scalar_lea.vmem %s1187_s28, 16  ;;  %s10804_s7 = scalar_lea.vmem %s1187_s28, 32 }
  0xc8   : > { %p10799_p9 = scmp.ne.s32.totalorder %s1187_s28, %s10798_s2  ;;  %p10805_p12 = scmp.lt.s32.totalorder %s1187_s28, %s1187_s28 }
  0xc9   : > { %p10806_p13 = scmp.lt.s32.totalorder %s10804_s7, %s10798_s2 }
  0xca   : > { %p10800_p10 = pnand %p10799_p9, %p10073_p3 }
  0xcb   : > { %p10807_p0 = por %p10806_p13, %p10805_p12 }
  0xcc   : > { %p10801_p11 = pneg %p10800_p10 }
  0xce   : > { %p10808_p1 = pnand %p10807_p0, %p10801_p11 }
  0xd0   : > { %10811 = shalt.err (!%p10808_p1)
}
  0xd1   : > { %9964 = dma.hbm_to_vmem [thread:$0]  (%p10073_p3), %s11739_s24, 16, %s1187_s28, [#allocation17]  }
  0xd2   : > { %s10812_s15 = scalar_lea.hbm %s12927_s6, 16 }
  0xd3   : > { %p10813_p4 = scmp.ne.s32.totalorder %s12927_s6, %s10812_s15  ;;  %p10818_p7 = scmp.lt.u32.totalorder %s10812_s15, %s12927_s6 }
  0xd5   : > { %p10814_p5 = pnand %p10813_p4, %p10073_p3 }
  0xd7   : > { %p10815_p6 = pneg %p10814_p5 }
  0xd9   : > { %p10820_p8 = pnand %p10818_p7, %p10815_p6 }
  0xdb   : > { %10823 = shalt.err (!%p10820_p8)
}
  0xdc   : > { %s10824_s16 = scalar_lea.vmem %s1211_s10, 16  ;;  %s10830_s18 = scalar_lea.vmem %s1211_s10, 32 }
  0xdd   : > { %p10825_p9 = scmp.ne.s32.totalorder %s1211_s10, %s10824_s16  ;;  %p10831_p12 = scmp.lt.s32.totalorder %s1211_s10, %s1211_s10 }
  0xde   : > { %p10832_p13 = scmp.lt.s32.totalorder %s10830_s18, %s10824_s16 }
  0xdf   : > { %p10826_p10 = pnand %p10825_p9, %p10073_p3 }
  0xe0   : > { %p10833_p0 = por %p10832_p13, %p10831_p12 }
  0xe1   : > { %p10827_p11 = pneg %p10826_p10 }
  0xe3   : > { %p10834_p1 = pnand %p10833_p0, %p10827_p11 }
  0xe5   : > { %10837 = shalt.err (!%p10834_p1)
}
  0xe6   : > { %9968 = dma.hbm_to_vmem [thread:$0]  (%p10073_p3), %s12927_s6, 16, %s1211_s10, [#allocation20]  }
  0xe7   : > { %s11639_s26 = smov [#allocation22]   ;;  %s11640_s1 = smov [#allocation25]  }
  0xe8   : > { %s1234_s28 = sshll.u32 %s11639_s26, 4  ;;  %s1258_s11 = sshll.u32 %s11640_s1, 4  ;;  %s1235_s28 = int_to_ptr.vmem [resolvable:$true] %s1234_s28  ;;  %s1259_s11 = int_to_ptr.vmem [resolvable:$true] %s1258_s11 }
  0xe9   : > { %s10838_s2 = scalar_lea.hbm %s11759_s20, 16 }
  0xea   : > { %p10839_p4 = scmp.ne.s32.totalorder %s11759_s20, %s10838_s2  ;;  %p10844_p7 = scmp.lt.u32.totalorder %s10838_s2, %s11759_s20 }
  0xec   : > { %p10840_p5 = pnand %p10839_p4, %p10073_p3 }
  0xee   : > { %p10841_p6 = pneg %p10840_p5 }
  0xf0   : > { %p10846_p8 = pnand %p10844_p7, %p10841_p6 }
  0xf2   : > { %10849 = shalt.err (!%p10846_p8)
}
  0xf3   : > { %s10850_s7 = scalar_lea.vmem %s1235_s28, 16  ;;  %s10856_s10 = scalar_lea.vmem %s1235_s28, 32 }
  0xf4   : > { %p10851_p9 = scmp.ne.s32.totalorder %s1235_s28, %s10850_s7  ;;  %p10857_p12 = scmp.lt.s32.totalorder %s1235_s28, %s1235_s28 }
  0xf5   : > { %p10858_p13 = scmp.lt.s32.totalorder %s10856_s10, %s10850_s7 }
  0xf6   : > { %p10852_p10 = pnand %p10851_p9, %p10073_p3 }
  0xf7   : > { %p10859_p0 = por %p10858_p13, %p10857_p12 }
  0xf8   : > { %p10853_p11 = pneg %p10852_p10 }
  0xfa   : > { %p10860_p1 = pnand %p10859_p0, %p10853_p11 }
  0xfc   : > { %10863 = shalt.err (!%p10860_p1)
}
  0xfd   : > { %9972 = dma.hbm_to_vmem [thread:$0]  (%p10073_p3), %s11759_s20, 16, %s1235_s28, [#allocation23]  }
  0xfe   : > { %s10864_s15 = scalar_lea.hbm %s12929_s4, 16 }
  0xff   : > { %p10865_p4 = scmp.ne.s32.totalorder %s12929_s4, %s10864_s15  ;;  %p10870_p7 = scmp.lt.u32.totalorder %s10864_s15, %s12929_s4 }
 0x101   : > { %p10866_p5 = pnand %p10865_p4, %p10073_p3 }
 0x103   : > { %p10867_p6 = pneg %p10866_p5 }
 0x105   : > { %p10872_p8 = pnand %p10870_p7, %p10867_p6 }
 0x107   : > { %10875 = shalt.err (!%p10872_p8)
}
 0x108   : > { %s10876_s16 = scalar_lea.vmem %s1259_s11, 16  ;;  %s10882_s18 = scalar_lea.vmem %s1259_s11, 32 }
 0x109   : > { %p10877_p9 = scmp.ne.s32.totalorder %s1259_s11, %s10876_s16  ;;  %p10883_p12 = scmp.lt.s32.totalorder %s1259_s11, %s1259_s11 }
 0x10a   : > { %p10884_p13 = scmp.lt.s32.totalorder %s10882_s18, %s10876_s16 }
 0x10b   : > { %p10878_p10 = pnand %p10877_p9, %p10073_p3 }
 0x10c   : > { %p10885_p0 = por %p10884_p13, %p10883_p12 }
 0x10d   : > { %p10879_p11 = pneg %p10878_p10 }
 0x10f   : > { %p10886_p1 = pnand %p10885_p0, %p10879_p11 }
 0x111   : > { %10889 = shalt.err (!%p10886_p1)
}
 0x112   : > { %9976 = dma.hbm_to_vmem [thread:$0]  (%p10073_p3), %s12929_s4, 16, %s1259_s11, [#allocation26]  }
 0x113   : > { %s11641_s26 = smov [#allocation28]   ;;  %s11642_s1 = smov [#allocation31]  }
 0x114   : > { %s1282_s28 = sshll.u32 %s11641_s26, 4  ;;  %s1306_s2 = sshll.u32 %s11642_s1, 4  ;;  %s1283_s28 = int_to_ptr.vmem [resolvable:$true] %s1282_s28  ;;  %s1307_s2 = int_to_ptr.vmem [resolvable:$true] %s1306_s2 }
 0x115   : > { %s10890_s7 = scalar_lea.hbm %s11784_s27, 3072 }
 0x116   : > { %p10891_p4 = scmp.ne.s32.totalorder %s11784_s27, %s10890_s7  ;;  %p10896_p7 = scmp.lt.u32.totalorder %s10890_s7, %s11784_s27 }
 0x118   : > { %p10892_p5 = pnand %p10891_p4, %p10073_p3 }
 0x11a   : > { %p10893_p6 = pneg %p10892_p5 }
 0x11c   : > { %p10898_p8 = pnand %p10896_p7, %p10893_p6 }
 0x11e   : > { %10901 = shalt.err (!%p10898_p8)
}
 0x11f   : > { %s10902_s10 = scalar_lea.vmem %s1283_s28, 3072  ;;  %p10909_p12 = scmp.lt.s32.totalorder %s1283_s28, %s1283_s28 }
 0x120   : > { %p10903_p9 = scmp.ne.s32.totalorder %s1283_s28, %s10902_s10  ;;  %p10910_p13 = scmp.lt.s32.totalorder %s10902_s10, %s10902_s10 }
 0x122   : > { %p10904_p10 = pnand %p10903_p9, %p10073_p3  ;;  %p10911_p0 = por %p10910_p13, %p10909_p12 }
 0x124   : > { %p10905_p11 = pneg %p10904_p10 }
 0x126   : > { %p10912_p1 = pnand %p10911_p0, %p10905_p11 }
 0x128   : > { %10915 = shalt.err (!%p10912_p1)
}
 0x129   : > { %s12885_s11 = smov 64   ;;  %s12887_s15 = smov 4  }
 0x12a   : > { %9980 = dma.hbm_to_vmem [thread:$0]  (%p10073_p3), %s11784_s27, 3072, %s1283_s28, [#allocation29], %s12885_s11, %s12885_s11, %s12887_s15  }
 0x12b   : > { %s10916_s16 = scalar_lea.hbm %s12926_s9, 1024 }
 0x12c   : > { %p10917_p4 = scmp.ne.s32.totalorder %s12926_s9, %s10916_s16  ;;  %p10922_p7 = scmp.lt.u32.totalorder %s10916_s16, %s12926_s9 }
 0x12e   : > { %p10918_p5 = pnand %p10917_p4, %p10073_p3 }
 0x130   : > { %p10919_p6 = pneg %p10918_p5 }
 0x132   : > { %p10924_p8 = pnand %p10922_p7, %p10919_p6 }
 0x134   : > { %10927 = shalt.err (!%p10924_p8)
}
 0x135   : > { %s10928_s18 = scalar_lea.vmem %s1307_s2, 1024  ;;  %p10935_p12 = scmp.lt.s32.totalorder %s1307_s2, %s1307_s2 }
 0x136   : > { %p10929_p9 = scmp.ne.s32.totalorder %s1307_s2, %s10928_s18  ;;  %p10936_p13 = scmp.lt.s32.totalorder %s10928_s18, %s10928_s18 }
 0x138   : > { %p10930_p10 = pnand %p10929_p9, %p10073_p3  ;;  %p10937_p0 = por %p10936_p13, %p10935_p12 }
 0x13a   : > { %p10931_p11 = pneg %p10930_p10 }
 0x13c   : > { %p10938_p1 = pnand %p10937_p0, %p10931_p11 }
 0x13e   : > { %10941 = shalt.err (!%p10938_p1)
}
 0x13f   : > { %9984 = dma.hbm_to_vmem [thread:$0]  (%p10073_p3), %s12926_s9, 1024, %s1307_s2, [#allocation32], %s12885_s11, %s12885_s11, %s12887_s15  }
 0x140   : > { %s11645_s26 = smov [#allocation34]   ;;  %s11646_s1 = smov [#allocation37]  }
 0x141   : > { %s1330_s28 = sshll.u32 %s11645_s26, 4  ;;  %s1354_s7 = sshll.u32 %s11646_s1, 4  ;;  %s1331_s28 = int_to_ptr.vmem [resolvable:$true] %s1330_s28  ;;  %s1355_s7 = int_to_ptr.vmem [resolvable:$true] %s1354_s7 }
 0x142   : > { %s10942_s10 = scalar_lea.hbm %s11804_s30, 3072 }
 0x143   : > { %p10943_p4 = scmp.ne.s32.totalorder %s11804_s30, %s10942_s10  ;;  %p10948_p7 = scmp.lt.u32.totalorder %s10942_s10, %s11804_s30 }
 0x145   : > { %p10944_p5 = pnand %p10943_p4, %p10073_p3 }
 0x147   : > { %p10945_p6 = pneg %p10944_p5 }
 0x149   : > { %p10950_p8 = pnand %p10948_p7, %p10945_p6 }
 0x14b   : > { %10953 = shalt.err (!%p10950_p8)
}
 0x14c   : > { %s10954_s16 = scalar_lea.vmem %s1331_s28, 3072  ;;  %p10961_p12 = scmp.lt.s32.totalorder %s1331_s28, %s1331_s28 }
 0x14d   : > { %p10955_p9 = scmp.ne.s32.totalorder %s1331_s28, %s10954_s16  ;;  %p10962_p13 = scmp.lt.s32.totalorder %s10954_s16, %s10954_s16 }
 0x14f   : > { %p10956_p10 = pnand %p10955_p9, %p10073_p3  ;;  %p10963_p0 = por %p10962_p13, %p10961_p12 }
 0x151   : > { %p10957_p11 = pneg %p10956_p10 }
 0x153   : > { %p10964_p1 = pnand %p10963_p0, %p10957_p11 }
 0x155   : > { %10967 = shalt.err (!%p10964_p1)
}
 0x156   : > { %9988 = dma.hbm_to_vmem [thread:$0]  (%p10073_p3), %s11804_s30, 3072, %s1331_s28, [#allocation35], %s12885_s11, %s12885_s11, %s12887_s15  }
 0x157   : > { %s10968_s2 = scalar_lea.hbm %s11814_s19, 1024 }
 0x158   : > { %p10969_p4 = scmp.ne.s32.totalorder %s11814_s19, %s10968_s2  ;;  %p10974_p7 = scmp.lt.u32.totalorder %s10968_s2, %s11814_s19 }
 0x15a   : > { %p10970_p5 = pnand %p10969_p4, %p10073_p3 }
 0x15c   : > { %p10971_p6 = pneg %p10970_p5 }
 0x15e   : > { %p10976_p8 = pnand %p10974_p7, %p10971_p6 }
 0x160   : > { %10979 = shalt.err (!%p10976_p8)
}
 0x161   : > { %s10980_s18 = scalar_lea.vmem %s1355_s7, 1024  ;;  %p10987_p12 = scmp.lt.s32.totalorder %s1355_s7, %s1355_s7 }
 0x162   : > { %p10981_p9 = scmp.ne.s32.totalorder %s1355_s7, %s10980_s18  ;;  %p10988_p13 = scmp.lt.s32.totalorder %s10980_s18, %s10980_s18 }
 0x164   : > { %p10982_p10 = pnand %p10981_p9, %p10073_p3  ;;  %p10989_p0 = por %p10988_p13, %p10987_p12 }
 0x166   : > { %p10983_p11 = pneg %p10982_p10 }
 0x168   : > { %p10990_p1 = pnand %p10989_p0, %p10983_p11 }
 0x16a   : > { %10993 = shalt.err (!%p10990_p1)
}
 0x16b   : > { %9992 = dma.hbm_to_vmem [thread:$0]  (%p10073_p3), %s11814_s19, 1024, %s1355_s7, [#allocation38], %s12885_s11, %s12885_s11, %s12887_s15  }
 0x16c   : > { %s11647_s26 = smov [#allocation40]   ;;  %s11648_s1 = smov [#allocation43]  }
 0x16d   : > { %s1382_s28 = sshll.u32 %s11647_s26, 4  ;;  %s1406_s10 = sshll.u32 %s11648_s1, 4  ;;  %s1383_s28 = int_to_ptr.vmem [resolvable:$true] %s1382_s28  ;;  %s1407_s10 = int_to_ptr.vmem [resolvable:$true] %s1406_s10 }
 0x16e   : > { %s10994_s16 = scalar_lea.hbm %s11829_s12, 16 }
 0x16f   : > { %p10995_p4 = scmp.ne.s32.totalorder %s11829_s12, %s10994_s16  ;;  %p11000_p7 = scmp.lt.u32.totalorder %s10994_s16, %s11829_s12 }
 0x171   : > { %p10996_p5 = pnand %p10995_p4, %p10073_p3 }
 0x173   : > { %p10997_p6 = pneg %p10996_p5 }
 0x175   : > { %p11002_p8 = pnand %p11000_p7, %p10997_p6 }
 0x177   : > { %11005 = shalt.err (!%p11002_p8)
}
 0x178   : > { %s11006_s2 = scalar_lea.vmem %s1383_s28, 16  ;;  %s11012_s7 = scalar_lea.vmem %s1383_s28, 32 }
 0x179   : > { %p11007_p9 = scmp.ne.s32.totalorder %s1383_s28, %s11006_s2  ;;  %p11013_p12 = scmp.lt.s32.totalorder %s1383_s28, %s1383_s28 }
 0x17a   : > { %p11014_p13 = scmp.lt.s32.totalorder %s11012_s7, %s11006_s2 }
 0x17b   : > { %p11008_p10 = pnand %p11007_p9, %p10073_p3 }
 0x17c   : > { %p11015_p0 = por %p11014_p13, %p11013_p12 }
 0x17d   : > { %p11009_p11 = pneg %p11008_p10 }
 0x17f   : > { %p11016_p1 = pnand %p11015_p0, %p11009_p11 }
 0x181   : > { %11019 = shalt.err (!%p11016_p1)
}
 0x182   : > { %9996 = dma.hbm_to_vmem [thread:$0]  (%p10073_p3), %s11829_s12, 16, %s1383_s28, [#allocation41]  }
 0x183   : > { %s11020_s18 = scalar_lea.hbm %s12928_s5, 16 }
 0x184   : > { %p11021_p4 = scmp.ne.s32.totalorder %s12928_s5, %s11020_s18  ;;  %p11026_p7 = scmp.lt.u32.totalorder %s11020_s18, %s12928_s5 }
 0x186   : > { %p11022_p5 = pnand %p11021_p4, %p10073_p3 }
 0x188   : > { %p11023_p6 = pneg %p11022_p5 }
 0x18a   : > { %p11028_p8 = pnand %p11026_p7, %p11023_p6 }
 0x18c   : > { %11031 = shalt.err (!%p11028_p8)
}
 0x18d   : > { %s11032_s26 = scalar_lea.vmem %s1407_s10, 16  ;;  %s11038_s1 = scalar_lea.vmem %s1407_s10, 32 }
 0x18e   : > { %p11033_p9 = scmp.ne.s32.totalorder %s1407_s10, %s11032_s26  ;;  %p11039_p12 = scmp.lt.s32.totalorder %s1407_s10, %s1407_s10 }
 0x18f   : > { %p11040_p13 = scmp.lt.s32.totalorder %s11038_s1, %s11032_s26 }
 0x190   : > { %p11034_p10 = pnand %p11033_p9, %p10073_p3 }
 0x191   : > { %p11041_p0 = por %p11040_p13, %p11039_p12 }
 0x192   : > { %p11035_p11 = pneg %p11034_p10 }
 0x194   : > { %p11042_p1 = pnand %p11041_p0, %p11035_p11 }
 0x196   : > { %11045 = shalt.err (!%p11042_p1)
}
 0x197   : > { %s12932_s28 = sld [smem:[#allocation93_spill]]  ;;  %s11649_s16 = smov [#allocation46]  }
 0x198   : > { %10000 = dma.hbm_to_vmem [thread:$0]  (%p10073_p3), %s12928_s5, 16, %s1407_s10, [#allocation44]  }
 0x199   : > { %s1432_s2 = sshll.u32 %s11649_s16, 4  ;;  %s1433_s2 = int_to_ptr.vmem [resolvable:$true] %s1432_s2 }
 0x19d   : > { %s11046_s7 = scalar_lea.hbm %s12932_s28, 3072 }
 0x19e   : > { %p11047_p4 = scmp.ne.s32.totalorder %s12932_s28, %s11046_s7  ;;  %p11052_p7 = scmp.lt.u32.totalorder %s11046_s7, %s12932_s28 }
 0x1a0   : > { %p11048_p5 = pnand %p11047_p4, %p10073_p3 }
 0x1a2   : > { %p11049_p6 = pneg %p11048_p5 }
 0x1a4   : > { %p11054_p8 = pnand %p11052_p7, %p11049_p6 }
 0x1a6   : > { %11057 = shalt.err (!%p11054_p8)
}
 0x1a7   : > { %s11058_s18 = scalar_lea.vmem %s1433_s2, 3072  ;;  %p11065_p12 = scmp.lt.s32.totalorder %s1433_s2, %s1433_s2 }
 0x1a8   : > { %p11059_p9 = scmp.ne.s32.totalorder %s1433_s2, %s11058_s18  ;;  %p11066_p13 = scmp.lt.s32.totalorder %s11058_s18, %s11058_s18 }
 0x1aa   : > { %p11060_p10 = pnand %p11059_p9, %p10073_p3  ;;  %p11067_p0 = por %p11066_p13, %p11065_p12 }
 0x1ac   : > { %p11061_p11 = pneg %p11060_p10 }
 0x1ae   : > { %p11068_p1 = pnand %p11067_p0, %p11061_p11 }
 0x1b0   : > { %11071 = shalt.err (!%p11068_p1)
}
 0x1b1   : > { %s12933_s10 = sld [smem:[#allocation70_spill]]  ;;  %s11650_s26 = smov [#allocation2]  }
 0x1b2   : > { %10004 = dma.hbm_to_vmem [thread:$0]  (%p10073_p3), %s12932_s28, 3072, %s1433_s2, [#allocation47], %s12885_s11, %s12885_s11, %s12887_s15  }
 0x1b3   : > { %s1076_s1 = sshll.u32 %s11650_s26, 4  ;;  %s11651_s16 = smov [#allocation6]   ;;  %s1077_s1 = int_to_ptr.vmem [resolvable:$true] %s1076_s1 }
 0x1b4   : > { %s1100_s7 = sshll.u32 %s11651_s16, 4  ;;  %s1101_s7 = int_to_ptr.vmem [resolvable:$true] %s1100_s7 }
 0x1b7   : > { %s11072_s18 = scalar_lea.hbm %s12933_s10, 3200 }
 0x1b8   : > { %p11073_p4 = scmp.ne.s32.totalorder %s12933_s10, %s11072_s18  ;;  %p11078_p7 = scmp.lt.u32.totalorder %s11072_s18, %s12933_s10 }
 0x1ba   : > { %p11074_p5 = pnand %p11073_p4, %p10073_p3 }
 0x1bc   : > { %p11075_p6 = pneg %p11074_p5 }
 0x1be   : > { %p11080_p8 = pnand %p11078_p7, %p11075_p6 }
 0x1c0   : > { %11083 = shalt.err (!%p11080_p8)
}
 0x1c1   : > { %s11084_s3 = scalar_lea.vmem %s1077_s1, 3200  ;;  %p11091_p12 = scmp.lt.s32.totalorder %s1077_s1, %s1077_s1 }
 0x1c2   : > { %p11085_p9 = scmp.ne.s32.totalorder %s1077_s1, %s11084_s3  ;;  %p11092_p13 = scmp.lt.s32.totalorder %s11084_s3, %s11084_s3 }
 0x1c4   : > { %p11086_p10 = pnand %p11085_p9, %p10073_p3  ;;  %p11093_p0 = por %p11092_p13, %p11091_p12 }
 0x1c6   : > { %p11087_p11 = pneg %p11086_p10 }
 0x1c8   : > { %p11094_p1 = pnand %p11093_p0, %p11087_p11 }
 0x1ca   : > { %11097 = shalt.err (!%p11094_p1)
}
 0x1cb   : > { %s12934_s2 = sld [smem:[#allocation71_spill]] }
 0x1cc   : > { %9946 = dma.hbm_to_vmem [thread:$0]  (%p10073_p3), %s12933_s10, 3200, %s1077_s1, [#allocation3], %s12885_s11, %s12885_s11, %s12887_s15  }
 0x1d1   : > { %s11098_s26 = scalar_lea.hbm %s12934_s2, 6144 }
 0x1d2   : > { %p11099_p4 = scmp.ne.s32.totalorder %s12934_s2, %s11098_s26  ;;  %p11104_p7 = scmp.lt.u32.totalorder %s11098_s26, %s12934_s2 }
 0x1d4   : > { %p11100_p5 = pnand %p11099_p4, %p10073_p3 }
 0x1d6   : > { %p11101_p6 = pneg %p11100_p5 }
 0x1d8   : > { %p11106_p8 = pnand %p11104_p7, %p11101_p6 }
 0x1da   : > { %11109 = shalt.err (!%p11106_p8)
}
 0x1db   : > { %s11110_s3 = scalar_lea.vmem %s1101_s7, 6144  ;;  %p11117_p12 = scmp.lt.s32.totalorder %s1101_s7, %s1101_s7 }
 0x1dc   : > { %p11111_p9 = scmp.ne.s32.totalorder %s1101_s7, %s11110_s3  ;;  %p11118_p13 = scmp.lt.s32.totalorder %s11110_s3, %s11110_s3 }
 0x1de   : > { %p11112_p10 = pnand %p11111_p9, %p10073_p3  ;;  %p11119_p0 = por %p11118_p13, %p11117_p12 }
 0x1e0   : > { %p11113_p11 = pneg %p11112_p10 }
 0x1e2   : > { %p11120_p1 = pnand %p11119_p0, %p11113_p11 }
 0x1e4   : > { %11123 = shalt.err (!%p11120_p1)
}
 0x1e5   : > { %s12935_s1 = sld [smem:[#allocation72_spill]]  ;;  %s11652_s16 = smov [#allocation9]  }
 0x1e6   : > { %9950 = dma.hbm_to_vmem [thread:$0]  (%p10073_p3), %s12934_s2, 6144, %s1101_s7, [#allocation5], %s12885_s11, %s12885_s11, %s12887_s15  }
 0x1e7   : > { %s1124_s18 = sshll.u32 %s11652_s16, 4  ;;  %s11653_s26 = smov [#allocation12]   ;;  %s1125_s18 = int_to_ptr.vmem [resolvable:$true] %s1124_s18 }
 0x1e8   : > { %s1148_s4 = sshll.u32 %s11653_s26, 4  ;;  %s1149_s4 = int_to_ptr.vmem [resolvable:$true] %s1148_s4 }
 0x1eb   : > { %s11124_s3 = scalar_lea.hbm %s12935_s1, 3072 }
 0x1ec   : > { %p11125_p4 = scmp.ne.s32.totalorder %s12935_s1, %s11124_s3  ;;  %p11130_p7 = scmp.lt.u32.totalorder %s11124_s3, %s12935_s1 }
 0x1ee   : > { %p11126_p5 = pnand %p11125_p4, %p10073_p3 }
 0x1f0   : > { %p11127_p6 = pneg %p11126_p5 }
 0x1f2   : > { %p11132_p8 = pnand %p11130_p7, %p11127_p6 }
 0x1f4   : > { %11135 = shalt.err (!%p11132_p8)
}
 0x1f5   : > { %s11136_s5 = scalar_lea.vmem %s1125_s18, 3072  ;;  %p11143_p12 = scmp.lt.s32.totalorder %s1125_s18, %s1125_s18 }
 0x1f6   : > { %p11137_p9 = scmp.ne.s32.totalorder %s1125_s18, %s11136_s5  ;;  %p11144_p13 = scmp.lt.s32.totalorder %s11136_s5, %s11136_s5 }
 0x1f8   : > { %p11138_p10 = pnand %p11137_p9, %p10073_p3  ;;  %p11145_p0 = por %p11144_p13, %p11143_p12 }
 0x1fa   : > { %p11139_p11 = pneg %p11138_p10 }
 0x1fc   : > { %p11146_p1 = pnand %p11145_p0, %p11139_p11 }
 0x1fe   : > { %11149 = shalt.err (!%p11146_p1)
}
 0x1ff   : > { %s12936_s7 = sld [smem:[#allocation74_spill]] }
 0x200   : > { %9954 = dma.hbm_to_vmem [thread:$0]  (%p10073_p3), %s12935_s1, 3072, %s1125_s18, [#allocation8], %s12885_s11, %s12885_s11, %s12887_s15  }
 0x205   : > { %s11150_s16 = scalar_lea.hbm %s12936_s7, 1024 }
 0x206   : > { %p11151_p4 = scmp.ne.s32.totalorder %s12936_s7, %s11150_s16  ;;  %p11156_p7 = scmp.lt.u32.totalorder %s11150_s16, %s12936_s7 }
 0x208   : > { %p11152_p5 = pnand %p11151_p4, %p10073_p3 }
 0x20a   : > { %p11153_p6 = pneg %p11152_p5 }
 0x20c   : > { %p11158_p8 = pnand %p11156_p7, %p11153_p6 }
 0x20e   : > { %11161 = shalt.err (!%p11158_p8)
}
 0x20f   : > { %s11162_s5 = scalar_lea.vmem %s1149_s4, 1024  ;;  %p11169_p12 = scmp.lt.s32.totalorder %s1149_s4, %s1149_s4 }
 0x210   : > { %p11163_p9 = scmp.ne.s32.totalorder %s1149_s4, %s11162_s5  ;;  %p11170_p13 = scmp.lt.s32.totalorder %s11162_s5, %s11162_s5 }
 0x212   : > { %p11164_p10 = pnand %p11163_p9, %p10073_p3  ;;  %p11171_p0 = por %p11170_p13, %p11169_p12 }
 0x214   : > { %p11165_p11 = pneg %p11164_p10 }
 0x216   : > { %p11172_p1 = pnand %p11171_p0, %p11165_p11 }
 0x218   : > { %11175 = shalt.err (!%p11172_p1)
}
 0x219   : > { %s12937_s18 = sld [smem:[#allocation75_spill]]  ;;  %s11654_s26 = smov [#allocation15]  }
 0x21a   : > { %9958 = dma.hbm_to_vmem [thread:$0]  (%p10073_p3), %s12936_s7, 1024, %s1149_s4, [#allocation11], %s12885_s11, %s12885_s11, %s12887_s15  }
 0x21b   : > { %s1172_s3 = sshll.u32 %s11654_s26, 4  ;;  %s11655_s16 = smov [#allocation18]   ;;  %s1173_s3 = int_to_ptr.vmem [resolvable:$true] %s1172_s3 }
 0x21c   : > { %s1196_s1 = sshll.u32 %s11655_s16, 4  ;;  %s1197_s1 = int_to_ptr.vmem [resolvable:$true] %s1196_s1 }
 0x21f   : > { %s11176_s5 = scalar_lea.hbm %s12937_s18, 3072 }
 0x220   : > { %p11177_p4 = scmp.ne.s32.totalorder %s12937_s18, %s11176_s5  ;;  %p11182_p7 = scmp.lt.u32.totalorder %s11176_s5, %s12937_s18 }
 0x222   : > { %p11178_p5 = pnand %p11177_p4, %p10073_p3 }
 0x224   : > { %p11179_p6 = pneg %p11178_p5 }
 0x226   : > { %p11184_p8 = pnand %p11182_p7, %p11179_p6 }
 0x228   : > { %11187 = shalt.err (!%p11184_p8)
}
 0x229   : > { %s11188_s2 = scalar_lea.vmem %s1173_s3, 3072  ;;  %p11195_p12 = scmp.lt.s32.totalorder %s1173_s3, %s1173_s3 }
 0x22a   : > { %p11189_p9 = scmp.ne.s32.totalorder %s1173_s3, %s11188_s2  ;;  %p11196_p13 = scmp.lt.s32.totalorder %s11188_s2, %s11188_s2 }
 0x22c   : > { %p11190_p10 = pnand %p11189_p9, %p10073_p3  ;;  %p11197_p0 = por %p11196_p13, %p11195_p12 }
 0x22e   : > { %p11191_p11 = pneg %p11190_p10 }
 0x230   : > { %p11198_p1 = pnand %p11197_p0, %p11191_p11 }
 0x232   : > { %11201 = shalt.err (!%p11198_p1)
}
 0x233   : > { %s12938_s4 = sld [smem:[#allocation76_spill]] }
 0x234   : > { %9962 = dma.hbm_to_vmem [thread:$0]  (%p10073_p3), %s12937_s18, 3072, %s1173_s3, [#allocation14], %s12885_s11, %s12885_s11, %s12887_s15  }
 0x239   : > { %s11202_s26 = scalar_lea.hbm %s12938_s4, 1024 }
 0x23a   : > { %p11203_p4 = scmp.ne.s32.totalorder %s12938_s4, %s11202_s26  ;;  %p11208_p7 = scmp.lt.u32.totalorder %s11202_s26, %s12938_s4 }
 0x23c   : > { %p11204_p5 = pnand %p11203_p4, %p10073_p3 }
 0x23e   : > { %p11205_p6 = pneg %p11204_p5 }
 0x240   : > { %p11210_p8 = pnand %p11208_p7, %p11205_p6 }
 0x242   : > { %11213 = shalt.err (!%p11210_p8)
}
 0x243   : > { %s11214_s2 = scalar_lea.vmem %s1197_s1, 1024  ;;  %p11221_p12 = scmp.lt.s32.totalorder %s1197_s1, %s1197_s1 }
 0x244   : > { %p11215_p9 = scmp.ne.s32.totalorder %s1197_s1, %s11214_s2  ;;  %p11222_p13 = scmp.lt.s32.totalorder %s11214_s2, %s11214_s2 }
 0x246   : > { %p11216_p10 = pnand %p11215_p9, %p10073_p3  ;;  %p11223_p0 = por %p11222_p13, %p11221_p12 }
 0x248   : > { %p11217_p11 = pneg %p11216_p10 }
 0x24a   : > { %p11224_p1 = pnand %p11223_p0, %p11217_p11 }
 0x24c   : > { %11227 = shalt.err (!%p11224_p1)
}
 0x24d   : > { %s12939_s3 = sld [smem:[#allocation78_spill]]  ;;  %s11656_s16 = smov [#allocation21]  }
 0x24e   : > { %9966 = dma.hbm_to_vmem [thread:$0]  (%p10073_p3), %s12938_s4, 1024, %s1197_s1, [#allocation17], %s12885_s11, %s12885_s11, %s12887_s15  }
 0x24f   : > { %s1220_s5 = sshll.u32 %s11656_s16, 4  ;;  %s11657_s26 = smov [#allocation24]   ;;  %s1221_s5 = int_to_ptr.vmem [resolvable:$true] %s1220_s5 }
 0x250   : > { %s1244_s6 = sshll.u32 %s11657_s26, 4  ;;  %s1245_s6 = int_to_ptr.vmem [resolvable:$true] %s1244_s6 }
 0x253   : > { %s11228_s2 = scalar_lea.hbm %s12939_s3, 3072 }
 0x254   : > { %p11229_p4 = scmp.ne.s32.totalorder %s12939_s3, %s11228_s2  ;;  %p11234_p7 = scmp.lt.u32.totalorder %s11228_s2, %s12939_s3 }
 0x256   : > { %p11230_p5 = pnand %p11229_p4, %p10073_p3 }
 0x258   : > { %p11231_p6 = pneg %p11230_p5 }
 0x25a   : > { %p11236_p8 = pnand %p11234_p7, %p11231_p6 }
 0x25c   : > { %11239 = shalt.err (!%p11236_p8)
}
 0x25d   : > { %s11240_s7 = scalar_lea.vmem %s1221_s5, 3072  ;;  %p11247_p12 = scmp.lt.s32.totalorder %s1221_s5, %s1221_s5 }
 0x25e   : > { %p11241_p9 = scmp.ne.s32.totalorder %s1221_s5, %s11240_s7  ;;  %p11248_p13 = scmp.lt.s32.totalorder %s11240_s7, %s11240_s7 }
 0x260   : > { %p11242_p10 = pnand %p11241_p9, %p10073_p3  ;;  %p11249_p0 = por %p11248_p13, %p11247_p12 }
 0x262   : > { %p11243_p11 = pneg %p11242_p10 }
 0x264   : > { %p11250_p1 = pnand %p11249_p0, %p11243_p11 }
 0x266   : > { %11253 = shalt.err (!%p11250_p1)
}
 0x267   : > { %s12940_s1 = sld [smem:[#allocation79_spill]] }
 0x268   : > { %9970 = dma.hbm_to_vmem [thread:$0]  (%p10073_p3), %s12939_s3, 3072, %s1221_s5, [#allocation20], %s12885_s11, %s12885_s11, %s12887_s15  }
 0x26d   : > { %s11254_s16 = scalar_lea.hbm %s12940_s1, 4352 }
 0x26e   : > { %p11255_p4 = scmp.ne.s32.totalorder %s12940_s1, %s11254_s16  ;;  %p11260_p7 = scmp.lt.u32.totalorder %s11254_s16, %s12940_s1 }
 0x270   : > { %p11256_p5 = pnand %p11255_p4, %p10073_p3 }
 0x272   : > { %p11257_p6 = pneg %p11256_p5 }
 0x274   : > { %p11262_p8 = pnand %p11260_p7, %p11257_p6 }
 0x276   : > { %11265 = shalt.err (!%p11262_p8)
}
 0x277   : > { %s11266_s7 = scalar_lea.vmem %s1245_s6, 4352  ;;  %p11273_p12 = scmp.lt.s32.totalorder %s1245_s6, %s1245_s6 }
 0x278   : > { %p11267_p9 = scmp.ne.s32.totalorder %s1245_s6, %s11266_s7  ;;  %p11274_p13 = scmp.lt.s32.totalorder %s11266_s7, %s11266_s7 }
 0x27a   : > { %p11268_p10 = pnand %p11267_p9, %p10073_p3  ;;  %p11275_p0 = por %p11274_p13, %p11273_p12 }
 0x27c   : > { %p11269_p11 = pneg %p11268_p10 }
 0x27e   : > { %p11276_p1 = pnand %p11275_p0, %p11269_p11 }
 0x280   : > { %11279 = shalt.err (!%p11276_p1)
}
 0x281   : > { %s12941_s5 = sld [smem:[#allocation82_spill]]  ;;  %s11658_s26 = smov [#allocation27]  }
 0x282   : > { %9974 = dma.hbm_to_vmem [thread:$0]  (%p10073_p3), %s12940_s1, 4352, %s1245_s6, [#allocation23], %s12885_s11, %s12885_s11, %s12887_s15  }
 0x283   : > { %s1272_s2 = sshll.u32 %s11658_s26, 4  ;;  %s11659_s16 = smov [#allocation30]   ;;  %s1273_s2 = int_to_ptr.vmem [resolvable:$true] %s1272_s2 }
 0x284   : > { %s1296_s3 = sshll.u32 %s11659_s16, 4  ;;  %s1297_s3 = int_to_ptr.vmem [resolvable:$true] %s1296_s3 }
 0x287   : > { %s11280_s7 = scalar_lea.hbm %s12941_s5, 16 }
 0x288   : > { %p11281_p4 = scmp.ne.s32.totalorder %s12941_s5, %s11280_s7  ;;  %p11286_p7 = scmp.lt.u32.totalorder %s11280_s7, %s12941_s5 }
 0x28a   : > { %p11282_p5 = pnand %p11281_p4, %p10073_p3 }
 0x28c   : > { %p11283_p6 = pneg %p11282_p5 }
 0x28e   : > { %p11288_p8 = pnand %p11286_p7, %p11283_p6 }
 0x290   : > { %11291 = shalt.err (!%p11288_p8)
}
 0x291   : > { %s11292_s4 = scalar_lea.vmem %s1273_s2, 16  ;;  %s11298_s6 = scalar_lea.vmem %s1273_s2, 32 }
 0x292   : > { %p11293_p9 = scmp.ne.s32.totalorder %s1273_s2, %s11292_s4  ;;  %p11299_p12 = scmp.lt.s32.totalorder %s1273_s2, %s1273_s2 }
 0x293   : > { %p11300_p13 = scmp.lt.s32.totalorder %s11298_s6, %s11292_s4 }
 0x294   : > { %p11294_p10 = pnand %p11293_p9, %p10073_p3 }
 0x295   : > { %p11301_p0 = por %p11300_p13, %p11299_p12 }
 0x296   : > { %p11295_p11 = pneg %p11294_p10 }
 0x298   : > { %p11302_p1 = pnand %p11301_p0, %p11295_p11 }
 0x29a   : > { %11305 = shalt.err (!%p11302_p1)
}
 0x29b   : > { %s12942_s26 = sld [smem:[#allocation83_spill]] }
 0x29c   : > { %9978 = dma.hbm_to_vmem [thread:$0]  (%p10073_p3), %s12941_s5, 16, %s1273_s2, [#allocation26]  }
 0x2a1   : > { %s11306_s16 = scalar_lea.hbm %s12942_s26, 16 }
 0x2a2   : > { %p11307_p4 = scmp.ne.s32.totalorder %s12942_s26, %s11306_s16  ;;  %p11312_p7 = scmp.lt.u32.totalorder %s11306_s16, %s12942_s26 }
 0x2a4   : > { %p11308_p5 = pnand %p11307_p4, %p10073_p3 }
 0x2a6   : > { %p11309_p6 = pneg %p11308_p5 }
 0x2a8   : > { %p11314_p8 = pnand %p11312_p7, %p11309_p6 }
 0x2aa   : > { %11317 = shalt.err (!%p11314_p8)
}
 0x2ab   : > { %s11318_s4 = scalar_lea.vmem %s1297_s3, 16  ;;  %s11324_s7 = scalar_lea.vmem %s1297_s3, 32 }
 0x2ac   : > { %p11319_p9 = scmp.ne.s32.totalorder %s1297_s3, %s11318_s4  ;;  %p11325_p12 = scmp.lt.s32.totalorder %s1297_s3, %s1297_s3 }
 0x2ad   : > { %p11326_p13 = scmp.lt.s32.totalorder %s11324_s7, %s11318_s4 }
 0x2ae   : > { %p11320_p10 = pnand %p11319_p9, %p10073_p3 }
 0x2af   : > { %p11327_p0 = por %p11326_p13, %p11325_p12 }
 0x2b0   : > { %p11321_p11 = pneg %p11320_p10 }
 0x2b2   : > { %p11328_p1 = pnand %p11327_p0, %p11321_p11 }
 0x2b4   : > { %11331 = shalt.err (!%p11328_p1)
}
 0x2b5   : > { %s12943_s2 = sld [smem:[#allocation85_spill]]  ;;  %s11660_s6 = smov [#allocation33]  }
 0x2b6   : > { %9982 = dma.hbm_to_vmem [thread:$0]  (%p10073_p3), %s12942_s26, 16, %s1297_s3, [#allocation29]  }
 0x2b7   : > { %s1320_s16 = sshll.u32 %s11660_s6, 4  ;;  %s11661_s11 = smov [#allocation36]   ;;  %s1321_s16 = int_to_ptr.vmem [resolvable:$true] %s1320_s16 }
 0x2b8   : > { %s1344_s15 = sshll.u32 %s11661_s11, 4  ;;  %s1345_s15 = int_to_ptr.vmem [resolvable:$true] %s1344_s15 }
 0x2bb   : > { %s11332_s1 = scalar_lea.hbm %s12943_s2, 16 }
 0x2bc   : > { %p11333_p4 = scmp.ne.s32.totalorder %s12943_s2, %s11332_s1  ;;  %p11338_p7 = scmp.lt.u32.totalorder %s11332_s1, %s12943_s2 }
 0x2be   : > { %p11334_p5 = pnand %p11333_p4, %p10073_p3 }
 0x2c0   : > { %p11335_p6 = pneg %p11334_p5 }
 0x2c2   : > { %p11340_p8 = pnand %p11338_p7, %p11335_p6 }
 0x2c4   : > { %11343 = shalt.err (!%p11340_p8)
}
 0x2c5   : > { %s11344_s4 = scalar_lea.vmem %s1321_s16, 16  ;;  %s11350_s3 = scalar_lea.vmem %s1321_s16, 32 }
 0x2c6   : > { %p11345_p9 = scmp.ne.s32.totalorder %s1321_s16, %s11344_s4  ;;  %p11351_p12 = scmp.lt.s32.totalorder %s1321_s16, %s1321_s16 }
 0x2c7   : > { %p11352_p13 = scmp.lt.s32.totalorder %s11350_s3, %s11344_s4 }
 0x2c8   : > { %p11346_p10 = pnand %p11345_p9, %p10073_p3 }
 0x2c9   : > { %p11353_p0 = por %p11352_p13, %p11351_p12 }
 0x2ca   : > { %p11347_p11 = pneg %p11346_p10 }
 0x2cc   : > { %p11354_p1 = pnand %p11353_p0, %p11347_p11 }
 0x2ce   : > { %11357 = shalt.err (!%p11354_p1)
}
 0x2cf   : > { %s12944_s11 = sld [smem:[#allocation86_spill]] }
 0x2d0   : > { %9986 = dma.hbm_to_vmem [thread:$0]  (%p10073_p3), %s12943_s2, 16, %s1321_s16, [#allocation32]  }
 0x2d5   : > { %s11358_s1 = scalar_lea.hbm %s12944_s11, 16 }
 0x2d6   : > { %p11359_p4 = scmp.ne.s32.totalorder %s12944_s11, %s11358_s1  ;;  %p11364_p7 = scmp.lt.u32.totalorder %s11358_s1, %s12944_s11 }
 0x2d8   : > { %p11360_p5 = pnand %p11359_p4, %p10073_p3 }
 0x2da   : > { %p11361_p6 = pneg %p11360_p5 }
 0x2dc   : > { %p11366_p8 = pnand %p11364_p7, %p11361_p6 }
 0x2de   : > { %11369 = shalt.err (!%p11366_p8)
}
 0x2df   : > { %s11370_s7 = scalar_lea.vmem %s1345_s15, 16  ;;  %s11376_s6 = scalar_lea.vmem %s1345_s15, 32 }
 0x2e0   : > { %p11371_p9 = scmp.ne.s32.totalorder %s1345_s15, %s11370_s7  ;;  %p11377_p12 = scmp.lt.s32.totalorder %s1345_s15, %s1345_s15 }
 0x2e1   : > { %p11378_p13 = scmp.lt.s32.totalorder %s11376_s6, %s11370_s7 }
 0x2e2   : > { %p11372_p10 = pnand %p11371_p9, %p10073_p3 }
 0x2e3   : > { %p11379_p0 = por %p11378_p13, %p11377_p12 }
 0x2e4   : > { %p11373_p11 = pneg %p11372_p10 }
 0x2e6   : > { %p11380_p1 = pnand %p11379_p0, %p11373_p11 }
 0x2e8   : > { %11383 = shalt.err (!%p11380_p1)
}
 0x2e9   : > { %s12945_s16 = sld [smem:[#allocation87_spill]]  ;;  %s11662_s4 = smov [#allocation39]  }
 0x2ea   : > { %9990 = dma.hbm_to_vmem [thread:$0]  (%p10073_p3), %s12944_s11, 16, %s1345_s15, [#allocation35]  }
 0x2eb   : > { %s1368_s3 = sshll.u32 %s11662_s4, 4  ;;  %s11663_s1 = smov [#allocation42]   ;;  %s1369_s3 = int_to_ptr.vmem [resolvable:$true] %s1368_s3 }
 0x2ec   : > { %s1392_s2 = sshll.u32 %s11663_s1, 4  ;;  %s1393_s2 = int_to_ptr.vmem [resolvable:$true] %s1392_s2 }
 0x2ef   : > { %s11384_s5 = scalar_lea.hbm %s12945_s16, 16 }
 0x2f0   : > { %p11385_p4 = scmp.ne.s32.totalorder %s12945_s16, %s11384_s5  ;;  %p11390_p7 = scmp.lt.u32.totalorder %s11384_s5, %s12945_s16 }
 0x2f2   : > { %p11386_p5 = pnand %p11385_p4, %p10073_p3 }
 0x2f4   : > { %p11387_p6 = pneg %p11386_p5 }
 0x2f6   : > { %p11392_p8 = pnand %p11390_p7, %p11387_p6 }
 0x2f8   : > { %11395 = shalt.err (!%p11392_p8)
}
 0x2f9   : > { %s11396_s7 = scalar_lea.vmem %s1369_s3, 16  ;;  %s11402_s15 = scalar_lea.vmem %s1369_s3, 32 }
 0x2fa   : > { %p11397_p9 = scmp.ne.s32.totalorder %s1369_s3, %s11396_s7  ;;  %p11403_p12 = scmp.lt.s32.totalorder %s1369_s3, %s1369_s3 }
 0x2fb   : > { %p11404_p13 = scmp.lt.s32.totalorder %s11402_s15, %s11396_s7 }
 0x2fc   : > { %p11398_p10 = pnand %p11397_p9, %p10073_p3 }
 0x2fd   : > { %p11405_p0 = por %p11404_p13, %p11403_p12 }
 0x2fe   : > { %p11399_p11 = pneg %p11398_p10 }
 0x300   : > { %p11406_p1 = pnand %p11405_p0, %p11399_p11 }
 0x302   : > { %11409 = shalt.err (!%p11406_p1)
}
 0x303   : > { %s12946_s6 = sld [smem:[#allocation89_spill]] }
 0x304   : > { %9994 = dma.hbm_to_vmem [thread:$0]  (%p10073_p3), %s12945_s16, 16, %s1369_s3, [#allocation38]  }
 0x309   : > { %s11410_s5 = scalar_lea.hbm %s12946_s6, 3072 }
 0x30a   : > { %p11411_p4 = scmp.ne.s32.totalorder %s12946_s6, %s11410_s5  ;;  %p11416_p7 = scmp.lt.u32.totalorder %s11410_s5, %s12946_s6 }
 0x30c   : > { %p11412_p5 = pnand %p11411_p4, %p10073_p3 }
 0x30e   : > { %p11413_p6 = pneg %p11412_p5 }
 0x310   : > { %p11418_p8 = pnand %p11416_p7, %p11413_p6 }
 0x312   : > { %11421 = shalt.err (!%p11418_p8)
}
 0x313   : > { %s11422_s4 = scalar_lea.vmem %s1393_s2, 3072  ;;  %p11429_p12 = scmp.lt.s32.totalorder %s1393_s2, %s1393_s2 }
 0x314   : > { %p11423_p9 = scmp.ne.s32.totalorder %s1393_s2, %s11422_s4  ;;  %p11430_p13 = scmp.lt.s32.totalorder %s11422_s4, %s11422_s4 }
 0x316   : > { %p11424_p10 = pnand %p11423_p9, %p10073_p3  ;;  %p11431_p0 = por %p11430_p13, %p11429_p12 }
 0x318   : > { %p11425_p11 = pneg %p11424_p10 }
 0x31a   : > { %p11432_p1 = pnand %p11431_p0, %p11425_p11 }
 0x31c   : > { %11435 = shalt.err (!%p11432_p1)
}
 0x31d   : > { %s12947_s3 = smov 4   ;;  %s12948_s1 = smov 64  }
 0x31e   : > { %s12949_s7 = sld [smem:[#allocation91_spill]]  ;;  %s11664_s15 = smov [#allocation45]  }
 0x31f   : > { %9998 = dma.hbm_to_vmem [thread:$0]  (%p10073_p3), %s12946_s6, 3072, %s1393_s2, [#allocation41], %s12948_s1, %s12948_s1, %s12947_s3  }
 0x320   : > { %s1416_s5 = sshll.u32 %s11664_s15, 4  ;;  %s11665_s9 = smov [#allocation48]   ;;  %s1417_s5 = int_to_ptr.vmem [resolvable:$true] %s1416_s5 }
 0x321   : > { %s1448_s10 = sshll.u32 %s11665_s9, 4  ;;  %s1449_s10 = int_to_ptr.vmem [resolvable:$true] %s1448_s10 }
 0x324   : > { %s11436_s4 = scalar_lea.hbm %s12949_s7, 1024 }
 0x325   : > { %p11437_p4 = scmp.ne.s32.totalorder %s12949_s7, %s11436_s4  ;;  %p11442_p7 = scmp.lt.u32.totalorder %s11436_s4, %s12949_s7 }
 0x327   : > { %p11438_p5 = pnand %p11437_p4, %p10073_p3 }
 0x329   : > { %p11439_p6 = pneg %p11438_p5 }
 0x32b   : > { %p11444_p8 = pnand %p11442_p7, %p11439_p6 }
 0x32d   : > { %11447 = shalt.err (!%p11444_p8)
}
 0x32e   : > { %s11448_s11 = scalar_lea.vmem %s1417_s5, 1024  ;;  %p11455_p12 = scmp.lt.s32.totalorder %s1417_s5, %s1417_s5 }
 0x32f   : > { %p11449_p9 = scmp.ne.s32.totalorder %s1417_s5, %s11448_s11  ;;  %p11456_p13 = scmp.lt.s32.totalorder %s11448_s11, %s11448_s11 }
 0x331   : > { %p11450_p10 = pnand %p11449_p9, %p10073_p3  ;;  %p11457_p0 = por %p11456_p13, %p11455_p12 }
 0x333   : > { %p11451_p11 = pneg %p11450_p10 }
 0x335   : > { %p11458_p1 = pnand %p11457_p0, %p11451_p11 }
 0x337   : > { %11461 = shalt.err (!%p11458_p1)
}
 0x338   : > { %s12950_s9 = sld [smem:[#allocation95_spill]] }
 0x339   : > { %10002 = dma.hbm_to_vmem [thread:$0]  (%p10073_p3), %s12949_s7, 1024, %s1417_s5, [#allocation44], %s12948_s1, %s12948_s1, %s12947_s3  }
 0x33e   : > { %s11462_s2 = scalar_lea.hbm %s12950_s9, 1024 }
 0x33f   : > { %p11463_p4 = scmp.ne.s32.totalorder %s12950_s9, %s11462_s2  ;;  %p11468_p7 = scmp.lt.u32.totalorder %s11462_s2, %s12950_s9 }
 0x341   : > { %p11464_p5 = pnand %p11463_p4, %p10073_p3 }
 0x343   : > { %p11465_p6 = pneg %p11464_p5 }
 0x345   : > { %p11470_p8 = pnand %p11468_p7, %p11465_p6 }
 0x347   : > { %11473 = shalt.err (!%p11470_p8)
}
 0x348   : > { %s11474_s11 = scalar_lea.vmem %s1449_s10, 1024  ;;  %p11481_p12 = scmp.lt.s32.totalorder %s1449_s10, %s1449_s10 }
 0x349   : > { %p11475_p9 = scmp.ne.s32.totalorder %s1449_s10, %s11474_s11  ;;  %p11482_p13 = scmp.lt.s32.totalorder %s11474_s11, %s11474_s11 }
 0x34b   : > { %p11476_p10 = pnand %p11475_p9, %p10073_p3  ;;  %p11483_p0 = por %p11482_p13, %p11481_p12 }
 0x34d   : > { %p11477_p11 = pneg %p11476_p10 }
 0x34f   : > { %p11484_p1 = pnand %p11483_p0, %p11477_p11 }
 0x351   : > { %11487 = shalt.err (!%p11484_p1)
}
 0x352   : > { %s12951_s15 = sld [smem:[#allocation97_spill]]  ;;  %s11666_s5 = smov [#allocation49]  }
 0x353   : > { %10006 = dma.hbm_to_vmem [thread:$0]  (%p10073_p3), %s12950_s9, 1024, %s1449_s10, [#allocation47], %s12948_s1, %s12948_s1, %s12947_s3  }
 0x354   : > { %s1464_s4 = sshll.u32 %s11666_s5, 4  ;;  %s1465_s4 = int_to_ptr.vmem [resolvable:$true] %s1464_s4 }
 0x358   : > { %s11488_s2 = scalar_lea.hbm %s12951_s15, 3072 }
 0x359   : > { %p11489_p4 = scmp.ne.s32.totalorder %s12951_s15, %s11488_s2  ;;  %p11494_p7 = scmp.lt.u32.totalorder %s11488_s2, %s12951_s15 }
 0x35b   : > { %p11490_p5 = pnand %p11489_p4, %p10073_p3 }
 0x35d   : > { %p11491_p6 = pneg %p11490_p5 }
 0x35f   : > { %p11496_p8 = pnand %p11494_p7, %p11491_p6 }
 0x361   : > { %11499 = shalt.err (!%p11496_p8)
}
 0x362   : > { %s11500_s11 = scalar_lea.vmem %s1465_s4, 3072  ;;  %p11507_p12 = scmp.lt.s32.totalorder %s1465_s4, %s1465_s4 }
 0x363   : > { %p11501_p9 = scmp.ne.s32.totalorder %s1465_s4, %s11500_s11  ;;  %p11508_p13 = scmp.lt.s32.totalorder %s11500_s11, %s11500_s11 }
 0x365   : > { %p11502_p10 = pnand %p11501_p9, %p10073_p3  ;;  %p11509_p0 = por %p11508_p13, %p11507_p12 }
 0x367   : > { %p11503_p11 = pneg %p11502_p10 }
 0x369   : > { %p11510_p1 = pnand %p11509_p0, %p11503_p11 }
 0x36b   : > { %11513 = shalt.err (!%p11510_p1)
}
 0x36c   : > { %10008 = dma.hbm_to_vmem [thread:$0]  (%p10073_p3), %s12951_s15, 3072, %s1465_s4, [#allocation50], %s12948_s1, %s12948_s1, %s12947_s3  }
 0x36d PF: > { %1505 = sbr.rel (%p11911_p2) target bundleno = 6195 (0x1833), region = 188  ;;  %p10105_p4 = scmp.eq.s32.totalorder (!%p11911_p2), %s11907_s0, 0 }
 0x374   : > { %11519 = dma.done.wait (%p10105_p4), [#allocation3], 3200  }
 0x375   : > { %11521 = vsyncadd (%p10105_p4), [#allocation3], 4294964096 }
 0x376   : > { %11523 = dma.done.wait (%p10105_p4), [#allocation5], 6160  }
 0x377   : > { %11525 = vsyncadd (%p10105_p4), [#allocation5], 4294961136 }
 0x378   : > { %11527 = dma.done.wait (%p10105_p4), [#allocation8], 3088  }
 0x379   : > { %11529 = vsyncadd (%p10105_p4), [#allocation8], 4294964208 }
 0x37a   : > { %11531 = dma.done.wait (%p10105_p4), [#allocation11], 1040  }
 0x37b   : > { %11533 = vsyncadd (%p10105_p4), [#allocation11], 4294966256 }
 0x37c   : > { %11535 = dma.done.wait (%p10105_p4), [#allocation14], 3088  }
 0x37d   : > { %11537 = vsyncadd (%p10105_p4), [#allocation14], 4294964208 }
 0x37e   : > { %11539 = dma.done.wait (%p10105_p4), [#allocation17], 1040  }
 0x37f   : > { %11541 = vsyncadd (%p10105_p4), [#allocation17], 4294966256 }
 0x380   : > { %11543 = dma.done.wait (%p10105_p4), [#allocation20], 3088  }
 0x381   : > { %11545 = vsyncadd (%p10105_p4), [#allocation20], 4294964208 }
 0x382   : > { %11547 = dma.done.wait (%p10105_p4), [#allocation23], 4368  }
 0x383   : > { %11549 = vsyncadd (%p10105_p4), [#allocation23], 4294962928 }
 0x384   : > { %11551 = dma.done.wait (%p10105_p4), [#allocation26], 32  }
 0x385   : > { %11553 = vsyncadd (%p10105_p4), [#allocation26], 4294967264 }
 0x386   : > { %11555 = dma.done.wait (%p10105_p4), [#allocation29], 3088  }
 0x387   : > { %11557 = vsyncadd (%p10105_p4), [#allocation29], 4294964208 }
 0x388   : > { %11559 = dma.done.wait (%p10105_p4), [#allocation32], 1040  }
 0x389   : > { %11561 = vsyncadd (%p10105_p4), [#allocation32], 4294966256 }
 0x38a   : > { %11563 = dma.done.wait (%p10105_p4), [#allocation35], 3088  }
 0x38b   : > { %11565 = vsyncadd (%p10105_p4), [#allocation35], 4294964208 }
 0x38c   : > { %11567 = dma.done.wait (%p10105_p4), [#allocation38], 1040  }
 0x38d   : > { %11569 = vsyncadd (%p10105_p4), [#allocation38], 4294966256 }
 0x38e   : > { %11571 = dma.done.wait (%p10105_p4), [#allocation41], 3088  }
 0x38f   : > { %11573 = vsyncadd (%p10105_p4), [#allocation41], 4294964208 }
 0x390   : > { %11575 = dma.done.wait (%p10105_p4), [#allocation44], 1040  }
 0x391   : > { %11577 = vsyncadd (%p10105_p4), [#allocation44], 4294966256 }
 0x392   : > { %11579 = dma.done.wait (%p10105_p4), [#allocation47], 4096  }
 0x393   : > { %11581 = vsyncadd (%p10105_p4), [#allocation47], 4294963200 }
 0x394   : > { %11583 = dma.done.wait (%p10105_p4), [#allocation50], 3072  }
 0x395   : > { %11585 = vsyncadd (%p10105_p4), [#allocation50], 4294964224  ;;  %s12952_s23 = sld [smem:[#allocation68_spill]]  ;;  %p1741_p2 = scmp.lt.s32.totalorder %s11907_s0, 1  ;;  %v11667_v0 = vmov 0   ;;  %vm1784_vm0 = vcmask 1040384  }
 0x396   : > { %2106 = vmatprep.subr.bf16.mxu1 %v11667_v0  ;;  %vm1785_vm1 = vsmask.f32 256  ;;  %vm1826_vm2 = vcmask 1046528   ;;  %v10231_v7 = vld [vmem:[#allocation2 + $0x40] sm:$0xff]   ;;  %vm1791_vm4 = vsmask.f32 7424 }
 0x397   : > { %s12971_s0 = smov (!%p1741_p2, %s11907_s0), 1  ;;  %v10232_v10 = vld [vmem:[#allocation2] sm:$0xff]   ;;  %vm12369_vm3 = vmand %vm1784_vm0, %vm1785_vm1  ;;  %8993 = vmatprep.subr.bf16.mxu0 %v10231_v7  ;;  %v10234_v16 = vld [vmem:[#allocation2 + $0x48] sm:$0xff]   ;;  %s11668_s1 = smov 10   ;;  %vm2059_vm5 = vcmask 1047552   ;;  %v11670_v60 = vmov 65535  }
 0x398   : > { %s8991_s10 = sshll.u32 %s12971_s0, 5  ;;  %v10233_v11 = vld [vmem:[#allocation2 + $0x80] sm:$0xff]   ;;  %8994 = vmatpush3.bf16.msra.mxu0 %v10232_v10  ;;  %v10235_v18 = vld [vmem:[#allocation2 + $0x8] sm:$0xff]   ;;  %v10237_v26 = vld [vmem:[#allocation2 + $0x50] sm:$0xff]   ;;  %s11669_s5 = smov 5   ;;  %v2060_v61 = vsel %vm1826_vm2, 4294967295, %v11670_v60 }
 0x399   : > { %2107 = vmatpush1.bf16.msra.mxu1 %v10233_v11  ;;  %8995 = vmatprep.subr.bf16.mxu0 %v10234_v16  ;;  %v10236_v21 = vld [vmem:[#allocation2 + $0x88] sm:$0xff]   ;;  %v10238_v29 = vld [vmem:[#allocation2 + $0x10] sm:$0xff]   ;;  %v10240_v42 = vld [vmem:[#allocation2 + $0x58] sm:$0xff]   ;;  %vm1820_vm6 = vcmask 39936   ;;  %vm1837_vm7 = vcmask 80896   ;;  %vm2054_vm8 = vcmask 121856  }
 0x39a   : > { %2108 = vmatprep.subr.bf16.mxu1 %v11667_v0  ;;  %v10239_v40 = vld [vmem:[#allocation2 + $0x90] sm:$0xff]   ;;  %v10241_v46 = vld [vmem:[#allocation2 + $0x18] sm:$0xff]   ;;  %v10243_v50 = vld [vmem:[#allocation2 + $0x60] sm:$0xff]   ;;  %vm11672_vm9 = vmmov 0   ;;  %vm2161_vm11 = vcmask 130048   ;;  %vm2328_vm13 = vcmask 1044480  }
 0x39b   : > { %s1745_s3 = scalar_lea.vmem %s12952_s23, %s8991_s10  ;;  %v10242_v48 = vld [vmem:[#allocation2 + $0x98] sm:$0xff]   ;;  %v10244_v52 = vld [vmem:[#allocation2 + $0x20] sm:$0xff]   ;;  %v10246_v55 = vld [vmem:[#allocation2 + $0x68] sm:$0xff]   ;;  %vm2329_vm14 = vsmask.f32 4352  ;;  %vm3293_vm0 = vcmask 1041408  }
 0x39c   : > { %v1760_v1 = vld [vmem:[%s1745_s3] sm:$0xff]  ;;  %v1762_v2 = vld [vmem:[%s1745_s3 + $0x10] sm:$0xff]  ;;  %v1761_v3 = vld [vmem:[%s1745_s3 + $0x8] sm:$0xff]  ;;  %8996 = vmatpush3.bf16.msra.mxu0 %v10235_v18  ;;  %vm3294_vm1 = vsmask.f32 1280  ;;  %s12961_s4 = sld [smem:[#allocation69_spill]] }
 0x39d   : > { %v1764_v4 = vpack.c.bf16 %v1762_v2, %v1760_v1  ;;  %v1763_v5 = vld [vmem:[%s1745_s3 + $0x18] sm:$0xff]  ;;  %2109 = vmatpush1.bf16.msra.mxu1 %v10236_v21  ;;  %8997 = vmatprep.subr.bf16.mxu0 %v10237_v26  ;;  %v10245_v53 = vld [vmem:[#allocation2 + $0xa0] sm:$0xff]   ;;  %v10247_v56 = vld [vmem:[#allocation2 + $0x28] sm:$0xff]   ;;  %s11674_s11 = smov 52   ;;  %s11675_s23 = smov 104  }
 0x39e   : > { %v1765_v6 = vpack.c.bf16 %v1763_v5, %v1761_v3  ;;  %2110 = vmatprep.subr.bf16.mxu1 %v11667_v0  ;;  %v10248_v57 = vld [vmem:[#allocation2 + $0xa8] sm:$0xff]   ;;  %v10249_v58 = vld [vmem:[#allocation2 + $0x70] sm:$0xff]   ;;  %v10252_v63 = vld [vmem:[#allocation2 + $0x78] sm:$0xff]   ;;  %s8506_s3 = sshll.u32 %s12971_s0, 2 }
 0x39f   : > { %v1767_v8 = vshrl.u32 %v1764_v4, 16  ;;  %v1770_v9 = vshll.u32 %v1764_v4, 16  ;;  %v10250_v59 = vld [vmem:[#allocation2 + $0x30] sm:$0xff]   ;;  %v10253_v1 = vld [vmem:[#allocation2 + $0x38] sm:$0xff]   ;;  %v10255_v3 = vld [vmem:[#allocation2 + $0xc0] sm:$0xff]   ;;  %v2061_v4 = vsel %vm2059_vm5, %v2060_v61, 0 }
 0x3a0   : > { %v1774_v13 = vshrl.u32 %v1765_v6, 16  ;;  %v1777_v14 = vshll.u32 %v1765_v6, 16  ;;  %8998 = vmatpush3.bf16.msra.mxu0 %v10238_v29  ;;  %v10251_v62 = vld [vmem:[#allocation2 + $0xb0] sm:$0xff]   ;;  %v10254_v2 = vld [vmem:[#allocation2 + $0xb8] sm:$0xff]   ;;  %v2063_v5 = vand.u32 %v10255_v3, %v2061_v4  ;;  %v10281_v3 = vld [vmem:[#allocation6 + $0x78] sm:$0xff]   ;;  %vm3297_vm5 = vcmask 1045504  }
 0x3a1   : > { %v1769_v15 = vrot.slane %v1767_v8, 7  ;;  %2111 = vmatpush1.bf16.msra.mxu1 %v10239_v40  ;;  %8999 = vmatprep.subr.bf16.mxu0 %v10240_v42  ;;  %v10256_v16 = vld [vmem:[#allocation6 + $0x40] sm:$0xff]   ;;  %v10258_v18 = vld [vmem:[#allocation6 + $0x48] sm:$0xff]   ;;  %v10263_v21 = vld [vmem:[#allocation6 + $0x10] sm:$0xff]  }
 0x3a2   : > { %v1776_v17 = vrot.slane %v1774_v13, 7  ;;  %2112 = vmatprep.subr.bf16.mxu1 %v11667_v0  ;;  %v10275_v60 = vld [vmem:[#allocation6 + $0x28] sm:$0xff]   ;;  %v10276_v61 = vld [vmem:[#allocation6 + $0xe0] sm:$0xff]   ;;  %vm12422_vm15 = vmand %vm2328_vm13, %vm2329_vm14  ;;  %s1750_s2 = scalar_lea.vmem %s12961_s4, %s8991_s10  ;;  %s12962_s10 = sld [smem:[#allocation81_spill]]  ;;  %vm6197_vm13 = vsmask.f32 2304 }
 0x3a3   : > { %v1772_v19 = vor.u32 %v1770_v9, %v1769_v15  ;;  %v1789_v20 = vsel %vm12369_vm3, %v1769_v15, 0  ;;  %v11671_v15 = vmov 0.0|0.0   ;;  %v10282_v4 = vld [vmem:[#allocation6 + $0xa8] sm:$0xff]   ;;  %s12966_s4 = sld [smem:[#allocation92_spill]] }
 0x3a4   : > { %v1828_v22 = vrot.slane %v1789_v20, 1  ;;  %v1800_v23 = vshll.u32 %v1789_v20, 16  ;;  %v1779_v24 = vor.u32 %v1777_v14, %v1776_v17  ;;  %v1790_v25 = vsel %vm12369_vm3, %v1776_v17, 0  ;;  %9000 = vmatpush3.bf16.msra.mxu0 %v10241_v46  ;;  %v10257_v17 = vld [vmem:[#allocation6] sm:$0xff]   ;;  %v10261_v20 = vld [vmem:[#allocation6 + $0x50] sm:$0xff]  }
 0x3a5   : > { %v12380_v27 = vsel %vm12369_vm3, 0, %v1772_v19  ;;  %v1831_v28 = vrot.slane %v1790_v25, 1  ;;  %v1812_v33 = vshll.u32 %v1790_v25, 16  ;;  %2113 = vmatpush1.bf16.msra.mxu1 %v10242_v48  ;;  %9001 = vmatprep.subr.bf16.mxu0 %v10243_v50  ;;  %v10259_v19 = vld [vmem:[#allocation6 + $0x8] sm:$0xff]   ;;  %v2149_v25 = vlaneseq }
 0x3a6   : > { %v1827_v30 = vrot.slane %v12380_v27, 1  ;;  %v1793_v31 = vshrl.u32 %v12380_v27, 16  ;;  %v1795_v32 = vshll.u32 %v12380_v27, 16  ;;  %v1802_v34 = vrot.slane %v1800_v23, 1  ;;  %2114 = vmatprep.subr.bf16.mxu1 %v11667_v0  ;;  %v10267_v23 = vld [vmem:[#allocation6 + $0x18] sm:$0xff]   ;;  %v10676_v12 = vld [vmem:[%s11884_s8 + $0x10] sm:$0xff]  }
 0x3a7   : > { %v12388_v35 = vsel %vm12369_vm3, 0, %v1779_v24  ;;  %v1814_v45 = vrot.slane %v1812_v33, 1  ;;  %v10269_v24 = vld [vmem:[#allocation6 + $0x60] sm:$0xff]  }
 0x3a8   : > { %v1829_v36 = vsel %vm1826_vm2, %v1827_v30, %v1828_v22  ;;  %v1797_v37 = vrot.slane %v1795_v32, 1  ;;  %v1830_v38 = vrot.slane %v12388_v35, 1  ;;  %v1805_v39 = vshrl.u32 %v12388_v35, 16  ;;  %9002 = vmatpush3.bf16.msra.mxu0 %v10244_v52  ;;  %v10265_v22 = vld [vmem:[#allocation6 + $0x58] sm:$0xff]   ;;  %v10264_v52 = vld [vmem:[#allocation6 + $0xc8] sm:$0xff]  }
 0x3a9   : > { %1833 = vrot.lane.b32.xlu1 %v1829_v36, %s11668_s1  ;;  %v1807_v41 = vshll.u32 %v12388_v35, 16  ;;  %2115 = vmatpush1.bf16.msra.mxu1 %v10245_v53  ;;  %v2150_v32 = vshrl.u32 %v2149_v25, 7  ;;  %v10266_v53 = vld [vmem:[#allocation6 + $0x88] sm:$0xff]  }
 0x3aa   : > { %v1798_v43 = vor.u32 %v1797_v37, %v1793_v31  ;;  %v1832_v44 = vsel %vm1826_vm2, %v1830_v38, %v1831_v28  ;;  %9003 = vmatprep.subr.bf16.mxu0 %v10246_v55  ;;  %2116 = vmatprep.subr.bf16.mxu1 %v11667_v0  ;;  %v8508_v28 = vld [vmem:[#allocation4] ss:$0 sm:$0xff]  ;;  %v10270_v55 = vld [vmem:[#allocation6 + $0x90] sm:$0xff]  }
 0x3ab   : > { %v1809_v47 = vrot.slane %v1807_v41, 1  ;;  %v2152_v41 = vand.u32 127, %v2149_v25  ;;  %v2153_v42 = vmul.u32 2, %v2150_v32  ;;  %v10287_v32 = vld [vmem:[#allocation6 + $0x100] sm:$0xff]  }
 0x3ac   : > { %v1803_v49 = vsel %vm1791_vm4, %v1798_v43, %v1802_v34  ;;  %9004 = vmatpush3.bf16.msra.mxu0 %v10247_v56  ;;  %v10271_v56 = vld [vmem:[#allocation6 + $0x20] sm:$0xff]  }
 0x3ad   : > { %1816 = vrot.lane.b32.xlu0 %v1803_v49, %s11669_s5  ;;  %1835 = vrot.lane.b32.xlu1 %v1832_v44, %s11668_s1  ;;  %v1810_v51 = vor.u32 %v1809_v47, %v1805_v39  ;;  %vm2154_vm10 = vcmp.eq.s32.totalorder %v2152_v41, %v2153_v42  ;;  %v2157_v46 = vadd.s32 1, %v2153_v42  ;;  %v10260_v49 = vld [vmem:[#allocation6 + $0xc0] sm:$0xff]   ;;  %v10292_v42 = vld [vmem:[#allocation6 + $0x150] sm:$0xff]   ;;  %s1754_s1 = scalar_lea.vmem %s11894_s29, %s8506_s3 }
 0x3ae   : > { %2117 = vmatpush1.bf16.msra.mxu1 %v10248_v57  ;;  %9005 = vmatprep.subr.bf16.mxu0 %v10249_v58  ;;  %v10272_v57 = vld [vmem:[#allocation6 + $0xd8] sm:$0xff]   ;;  %v10273_v58 = vld [vmem:[#allocation6 + $0x68] sm:$0xff]  }
 0x3af   : > { %v1815_v54 = vsel %vm1791_vm4, %v1810_v51, %v1814_v45  ;;  %2118 = vmatprep.subr.bf16.mxu1 %v11667_v0  ;;  %vm2158_vm12 = vcmp.eq.s32.totalorder %v2152_v41, %v2157_v46  ;;  %v10262_v51 = vld [vmem:[#allocation6 + $0x80] sm:$0xff]   ;;  %v10294_v46 = vld [vmem:[#allocation6 + $0x158] sm:$0xff]  }
 0x3b0   : > { %9006 = vmatpush3.bf16.msra.mxu0 %v10250_v59  ;;  %v10274_v59 = vld [vmem:[#allocation6 + $0x98] sm:$0xff]  }
 0x3b1   : > { %1818 = vrot.lane.b32.xlu0 %v1815_v54, %s11669_s5  ;;  %9007 = vmatprep.subr.bf16.mxu0 %v10252_v63  ;;  %v10268_v54 = vld [vmem:[#allocation6 + $0xd0] sm:$0xff]   ;;  %v10278_v63 = vld [vmem:[#allocation6 + $0xa0] sm:$0xff]   ;;  %s12963_s5 = sld [smem:[#allocation88_spill]] }
 0x3b2   : > { %2119 = vmatpush1.bf16.msra.mxu1 %v10251_v62  ;;  %v10277_v62 = vld [vmem:[#allocation6 + $0x70] sm:$0xff]  }
 0x3b3   : > { %2120 = vmatprep.subr.bf16.mxu1 %v11667_v0 }
 0x3b4   : > { %9008 = vmatpush3.bf16.msra.mxu0 %v10253_v1  ;;  %v10279_v1 = vld [vmem:[#allocation6 + $0x30] sm:$0xff]  }
 0x3b5   : > { %9933 = vmatprep.subr.bf16.mxu0 %v11671_v15 }
 0x3b6   : > { %2121 = vmatpush1.bf16.msra.mxu1 %v10254_v2  ;;  %v10280_v2 = vld [vmem:[#allocation6 + $0xe8] sm:$0xff]  }
 0x3b7   : > { %2122 = vmatprep.subr.bf16.mxu1 %v11667_v0  ;;  %v11673_v0 = vmov 0.0  }
 0x3b8   : > { %v12410_v48 = vsel %vm2154_vm10, 1.0, %v11673_v0  ;;  %v12418_v50 = vsel %vm2158_vm12, 1.0, %v11673_v0  ;;  %vm4369_vm10 = vcmask 228352   ;;  %vm6196_vm12 = vcmask 1042432  }
 0x3b9   : > { %vm12731_vm14 = vmand %vm6196_vm12, %vm6197_vm13 }
 0x3ba   : > { %2123 = vmatpush1.bf16.msra.mxu1 %v2063_v5  ;;  %v10283_v5 = vld [vmem:[#allocation6 + $0x38] sm:$0xff]  }
 0x3bb   : > { %9021 = vmatprep.subr.bf16.mxu1 %v10256_v16 }
 0x41b   : > { %v1834_v6 = vpop.permute.xlu1 %1833 }
 0x41f   : > { %v1817_v7 = vpop.permute.xlu0 %1816  ;;  %v1836_v8 = vpop.permute.xlu1 %1835 }
 0x420   : > { %v1841_v9 = vsel %vm1820_vm6, %v12388_v35, %v1817_v7  ;;  %v1838_v10 = vsel %vm1837_vm7, %v1834_v6, %v1836_v8  ;;  %v10286_v8 = vld [vmem:[#allocation6 + $0x140] sm:$0xff]  }
 0x421   : > { %2097 = vmatprep.mubr.bf16.mxu0 %v1841_v9  ;;  %8534 = vmatprep.mubr.msk.bf16.mxu1 %vm2054_vm8, %v1838_v10  ;;  %v10288_v9 = vld [vmem:[#allocation6 + $0xf8] sm:$0xff]  }
 0x422   : > { %2098 = vmatmul.mubr.bf16.vlgmr.msra.gmra.mrb[0].mxu0 %v12380_v27  ;;  %v10289_v10 = vld [vmem:[#allocation6 + $0xb8] sm:$0xff]  }
 0x423   : > { %v1819_v11 = vpop.permute.xlu0 %1818  ;;  %9591 = vmatprep.mubr.msk.f32.mxu0 %vm11672_vm9, %v11673_v0 }
 0x424   : > { %v1821_v13 = vsel %vm1820_vm6, %v1817_v7, %v1819_v11  ;;  %v10285_v7 = vld [vmem:[#allocation6 + $0xb0] sm:$0xff]   ;;  %vm3298_vm6 = vsmask.f32 5376 }
 0x425   : > { %v1846_v14 = vsel %vm1837_vm7, %v1821_v13, %v1834_v6  ;;  %v10284_v6 = vld [vmem:[#allocation6 + $0xf0] sm:$0xff]   ;;  %vm12476_vm7 = vmand %vm3293_vm0, %vm3294_vm1  ;;  %vm7163_vm0 = vsmask.f32 3328 }
 0x426   : > { %2139 = vmatmul.mubr.bf16.vlgmr.msra.gmra.mrb[0].mxu1 %v1846_v14  ;;  %vm12481_vm8 = vmand %vm3297_vm5, %vm3298_vm6 }
 0x427   : > { %9022 = vmatpush3.bf16.msra.mxu1 %v10257_v17 }
 0x428   : > { %9023 = vmatprep.subr.bf16.mxu1 %v10258_v18 }
 0x42b   : > { %9024 = vmatpush3.bf16.msra.mxu1 %v10259_v19 }
 0x42c   : > { %9025 = vmatprep.subr.bf16.mxu1 %v10261_v20 }
 0x42f   : > { %9026 = vmatpush3.bf16.msra.mxu1 %v10263_v21 }
 0x430   : > { %9027 = vmatprep.subr.bf16.mxu1 %v10265_v22 }
 0x433   : > { %9028 = vmatpush3.bf16.msra.mxu1 %v10267_v23 }
 0x434   : > { %9029 = vmatprep.subr.bf16.mxu1 %v10269_v24  ;;  %v10501_v24 = vld [vmem:[#allocation31 + $0x18] sm:$0xff]  }
 0x437   : > { %9030 = vmatpush3.bf16.msra.mxu1 %v10271_v56  ;;  %v10302_v56 = vld [vmem:[#allocation6 + $0x178] sm:$0xff]  }
 0x438   : > { %9031 = vmatprep.subr.bf16.mxu1 %v10273_v58 }
 0x43b   : > { %9032 = vmatpush3.bf16.msra.mxu1 %v10275_v60  ;;  %v10305_v60 = vld [vmem:[#allocation9 + $0x40] sm:$0xff]  }
 0x43c   : > { %9033 = vmatprep.subr.bf16.mxu1 %v10277_v62  ;;  %v10308_v62 = vld [vmem:[#allocation9 + $0x48] sm:$0xff]  }
 0x43f   : > { %9034 = vmatpush3.bf16.msra.mxu1 %v10279_v1  ;;  %v10310_v1 = vld [vmem:[#allocation9 + $0x8] sm:$0xff]  }
 0x440   : > { %9035 = vmatprep.subr.bf16.mxu1 %v10281_v3  ;;  %v10311_v3 = vld [vmem:[#allocation9 + $0x50] sm:$0xff]  }
 0x443   : > { %9036 = vmatpush3.bf16.msra.mxu1 %v10283_v5  ;;  %v10313_v5 = vld [vmem:[#allocation9 + $0x10] sm:$0xff]  }
 0x444   : > { %9065 = vmatprep.subr.bf16.mxu1 %v10286_v8  ;;  %v10316_v8 = vld [vmem:[#allocation9 + $0x18] sm:$0xff]  }
 0x4f5   : > { %v9009_v26 = vpop.f32.mrb[0].mxu0 }
 0x4f6   : > { %v9010_v27 = vpop.f32.mrb[1].mxu0 }
 0x4f7   : > { %v9011_v29 = vadd.f32 %v9010_v27, %v9009_v26  ;;  %v9012_v30 = vpop.f32.mrb[2].mxu0 }
 0x4f8   : > { %v9013_v31 = vpop.f32.mrb[3].mxu0 }
 0x4f9   : > { %v9014_v33 = vadd.f32 %v9013_v31, %v9012_v30  ;;  %v2100_v34 = vadd.f32 %v9011_v29, %v8508_v28  ;;  %v2140_v35 = vpop.f32.mrb[0].mxu1 }
 0x4fa   : > { %v2142_v36 = vpop.f32.mrb[1].mxu1 }
 0x4fb   : > { %v2141_v37 = vadd.f32 %v2140_v35, %v2100_v34  ;;  %v2103_v38 = vadd.f32 %v9014_v33, %v8508_v28  ;;  %v2143_v39 = vpop.f32.mrb[2].mxu1  ;;  %v10290_v34 = vld [vmem:[#allocation6 + $0x148] sm:$0xff]  }
 0x4fc   : > { %v2145_v40 = vpop.f32.mrb[3].mxu1 }
 0x4fd   : > { %v2144_v43 = vadd.f32 %v2143_v39, %v2103_v38  ;;  %v2147_v44 = vmax.f32 %v2141_v37, 0.0  ;;  %v10291_v38 = vld [vmem:[#allocation6 + $0x108] sm:$0xff]  }
 0x4ff   : > { %v2148_v45 = vmax.f32 %v2144_v43, 0.0 }
 0x501   : > { %v9934_v47 = vpack.c.bf16 %v2148_v45, %v2147_v44  ;;  %v10293_v45 = vld [vmem:[#allocation6 + $0x110] sm:$0xff]  }
 0x503   : > { %9935 = vmatpush3.bf16.msra.mxu0 %v9934_v47 }
 0x504   : > { %9936 = vmatprep.subr.bf16.mxu0 %v11671_v15 }
 0x506   : > { %9592 = vmatmul.mubr.msk.f32.vlgmr.msra.gmra.mrb[4].mxu0 %vm2161_vm11, %v12410_v48 }
 0x507   : > { %9938 = vmatpush3.bf16.msra.mxu0 %v9934_v47  ;;  %9598 = vmatprep.mubr.msk.f32.mxu0 %vm11672_vm9, %v11673_v0  ;;  %v10295_v47 = vld [vmem:[#allocation6 + $0x118] sm:$0xff]  }
 0x508   : > { %9043 = vmatprep.subr.bf16.mxu0 %v10260_v49  ;;  %v10296_v49 = vld [vmem:[#allocation6 + $0x160] sm:$0xff]  }
 0x50a   : > { %9599 = vmatmul.mubr.msk.f32.vlgmr.msra.gmra.mrb[6].mxu0 %vm2161_vm11, %v12418_v50 }
 0x50b   : > { %9044 = vmatpush3.bf16.msra.mxu0 %v10262_v51  ;;  %v10297_v51 = vld [vmem:[#allocation6 + $0x120] sm:$0xff]  }
 0x50c   : > { %9045 = vmatprep.subr.bf16.mxu0 %v10264_v52  ;;  %v10298_v52 = vld [vmem:[#allocation6 + $0x168] sm:$0xff]  }
 0x50f   : > { %9046 = vmatpush3.bf16.msra.mxu0 %v10266_v53  ;;  %v10299_v53 = vld [vmem:[#allocation6 + $0x128] sm:$0xff]  }
 0x510   : > { %9047 = vmatprep.subr.bf16.mxu0 %v10268_v54  ;;  %v10300_v54 = vld [vmem:[#allocation6 + $0x170] sm:$0xff]  }
 0x513   : > { %9048 = vmatpush3.bf16.msra.mxu0 %v10270_v55  ;;  %v10301_v55 = vld [vmem:[#allocation6 + $0x130] sm:$0xff]  }
 0x514   : > { %9049 = vmatprep.subr.bf16.mxu0 %v10272_v57  ;;  %v10303_v57 = vld [vmem:[#allocation6 + $0x138] sm:$0xff]  }
 0x517   : > { %9050 = vmatpush3.bf16.msra.mxu0 %v10274_v59  ;;  %v10304_v59 = vld [vmem:[#allocation9 + $0x80] sm:$0xff]  }
 0x518   : > { %9051 = vmatprep.subr.bf16.mxu0 %v10276_v61  ;;  %v10307_v61 = vld [vmem:[#allocation9] sm:$0xff]  }
 0x51b   : > { %9052 = vmatpush3.bf16.msra.mxu0 %v10278_v63  ;;  %v10306_v63 = vld [vmem:[#allocation9 + $0x88] sm:$0xff]  }
 0x51c   : > { %9053 = vmatprep.subr.bf16.mxu0 %v10280_v2  ;;  %v10309_v2 = vld [vmem:[#allocation9 + $0x90] sm:$0xff]  }
 0x51f   : > { %9054 = vmatpush3.bf16.msra.mxu0 %v10282_v4  ;;  %v10312_v4 = vld [vmem:[#allocation9 + $0x98] sm:$0xff]  }
 0x520   : > { %9055 = vmatprep.subr.bf16.mxu0 %v10284_v6  ;;  %v10314_v6 = vld [vmem:[#allocation9 + $0x58] sm:$0xff]  }
 0x523   : > { %9056 = vmatpush3.bf16.msra.mxu0 %v10285_v7  ;;  %v10315_v7 = vld [vmem:[#allocation9 + $0xa0] sm:$0xff]  }
 0x524   : > { %9057 = vmatprep.subr.bf16.mxu0 %v10288_v9  ;;  %v10317_v9 = vld [vmem:[#allocation9 + $0x60] sm:$0xff]  }
 0x527   : > { %9058 = vmatpush3.bf16.msra.mxu0 %v10289_v10  ;;  %v10318_v10 = vld [vmem:[#allocation9 + $0xa8] sm:$0xff]  }
 0x528   : > { %9087 = vmatprep.subr.bf16.mxu0 %v10305_v60  ;;  %v10331_v60 = vld [vmem:[#allocation12 + $0x18] sm:$0xff]  }
 0x5d9   : > { %v2231_v11 = vpop.f32.mrb[4].mxu0 }
 0x5da   : > { %v2308_v13 = vpack.c.bf16 %v2231_v11, %v2231_v11  ;;  %v9593_v14 = vpop.f32.mrb[5].mxu0  ;;  %v10319_v11 = vld [vmem:[#allocation9 + $0x20] sm:$0xff]  }
 0x5db   : > { %v10321_v14 = vld [vmem:[#allocation9 + $0xb0] sm:$0xff]  }
 0x5dc   : > { %v2311_v16 = vshrl.u32 %v2308_v13, 16  ;;  %v2314_v19 = vshll.u32 %v2308_v13, 16  ;;  %v10320_v13 = vld [vmem:[#allocation9 + $0x68] sm:$0xff]  }
 0x5dd   : > { %v2304_v17 = vpop.f32.mrb[6].mxu0 }
 0x5de   : > { %v2313_v18 = vrot.slane %v2311_v16, 7  ;;  %v2309_v20 = vpack.c.bf16 %v2304_v17, %v2304_v17  ;;  %v9600_v21 = vpop.f32.mrb[7].mxu0  ;;  %v10322_v16 = vld [vmem:[#allocation9 + $0x28] sm:$0xff]   ;;  %v10323_v17 = vld [vmem:[#allocation9 + $0x70] sm:$0xff]  }
 0x5df   : > { %v10327_v21 = vld [vmem:[#allocation9 + $0x38] sm:$0xff]  }
 0x5e0   : > { %v2316_v22 = vor.u32 %v2314_v19, %v2313_v18  ;;  %v2318_v23 = vshrl.u32 %v2309_v20, 16  ;;  %v2321_v26 = vshll.u32 %v2309_v20, 16  ;;  %v10324_v18 = vld [vmem:[#allocation9 + $0xb8] sm:$0xff]   ;;  %v10325_v19 = vld [vmem:[#allocation9 + $0x30] sm:$0xff]  }
 0x5e1   : > { %v10326_v20 = vld [vmem:[#allocation9 + $0x78] sm:$0xff]  }
 0x5e2   : > { %v2320_v25 = vrot.slane %v2318_v23, 7  ;;  %v2326_v27 = vsel %vm12369_vm3, 0, %v2316_v22 }
 0x5e3   : > { %v2331_v28 = vsel %vm12422_vm15, %v2326_v27, 0 }
 0x5e4   : > { %v2323_v29 = vor.u32 %v2321_v26, %v2320_v25  ;;  %v2336_v30 = vshll.u32 %v2331_v28, 16  ;;  %v2334_v41 = vshrl.u32 %v2331_v28, 16  ;;  %v2351_v58 = vrot.slane %v2331_v28, 1 }
 0x5e6   : > { %v2327_v31 = vsel %vm12369_vm3, 0, %v2323_v29  ;;  %v2338_v37 = vrot.slane %v2336_v30, 1 }
 0x5e7   : > { %v2332_v33 = vsel %vm12422_vm15, %v2327_v31, 0 }
 0x5e8   : > { %2778 = vmatprep.mubr.bf16.mxu1 %v2332_v33  ;;  %v2352_v35 = vrot.slane %v2332_v33, 1  ;;  %v2343_v36 = vshll.u32 %v2332_v33, 16  ;;  %v2341_v39 = vshrl.u32 %v2332_v33, 16  ;;  %v2339_v44 = vor.u32 %v2338_v37, %v2334_v41 }
 0x5e9   : > { %2779 = vmatmul.mubr.bf16.vlgmr.msra.gmra.mrb[4].mxu1 %v2331_v28  ;;  %v8539_v28 = vld [vmem:[#allocation7] ss:$0 sm:$0xff] }
 0x5ea   : > { %9066 = vmatpush3.bf16.msra.mxu1 %v10287_v32  ;;  %2858 = vmatprep.mubr.bf16.mxu1 %v2352_v35  ;;  %v2345_v40 = vrot.slane %v2343_v36, 1 }
 0x5eb   : > { %9067 = vmatprep.subr.bf16.mxu1 %v10290_v34 }
 0x5ec   : > { %v2346_v43 = vor.u32 %v2345_v40, %v2341_v39 }
 0x5ee   : > { %9068 = vmatpush3.bf16.msra.mxu1 %v10291_v38  ;;  %2818 = vmatprep.mubr.bf16.mxu0 %v2346_v43 }
 0x5ef   : > { %2819 = vmatmul.mubr.bf16.vlgmr.msra.gmra.mrb[8].mxu0 %v2339_v44  ;;  %9069 = vmatprep.subr.bf16.mxu1 %v10292_v42 }
 0x5f0   : > { %9088 = vmatpush3.bf16.msra.mxu0 %v10307_v61  ;;  %v10332_v61 = vld [vmem:[#allocation12 + $0x20] sm:$0xff]  }
 0x5f1   : > { %9089 = vmatprep.subr.bf16.mxu0 %v10308_v62  ;;  %v10333_v62 = vld [vmem:[#allocation12 + $0x28] sm:$0xff]  }
 0x5f2   : > { %9070 = vmatpush3.bf16.msra.mxu1 %v10293_v45 }
 0x5f3   : > { %9071 = vmatprep.subr.bf16.mxu1 %v10294_v46 }
 0x5f4   : > { %9090 = vmatpush3.bf16.msra.mxu0 %v10310_v1  ;;  %v10335_v1 = vld [vmem:[#allocation12 + $0x38] sm:$0xff]  }
 0x5f5   : > { %9091 = vmatprep.subr.bf16.mxu0 %v10311_v3  ;;  %v10339_v3 = vld [vmem:[#allocation15] sm:$0xff]  }
 0x5f6   : > { %9072 = vmatpush3.bf16.msra.mxu1 %v10295_v47 }
 0x5f7   : > { %9073 = vmatprep.subr.bf16.mxu1 %v10296_v49 }
 0x5f8   : > { %9092 = vmatpush3.bf16.msra.mxu0 %v10313_v5  ;;  %v10342_v5 = vld [vmem:[#allocation15 + $0x8] sm:$0xff]  }
 0x5f9   : > { %9093 = vmatprep.subr.bf16.mxu0 %v10314_v6 }
 0x5fa   : > { %9074 = vmatpush3.bf16.msra.mxu1 %v10297_v51 }
 0x5fb   : > { %9075 = vmatprep.subr.bf16.mxu1 %v10298_v52 }
 0x5fc   : > { %9094 = vmatpush3.bf16.msra.mxu0 %v10316_v8 }
 0x5fd   : > { %9095 = vmatprep.subr.bf16.mxu0 %v10317_v9 }
 0x5fe   : > { %9076 = vmatpush3.bf16.msra.mxu1 %v10299_v53 }
 0x5ff   : > { %9077 = vmatprep.subr.bf16.mxu1 %v10300_v54 }
 0x600   : > { %9096 = vmatpush3.bf16.msra.mxu0 %v10319_v11  ;;  %v8588_v11 = vld [vmem:[#allocation10] ss:$0 sm:$0xff] }
 0x601   : > { %9097 = vmatprep.subr.bf16.mxu0 %v10320_v13 }
 0x602   : > { %9078 = vmatpush3.bf16.msra.mxu1 %v10301_v55 }
 0x603   : > { %9079 = vmatprep.subr.bf16.mxu1 %v10302_v56 }
 0x604   : > { %9098 = vmatpush3.bf16.msra.mxu0 %v10322_v16 }
 0x605   : > { %9099 = vmatprep.subr.bf16.mxu0 %v10323_v17 }
 0x606   : > { %9080 = vmatpush3.bf16.msra.mxu1 %v10303_v57  ;;  %v10328_v57 = vld [vmem:[#allocation12] sm:$0xff]  }
 0x607   : > { %9601 = vmatprep.subr.bf16.mxu1 %v11673_v0 }
 0x608   : > { %9100 = vmatpush3.bf16.msra.mxu0 %v10325_v19 }
 0x609   : > { %2859 = vmatmul.mubr.bf16.vlgmr.msra.gmra.mrb[8].mxu1 %v2351_v58  ;;  %9101 = vmatprep.subr.bf16.mxu0 %v10326_v20  ;;  %v10329_v58 = vld [vmem:[#allocation12 + $0x8] sm:$0xff]  }
 0x60a   : > { %9617 = vmatprep.mubr.msk.bf16.mxu1 %vm11672_vm9, %v11673_v0  ;;  %9602 = vmatpush3.bf16.msra.mxu1 %v10304_v59  ;;  %v10330_v59 = vld [vmem:[#allocation12 + $0x10] sm:$0xff]  }
 0x60b   : > { %9603 = vmatprep.subr.bf16.mxu1 %v11673_v0 }
 0x60c   : > { %9102 = vmatpush3.bf16.msra.mxu0 %v10327_v21  ;;  %v10336_v21 = vld [vmem:[#allocation15 + $0x80] sm:$0xff]  }
 0x60d   : > { %9621 = vmatprep.subr.bf16.mxu0 %v11673_v0 }
 0x60e   : > { %9604 = vmatpush3.bf16.msra.mxu1 %v10306_v63  ;;  %v10334_v63 = vld [vmem:[#allocation12 + $0x30] sm:$0xff]  }
 0x60f   : > { %9605 = vmatprep.subr.bf16.mxu1 %v11673_v0 }
 0x612   : > { %9606 = vmatpush3.bf16.msra.mxu1 %v10309_v2  ;;  %v10337_v2 = vld [vmem:[#allocation15 + $0x40] sm:$0xff]  }
 0x613   : > { %9607 = vmatprep.subr.bf16.mxu1 %v11673_v0 }
 0x616   : > { %9608 = vmatpush3.bf16.msra.mxu1 %v10312_v4  ;;  %v10340_v4 = vld [vmem:[#allocation15 + $0x48] sm:$0xff]  }
 0x617   : > { %9609 = vmatprep.subr.bf16.mxu1 %v11673_v0 }
 0x61a   : > { %9610 = vmatpush3.bf16.msra.mxu1 %v10315_v7 }
 0x61b   : > { %9611 = vmatprep.subr.bf16.mxu1 %v11673_v0 }
 0x61e   : > { %9612 = vmatpush3.bf16.msra.mxu1 %v10318_v10 }
 0x61f   : > { %9613 = vmatprep.subr.bf16.mxu1 %v11673_v0 }
 0x622   : > { %9614 = vmatpush3.bf16.msra.mxu1 %v10321_v14 }
 0x623   : > { %9615 = vmatprep.subr.bf16.mxu1 %v11673_v0 }
 0x626   : > { %9616 = vmatpush3.bf16.msra.mxu1 %v10324_v18 }
 0x627   : > { %9127 = vmatprep.subr.bf16.mxu1 %v10337_v2 }
 0x6bc   : > { %v9037_v22 = vpop.f32.mrb[4].mxu1 }
 0x6bd   : > { %v9038_v23 = vpop.f32.mrb[5].mxu1 }
 0x6be   : > { %v9039_v25 = vadd.f32 %v9038_v23, %v9037_v22  ;;  %v9040_v26 = vpop.f32.mrb[6].mxu1  ;;  %v10338_v23 = vld [vmem:[#allocation15 + $0x88] sm:$0xff]  }
 0x6bf   : > { %v9041_v27 = vpop.f32.mrb[7].mxu1  ;;  %v10343_v26 = vld [vmem:[#allocation15 + $0x50] sm:$0xff]  }
 0x6c0   : > { %v2781_v31 = vadd.f32 %v9039_v25, %v8539_v28  ;;  %v10341_v25 = vld [vmem:[#allocation15 + $0x90] sm:$0xff]   ;;  %v10344_v27 = vld [vmem:[#allocation15 + $0x98] sm:$0xff]  }
 0x6c1   : > { %v10345_v28 = vld [vmem:[#allocation15 + $0x10] sm:$0xff]  }
 0x6c2   : > { %v9059_v29 = vpop.f32.mrb[8].mxu0 }
 0x6c3   : > { %v9060_v30 = vpop.f32.mrb[9].mxu0 }
 0x6c4   : > { %v9061_v32 = vadd.f32 %v9060_v30, %v9059_v29  ;;  %v9062_v33 = vpop.f32.mrb[10].mxu0  ;;  %v10346_v29 = vld [vmem:[#allocation15 + $0x58] sm:$0xff]   ;;  %v10347_v30 = vld [vmem:[#allocation15 + $0xa0] sm:$0xff]  }
 0x6c5   : > { %v9063_v34 = vpop.f32.mrb[11].mxu0  ;;  %v10350_v33 = vld [vmem:[#allocation15 + $0xa8] sm:$0xff]  }
 0x6c6   : > { %v2821_v35 = vadd.f32 %v9061_v32, %v2781_v31  ;;  %v10348_v31 = vld [vmem:[#allocation15 + $0x18] sm:$0xff]   ;;  %v10349_v32 = vld [vmem:[#allocation15 + $0x60] sm:$0xff]  }
 0x6c7   : > { %v10351_v34 = vld [vmem:[#allocation15 + $0x20] sm:$0xff]  }
 0x6dc   : > { %v9081_v36 = vpop.f32.mrb[8].mxu1 }
 0x6dd   : > { %v9082_v37 = vpop.f32.mrb[9].mxu1 }
 0x6de   : > { %v9083_v38 = vadd.f32 %v9082_v37, %v9081_v36  ;;  %v9084_v39 = vpop.f32.mrb[10].mxu1  ;;  %v10353_v36 = vld [vmem:[#allocation15 + $0xb0] sm:$0xff]   ;;  %v10354_v37 = vld [vmem:[#allocation15 + $0x28] sm:$0xff]  }
 0x6df   : > { %v9085_v40 = vpop.f32.mrb[11].mxu1  ;;  %v10356_v39 = vld [vmem:[#allocation15 + $0xb8] sm:$0xff]  }
 0x6e0   : > { %v12445_v41 = vadd.f32 %v9083_v38, %v2821_v35  ;;  %v10352_v35 = vld [vmem:[#allocation15 + $0x68] sm:$0xff]   ;;  %v10355_v38 = vld [vmem:[#allocation15 + $0x70] sm:$0xff]  }
 0x6e1   : > { %v10357_v40 = vld [vmem:[#allocation15 + $0x30] sm:$0xff]  }
 0x6e2   : > { %v2866_v42 = vmax.f32 %v12445_v41, 0.0 }
 0x6e4   : > { %v2867_v43 = vpack.c.bf16 %v2866_v42, %v2866_v42  ;;  %v10358_v42 = vld [vmem:[#allocation15 + $0x78] sm:$0xff]  }
 0x6e6   : > { %v2869_v44 = vshrl.u32 %v2867_v43, 16  ;;  %v2872_v46 = vshll.u32 %v2867_v43, 16  ;;  %v10359_v43 = vld [vmem:[#allocation15 + $0x38] sm:$0xff]  }
 0x6e8   : > { %v2871_v45 = vrot.slane %v2869_v44, 7  ;;  %v8613_v44 = vld [vmem:[#allocation13] ss:$0 sm:$0xff] }
 0x6ea   : > { %v2874_v47 = vor.u32 %v2872_v46, %v2871_v45 }
 0x6ec   : > { %v2876_v49 = vsel %vm12369_vm3, 0, %v2874_v47 }
 0x6ed   : > { %v2877_v51 = vsel %vm12422_vm15, %v2876_v49, 0 }
 0x6ee   : > { %v2887_v52 = vrot.slane %v2877_v51, 1  ;;  %v2881_v53 = vshll.u32 %v2877_v51, 16  ;;  %v2879_v54 = vshrl.u32 %v2877_v51, 16 }
 0x6f0   : > { %9618 = vmatmul.mubr.bf16.vlgmr.msra.gmra.mrb[12].mxu1 %v2887_v52  ;;  %v2883_v55 = vrot.slane %v2881_v53, 1 }
 0x6f1   : > { %9128 = vmatpush3.bf16.msra.mxu1 %v10339_v3 }
 0x6f2   : > { %v2884_v56 = vor.u32 %v2883_v55, %v2879_v54  ;;  %9129 = vmatprep.subr.bf16.mxu1 %v10340_v4 }
 0x6f4   : > { %3120 = vmatprep.mubr.bf16.mxu0 %v2884_v56 }
 0x6f5   : > { %3121 = vmatmul.mubr.bf16.vlgmr.msra.gmra.mrb[12].mxu0 %v2877_v51  ;;  %9130 = vmatpush3.bf16.msra.mxu1 %v10342_v5 }
 0x6f6   : > { %9622 = vmatpush3.bf16.msra.mxu0 %v10328_v57  ;;  %9637 = vmatprep.mubr.msk.bf16.mxu0 %vm11672_vm9, %v11673_v0 }
 0x6f7   : > { %9623 = vmatprep.subr.bf16.mxu0 %v11673_v0  ;;  %9131 = vmatprep.subr.bf16.mxu1 %v10343_v26 }
 0x6f9   : > { %9132 = vmatpush3.bf16.msra.mxu1 %v10345_v28  ;;  %v10371_v28 = vld [vmem:[#allocation21] sm:$0xff]  }
 0x6fa   : > { %9624 = vmatpush3.bf16.msra.mxu0 %v10329_v58  ;;  %9133 = vmatprep.subr.bf16.mxu1 %v10346_v29 }
 0x6fb   : > { %9625 = vmatprep.subr.bf16.mxu0 %v11673_v0 }
 0x6fd   : > { %9134 = vmatpush3.bf16.msra.mxu1 %v10348_v31 }
 0x6fe   : > { %9626 = vmatpush3.bf16.msra.mxu0 %v10330_v59  ;;  %9135 = vmatprep.subr.bf16.mxu1 %v10349_v32  ;;  %v10644_v59 = vld [vmem:[#allocation48 + $0x10] sm:$0xff]  }
 0x6ff   : > { %9627 = vmatprep.subr.bf16.mxu0 %v11673_v0 }
 0x701   : > { %9136 = vmatpush3.bf16.msra.mxu1 %v10351_v34 }
 0x702   : > { %9628 = vmatpush3.bf16.msra.mxu0 %v10331_v60  ;;  %9137 = vmatprep.subr.bf16.mxu1 %v10352_v35 }
 0x703   : > { %9629 = vmatprep.subr.bf16.mxu0 %v11673_v0 }
 0x705   : > { %9138 = vmatpush3.bf16.msra.mxu1 %v10354_v37  ;;  %v10374_v37 = vld [vmem:[#allocation21 + $0x8] sm:$0xff]  }
 0x706   : > { %9630 = vmatpush3.bf16.msra.mxu0 %v10332_v61  ;;  %9139 = vmatprep.subr.bf16.mxu1 %v10355_v38 }
 0x707   : > { %9631 = vmatprep.subr.bf16.mxu0 %v11673_v0 }
 0x709   : > { %9140 = vmatpush3.bf16.msra.mxu1 %v10357_v40  ;;  %v10375_v40 = vld [vmem:[#allocation21 + $0x50] sm:$0xff]  }
 0x70a   : > { %9632 = vmatpush3.bf16.msra.mxu0 %v10333_v62  ;;  %9141 = vmatprep.subr.bf16.mxu1 %v10358_v42 }
 0x70b   : > { %9633 = vmatprep.subr.bf16.mxu0 %v11673_v0 }
 0x70d   : > { %9142 = vmatpush3.bf16.msra.mxu1 %v10359_v43 }
 0x70e   : > { %9634 = vmatpush3.bf16.msra.mxu0 %v10334_v63  ;;  %9661 = vmatprep.subr.bf16.mxu1 %v11673_v0 }
 0x70f   : > { %9635 = vmatprep.subr.bf16.mxu0 %v11673_v0 }
 0x712   : > { %9636 = vmatpush3.bf16.msra.mxu0 %v10335_v1 }
 0x713   : > { %9641 = vmatprep.subr.bf16.mxu0 %v11673_v0 }
 0x7c3   : > { %v3162_v6 = vpop.f32.mrb[12].mxu1 }
 0x7c4   : > { %v9619_v7 = vpop.f32.mrb[13].mxu1 }
 0x7c5   : > { %v3165_v8 = vpop.f32.mrb[14].mxu1  ;;  %v10361_v7 = vld [vmem:[#allocation18 + $0x8] sm:$0xff]  }
 0x7c6   : > { %v9620_v9 = vpop.f32.mrb[15].mxu1  ;;  %v10362_v8 = vld [vmem:[#allocation18 + $0x10] sm:$0xff]  }
 0x7c7   : > { %v10363_v9 = vld [vmem:[#allocation18 + $0x18] sm:$0xff]  }
 0x7c8   : > { %v9103_v10 = vpop.f32.mrb[12].mxu0 }
 0x7c9   : > { %v9104_v13 = vpop.f32.mrb[13].mxu0 }
 0x7ca   : > { %v9105_v14 = vadd.f32 %v9104_v13, %v9103_v10  ;;  %v9106_v16 = vpop.f32.mrb[14].mxu0  ;;  %v10364_v10 = vld [vmem:[#allocation18 + $0x20] sm:$0xff]   ;;  %v10366_v13 = vld [vmem:[#allocation18 + $0x30] sm:$0xff]  }
 0x7cb   : > { %v9107_v17 = vpop.f32.mrb[15].mxu0  ;;  %v4008_v16 = vld [vmem:[%s1750_s2 + $0x8] sm:$0xff] }
 0x7cc   : > { %v3123_v18 = vadd.f32 %v9105_v14, %v8588_v11  ;;  %v10365_v11 = vld [vmem:[#allocation18 + $0x28] sm:$0xff]   ;;  %v10367_v14 = vld [vmem:[#allocation18 + $0x38] sm:$0xff]  }
 0x7cd   : > { %v4010_v17 = vld [vmem:[%s1750_s2 + $0x18] sm:$0xff] }
 0x7ce   : > { %v3163_v19 = vadd.f32 %v3162_v6, %v3123_v18  ;;  %v10360_v6 = vld [vmem:[#allocation18] sm:$0xff]   ;;  %v4007_v18 = vld [vmem:[%s1750_s2] sm:$0xff] }
 0x7d0   : > { %v3168_v20 = vmax.f32 %v3163_v19, 0.0  ;;  %v4012_v19 = vpack.c.bf16 %v4010_v17, %v4008_v16 }
 0x7d2   : > { %v3169_v22 = vpack.c.bf16 %v3168_v20, %v3168_v20  ;;  %v4009_v20 = vld [vmem:[%s1750_s2 + $0x10] sm:$0xff]  ;;  %s12967_s2 = sld [smem:[#allocation94_spill]] }
 0x7d4   : > { %9638 = vmatmul.mubr.bf16.vlgmr.msra.gmra.mrb[16].mxu0 %v3169_v22  ;;  %v4011_v22 = vpack.c.bf16 %v4009_v20, %v4007_v18  ;;  %v10368_v18 = vld [vmem:[#allocation21 + $0x80] sm:$0xff]   ;;  %v10370_v20 = vld [vmem:[#allocation21 + $0x88] sm:$0xff]  }
 0x7d5   : > { %9642 = vmatpush3.bf16.msra.mxu0 %v10336_v21  ;;  %9657 = vmatprep.mubr.msk.bf16.mxu0 %vm11672_vm9, %v11673_v0  ;;  %v10369_v21 = vld [vmem:[#allocation21 + $0x40] sm:$0xff]  }
 0x7d6   : > { %9643 = vmatprep.subr.bf16.mxu0 %v11673_v0  ;;  %v4014_v26 = vshrl.u32 %v4011_v22, 16 }
 0x7d8   : > { %v4016_v31 = vrot.slane %v4014_v26, 7  ;;  %v10380_v26 = vld [vmem:[#allocation21 + $0x18] sm:$0xff]  }
 0x7d9   : > { %9644 = vmatpush3.bf16.msra.mxu0 %v10338_v23  ;;  %v4021_v23 = vshrl.u32 %v4012_v19, 16 }
 0x7da   : > { %9645 = vmatprep.subr.bf16.mxu0 %v11673_v0 }
 0x7db   : > { %v4023_v29 = vrot.slane %v4021_v23, 7  ;;  %v10378_v23 = vld [vmem:[#allocation21 + $0x58] sm:$0xff]  }
 0x7dd   : > { %9646 = vmatpush3.bf16.msra.mxu0 %v10341_v25  ;;  %v4024_v25 = vshll.u32 %v4012_v19, 16 }
 0x7de   : > { %9647 = vmatprep.subr.bf16.mxu0 %v11673_v0 }
 0x7df   : > { %v4026_v32 = vor.u32 %v4024_v25, %v4023_v29  ;;  %v10379_v25 = vld [vmem:[#allocation21 + $0xa0] sm:$0xff]  }
 0x7e1   : > { %9648 = vmatpush3.bf16.msra.mxu0 %v10344_v27  ;;  %v4017_v27 = vshll.u32 %v4011_v22, 16  ;;  %v12508_v38 = vsel %vm12369_vm3, 0, %v4026_v32  ;;  %v10376_v22 = vld [vmem:[#allocation21 + $0x98] sm:$0xff]   ;;  %v10386_v32 = vld [vmem:[#allocation21 + $0x28] sm:$0xff]  }
 0x7e2   : > { %9649 = vmatprep.subr.bf16.mxu0 %v11673_v0  ;;  %v4048_v42 = vshrl.u32 %v12508_v38, 16  ;;  %v4050_v43 = vshll.u32 %v12508_v38, 16 }
 0x7e3   : > { %v4019_v35 = vor.u32 %v4017_v27, %v4016_v31  ;;  %v10381_v27 = vld [vmem:[#allocation21 + $0x60] sm:$0xff]  }
 0x7e5   : > { %9650 = vmatpush3.bf16.msra.mxu0 %v10347_v30  ;;  %v10372_v30 = vld [vmem:[#allocation21 + $0x48] sm:$0xff]  }
 0x7e6   : > { %9651 = vmatprep.subr.bf16.mxu0 %v11673_v0 }
 0x7e9   : > { %9652 = vmatpush3.bf16.msra.mxu0 %v10350_v33  ;;  %v4034_v33 = vsel %vm12369_vm3, %v4023_v29, 0  ;;  %v10383_v29 = vld [vmem:[#allocation21 + $0x20] sm:$0xff]  }
 0x7ea   : > { %9653 = vmatprep.subr.bf16.mxu0 %v11673_v0  ;;  %v4055_v34 = vshll.u32 %v4034_v33, 16 }
 0x7ed   : > { %9654 = vmatpush3.bf16.msra.mxu0 %v10353_v36  ;;  %v4033_v36 = vsel %vm12369_vm3, %v4016_v31, 0  ;;  %v10385_v31 = vld [vmem:[#allocation21 + $0xb0] sm:$0xff]  }
 0x7ee   : > { %9655 = vmatprep.subr.bf16.mxu0 %v11673_v0 }
 0x7f1   : > { %9656 = vmatpush3.bf16.msra.mxu0 %v10356_v39  ;;  %v4043_v39 = vshll.u32 %v4033_v36, 16 }
 0x7f2   : > { %9167 = vmatprep.subr.bf16.mxu0 %v10369_v21  ;;  %v10373_v21 = vld [vmem:[#allocation21 + $0x90] sm:$0xff]  }
 0x8a7   : > { %v3275_v45 = vpop.f32.mrb[16].mxu0 }
 0x8a8   : > { %v3276_v46 = vadd.f32 %v8613_v44, %v3275_v45  ;;  %v9639_v47 = vpop.f32.mrb[17].mxu0  ;;  %v12514_v44 = vsel %vm12369_vm3, 0, %v4019_v35  ;;  %v10389_v35 = vld [vmem:[#allocation21 + $0x30] sm:$0xff]  }
 0x8a9   : > { %v3278_v49 = vpop.f32.mrb[18].mxu0  ;;  %v4036_v45 = vshrl.u32 %v12514_v44, 16  ;;  %v4052_v47 = vrot.slane %v4050_v43, 1 }
 0x8aa   : > { %v12473_v51 = vadd.f32 %v3276_v46, %v12445_v41  ;;  %v9640_v52 = vpop.f32.mrb[19].mxu0  ;;  %v4038_v46 = vshll.u32 %v12514_v44, 16  ;;  %v4057_v49 = vrot.slane %v4055_v34, 1  ;;  %v10388_v34 = vld [vmem:[#allocation21 + $0xb8] sm:$0xff]   ;;  %v10532_v41 = vld [vmem:[#allocation37 + $0x10] sm:$0xff]  }
 0x8ab   : > { %v10377_v52 = vld [vmem:[#allocation21 + $0x10] sm:$0xff]  }
 0x8ac   : > { %v3282_v53 = vmax.f32 %v12473_v51, 0.0 }
 0x8ae   : > { %v3283_v54 = vpack.c.bf16 %v3282_v53, %v3282_v53  ;;  %v4040_v53 = vrot.slane %v4038_v46, 1 }
 0x8b0   : > { %v3285_v55 = vshrl.u32 %v3283_v54, 16  ;;  %v3288_v56 = vshll.u32 %v3283_v54, 16  ;;  %v4045_v54 = vrot.slane %v4043_v39, 1  ;;  %v10393_v39 = vld [vmem:[#allocation21 + $0x38] sm:$0xff]  }
 0x8b2   : > { %v3287_v57 = vrot.slane %v3285_v55, 6  ;;  %v3290_v58 = vrot.slane %v3288_v56, 7  ;;  %v4053_v55 = vor.u32 %v4052_v47, %v4048_v42  ;;  %v4072_v56 = vrot.slane %v12508_v38, 1  ;;  %v8647_v42 = vld [vmem:[#allocation19] ss:$0 sm:$0xff] }
 0x8b4   : > { %v3291_v60 = vor.u32 %v3290_v58, %v3287_v57  ;;  %v4073_v57 = vrot.slane %v4034_v33, 1  ;;  %v4041_v58 = vor.u32 %v4040_v53, %v4036_v45  ;;  %v10387_v33 = vld [vmem:[#allocation21 + $0x70] sm:$0xff]  }
 0x8b6   : > { %v3296_v61 = vsel %vm12476_vm7, 0, %v3291_v60  ;;  %v4069_v60 = vrot.slane %v12514_v44, 1 }
 0x8b7   : > { %v3300_v62 = vsel %vm12481_vm8, %v3296_v61, 0  ;;  %v4070_v61 = vrot.slane %v4033_v36, 1  ;;  %v10390_v36 = vld [vmem:[#allocation24 + $0xc0] sm:$0xff]  }
 0x8b8   : > { %v3311_v63 = vrot.slane %v3300_v62, 3  ;;  %v3302_v1 = vshrl.u32 %v3300_v62, 16  ;;  %v3305_v2 = vshll.u32 %v3300_v62, 16 }
 0x8ba   : > { %9658 = vmatmul.mubr.bf16.vlgmr.msra.gmra.mrb[20].mxu0 %v3311_v63  ;;  %v3304_v3 = vrot.slane %v3302_v1, 1  ;;  %v3307_v4 = vrot.slane %v3305_v2, 2  ;;  %v4046_v63 = vsel %vm1791_vm4, %v4041_v58, %v4045_v54  ;;  %v4074_v1 = vsel %vm1826_vm2, %v4072_v56, %v4073_v57 }
 0x8bb   : > { %9168 = vmatpush3.bf16.msra.mxu0 %v10371_v28  ;;  %4059 = vrot.lane.b32.xlu0 %v4046_v63, %s11674_s11  ;;  %v4071_v2 = vsel %vm1826_vm2, %v4069_v60, %v4070_v61  ;;  %v10382_v28 = vld [vmem:[#allocation21 + $0xa8] sm:$0xff]   ;;  %vm4079_vm2 = vcmask 850944  }
 0x8bc   : > { %v3308_v5 = vor.u32 %v3307_v4, %v3304_v3  ;;  %9169 = vmatprep.subr.bf16.mxu0 %v10372_v30  ;;  %v10384_v30 = vld [vmem:[#allocation21 + $0x68] sm:$0xff]  }
 0x8be   : > { %3544 = vmatprep.mubr.bf16.mxu1 %v3308_v5 }
 0x8bf   : > { %3545 = vmatmul.mubr.bf16.vlgmr.msra.gmra.mrb[16].mxu1 %v3300_v62  ;;  %9170 = vmatpush3.bf16.msra.mxu0 %v10374_v37  ;;  %v4058_v62 = vsel %vm1791_vm4, %v4053_v55, %v4057_v49  ;;  %v10391_v37 = vld [vmem:[#allocation21 + $0x78] sm:$0xff]   ;;  %vm4063_vm4 = vcmask 424960  }
 0x8c0   : > { %9662 = vmatpush3.bf16.msra.mxu1 %v10360_v6  ;;  %9677 = vmatprep.mubr.msk.bf16.mxu1 %vm11672_vm9, %v11673_v0 }
 0x8c1   : > { %9663 = vmatprep.subr.bf16.mxu1 %v11673_v0  ;;  %9171 = vmatprep.subr.bf16.mxu0 %v10375_v40  ;;  %v10395_v40 = vld [vmem:[#allocation24 + $0x40] sm:$0xff]  }
 0x8c2   : > { %4061 = vrot.lane.b32.xlu1 %v4058_v62, %s11674_s11  ;;  %4075 = vrot.lane.b32.xlu0 %v4071_v2, %s11675_s23  ;;  %s12968_s11 = sld [smem:[#allocation96_spill]] }
 0x8c3   : > { %9172 = vmatpush3.bf16.msra.mxu0 %v10377_v52 }
 0x8c4   : > { %9664 = vmatpush3.bf16.msra.mxu1 %v10361_v7  ;;  %9173 = vmatprep.subr.bf16.mxu0 %v10378_v23  ;;  %v10407_v23 = vld [vmem:[#allocation24 + $0x58] sm:$0xff]  }
 0x8c5   : > { %9665 = vmatprep.subr.bf16.mxu1 %v11673_v0 }
 0x8c6   : > { %4077 = vrot.lane.b32.xlu1 %v4074_v1, %s11675_s23  ;;  %v10392_v1 = vld [vmem:[#allocation24 + $0x80] sm:$0xff]   ;;  %s12969_s23 = sld [smem:[#allocation98_spill]] }
 0x8c7   : > { %9174 = vmatpush3.bf16.msra.mxu0 %v10380_v26  ;;  %v10410_v26 = vld [vmem:[#allocation24 + $0xe8] sm:$0xff]  }
 0x8c8   : > { %9666 = vmatpush3.bf16.msra.mxu1 %v10362_v8  ;;  %v8622_v8 = vld [vmem:[#allocation16] ss:$0 sm:$0xff]  ;;  %9175 = vmatprep.subr.bf16.mxu0 %v10381_v27  ;;  %v10411_v27 = vld [vmem:[#allocation24 + $0x60] sm:$0xff]  }
 0x8c9   : > { %9667 = vmatprep.subr.bf16.mxu1 %v11673_v0 }
 0x8cb   : > { %9176 = vmatpush3.bf16.msra.mxu0 %v10383_v29  ;;  %v10413_v29 = vld [vmem:[#allocation24 + $0x20] sm:$0xff]  }
 0x8cc   : > { %9668 = vmatpush3.bf16.msra.mxu1 %v10363_v9  ;;  %9177 = vmatprep.subr.bf16.mxu0 %v10384_v30  ;;  %v10414_v30 = vld [vmem:[#allocation24 + $0xf0] sm:$0xff]  }
 0x8cd   : > { %9669 = vmatprep.subr.bf16.mxu1 %v11673_v0 }
 0x8cf   : > { %9178 = vmatpush3.bf16.msra.mxu0 %v10386_v32  ;;  %v10416_v32 = vld [vmem:[#allocation24 + $0xb0] sm:$0xff]  }
 0x8d0   : > { %9670 = vmatpush3.bf16.msra.mxu1 %v10364_v10  ;;  %9179 = vmatprep.subr.bf16.mxu0 %v10387_v33  ;;  %v10417_v33 = vld [vmem:[#allocation24 + $0x28] sm:$0xff]  }
 0x8d1   : > { %9671 = vmatprep.subr.bf16.mxu1 %v11673_v0 }
 0x8d3   : > { %9180 = vmatpush3.bf16.msra.mxu0 %v10389_v35  ;;  %v10419_v35 = vld [vmem:[#allocation24 + $0x70] sm:$0xff]  }
 0x8d4   : > { %9672 = vmatpush3.bf16.msra.mxu1 %v10365_v11  ;;  %9181 = vmatprep.subr.bf16.mxu0 %v10391_v37 }
 0x8d5   : > { %9673 = vmatprep.subr.bf16.mxu1 %v11673_v0 }
 0x8d7   : > { %9182 = vmatpush3.bf16.msra.mxu0 %v10393_v39  ;;  %v10421_v39 = vld [vmem:[#allocation24 + $0x30] sm:$0xff]  }
 0x8d8   : > { %9674 = vmatpush3.bf16.msra.mxu1 %v10366_v13  ;;  %9198 = vmatprep.subr.bf16.mxu0 %v10395_v40  ;;  %v10422_v40 = vld [vmem:[#allocation24 + $0x78] sm:$0xff]  }
 0x8d9   : > { %9675 = vmatprep.subr.bf16.mxu1 %v11673_v0 }
 0x8dc   : > { %9676 = vmatpush3.bf16.msra.mxu1 %v10367_v14 }
 0x8dd   : > { %9681 = vmatprep.subr.bf16.mxu1 %v11673_v0 }
 0x92d   : > { %v12536_v55 = vpop.permute.xlu0 %4059 }
 0x934   : > { %v12534_v54 = vpop.permute.xlu1 %4061  ;;  %v12540_v62 = vpop.permute.xlu0 %4075 }
 0x935   : > { %v4064_v37 = vsel %vm4063_vm4, %v12536_v55, %v12534_v54  ;;  %v10436_v54 = vld [vmem:[%s12962_s10 + $0x88] sm:$0xff]  }
 0x938   : > { %v12538_v61 = vpop.permute.xlu1 %4077 }
 0x98d   : > { %v3586_v3 = vpop.f32.mrb[20].mxu0 }
 0x98e   : > { %v9659_v4 = vpop.f32.mrb[21].mxu0 }
 0x98f   : > { %v3589_v5 = vpop.f32.mrb[22].mxu0 }
 0x990   : > { %v9660_v6 = vpop.f32.mrb[23].mxu0  ;;  %v4080_v5 = vsel %vm4079_vm2, %v12540_v62, %v12538_v61 }
 0x992   : > { %v9143_v7 = vpop.f32.mrb[16].mxu1 }
 0x993   : > { %v9144_v9 = vpop.f32.mrb[17].mxu1 }
 0x994   : > { %v9145_v10 = vadd.f32 %v9144_v9, %v9143_v7  ;;  %v9146_v11 = vpop.f32.mrb[18].mxu1 }
 0x995   : > { %v9147_v13 = vpop.f32.mrb[19].mxu1  ;;  %v10398_v11 = vld [vmem:[#allocation24 + $0xd0] sm:$0xff]  }
 0x996   : > { %v3547_v14 = vadd.f32 %v9145_v10, %v8622_v8  ;;  %v10396_v8 = vld [vmem:[#allocation24 + $0x88] sm:$0xff]   ;;  %v10397_v10 = vld [vmem:[#allocation24] sm:$0xff]  }
 0x997   : > { %v10399_v13 = vld [vmem:[#allocation24 + $0x48] sm:$0xff]  }
 0x998   : > { %v3587_v16 = vadd.f32 %v3586_v3, %v3547_v14  ;;  %v10394_v3 = vld [vmem:[#allocation24 + $0xc8] sm:$0xff]   ;;  %v4084_v14 = vsel %vm4063_vm4, %v12508_v38, %v12536_v55  ;;  %v10408_v38 = vld [vmem:[#allocation24 + $0xa0] sm:$0xff]  }
 0x999   : > { %v10438_v55 = vld [vmem:[%s12962_s10 + $0xd0] sm:$0xff]  }
 0x99a   : > { %v3592_v17 = vmax.f32 %v3587_v16, 0.0  ;;  %v10400_v16 = vld [vmem:[#allocation24 + $0x90] sm:$0xff]  }
 0x99c   : > { %v3593_v19 = vpack.c.bf16 %v3592_v17, %v3592_v17  ;;  %v10401_v17 = vld [vmem:[#allocation24 + $0x8] sm:$0xff]  }
 0x99e   : > { %9678 = vmatmul.mubr.bf16.vlgmr.msra.gmra.mrb[20].mxu1 %v3593_v19  ;;  %v10403_v19 = vld [vmem:[#allocation24 + $0x50] sm:$0xff]  }
 0x99f   : > { %9682 = vmatpush3.bf16.msra.mxu1 %v10368_v18  ;;  %9697 = vmatprep.mubr.msk.bf16.mxu1 %vm11672_vm9, %v11673_v0  ;;  %v10402_v18 = vld [vmem:[#allocation24 + $0xd8] sm:$0xff]  }
 0x9a0   : > { %9683 = vmatprep.subr.bf16.mxu1 %v11673_v0 }
 0x9a3   : > { %9684 = vmatpush3.bf16.msra.mxu1 %v10370_v20  ;;  %v10404_v20 = vld [vmem:[#allocation24 + $0x98] sm:$0xff]  }
 0x9a4   : > { %9685 = vmatprep.subr.bf16.mxu1 %v11673_v0 }
 0x9a7   : > { %9686 = vmatpush3.bf16.msra.mxu1 %v10373_v21  ;;  %v10405_v21 = vld [vmem:[#allocation24 + $0x10] sm:$0xff]  }
 0x9a8   : > { %9687 = vmatprep.subr.bf16.mxu1 %v11673_v0 }
 0x9ab   : > { %9688 = vmatpush3.bf16.msra.mxu1 %v10376_v22  ;;  %v10406_v22 = vld [vmem:[#allocation24 + $0xe0] sm:$0xff]  }
 0x9ac   : > { %9689 = vmatprep.subr.bf16.mxu1 %v11673_v0 }
 0x9af   : > { %9690 = vmatpush3.bf16.msra.mxu1 %v10379_v25  ;;  %v10409_v25 = vld [vmem:[#allocation24 + $0x18] sm:$0xff]  }
 0x9b0   : > { %9691 = vmatprep.subr.bf16.mxu1 %v11673_v0 }
 0x9b3   : > { %9692 = vmatpush3.bf16.msra.mxu1 %v10382_v28  ;;  %v10412_v28 = vld [vmem:[#allocation24 + $0xa8] sm:$0xff]  }
 0x9b4   : > { %9693 = vmatprep.subr.bf16.mxu1 %v11673_v0 }
 0x9b7   : > { %9694 = vmatpush3.bf16.msra.mxu1 %v10385_v31  ;;  %v10415_v31 = vld [vmem:[#allocation24 + $0x68] sm:$0xff]  }
 0x9b8   : > { %9695 = vmatprep.subr.bf16.mxu1 %v11673_v0 }
 0x9bb   : > { %9696 = vmatpush3.bf16.msra.mxu1 %v10388_v34  ;;  %v10418_v34 = vld [vmem:[#allocation24 + $0xf8] sm:$0xff]  }
 0x9bc   : > { %9220 = vmatprep.subr.bf16.mxu1 %v10390_v36  ;;  %v10420_v36 = vld [vmem:[#allocation24 + $0xb8] sm:$0xff]  }
 0xa71   : > { %v3699_v43 = vpop.f32.mrb[20].mxu1 }
 0xa72   : > { %v3700_v45 = vadd.f32 %v8647_v42, %v3699_v43  ;;  %v9679_v46 = vpop.f32.mrb[21].mxu1  ;;  %v4089_v42 = vsel %vm4079_vm2, %v4064_v37, %v12540_v62  ;;  %v10423_v43 = vld [vmem:[#allocation24 + $0x100] sm:$0xff]   ;;  %v8656_v62 = vld [vmem:[#allocation22] ss:$0 sm:$0xff] }
 0xa73   : > { %v3702_v47 = vpop.f32.mrb[22].mxu1  ;;  %v10425_v46 = vld [vmem:[#allocation24 + $0x108] sm:$0x3f]   ;;  %v10431_v37 = vld [vmem:[%s12962_s10 + $0x50] sm:$0xff]  }
 0xa74   : > { %v3705_v49 = vadd.f32 %v3700_v45, %v12473_v51  ;;  %v9680_v52 = vpop.f32.mrb[23].mxu1  ;;  %v10424_v45 = vld [vmem:[#allocation24 + $0x38] sm:$0xff]   ;;  %v4375_v47 = vsel %vm3297_vm5, %v10425_v46, 0  ;;  %v10442_v46 = vld [vmem:[%s12962_s10 + $0xd8] sm:$0xff]  }
 0xa75   : > { %v10432_v52 = vld [vmem:[%s12962_s10 + $0x80] sm:$0xff]  }
 0xa76   : > { %v3706_v53 = vpack.c.bf16 %v3705_v49, %v3705_v49  ;;  %v10430_v49 = vld [vmem:[%s12962_s10 + $0xc0] sm:$0xff]  }
 0xa78   : > { %v3708_v56 = vshrl.u32 %v3706_v53, 16  ;;  %v3711_v58 = vshll.u32 %v3706_v53, 16  ;;  %v10434_v53 = vld [vmem:[%s12962_s10 + $0xc8] sm:$0xff]  }
 0xa7a   : > { %v3710_v57 = vrot.slane %v3708_v56, 7  ;;  %v10440_v56 = vld [vmem:[%s12962_s10 + $0x90] sm:$0xff]  }
 0xa7c   : > { %v3713_v60 = vor.u32 %v3711_v58, %v3710_v57 }
 0xa7e   : > { %v3715_v63 = vsel %vm12369_vm3, 0, %v3713_v60 }
 0xa7f   : > { %v3716_v51 = vsel %vm12422_vm15, %v3715_v63, 0 }
 0xa80   : > { %v3726_v2 = vrot.slane %v3716_v51, 1  ;;  %v3720_v4 = vshll.u32 %v3716_v51, 16  ;;  %v3718_v6 = vshrl.u32 %v3716_v51, 16 }
 0xa82   : > { %9698 = vmatmul.mubr.bf16.vlgmr.msra.gmra.mrb[24].mxu1 %v3726_v2  ;;  %v3722_v7 = vrot.slane %v3720_v4, 1 }
 0xa83   : > { %9221 = vmatpush3.bf16.msra.mxu1 %v10392_v1  ;;  %4450 = vmatprep.mubr.bf16.mxu1 %v4080_v5 }
 0xa84   : > { %9222 = vmatprep.subr.bf16.mxu1 %v10394_v3  ;;  %v3723_v9 = vor.u32 %v3722_v7, %v3718_v6 }
 0xa86   : > { %3959 = vmatprep.mubr.bf16.mxu0 %v3723_v9 }
 0xa87   : > { %9223 = vmatpush3.bf16.msra.mxu1 %v10396_v8  ;;  %3960 = vmatmul.mubr.bf16.vlgmr.msra.gmra.mrb[24].mxu0 %v3716_v51 }
 0xa88   : > { %9199 = vmatpush3.bf16.msra.mxu0 %v10397_v10  ;;  %9224 = vmatprep.subr.bf16.mxu1 %v10398_v11 }
 0xa89   : > { %9200 = vmatprep.subr.bf16.mxu0 %v10399_v13  ;;  %4409 = vmatprep.mubr.bf16.mxu0 %v4084_v14  ;;  %v8681_v14 = vld [vmem:[#allocation25] ss:$0 sm:$0xff] }
 0xa8b   : > { %9225 = vmatpush3.bf16.msra.mxu1 %v10400_v16 }
 0xa8c   : > { %9201 = vmatpush3.bf16.msra.mxu0 %v10401_v17  ;;  %9226 = vmatprep.subr.bf16.mxu1 %v10402_v18 }
 0xa8d   : > { %9202 = vmatprep.subr.bf16.mxu0 %v10403_v19 }
 0xa8f   : > { %9227 = vmatpush3.bf16.msra.mxu1 %v10404_v20 }
 0xa90   : > { %9203 = vmatpush3.bf16.msra.mxu0 %v10405_v21  ;;  %9228 = vmatprep.subr.bf16.mxu1 %v10406_v22 }
 0xa91   : > { %9204 = vmatprep.subr.bf16.mxu0 %v10407_v23 }
 0xa93   : > { %9229 = vmatpush3.bf16.msra.mxu1 %v10408_v38 }
 0xa94   : > { %9205 = vmatpush3.bf16.msra.mxu0 %v10409_v25  ;;  %9230 = vmatprep.subr.bf16.mxu1 %v10410_v26 }
 0xa95   : > { %9206 = vmatprep.subr.bf16.mxu0 %v10411_v27 }
 0xa97   : > { %9231 = vmatpush3.bf16.msra.mxu1 %v10412_v28 }
 0xa98   : > { %9207 = vmatpush3.bf16.msra.mxu0 %v10413_v29  ;;  %9232 = vmatprep.subr.bf16.mxu1 %v10414_v30 }
 0xa99   : > { %9208 = vmatprep.subr.bf16.mxu0 %v10415_v31 }
 0xa9b   : > { %9233 = vmatpush3.bf16.msra.mxu1 %v10416_v32 }
 0xa9c   : > { %9209 = vmatpush3.bf16.msra.mxu0 %v10417_v33  ;;  %9234 = vmatprep.subr.bf16.mxu1 %v10418_v34  ;;  %v10426_v34 = vld [vmem:[%s12962_s10 + $0x40] sm:$0xff]  }
 0xa9d   : > { %9210 = vmatprep.subr.bf16.mxu0 %v10419_v35  ;;  %v10427_v35 = vld [vmem:[%s12962_s10] sm:$0xff]  }
 0xa9f   : > { %9235 = vmatpush3.bf16.msra.mxu1 %v10420_v36  ;;  %v10428_v36 = vld [vmem:[%s12962_s10 + $0x48] sm:$0xff]  }
 0xaa0   : > { %9211 = vmatpush3.bf16.msra.mxu0 %v10421_v39  ;;  %9701 = vmatprep.subr.bf16.mxu1 %v11673_v0  ;;  %v10433_v39 = vld [vmem:[%s12962_s10 + $0x10] sm:$0xff]  }
 0xaa1   : > { %9212 = vmatprep.subr.bf16.mxu0 %v10422_v40  ;;  %v10435_v40 = vld [vmem:[%s12962_s10 + $0x58] sm:$0xff]  }
 0xaa2   : > { %4451 = vmatmul.mubr.bf16.vlgmr.msra.gmra.mrb[28].mxu1 %v4089_v42  ;;  %v10437_v42 = vld [vmem:[%s12962_s10 + $0x18] sm:$0xff]  }
 0xaa3   : > { %9702 = vmatpush3.bf16.msra.mxu1 %v10423_v43  ;;  %9705 = vmatprep.mubr.msk.bf16.mxu1 %vm11672_vm9, %v11673_v0  ;;  %v10439_v43 = vld [vmem:[%s12962_s10 + $0x60] sm:$0xff]  }
 0xaa4   : > { %9213 = vmatpush3.bf16.msra.mxu0 %v10424_v45  ;;  %9703 = vmatprep.subr.bf16.mxu1 %v11673_v0  ;;  %v10441_v45 = vld [vmem:[%s12962_s10 + $0x20] sm:$0xff]  }
 0xaa5   : > { %9939 = vmatprep.subr.bf16.mxu0 %v11671_v15 }
 0xaa7   : > { %4410 = vmatmul.mubr.bf16.vlgmr.msra.gmra.mrb[28].mxu0 %v12514_v44  ;;  %9704 = vmatpush3.bf16.msra.mxu1 %v4375_v47  ;;  %v10443_v47 = vld [vmem:[%s12962_s10 + $0x68] sm:$0xff]  }
 0xaa8   : > { %9713 = vmatprep.mubr.msk.f32.mxu0 %vm11672_vm9, %v11673_v0  ;;  %9273 = vmatprep.subr.bf16.mxu1 %v10430_v49  ;;  %v10444_v49 = vld [vmem:[%s12962_s10 + $0x98] sm:$0xff]  }
 0xaaa   : > { %9706 = vmatmul.mubr.msk.bf16.vlgmr.msra.gmra.mrb[32].mxu1 %vm4369_vm10, %v12538_v61 }
 0xaab   : > { %9274 = vmatpush3.bf16.msra.mxu1 %v10432_v52  ;;  %v10445_v52 = vld [vmem:[%s12962_s10 + $0x28] sm:$0xff]  }
 0xaac   : > { %9275 = vmatprep.subr.bf16.mxu1 %v10434_v53  ;;  %v10446_v53 = vld [vmem:[%s12962_s10 + $0xe0] sm:$0xff]  }
 0xaaf   : > { %9276 = vmatpush3.bf16.msra.mxu1 %v10436_v54  ;;  %v10447_v54 = vld [vmem:[%s12962_s10 + $0x70] sm:$0xff]  }
 0xab0   : > { %9277 = vmatprep.subr.bf16.mxu1 %v10438_v55  ;;  %v10448_v55 = vld [vmem:[%s12962_s10 + $0xa0] sm:$0xff]  }
 0xab3   : > { %9278 = vmatpush3.bf16.msra.mxu1 %v10440_v56  ;;  %v10449_v56 = vld [vmem:[%s12962_s10 + $0x30] sm:$0xff]  }
 0xab4   : > { %9279 = vmatprep.subr.bf16.mxu1 %v10442_v46  ;;  %v10472_v46 = vld [vmem:[%s12962_s10 + $0x178] sm:$0xff]  }
 0xab7   : > { %9280 = vmatpush3.bf16.msra.mxu1 %v10444_v49 }
 0xab8   : > { %9281 = vmatprep.subr.bf16.mxu1 %v10446_v53  ;;  %v10475_v53 = vld [vmem:[#allocation28 + $0x40] sm:$0xff]  }
 0xabb   : > { %9282 = vmatpush3.bf16.msra.mxu1 %v10448_v55  ;;  %v10478_v55 = vld [vmem:[#allocation28 + $0x48] sm:$0xff]  }
 0xb55   : > { %v4001_v44 = vpop.f32.mrb[24].mxu1 }
 0xb56   : > { %v9699_v57 = vpop.f32.mrb[25].mxu1 }
 0xb57   : > { %v4004_v58 = vpop.f32.mrb[26].mxu1  ;;  %v10451_v57 = vld [vmem:[%s12962_s10 + $0x78] sm:$0xff]  }
 0xb58   : > { %v9700_v60 = vpop.f32.mrb[27].mxu1  ;;  %v10452_v58 = vld [vmem:[%s12962_s10 + $0xa8] sm:$0xff]  }
 0xb59   : > { %v10453_v60 = vld [vmem:[%s12962_s10 + $0x38] sm:$0xff]  }
 0xb5a   : > { %v9183_v61 = vpop.f32.mrb[24].mxu0 }
 0xb5b   : > { %v9184_v63 = vpop.f32.mrb[25].mxu0 }
 0xb5c   : > { %v9185_v51 = vadd.f32 %v9184_v63, %v9183_v61  ;;  %v9186_v1 = vpop.f32.mrb[26].mxu0  ;;  %v10454_v61 = vld [vmem:[%s12962_s10 + $0xf0] sm:$0xff]   ;;  %v10456_v63 = vld [vmem:[%s12962_s10 + $0x140] sm:$0xff]  }
 0xb5d   : > { %v9187_v2 = vpop.f32.mrb[27].mxu0  ;;  %v10459_v1 = vld [vmem:[%s12962_s10 + $0xb8] sm:$0xff]  }
 0xb5e   : > { %v3962_v3 = vadd.f32 %v9185_v51, %v8656_v62  ;;  %v10455_v62 = vld [vmem:[%s12962_s10 + $0xb0] sm:$0xff]   ;;  %v10458_v51 = vld [vmem:[%s12962_s10 + $0xf8] sm:$0xff]  }
 0xb60   : > { %v4002_v4 = vadd.f32 %v4001_v44, %v3962_v3  ;;  %v10450_v44 = vld [vmem:[%s12962_s10 + $0xe8] sm:$0xff]  }
 0xb61   : > { %9283 = vmatprep.subr.bf16.mxu1 %v10450_v44  ;;  %v10480_v44 = vld [vmem:[#allocation28 + $0x8] sm:$0xff]  }
 0xb62   : > { %v7984_v5 = vpack.c.bf16 %v4002_v4, %v4002_v4  ;;  %9284 = vmatpush3.bf16.msra.mxu1 %v10452_v58  ;;  %v10481_v58 = vld [vmem:[#allocation28 + $0x50] sm:$0xff]  }
 0xb63   : > { %9285 = vmatprep.subr.bf16.mxu1 %v10454_v61  ;;  %v10483_v61 = vld [vmem:[#allocation28 + $0x10] sm:$0xff]  }
 0xb64   : > { %7985 = vst [vmem:[%s1754_s1] sm:$0xf] %v7984_v5  ;;  %s1758_s1 = scalar_lea.vmem %s11899_s13, %s8506_s3 }
 0xb66   : > { %9286 = vmatpush3.bf16.msra.mxu1 %v10455_v62  ;;  %v10484_v62 = vld [vmem:[#allocation28 + $0x58] sm:$0xff]  }
 0xb67   : > { %9287 = vmatprep.subr.bf16.mxu1 %v10458_v51  ;;  %v10486_v51 = vld [vmem:[#allocation28 + $0x18] sm:$0xff]  }
 0xb6a   : > { %9288 = vmatpush3.bf16.msra.mxu1 %v10459_v1  ;;  %v10487_v1 = vld [vmem:[#allocation28 + $0x60] sm:$0xff]  }
 0xb6b   : > { %9317 = vmatprep.subr.bf16.mxu1 %v10475_v53  ;;  %v10500_v53 = vld [vmem:[#allocation31 + $0x10] sm:$0xff]  }
 0xb75   : > { %v9236_v6 = vpop.f32.mrb[28].mxu1 }
 0xb76   : > { %v9237_v7 = vpop.f32.mrb[29].mxu1 }
 0xb77   : > { %v9238_v8 = vadd.f32 %v9237_v7, %v9236_v6  ;;  %v9239_v9 = vpop.f32.mrb[30].mxu1 }
 0xb78   : > { %v9240_v10 = vpop.f32.mrb[31].mxu1 }
 0xb79   : > { %v9241_v11 = vadd.f32 %v9240_v10, %v9239_v9 }
 0xb7a   : > { %v9214_v13 = vpop.f32.mrb[28].mxu0 }
 0xb7b   : > { %v9215_v16 = vpop.f32.mrb[29].mxu0 }
 0xb7c   : > { %v9216_v17 = vadd.f32 %v9215_v16, %v9214_v13  ;;  %v9217_v18 = vpop.f32.mrb[30].mxu0 }
 0xb7d   : > { %v9218_v19 = vpop.f32.mrb[31].mxu0  ;;  %v4493_v20 = vpop.f32.mrb[32].mxu1 }
 0xb7e   : > { %v4412_v21 = vadd.f32 %v9216_v17, %v8681_v14  ;;  %v9219_v22 = vadd.f32 %v9218_v19, %v9217_v18  ;;  %v9707_v23 = vpop.f32.mrb[33].mxu1 }
 0xb7f   : > { %v4496_v38 = vpop.f32.mrb[34].mxu1 }
 0xb80   : > { %v4415_v25 = vadd.f32 %v9219_v22, %v8681_v14  ;;  %v4453_v26 = vadd.f32 %v9238_v8, %v4412_v21  ;;  %v9708_v27 = vpop.f32.mrb[35].mxu1  ;;  %v10457_v22 = vld [vmem:[%s12962_s10 + $0x100] sm:$0xff]  }
 0xb82   : > { %v4494_v28 = vadd.f32 %v4493_v20, %v4453_v26  ;;  %v4456_v29 = vadd.f32 %v9241_v11, %v4415_v25 }
 0xb84   : > { %v4497_v30 = vadd.f32 %v4496_v38, %v4456_v29  ;;  %v4500_v31 = vmax.f32 %v4494_v28, 0.0  ;;  %v10460_v38 = vld [vmem:[%s12962_s10 + $0x148] sm:$0xff]  }
 0xb85   : > { %v10461_v28 = vld [vmem:[%s12962_s10 + $0x108] sm:$0xff]  }
 0xb86   : > { %v4501_v32 = vmax.f32 %v4497_v30, 0.0 }
 0xb88   : > { %v9940_v33 = vpack.c.bf16 %v4501_v32, %v4500_v31  ;;  %v10462_v32 = vld [vmem:[%s12962_s10 + $0x150] sm:$0xff]  }
 0xb8a   : > { %9941 = vmatpush3.bf16.msra.mxu0 %v9940_v33 }
 0xb8b   : > { %9942 = vmatprep.subr.bf16.mxu0 %v11671_v15  ;;  %v10429_v15 = vld [vmem:[%s12962_s10 + $0x8] sm:$0xff]  }
 0xb8d   : > { %9714 = vmatmul.mubr.msk.f32.vlgmr.msra.gmra.mrb[32].mxu0 %vm2161_vm11, %v12410_v48 }
 0xb8e   : > { %9944 = vmatpush3.bf16.msra.mxu0 %v9940_v33  ;;  %9720 = vmatprep.mubr.msk.f32.mxu0 %vm11672_vm9, %v11673_v0 }
 0xb8f   : > { %9251 = vmatprep.subr.bf16.mxu0 %v10426_v34 }
 0xb91   : > { %9721 = vmatmul.mubr.msk.f32.vlgmr.msra.gmra.mrb[34].mxu0 %vm2161_vm11, %v12418_v50  ;;  %vm6031_vm11 = vcmask 64512  }
 0xb92   : > { %9252 = vmatpush3.bf16.msra.mxu0 %v10427_v35  ;;  %v10463_v35 = vld [vmem:[%s12962_s10 + $0x110] sm:$0xff]  }
 0xb93   : > { %9253 = vmatprep.subr.bf16.mxu0 %v10428_v36  ;;  %v10464_v36 = vld [vmem:[%s12962_s10 + $0x158] sm:$0xff]  }
 0xb96   : > { %9254 = vmatpush3.bf16.msra.mxu0 %v10429_v15  ;;  %v10465_v15 = vld [vmem:[%s12962_s10 + $0x118] sm:$0xff]  }
 0xb97   : > { %9255 = vmatprep.subr.bf16.mxu0 %v10431_v37  ;;  %v10466_v37 = vld [vmem:[%s12962_s10 + $0x160] sm:$0xff]  }
 0xb9a   : > { %9256 = vmatpush3.bf16.msra.mxu0 %v10433_v39  ;;  %v10467_v39 = vld [vmem:[%s12962_s10 + $0x120] sm:$0xff]  }
 0xb9b   : > { %9257 = vmatprep.subr.bf16.mxu0 %v10435_v40  ;;  %v10468_v40 = vld [vmem:[%s12962_s10 + $0x168] sm:$0xff]  }
 0xb9e   : > { %9258 = vmatpush3.bf16.msra.mxu0 %v10437_v42  ;;  %v10469_v42 = vld [vmem:[%s12962_s10 + $0x128] sm:$0xff]  }
 0xb9f   : > { %9259 = vmatprep.subr.bf16.mxu0 %v10439_v43  ;;  %v10470_v43 = vld [vmem:[%s12962_s10 + $0x170] sm:$0xff]  }
 0xba2   : > { %9260 = vmatpush3.bf16.msra.mxu0 %v10441_v45  ;;  %v10471_v45 = vld [vmem:[%s12962_s10 + $0x130] sm:$0xff]  }
 0xba3   : > { %9261 = vmatprep.subr.bf16.mxu0 %v10443_v47  ;;  %v10473_v47 = vld [vmem:[%s12962_s10 + $0x138] sm:$0xff]  }
 0xba6   : > { %9262 = vmatpush3.bf16.msra.mxu0 %v10445_v52  ;;  %v10474_v52 = vld [vmem:[#allocation28 + $0x80] sm:$0xff]  }
 0xba7   : > { %9263 = vmatprep.subr.bf16.mxu0 %v10447_v54  ;;  %v10477_v54 = vld [vmem:[#allocation28] sm:$0xff]  }
 0xbaa   : > { %9264 = vmatpush3.bf16.msra.mxu0 %v10449_v56  ;;  %v10476_v56 = vld [vmem:[#allocation28 + $0x88] sm:$0xff]  }
 0xbab   : > { %9265 = vmatprep.subr.bf16.mxu0 %v10451_v57  ;;  %v10479_v57 = vld [vmem:[#allocation28 + $0x90] sm:$0xff]  }
 0xbae   : > { %9266 = vmatpush3.bf16.msra.mxu0 %v10453_v60  ;;  %v10482_v60 = vld [vmem:[#allocation28 + $0x98] sm:$0xff]  }
 0xbaf   : > { %9295 = vmatprep.subr.bf16.mxu0 %v10456_v63  ;;  %v10485_v63 = vld [vmem:[#allocation28 + $0xa0] sm:$0xff]  }
 0xc60   : > { %v4568_v2 = vpop.f32.mrb[32].mxu0 }
 0xc61   : > { %v4642_v3 = vpack.c.bf16 %v4568_v2, %v4568_v2  ;;  %v9715_v4 = vpop.f32.mrb[33].mxu0  ;;  %v10488_v2 = vld [vmem:[#allocation28 + $0xa8] sm:$0xff]  }
 0xc62   : > { %v10490_v4 = vld [vmem:[#allocation28 + $0x68] sm:$0xff]  }
 0xc63   : > { %v4645_v5 = vshrl.u32 %v4642_v3, 16  ;;  %v4648_v8 = vshll.u32 %v4642_v3, 16  ;;  %v10489_v3 = vld [vmem:[#allocation28 + $0x20] sm:$0xff]  }
 0xc64   : > { %v4638_v6 = vpop.f32.mrb[34].mxu0 }
 0xc65   : > { %v4647_v7 = vrot.slane %v4645_v5, 7  ;;  %v4643_v9 = vpack.c.bf16 %v4638_v6, %v4638_v6  ;;  %v9722_v10 = vpop.f32.mrb[35].mxu0  ;;  %v10491_v5 = vld [vmem:[#allocation28 + $0xb0] sm:$0xff]   ;;  %v10492_v6 = vld [vmem:[#allocation28 + $0x28] sm:$0xff]  }
 0xc66   : > { %v10496_v10 = vld [vmem:[#allocation28 + $0x78] sm:$0xff]  }
 0xc67   : > { %v4650_v11 = vor.u32 %v4648_v8, %v4647_v7  ;;  %v4652_v13 = vshrl.u32 %v4643_v9, 16  ;;  %v4655_v16 = vshll.u32 %v4643_v9, 16  ;;  %v10493_v7 = vld [vmem:[#allocation28 + $0x70] sm:$0xff]   ;;  %v10494_v8 = vld [vmem:[#allocation28 + $0xb8] sm:$0xff]  }
 0xc68   : > { %v10495_v9 = vld [vmem:[#allocation28 + $0x30] sm:$0xff]  }
 0xc69   : > { %v4654_v14 = vrot.slane %v4652_v13, 7  ;;  %v4660_v17 = vsel %vm12369_vm3, 0, %v4650_v11  ;;  %v10497_v11 = vld [vmem:[#allocation28 + $0x38] sm:$0xff]  }
 0xc6a   : > { %v4662_v18 = vsel %vm12422_vm15, %v4660_v17, 0 }
 0xc6b   : > { %v4657_v19 = vor.u32 %v4655_v16, %v4654_v14  ;;  %v4667_v20 = vshll.u32 %v4662_v18, 16  ;;  %v4665_v31 = vshrl.u32 %v4662_v18, 16  ;;  %v4682_v49 = vrot.slane %v4662_v18, 1 }
 0xc6d   : > { %v4661_v21 = vsel %vm12369_vm3, 0, %v4657_v19  ;;  %v4669_v27 = vrot.slane %v4667_v20, 1  ;;  %v8719_v19 = vld [vmem:[#allocation27] ss:$0 sm:$0xff] }
 0xc6e   : > { %v4663_v23 = vsel %vm12422_vm15, %v4661_v21, 0 }
 0xc6f   : > { %5109 = vmatprep.mubr.bf16.mxu0 %v4663_v23  ;;  %v4683_v25 = vrot.slane %v4663_v23, 1  ;;  %v4674_v26 = vshll.u32 %v4663_v23, 16  ;;  %v4672_v29 = vshrl.u32 %v4663_v23, 16  ;;  %v4670_v34 = vor.u32 %v4669_v27, %v4665_v31 }
 0xc70   : > { %5110 = vmatmul.mubr.bf16.vlgmr.msra.gmra.mrb[36].mxu0 %v4662_v18 }
 0xc71   : > { %9296 = vmatpush3.bf16.msra.mxu0 %v10457_v22  ;;  %5189 = vmatprep.mubr.bf16.mxu0 %v4683_v25  ;;  %v4676_v30 = vrot.slane %v4674_v26, 1 }
 0xc72   : > { %9297 = vmatprep.subr.bf16.mxu0 %v10460_v38 }
 0xc73   : > { %v4677_v33 = vor.u32 %v4676_v30, %v4672_v29 }
 0xc75   : > { %9298 = vmatpush3.bf16.msra.mxu0 %v10461_v28  ;;  %5149 = vmatprep.mubr.bf16.mxu1 %v4677_v33 }
 0xc76   : > { %5150 = vmatmul.mubr.bf16.vlgmr.msra.gmra.mrb[36].mxu1 %v4670_v34  ;;  %9299 = vmatprep.subr.bf16.mxu0 %v10462_v32 }
 0xc77   : > { %9318 = vmatpush3.bf16.msra.mxu1 %v10477_v54  ;;  %v10502_v54 = vld [vmem:[#allocation31 + $0x20] sm:$0xff]  }
 0xc78   : > { %9319 = vmatprep.subr.bf16.mxu1 %v10478_v55  ;;  %v10503_v55 = vld [vmem:[#allocation31 + $0x28] sm:$0xff]  }
 0xc79   : > { %9300 = vmatpush3.bf16.msra.mxu0 %v10463_v35 }
 0xc7a   : > { %9301 = vmatprep.subr.bf16.mxu0 %v10464_v36 }
 0xc7b   : > { %9320 = vmatpush3.bf16.msra.mxu1 %v10480_v44  ;;  %v10505_v44 = vld [vmem:[#allocation31 + $0x38] sm:$0xff]  }
 0xc7c   : > { %9321 = vmatprep.subr.bf16.mxu1 %v10481_v58  ;;  %v10509_v58 = vld [vmem:[#allocation34] sm:$0xff]  }
 0xc7d   : > { %9302 = vmatpush3.bf16.msra.mxu0 %v10465_v15 }
 0xc7e   : > { %9303 = vmatprep.subr.bf16.mxu0 %v10466_v37 }
 0xc7f   : > { %9322 = vmatpush3.bf16.msra.mxu1 %v10483_v61  ;;  %v10512_v61 = vld [vmem:[#allocation34 + $0x8] sm:$0xff]  }
 0xc80   : > { %9323 = vmatprep.subr.bf16.mxu1 %v10484_v62 }
 0xc81   : > { %9304 = vmatpush3.bf16.msra.mxu0 %v10467_v39 }
 0xc82   : > { %9305 = vmatprep.subr.bf16.mxu0 %v10468_v40 }
 0xc83   : > { %9324 = vmatpush3.bf16.msra.mxu1 %v10486_v51 }
 0xc84   : > { %9325 = vmatprep.subr.bf16.mxu1 %v10487_v1 }
 0xc85   : > { %9306 = vmatpush3.bf16.msra.mxu0 %v10469_v42 }
 0xc86   : > { %9307 = vmatprep.subr.bf16.mxu0 %v10470_v43 }
 0xc87   : > { %9326 = vmatpush3.bf16.msra.mxu1 %v10489_v3  ;;  %v8768_v3 = vld [vmem:[#allocation30] ss:$0 sm:$0xff] }
 0xc88   : > { %9327 = vmatprep.subr.bf16.mxu1 %v10490_v4 }
 0xc89   : > { %9308 = vmatpush3.bf16.msra.mxu0 %v10471_v45 }
 0xc8a   : > { %9309 = vmatprep.subr.bf16.mxu0 %v10472_v46 }
 0xc8b   : > { %9328 = vmatpush3.bf16.msra.mxu1 %v10492_v6 }
 0xc8c   : > { %9329 = vmatprep.subr.bf16.mxu1 %v10493_v7 }
 0xc8d   : > { %9310 = vmatpush3.bf16.msra.mxu0 %v10473_v47 }
 0xc8e   : > { %9723 = vmatprep.subr.bf16.mxu0 %v11673_v0 }
 0xc8f   : > { %9330 = vmatpush3.bf16.msra.mxu1 %v10495_v9 }
 0xc90   : > { %5190 = vmatmul.mubr.bf16.vlgmr.msra.gmra.mrb[40].mxu0 %v4682_v49  ;;  %9331 = vmatprep.subr.bf16.mxu1 %v10496_v10  ;;  %v10498_v49 = vld [vmem:[#allocation31] sm:$0xff]  }
 0xc91   : > { %9739 = vmatprep.mubr.msk.bf16.mxu0 %vm11672_vm9, %v11673_v0  ;;  %9724 = vmatpush3.bf16.msra.mxu0 %v10474_v52  ;;  %v10499_v52 = vld [vmem:[#allocation31 + $0x8] sm:$0xff]  }
 0xc92   : > { %9725 = vmatprep.subr.bf16.mxu0 %v11673_v0 }
 0xc93   : > { %9332 = vmatpush3.bf16.msra.mxu1 %v10497_v11  ;;  %v10506_v11 = vld [vmem:[#allocation34 + $0x80] sm:$0xff]  }
 0xc94   : > { %9743 = vmatprep.subr.bf16.mxu1 %v11673_v0 }
 0xc95   : > { %9726 = vmatpush3.bf16.msra.mxu0 %v10476_v56  ;;  %v10504_v56 = vld [vmem:[#allocation31 + $0x30] sm:$0xff]  }
 0xc96   : > { %9727 = vmatprep.subr.bf16.mxu0 %v11673_v0 }
 0xc99   : > { %9728 = vmatpush3.bf16.msra.mxu0 %v10479_v57  ;;  %v10507_v57 = vld [vmem:[#allocation34 + $0x40] sm:$0xff]  }
 0xc9a   : > { %9729 = vmatprep.subr.bf16.mxu0 %v11673_v0 }
 0xc9d   : > { %9730 = vmatpush3.bf16.msra.mxu0 %v10482_v60  ;;  %v10510_v60 = vld [vmem:[#allocation34 + $0x48] sm:$0xff]  }
 0xc9e   : > { %9731 = vmatprep.subr.bf16.mxu0 %v11673_v0 }
 0xca1   : > { %9732 = vmatpush3.bf16.msra.mxu0 %v10485_v63 }
 0xca2   : > { %9733 = vmatprep.subr.bf16.mxu0 %v11673_v0 }
 0xca5   : > { %9734 = vmatpush3.bf16.msra.mxu0 %v10488_v2 }
 0xca6   : > { %9735 = vmatprep.subr.bf16.mxu0 %v11673_v0 }
 0xca9   : > { %9736 = vmatpush3.bf16.msra.mxu0 %v10491_v5 }
 0xcaa   : > { %9737 = vmatprep.subr.bf16.mxu0 %v11673_v0 }
 0xcad   : > { %9738 = vmatpush3.bf16.msra.mxu0 %v10494_v8 }
 0xcae   : > { %9357 = vmatprep.subr.bf16.mxu0 %v10507_v57 }
 0xd43   : > { %v9267_v13 = vpop.f32.mrb[36].mxu0 }
 0xd44   : > { %v9268_v14 = vpop.f32.mrb[37].mxu0 }
 0xd45   : > { %v9269_v16 = vadd.f32 %v9268_v14, %v9267_v13  ;;  %v9270_v17 = vpop.f32.mrb[38].mxu0  ;;  %v10508_v14 = vld [vmem:[#allocation34 + $0x88] sm:$0xff]  }
 0xd46   : > { %v9271_v18 = vpop.f32.mrb[39].mxu0  ;;  %v10513_v17 = vld [vmem:[#allocation34 + $0x50] sm:$0xff]  }
 0xd47   : > { %v5112_v22 = vadd.f32 %v9269_v16, %v8719_v19  ;;  %v10511_v16 = vld [vmem:[#allocation34 + $0x90] sm:$0xff]   ;;  %v10514_v18 = vld [vmem:[#allocation34 + $0x98] sm:$0xff]  }
 0xd48   : > { %v10515_v19 = vld [vmem:[#allocation34 + $0x10] sm:$0xff]  }
 0xd49   : > { %v9289_v20 = vpop.f32.mrb[36].mxu1 }
 0xd4a   : > { %v9290_v21 = vpop.f32.mrb[37].mxu1 }
 0xd4b   : > { %v9291_v23 = vadd.f32 %v9290_v21, %v9289_v20  ;;  %v9292_v38 = vpop.f32.mrb[38].mxu1  ;;  %v10516_v20 = vld [vmem:[#allocation34 + $0x58] sm:$0xff]   ;;  %v10517_v21 = vld [vmem:[#allocation34 + $0xa0] sm:$0xff]  }
 0xd4c   : > { %v9293_v25 = vpop.f32.mrb[39].mxu1  ;;  %v10520_v38 = vld [vmem:[#allocation34 + $0xa8] sm:$0xff]  }
 0xd4d   : > { %v5152_v26 = vadd.f32 %v9291_v23, %v5112_v22  ;;  %v10518_v22 = vld [vmem:[#allocation34 + $0x18] sm:$0xff]   ;;  %v10519_v23 = vld [vmem:[#allocation34 + $0x60] sm:$0xff]  }
 0xd4e   : > { %v10521_v25 = vld [vmem:[#allocation34 + $0x20] sm:$0xff]  }
 0xd63   : > { %v9311_v27 = vpop.f32.mrb[40].mxu0 }
 0xd64   : > { %v9312_v28 = vpop.f32.mrb[41].mxu0 }
 0xd65   : > { %v9313_v29 = vadd.f32 %v9312_v28, %v9311_v27  ;;  %v9314_v30 = vpop.f32.mrb[42].mxu0  ;;  %v10523_v27 = vld [vmem:[#allocation34 + $0xb0] sm:$0xff]   ;;  %v10524_v28 = vld [vmem:[#allocation34 + $0x28] sm:$0xff]  }
 0xd66   : > { %v9315_v31 = vpop.f32.mrb[43].mxu0  ;;  %v10526_v30 = vld [vmem:[#allocation34 + $0xb8] sm:$0xff]  }
 0xd67   : > { %v12645_v32 = vadd.f32 %v9313_v29, %v5152_v26  ;;  %v10522_v26 = vld [vmem:[#allocation34 + $0x68] sm:$0xff]   ;;  %v10525_v29 = vld [vmem:[#allocation34 + $0x70] sm:$0xff]  }
 0xd68   : > { %v10527_v31 = vld [vmem:[#allocation34 + $0x30] sm:$0xff]  }
 0xd69   : > { %v5197_v33 = vmax.f32 %v12645_v32, 0.0 }
 0xd6b   : > { %v5198_v34 = vpack.c.bf16 %v5197_v33, %v5197_v33  ;;  %v10528_v33 = vld [vmem:[#allocation34 + $0x78] sm:$0xff]  }
 0xd6d   : > { %v5200_v35 = vshrl.u32 %v5198_v34, 16  ;;  %v5203_v15 = vshll.u32 %v5198_v34, 16  ;;  %v10529_v34 = vld [vmem:[#allocation34 + $0x38] sm:$0xff]  }
 0xd6f   : > { %v5202_v36 = vrot.slane %v5200_v35, 7  ;;  %v8793_v35 = vld [vmem:[#allocation33] ss:$0 sm:$0xff] }
 0xd71   : > { %v5205_v37 = vor.u32 %v5203_v15, %v5202_v36 }
 0xd73   : > { %v5207_v39 = vsel %vm12369_vm3, 0, %v5205_v37 }
 0xd74   : > { %v5208_v40 = vsel %vm12422_vm15, %v5207_v39, 0  ;;  %vm7162_vm15 = vcmask 1043456  }
 0xd75   : > { %v5218_v42 = vrot.slane %v5208_v40, 1  ;;  %v5212_v43 = vshll.u32 %v5208_v40, 16  ;;  %v5210_v45 = vshrl.u32 %v5208_v40, 16  ;;  %vm7164_vm1 = vmand %vm7162_vm15, %vm7163_vm0 }
 0xd77   : > { %9740 = vmatmul.mubr.bf16.vlgmr.msra.gmra.mrb[44].mxu0 %v5218_v42  ;;  %v5214_v46 = vrot.slane %v5212_v43, 1 }
 0xd78   : > { %9358 = vmatpush3.bf16.msra.mxu0 %v10509_v58 }
 0xd79   : > { %v5215_v47 = vor.u32 %v5214_v46, %v5210_v45  ;;  %9359 = vmatprep.subr.bf16.mxu0 %v10510_v60  ;;  %v10530_v60 = vld [vmem:[#allocation37] sm:$0xff]  }
 0xd7b   : > { %5451 = vmatprep.mubr.bf16.mxu1 %v5215_v47 }
 0xd7c   : > { %5452 = vmatmul.mubr.bf16.vlgmr.msra.gmra.mrb[40].mxu1 %v5208_v40  ;;  %9360 = vmatpush3.bf16.msra.mxu0 %v10512_v61  ;;  %v10531_v61 = vld [vmem:[#allocation37 + $0x8] sm:$0xff]  }
 0xd7d   : > { %9744 = vmatpush3.bf16.msra.mxu1 %v10498_v49  ;;  %9759 = vmatprep.mubr.msk.bf16.mxu1 %vm11672_vm9, %v11673_v0 }
 0xd7e   : > { %9745 = vmatprep.subr.bf16.mxu1 %v11673_v0  ;;  %9361 = vmatprep.subr.bf16.mxu0 %v10513_v17 }
 0xd80   : > { %9362 = vmatpush3.bf16.msra.mxu0 %v10515_v19  ;;  %v10542_v19 = vld [vmem:[%s12963_s5 + $0xc0] sm:$0xff]  }
 0xd81   : > { %9746 = vmatpush3.bf16.msra.mxu1 %v10499_v52  ;;  %9363 = vmatprep.subr.bf16.mxu0 %v10516_v20  ;;  %v10544_v20 = vld [vmem:[%s12963_s5 + $0x80] sm:$0xff]  }
 0xd82   : > { %9747 = vmatprep.subr.bf16.mxu1 %v11673_v0 }
 0xd84   : > { %9364 = vmatpush3.bf16.msra.mxu0 %v10518_v22  ;;  %v10548_v22 = vld [vmem:[%s12963_s5 + $0x88] sm:$0xff]  }
 0xd85   : > { %9748 = vmatpush3.bf16.msra.mxu1 %v10500_v53  ;;  %9365 = vmatprep.subr.bf16.mxu0 %v10519_v23  ;;  %v10550_v23 = vld [vmem:[%s12963_s5 + $0xd0] sm:$0xff]  }
 0xd86   : > { %9749 = vmatprep.subr.bf16.mxu1 %v11673_v0 }
 0xd88   : > { %9366 = vmatpush3.bf16.msra.mxu0 %v10521_v25  ;;  %v8827_v25 = vld [vmem:[#allocation39] ss:$0 sm:$0xff] }
 0xd89   : > { %9750 = vmatpush3.bf16.msra.mxu1 %v10501_v24  ;;  %9367 = vmatprep.subr.bf16.mxu0 %v10522_v26 }
 0xd8a   : > { %9751 = vmatprep.subr.bf16.mxu1 %v11673_v0 }
 0xd8c   : > { %9368 = vmatpush3.bf16.msra.mxu0 %v10524_v28 }
 0xd8d   : > { %9752 = vmatpush3.bf16.msra.mxu1 %v10502_v54  ;;  %9369 = vmatprep.subr.bf16.mxu0 %v10525_v29 }
 0xd8e   : > { %9753 = vmatprep.subr.bf16.mxu1 %v11673_v0 }
 0xd90   : > { %9370 = vmatpush3.bf16.msra.mxu0 %v10527_v31 }
 0xd91   : > { %9754 = vmatpush3.bf16.msra.mxu1 %v10503_v55  ;;  %9371 = vmatprep.subr.bf16.mxu0 %v10528_v33  ;;  %v10538_v33 = vld [vmem:[%s12963_s5 + $0x40] sm:$0xff]  }
 0xd92   : > { %9755 = vmatprep.subr.bf16.mxu1 %v11673_v0 }
 0xd94   : > { %9372 = vmatpush3.bf16.msra.mxu0 %v10529_v34  ;;  %v10539_v34 = vld [vmem:[%s12963_s5] sm:$0xff]  }
 0xd95   : > { %9756 = vmatpush3.bf16.msra.mxu1 %v10504_v56  ;;  %9783 = vmatprep.subr.bf16.mxu0 %v11673_v0 }
 0xd96   : > { %9757 = vmatprep.subr.bf16.mxu1 %v11673_v0 }
 0xd99   : > { %9758 = vmatpush3.bf16.msra.mxu1 %v10505_v44 }
 0xd9a   : > { %9763 = vmatprep.subr.bf16.mxu1 %v11673_v0 }
 0xe4a   : > { %v5493_v62 = vpop.f32.mrb[44].mxu0 }
 0xe4b   : > { %v9741_v63 = vpop.f32.mrb[45].mxu0 }
 0xe4c   : > { %v5496_v51 = vpop.f32.mrb[46].mxu0  ;;  %v10534_v63 = vld [vmem:[#allocation37 + $0x20] sm:$0xff]  }
 0xe4d   : > { %v9742_v1 = vpop.f32.mrb[47].mxu0  ;;  %v10535_v51 = vld [vmem:[#allocation37 + $0x28] sm:$0xff]  }
 0xe4e   : > { %v10536_v1 = vld [vmem:[#allocation37 + $0x30] sm:$0xff]  }
 0xe4f   : > { %v9333_v2 = vpop.f32.mrb[40].mxu1 }
 0xe50   : > { %v9334_v4 = vpop.f32.mrb[41].mxu1 }
 0xe51   : > { %v9335_v5 = vadd.f32 %v9334_v4, %v9333_v2  ;;  %v9336_v6 = vpop.f32.mrb[42].mxu1  ;;  %v10537_v2 = vld [vmem:[#allocation37 + $0x38] sm:$0xff]  }
 0xe52   : > { %v9337_v7 = vpop.f32.mrb[43].mxu1 }
 0xe53   : > { %v5454_v8 = vadd.f32 %v9335_v5, %v8768_v3 }
 0xe55   : > { %v5494_v9 = vadd.f32 %v5493_v62, %v5454_v8  ;;  %v10533_v62 = vld [vmem:[#allocation37 + $0x18] sm:$0xff]  }
 0xe56   : > { %v8802_v8 = vld [vmem:[#allocation36] ss:$0 sm:$0xff] }
 0xe57   : > { %v5499_v10 = vmax.f32 %v5494_v9, 0.0 }
 0xe59   : > { %v5500_v13 = vpack.c.bf16 %v5499_v10, %v5499_v10 }
 0xe5b   : > { %9760 = vmatmul.mubr.bf16.vlgmr.msra.gmra.mrb[44].mxu1 %v5500_v13 }
 0xe5c   : > { %9764 = vmatpush3.bf16.msra.mxu1 %v10506_v11  ;;  %9779 = vmatprep.mubr.msk.bf16.mxu1 %vm11672_vm9, %v11673_v0 }
 0xe5d   : > { %9765 = vmatprep.subr.bf16.mxu1 %v11673_v0 }
 0xe60   : > { %9766 = vmatpush3.bf16.msra.mxu1 %v10508_v14 }
 0xe61   : > { %9767 = vmatprep.subr.bf16.mxu1 %v11673_v0 }
 0xe64   : > { %9768 = vmatpush3.bf16.msra.mxu1 %v10511_v16 }
 0xe65   : > { %9769 = vmatprep.subr.bf16.mxu1 %v11673_v0 }
 0xe68   : > { %9770 = vmatpush3.bf16.msra.mxu1 %v10514_v18 }
 0xe69   : > { %9771 = vmatprep.subr.bf16.mxu1 %v11673_v0 }
 0xe6c   : > { %9772 = vmatpush3.bf16.msra.mxu1 %v10517_v21  ;;  %v10546_v21 = vld [vmem:[%s12963_s5 + $0xc8] sm:$0xff]  }
 0xe6d   : > { %9773 = vmatprep.subr.bf16.mxu1 %v11673_v0 }
 0xe70   : > { %9774 = vmatpush3.bf16.msra.mxu1 %v10520_v38  ;;  %v10552_v38 = vld [vmem:[%s12963_s5 + $0x90] sm:$0xff]  }
 0xe71   : > { %9775 = vmatprep.subr.bf16.mxu1 %v11673_v0 }
 0xe74   : > { %9776 = vmatpush3.bf16.msra.mxu1 %v10523_v27 }
 0xe75   : > { %9777 = vmatprep.subr.bf16.mxu1 %v11673_v0 }
 0xe78   : > { %9778 = vmatpush3.bf16.msra.mxu1 %v10526_v30 }
 0xe79   : > { %9803 = vmatprep.subr.mxu1 %v11673_v0 }
 0xf2e   : > { %v5606_v36 = vpop.f32.mrb[44].mxu1 }
 0xf2f   : > { %v5607_v15 = vadd.f32 %v8793_v35, %v5606_v36  ;;  %v9761_v37 = vpop.f32.mrb[45].mxu1  ;;  %v10540_v35 = vld [vmem:[%s12963_s5 + $0x48] sm:$0xff]  }
 0xf30   : > { %v5609_v39 = vpop.f32.mrb[46].mxu1  ;;  %v10541_v36 = vld [vmem:[%s12963_s5 + $0x8] sm:$0xff]   ;;  %v10547_v37 = vld [vmem:[%s12963_s5 + $0x58] sm:$0xff]  }
 0xf31   : > { %v12674_v40 = vadd.f32 %v5607_v15, %v12645_v32  ;;  %v9762_v42 = vpop.f32.mrb[47].mxu1  ;;  %v10545_v15 = vld [vmem:[%s12963_s5 + $0x10] sm:$0xff]   ;;  %v10549_v39 = vld [vmem:[%s12963_s5 + $0x18] sm:$0xff]  }
 0xf32   : > { %v10554_v42 = vld [vmem:[%s12963_s5 + $0xd8] sm:$0xff]  }
 0xf33   : > { %v5613_v43 = vmax.f32 %v12674_v40, 0.0 }
 0xf35   : > { %v5614_v45 = vpack.c.bf16 %v5613_v43, %v5613_v43  ;;  %v10555_v43 = vld [vmem:[%s12963_s5 + $0x68] sm:$0xff]  }
 0xf37   : > { %v5616_v46 = vshrl.u32 %v5614_v45, 16  ;;  %v5619_v47 = vshll.u32 %v5614_v45, 16  ;;  %v10556_v45 = vld [vmem:[%s12963_s5 + $0x98] sm:$0xff]  }
 0xf39   : > { %v5618_v49 = vrot.slane %v5616_v46, 6  ;;  %v5621_v52 = vrot.slane %v5619_v47, 7  ;;  %v10557_v46 = vld [vmem:[%s12963_s5 + $0x28] sm:$0xff]   ;;  %v10558_v47 = vld [vmem:[%s12963_s5 + $0xe0] sm:$0xff]  }
 0xf3b   : > { %v5622_v53 = vor.u32 %v5621_v52, %v5618_v49  ;;  %v10559_v49 = vld [vmem:[%s12963_s5 + $0x70] sm:$0xff]   ;;  %v10560_v52 = vld [vmem:[%s12963_s5 + $0xa0] sm:$0xff]  }
 0xf3d   : > { %v5624_v24 = vsel %vm12476_vm7, 0, %v5622_v53  ;;  %v10561_v53 = vld [vmem:[%s12963_s5 + $0x30] sm:$0xff]  }
 0xf3e   : > { %v5625_v54 = vsel %vm12481_vm8, %v5624_v24, 0  ;;  %v10562_v24 = vld [vmem:[%s12963_s5 + $0xe8] sm:$0xff]  }
 0xf3f   : > { %v5636_v55 = vrot.slane %v5625_v54, 3  ;;  %v5627_v56 = vshrl.u32 %v5625_v54, 16  ;;  %v5630_v44 = vshll.u32 %v5625_v54, 16 }
 0xf41   : > { %9780 = vmatmul.mubr.bf16.vlgmr.msra.gmra.mrb[48].mxu1 %v5636_v55  ;;  %v5629_v32 = vrot.slane %v5627_v56, 1  ;;  %v5632_v57 = vrot.slane %v5630_v44, 2  ;;  %v10564_v55 = vld [vmem:[%s12963_s5 + $0xa8] sm:$0xff]   ;;  %v10565_v56 = vld [vmem:[%s12963_s5 + $0x38] sm:$0xff]   ;;  %v10566_v44 = vld [vmem:[%s12963_s5 + $0xf0] sm:$0xff]  }
 0xf42   : > { %9805 = vmatprep.mubr.msk.f32.mxu1 %vm11672_vm9, %v11673_v0 }
 0xf43   : > { %v5633_v58 = vor.u32 %v5632_v57, %v5629_v32  ;;  %v10567_v32 = vld [vmem:[%s12963_s5 + $0xb0] sm:$0xff]   ;;  %v10568_v57 = vld [vmem:[%s12963_s5 + $0x140] sm:$0xff]  }
 0xf45   : > { %5869 = vmatprep.mubr.bf16.mxu0 %v5633_v58  ;;  %v10570_v58 = vld [vmem:[%s12963_s5 + $0xf8] sm:$0xff]  }
 0xf46   : > { %5870 = vmatmul.mubr.bf16.vlgmr.msra.gmra.mrb[48].mxu0 %v5625_v54  ;;  %v10563_v54 = vld [vmem:[%s12963_s5 + $0x78] sm:$0xff]  }
 0xf47   : > { %9784 = vmatpush3.bf16.msra.mxu0 %v10530_v60  ;;  %9799 = vmatprep.mubr.msk.bf16.mxu0 %vm11672_vm9, %v11673_v0  ;;  %v10571_v60 = vld [vmem:[%s12963_s5 + $0xb8] sm:$0xff]  }
 0xf48   : > { %9785 = vmatprep.subr.bf16.mxu0 %v11673_v0 }
 0xf4b   : > { %9786 = vmatpush3.bf16.msra.mxu0 %v10531_v61 }
 0xf4c   : > { %9787 = vmatprep.subr.bf16.mxu0 %v11673_v0 }
 0xf4f   : > { %9788 = vmatpush3.bf16.msra.mxu0 %v10532_v41 }
 0xf50   : > { %9789 = vmatprep.subr.bf16.mxu0 %v11673_v0 }
 0xf53   : > { %9790 = vmatpush3.bf16.msra.mxu0 %v10533_v62 }
 0xf54   : > { %9791 = vmatprep.subr.bf16.mxu0 %v11673_v0 }
 0xf57   : > { %9792 = vmatpush3.bf16.msra.mxu0 %v10534_v63 }
 0xf58   : > { %9793 = vmatprep.subr.bf16.mxu0 %v11673_v0 }
 0xf5b   : > { %9794 = vmatpush3.bf16.msra.mxu0 %v10535_v51 }
 0xf5c   : > { %9795 = vmatprep.subr.bf16.mxu0 %v11673_v0 }
 0xf5f   : > { %9796 = vmatpush3.bf16.msra.mxu0 %v10536_v1 }
 0xf60   : > { %9797 = vmatprep.subr.bf16.mxu0 %v11673_v0 }
 0xf63   : > { %9798 = vmatpush3.bf16.msra.mxu0 %v10537_v2 }
 0xf64   : > { %9423 = vmatprep.subr.bf16.mxu0 %v10542_v19  ;;  %v10572_v19 = vld [vmem:[%s12963_s5 + $0x148] sm:$0xff]  }
0x1014   : > { %v5911_v3 = vpop.f32.mrb[48].mxu1 }
0x1015   : > { %v9781_v4 = vpop.f32.mrb[49].mxu1 }
0x1016   : > { %v5914_v5 = vpop.f32.mrb[50].mxu1 }
0x1017   : > { %v9782_v6 = vpop.f32.mrb[51].mxu1 }
0x1019   : > { %v9373_v7 = vpop.f32.mrb[48].mxu0 }
0x101a   : > { %v9374_v9 = vpop.f32.mrb[49].mxu0 }
0x101b   : > { %v9375_v10 = vadd.f32 %v9374_v9, %v9373_v7  ;;  %v9376_v11 = vpop.f32.mrb[50].mxu0  ;;  %v10677_v7 = vld [vmem:[%s11884_s8 + $0x18] sm:$0xff]  }
0x101c   : > { %v9377_v13 = vpop.f32.mrb[51].mxu0 }
0x101d   : > { %v5872_v14 = vadd.f32 %v9375_v10, %v8802_v8 }
0x101f   : > { %v5912_v16 = vadd.f32 %v5911_v3, %v5872_v14 }
0x1021   : > { %v5917_v17 = vmax.f32 %v5912_v16, 0.0 }
0x1023   : > { %v5918_v18 = vpack.c.bf16 %v5917_v17, %v5917_v17  ;;  %v10569_v17 = vld [vmem:[%s12963_s5 + $0x100] sm:$0xff]  }
0x1025   : > { %9800 = vmatmul.mubr.bf16.vlgmr.msra.gmra.mrb[52].mxu0 %v5918_v18 }
0x1026   : > { %9424 = vmatpush3.bf16.msra.mxu0 %v10544_v20 }
0x1027   : > { %9425 = vmatprep.subr.bf16.mxu0 %v10546_v21 }
0x102a   : > { %9426 = vmatpush3.bf16.msra.mxu0 %v10548_v22 }
0x102b   : > { %9427 = vmatprep.subr.bf16.mxu0 %v10550_v23  ;;  %v10573_v23 = vld [vmem:[%s12963_s5 + $0x108] sm:$0xff]  }
0x102e   : > { %9428 = vmatpush3.bf16.msra.mxu0 %v10552_v38 }
0x102f   : > { %9429 = vmatprep.subr.bf16.mxu0 %v10554_v42  ;;  %v10586_v42 = vld [vmem:[#allocation42 + $0x80] sm:$0xff]  }
0x1032   : > { %9430 = vmatpush3.bf16.msra.mxu0 %v10556_v45  ;;  %v10589_v45 = vld [vmem:[#allocation42] sm:$0xff]  }
0x1033   : > { %9431 = vmatprep.subr.bf16.mxu0 %v10558_v47  ;;  %v10588_v47 = vld [vmem:[#allocation42 + $0x88] sm:$0xff]  }
0x1036   : > { %9432 = vmatpush3.bf16.msra.mxu0 %v10560_v52  ;;  %v10591_v52 = vld [vmem:[#allocation42 + $0x90] sm:$0xff]  }
0x1037   : > { %9433 = vmatprep.subr.bf16.mxu0 %v10562_v24  ;;  %v10594_v24 = vld [vmem:[#allocation42 + $0x98] sm:$0xff]  }
0x103a   : > { %9434 = vmatpush3.bf16.msra.mxu0 %v10564_v55  ;;  %v10596_v55 = vld [vmem:[#allocation42 + $0x58] sm:$0xff]  }
0x103b   : > { %9435 = vmatprep.subr.bf16.mxu0 %v10566_v44  ;;  %v10598_v44 = vld [vmem:[#allocation42 + $0x18] sm:$0xff]  }
0x103e   : > { %9436 = vmatpush3.bf16.msra.mxu0 %v10567_v32  ;;  %v10599_v32 = vld [vmem:[#allocation42 + $0x60] sm:$0xff]  }
0x103f   : > { %9437 = vmatprep.subr.bf16.mxu0 %v10570_v58  ;;  %v10601_v58 = vld [vmem:[#allocation42 + $0x20] sm:$0xff]  }
0x1042   : > { %9438 = vmatpush3.bf16.msra.mxu0 %v10571_v60  ;;  %v10602_v60 = vld [vmem:[#allocation42 + $0x68] sm:$0xff]  }
0x10f8   : > { %v6024_v26 = vpop.f32.mrb[52].mxu0 }
0x10f9   : > { %v6025_v27 = vadd.f32 %v8827_v25, %v6024_v26  ;;  %v9801_v28 = vpop.f32.mrb[53].mxu0 }
0x10fa   : > { %v6027_v29 = vpop.f32.mrb[54].mxu0 }
0x10fb   : > { %v6030_v30 = vadd.f32 %v6025_v27, %v12674_v40  ;;  %v9802_v31 = vpop.f32.mrb[55].mxu0  ;;  %v10551_v40 = vld [vmem:[%s12963_s5 + $0x60] sm:$0xff]   ;;  %v10574_v27 = vld [vmem:[%s12963_s5 + $0x150] sm:$0xff]  }
0x10fc   : > { %v10576_v31 = vld [vmem:[%s12963_s5 + $0x158] sm:$0xff]  }
0x10fd   : > { %9804 = vmatpush3.msra.mxu1 %v6030_v30 }
0x10fe   : > { %9806 = vmatmul.mubr.msk.f32.vlgmr.msra.gmra.mrb[52].mxu1 %vm6031_vm11, %v12410_v48  ;;  %9808 = vmatprep.subr.mxu1 %v11673_v0  ;;  %v10543_v48 = vld [vmem:[%s12963_s5 + $0x50] sm:$0xff]  }
0x10ff   : > { %9809 = vmatpush3.msra.mxu1 %v6030_v30  ;;  %9810 = vmatprep.mubr.msk.f32.mxu1 %vm11672_vm9, %v11673_v0  ;;  %v10575_v30 = vld [vmem:[%s12963_s5 + $0x110] sm:$0xff]  }
0x1100   : > { %9401 = vmatprep.subr.bf16.mxu1 %v10538_v33  ;;  %v10577_v33 = vld [vmem:[%s12963_s5 + $0x118] sm:$0xff]  }
0x1102   : > { %9811 = vmatmul.mubr.msk.f32.vlgmr.msra.gmra.mrb[54].mxu1 %vm6031_vm11, %v12418_v50  ;;  %v10553_v50 = vld [vmem:[%s12963_s5 + $0x20] sm:$0xff]  }
0x1103   : > { %9402 = vmatpush3.bf16.msra.mxu1 %v10539_v34  ;;  %v10578_v34 = vld [vmem:[%s12963_s5 + $0x160] sm:$0xff]  }
0x1104   : > { %9403 = vmatprep.subr.bf16.mxu1 %v10540_v35  ;;  %v10579_v35 = vld [vmem:[%s12963_s5 + $0x120] sm:$0xff]  }
0x1107   : > { %9404 = vmatpush3.bf16.msra.mxu1 %v10541_v36  ;;  %v10580_v36 = vld [vmem:[%s12963_s5 + $0x168] sm:$0xff]  }
0x1108   : > { %9405 = vmatprep.subr.bf16.mxu1 %v10543_v48  ;;  %v10581_v48 = vld [vmem:[%s12963_s5 + $0x128] sm:$0xff]  }
0x110b   : > { %9406 = vmatpush3.bf16.msra.mxu1 %v10545_v15  ;;  %v10582_v15 = vld [vmem:[%s12963_s5 + $0x170] sm:$0xff]  }
0x110c   : > { %9407 = vmatprep.subr.bf16.mxu1 %v10547_v37  ;;  %v10583_v37 = vld [vmem:[%s12963_s5 + $0x130] sm:$0xff]  }
0x110f   : > { %9408 = vmatpush3.bf16.msra.mxu1 %v10549_v39  ;;  %v10584_v39 = vld [vmem:[%s12963_s5 + $0x178] sm:$0xff]  }
0x1110   : > { %9409 = vmatprep.subr.bf16.mxu1 %v10551_v40  ;;  %v10585_v40 = vld [vmem:[%s12963_s5 + $0x138] sm:$0xff]  }
0x1113   : > { %9410 = vmatpush3.bf16.msra.mxu1 %v10553_v50 }
0x1114   : > { %9411 = vmatprep.subr.bf16.mxu1 %v10555_v43  ;;  %v10587_v43 = vld [vmem:[#allocation42 + $0x40] sm:$0xff]  }
0x1115   : > { %9467 = vmatprep.subr.bf16.mxu0 %v10587_v43  ;;  %v10615_v43 = vld [vmem:[#allocation45 + $0x28] sm:$0xff]  }
0x1117   : > { %9412 = vmatpush3.bf16.msra.mxu1 %v10557_v46  ;;  %v10590_v46 = vld [vmem:[#allocation42 + $0x48] sm:$0xff]  }
0x1118   : > { %9413 = vmatprep.subr.bf16.mxu1 %v10559_v49  ;;  %v10592_v49 = vld [vmem:[#allocation42 + $0x8] sm:$0xff]  }
0x111b   : > { %9414 = vmatpush3.bf16.msra.mxu1 %v10561_v53  ;;  %v10593_v53 = vld [vmem:[#allocation42 + $0x50] sm:$0xff]  }
0x111c   : > { %9415 = vmatprep.subr.bf16.mxu1 %v10563_v54  ;;  %v10595_v54 = vld [vmem:[#allocation42 + $0x10] sm:$0xff]  }
0x111f   : > { %9416 = vmatpush3.bf16.msra.mxu1 %v10565_v56  ;;  %v10597_v56 = vld [vmem:[#allocation42 + $0xa0] sm:$0xff]  }
0x1120   : > { %9445 = vmatprep.subr.bf16.mxu1 %v10568_v57  ;;  %v10600_v57 = vld [vmem:[#allocation42 + $0xa8] sm:$0xff]  }
0x11d1   : > { %v6100_v61 = vpop.f32.mrb[52].mxu1 }
0x11d2   : > { %v6176_v41 = vpack.c.bf16 %v6100_v61, %v6100_v61  ;;  %v9807_v62 = vpop.f32.mrb[53].mxu1  ;;  %v10603_v61 = vld [vmem:[#allocation42 + $0xb0] sm:$0xff]  }
0x11d3   : > { %v10605_v62 = vld [vmem:[#allocation42 + $0x70] sm:$0xff]  }
0x11d4   : > { %v6179_v63 = vshrl.u32 %v6176_v41, 16  ;;  %v6182_v2 = vshll.u32 %v6176_v41, 16  ;;  %v10604_v41 = vld [vmem:[#allocation42 + $0x28] sm:$0xff]  }
0x11d5   : > { %v6172_v51 = vpop.f32.mrb[54].mxu1 }
0x11d6   : > { %v6181_v1 = vrot.slane %v6179_v63, 7  ;;  %v6177_v3 = vpack.c.bf16 %v6172_v51, %v6172_v51  ;;  %v9812_v4 = vpop.f32.mrb[55].mxu1  ;;  %v10606_v63 = vld [vmem:[#allocation42 + $0xb8] sm:$0xff]   ;;  %v10607_v51 = vld [vmem:[#allocation42 + $0x30] sm:$0xff]  }
0x11d8   : > { %v6184_v5 = vor.u32 %v6182_v2, %v6181_v1  ;;  %v6186_v6 = vshrl.u32 %v6177_v3, 16  ;;  %v6189_v9 = vshll.u32 %v6177_v3, 16  ;;  %v10608_v1 = vld [vmem:[#allocation42 + $0x78] sm:$0xff]  }
0x11d9   : > { %v10609_v2 = vld [vmem:[#allocation42 + $0x38] sm:$0xff]  }
0x11da   : > { %v6188_v8 = vrot.slane %v6186_v6, 7  ;;  %v6194_v10 = vsel %vm12369_vm3, 0, %v6184_v5 }
0x11db   : > { %v6199_v11 = vsel %vm12731_vm14, %v6194_v10, 0 }
0x11dc   : > { %v6191_v13 = vor.u32 %v6189_v9, %v6188_v8  ;;  %v6204_v14 = vshll.u32 %v6199_v11, 16  ;;  %v6202_v26 = vshrl.u32 %v6199_v11, 16  ;;  %v6219_v50 = vrot.slane %v6199_v11, 1  ;;  %v8838_v9 = vld [vmem:[#allocation40] ss:$0 sm:$0xff] }
0x11de   : > { %v6195_v16 = vsel %vm12369_vm3, 0, %v6191_v13  ;;  %v6206_v22 = vrot.slane %v6204_v14, 1 }
0x11df   : > { %v6200_v18 = vsel %vm12731_vm14, %v6195_v16, 0 }
0x11e0   : > { %6646 = vmatprep.mubr.bf16.mxu1 %v6200_v18  ;;  %v6211_v20 = vshll.u32 %v6200_v18, 16  ;;  %v6220_v21 = vrot.slane %v6200_v18, 1  ;;  %v6209_v38 = vshrl.u32 %v6200_v18, 16  ;;  %v6207_v29 = vor.u32 %v6206_v22, %v6202_v26 }
0x11e1   : > { %6647 = vmatmul.mubr.bf16.vlgmr.msra.gmra.mrb[56].mxu1 %v6199_v11 }
0x11e2   : > { %9446 = vmatpush3.bf16.msra.mxu1 %v10569_v17  ;;  %v6213_v25 = vrot.slane %v6211_v20, 1  ;;  %6726 = vmatprep.mubr.bf16.mxu1 %v6220_v21 }
0x11e3   : > { %9447 = vmatprep.subr.bf16.mxu1 %v10572_v19 }
0x11e4   : > { %v6214_v28 = vor.u32 %v6213_v25, %v6209_v38 }
0x11e6   : > { %9448 = vmatpush3.bf16.msra.mxu1 %v10573_v23  ;;  %6686 = vmatprep.mubr.bf16.mxu0 %v6214_v28 }
0x11e7   : > { %6687 = vmatmul.mubr.bf16.vlgmr.msra.gmra.mrb[56].mxu0 %v6207_v29  ;;  %9449 = vmatprep.subr.bf16.mxu1 %v10574_v27 }
0x11e8   : > { %9468 = vmatpush3.bf16.msra.mxu0 %v10589_v45  ;;  %v10616_v45 = vld [vmem:[#allocation45 + $0x30] sm:$0xff]  }
0x11e9   : > { %9469 = vmatprep.subr.bf16.mxu0 %v10590_v46  ;;  %v10617_v46 = vld [vmem:[#allocation45 + $0x38] sm:$0xff]  }
0x11ea   : > { %9450 = vmatpush3.bf16.msra.mxu1 %v10575_v30 }
0x11eb   : > { %9451 = vmatprep.subr.bf16.mxu1 %v10576_v31 }
0x11ec   : > { %9470 = vmatpush3.bf16.msra.mxu0 %v10592_v49  ;;  %v10621_v49 = vld [vmem:[#allocation46] sm:$0xff]  }
0x11ed   : > { %9471 = vmatprep.subr.bf16.mxu0 %v10593_v53  ;;  %v10624_v53 = vld [vmem:[#allocation46 + $0x8] sm:$0xff]  }
0x11ee   : > { %9452 = vmatpush3.bf16.msra.mxu1 %v10577_v33 }
0x11ef   : > { %9453 = vmatprep.subr.bf16.mxu1 %v10578_v34 }
0x11f0   : > { %9472 = vmatpush3.bf16.msra.mxu0 %v10595_v54 }
0x11f1   : > { %9473 = vmatprep.subr.bf16.mxu0 %v10596_v55 }
0x11f2   : > { %9454 = vmatpush3.bf16.msra.mxu1 %v10579_v35 }
0x11f3   : > { %9455 = vmatprep.subr.bf16.mxu1 %v10580_v36 }
0x11f4   : > { %9474 = vmatpush3.bf16.msra.mxu0 %v10598_v44 }
0x11f5   : > { %9475 = vmatprep.subr.bf16.mxu0 %v10599_v32  ;;  %v8887_v32 = vld [vmem:[#allocation43] ss:$0 sm:$0xff] }
0x11f6   : > { %9456 = vmatpush3.bf16.msra.mxu1 %v10581_v48 }
0x11f7   : > { %9457 = vmatprep.subr.bf16.mxu1 %v10582_v15 }
0x11f8   : > { %9476 = vmatpush3.bf16.msra.mxu0 %v10601_v58 }
0x11f9   : > { %9477 = vmatprep.subr.bf16.mxu0 %v10602_v60 }
0x11fa   : > { %9458 = vmatpush3.bf16.msra.mxu1 %v10583_v37  ;;  %v10610_v37 = vld [vmem:[#allocation45] sm:$0xff]  }
0x11fb   : > { %9459 = vmatprep.subr.bf16.mxu1 %v10584_v39  ;;  %v10611_v39 = vld [vmem:[#allocation45 + $0x8] sm:$0xff]  }
0x11fc   : > { %9478 = vmatpush3.bf16.msra.mxu0 %v10604_v41 }
0x11fd   : > { %9479 = vmatprep.subr.bf16.mxu0 %v10605_v62 }
0x11fe   : > { %9460 = vmatpush3.bf16.msra.mxu1 %v10585_v40  ;;  %v10612_v40 = vld [vmem:[#allocation45 + $0x10] sm:$0xff]  }
0x11ff   : > { %9813 = vmatprep.subr.bf16.mxu1 %v11673_v0 }
0x1200   : > { %9480 = vmatpush3.bf16.msra.mxu0 %v10607_v51  ;;  %v10618_v51 = vld [vmem:[#allocation46 + $0x80] sm:$0xff]  }
0x1201   : > { %6727 = vmatmul.mubr.bf16.vlgmr.msra.gmra.mrb[60].mxu1 %v6219_v50  ;;  %9481 = vmatprep.subr.bf16.mxu0 %v10608_v1  ;;  %v10613_v50 = vld [vmem:[#allocation45 + $0x18] sm:$0xff]  }
0x1202   : > { %9829 = vmatprep.mubr.msk.bf16.mxu1 %vm11672_vm9, %v11673_v0  ;;  %9814 = vmatpush3.bf16.msra.mxu1 %v10586_v42  ;;  %v10614_v42 = vld [vmem:[#allocation45 + $0x20] sm:$0xff]  }
0x1203   : > { %9815 = vmatprep.subr.bf16.mxu1 %v11673_v0 }
0x1204   : > { %9482 = vmatpush3.bf16.msra.mxu0 %v10609_v2  ;;  %v10620_v2 = vld [vmem:[#allocation46 + $0x88] sm:$0xff]  }
0x1205   : > { %9833 = vmatprep.subr.bf16.mxu0 %v11673_v0 }
0x1206   : > { %9816 = vmatpush3.bf16.msra.mxu1 %v10588_v47  ;;  %v10619_v47 = vld [vmem:[#allocation46 + $0x40] sm:$0xff]  }
0x1207   : > { %9817 = vmatprep.subr.bf16.mxu1 %v11673_v0 }
0x120a   : > { %9818 = vmatpush3.bf16.msra.mxu1 %v10591_v52  ;;  %v10622_v52 = vld [vmem:[#allocation46 + $0x48] sm:$0xff]  }
0x120b   : > { %9819 = vmatprep.subr.bf16.mxu1 %v11673_v0 }
0x120e   : > { %9820 = vmatpush3.bf16.msra.mxu1 %v10594_v24 }
0x120f   : > { %9821 = vmatprep.subr.bf16.mxu1 %v11673_v0 }
0x1212   : > { %9822 = vmatpush3.bf16.msra.mxu1 %v10597_v56 }
0x1213   : > { %9823 = vmatprep.subr.bf16.mxu1 %v11673_v0 }
0x1216   : > { %9824 = vmatpush3.bf16.msra.mxu1 %v10600_v57 }
0x1217   : > { %9825 = vmatprep.subr.bf16.mxu1 %v11673_v0 }
0x121a   : > { %9826 = vmatpush3.bf16.msra.mxu1 %v10603_v61 }
0x121b   : > { %9827 = vmatprep.subr.bf16.mxu1 %v11673_v0 }
0x121e   : > { %9828 = vmatpush3.bf16.msra.mxu1 %v10606_v63 }
0x121f   : > { %9507 = vmatprep.subr.bf16.mxu1 %v10619_v47  ;;  %v10642_v47 = vld [vmem:[#allocation48] sm:$0xff]  }
0x12b4   : > { %v9417_v3 = vpop.f32.mrb[56].mxu1 }
0x12b5   : > { %v9418_v4 = vpop.f32.mrb[57].mxu1 }
0x12b6   : > { %v9419_v5 = vadd.f32 %v9418_v4, %v9417_v3  ;;  %v9420_v6 = vpop.f32.mrb[58].mxu1  ;;  %v10623_v3 = vld [vmem:[#allocation46 + $0x90] sm:$0xff]  }
0x12b7   : > { %v9421_v8 = vpop.f32.mrb[59].mxu1  ;;  %v10625_v4 = vld [vmem:[#allocation46 + $0x50] sm:$0xff]  }
0x12b8   : > { %v6649_v13 = vadd.f32 %v9419_v5, %v8838_v9  ;;  %v10626_v5 = vld [vmem:[#allocation46 + $0x98] sm:$0xff]   ;;  %v10627_v6 = vld [vmem:[#allocation46 + $0x10] sm:$0xff]   ;;  %v10629_v9 = vld [vmem:[#allocation46 + $0xa0] sm:$0xff]  }
0x12b9   : > { %v10628_v8 = vld [vmem:[#allocation46 + $0x58] sm:$0xff]  }
0x12ba   : > { %v9439_v10 = vpop.f32.mrb[56].mxu0 }
0x12bb   : > { %v9440_v11 = vpop.f32.mrb[57].mxu0 }
0x12bc   : > { %v9441_v14 = vadd.f32 %v9440_v11, %v9439_v10  ;;  %v9442_v16 = vpop.f32.mrb[58].mxu0  ;;  %v10630_v10 = vld [vmem:[#allocation46 + $0x18] sm:$0xff]   ;;  %v10631_v11 = vld [vmem:[#allocation46 + $0x60] sm:$0xff]  }
0x12bd   : > { %v9443_v17 = vpop.f32.mrb[59].mxu0  ;;  %v10634_v16 = vld [vmem:[#allocation46 + $0x68] sm:$0xff]  }
0x12be   : > { %v6689_v18 = vadd.f32 %v9441_v14, %v6649_v13  ;;  %v10632_v13 = vld [vmem:[#allocation46 + $0xa8] sm:$0xff]   ;;  %v10633_v14 = vld [vmem:[#allocation46 + $0x20] sm:$0xff]   ;;  %v10635_v17 = vld [vmem:[#allocation46 + $0xb0] sm:$0xff]  }
0x12d4   : > { %v9461_v19 = vpop.f32.mrb[60].mxu1 }
0x12d5   : > { %v9462_v20 = vpop.f32.mrb[61].mxu1 }
0x12d6   : > { %v9463_v21 = vadd.f32 %v9462_v20, %v9461_v19  ;;  %v9464_v22 = vpop.f32.mrb[62].mxu1  ;;  %v10637_v19 = vld [vmem:[#allocation46 + $0x70] sm:$0xff]   ;;  %v10638_v20 = vld [vmem:[#allocation46 + $0xb8] sm:$0xff]  }
0x12d7   : > { %v9465_v23 = vpop.f32.mrb[63].mxu1  ;;  %v10640_v22 = vld [vmem:[#allocation46 + $0x78] sm:$0xff]  }
0x12d8   : > { %v12769_v38 = vadd.f32 %v9463_v21, %v6689_v18  ;;  %v10636_v18 = vld [vmem:[#allocation46 + $0x28] sm:$0xff]   ;;  %v10639_v21 = vld [vmem:[#allocation46 + $0x30] sm:$0xff]   ;;  %v10641_v23 = vld [vmem:[#allocation46 + $0x38] sm:$0xff]  }
0x12da   : > { %v6734_v25 = vmax.f32 %v12769_v38, 0.0 }
0x12dc   : > { %v6735_v26 = vpack.c.bf16 %v6734_v25, %v6734_v25  ;;  %v8912_v25 = vld [vmem:[%s12966_s4] ss:$0 sm:$0xff] }
0x12de   : > { %v6737_v27 = vshrl.u32 %v6735_v26, 16  ;;  %v6740_v29 = vshll.u32 %v6735_v26, 16 }
0x12e0   : > { %v6739_v28 = vrot.slane %v6737_v27, 7 }
0x12e2   : > { %v6742_v30 = vor.u32 %v6740_v29, %v6739_v28 }
0x12e4   : > { %v6744_v31 = vsel %vm12369_vm3, 0, %v6742_v30 }
0x12e5   : > { %v6745_v33 = vsel %vm12731_vm14, %v6744_v31, 0 }
0x12e6   : > { %v6755_v34 = vrot.slane %v6745_v33, 1  ;;  %v6749_v35 = vshll.u32 %v6745_v33, 16  ;;  %v6747_v36 = vshrl.u32 %v6745_v33, 16 }
0x12e8   : > { %9830 = vmatmul.mubr.bf16.vlgmr.msra.gmra.mrb[64].mxu1 %v6755_v34  ;;  %v6751_v48 = vrot.slane %v6749_v35, 1 }
0x12e9   : > { %9508 = vmatpush3.bf16.msra.mxu1 %v10621_v49  ;;  %v10643_v49 = vld [vmem:[#allocation48 + $0x8] sm:$0xff]  }
0x12ea   : > { %v6752_v15 = vor.u32 %v6751_v48, %v6747_v36  ;;  %9509 = vmatprep.subr.bf16.mxu1 %v10622_v52  ;;  %v10645_v52 = vld [vmem:[#allocation48 + $0x18] sm:$0xff]  }
0x12ec   : > { %6988 = vmatprep.mubr.bf16.mxu0 %v6752_v15 }
0x12ed   : > { %6989 = vmatmul.mubr.bf16.vlgmr.msra.gmra.mrb[60].mxu0 %v6745_v33  ;;  %9510 = vmatpush3.bf16.msra.mxu1 %v10624_v53  ;;  %v10646_v53 = vld [vmem:[#allocation48 + $0x20] sm:$0xff]  }
0x12ee   : > { %9834 = vmatpush3.bf16.msra.mxu0 %v10610_v37  ;;  %9849 = vmatprep.mubr.msk.bf16.mxu0 %vm11672_vm9, %v11673_v0 }
0x12ef   : > { %9835 = vmatprep.subr.bf16.mxu0 %v11673_v0  ;;  %9511 = vmatprep.subr.bf16.mxu1 %v10625_v4 }
0x12f1   : > { %9512 = vmatpush3.bf16.msra.mxu1 %v10627_v6 }
0x12f2   : > { %9836 = vmatpush3.bf16.msra.mxu0 %v10611_v39  ;;  %9513 = vmatprep.subr.bf16.mxu1 %v10628_v8 }
0x12f3   : > { %9837 = vmatprep.subr.bf16.mxu0 %v11673_v0 }
0x12f5   : > { %9514 = vmatpush3.bf16.msra.mxu1 %v10630_v10  ;;  %v10650_v10 = vld [vmem:[#allocation49 + $0x80] sm:$0xff]  }
0x12f6   : > { %9838 = vmatpush3.bf16.msra.mxu0 %v10612_v40  ;;  %9515 = vmatprep.subr.bf16.mxu1 %v10631_v11 }
0x12f7   : > { %9839 = vmatprep.subr.bf16.mxu0 %v11673_v0 }
0x12f9   : > { %9516 = vmatpush3.bf16.msra.mxu1 %v10633_v14  ;;  %v10655_v14 = vld [vmem:[#allocation49 + $0x90] sm:$0xff]  }
0x12fa   : > { %9840 = vmatpush3.bf16.msra.mxu0 %v10613_v50  ;;  %9517 = vmatprep.subr.bf16.mxu1 %v10634_v16  ;;  %v10658_v16 = vld [vmem:[#allocation49 + $0x98] sm:$0xff]  }
0x12fb   : > { %9841 = vmatprep.subr.bf16.mxu0 %v11673_v0 }
0x12fd   : > { %9518 = vmatpush3.bf16.msra.mxu1 %v10636_v18  ;;  %v10661_v18 = vld [vmem:[#allocation49 + $0xa0] sm:$0xff]  }
0x12fe   : > { %9842 = vmatpush3.bf16.msra.mxu0 %v10614_v42  ;;  %9519 = vmatprep.subr.bf16.mxu1 %v10637_v19  ;;  %v10662_v19 = vld [vmem:[#allocation49 + $0x18] sm:$0xff]  }
0x12ff   : > { %9843 = vmatprep.subr.bf16.mxu0 %v11673_v0 }
0x1301   : > { %9520 = vmatpush3.bf16.msra.mxu1 %v10639_v21  ;;  %v10664_v21 = vld [vmem:[#allocation49 + $0xa8] sm:$0xff]  }
0x1302   : > { %9844 = vmatpush3.bf16.msra.mxu0 %v10615_v43  ;;  %9521 = vmatprep.subr.bf16.mxu1 %v10640_v22  ;;  %v10665_v22 = vld [vmem:[#allocation49 + $0x20] sm:$0xff]  }
0x1303   : > { %9845 = vmatprep.subr.bf16.mxu0 %v11673_v0 }
0x1305   : > { %9522 = vmatpush3.bf16.msra.mxu1 %v10641_v23  ;;  %v10666_v23 = vld [vmem:[#allocation49 + $0x68] sm:$0xff]  }
0x1306   : > { %9846 = vmatpush3.bf16.msra.mxu0 %v10616_v45  ;;  %9873 = vmatprep.subr.bf16.mxu1 %v11673_v0 }
0x1307   : > { %9847 = vmatprep.subr.bf16.mxu0 %v11673_v0 }
0x130a   : > { %9848 = vmatpush3.bf16.msra.mxu0 %v10617_v46 }
0x130b   : > { %9853 = vmatprep.subr.bf16.mxu0 %v11673_v0 }
0x13bb   : > { %v7030_v24 = vpop.f32.mrb[64].mxu1 }
0x13bc   : > { %v9831_v54 = vpop.f32.mrb[65].mxu1 }
0x13bd   : > { %v7033_v55 = vpop.f32.mrb[66].mxu1  ;;  %v10648_v54 = vld [vmem:[#allocation48 + $0x30] sm:$0xff]  }
0x13be   : > { %v9832_v56 = vpop.f32.mrb[67].mxu1  ;;  %v10649_v55 = vld [vmem:[#allocation48 + $0x38] sm:$0xff]  }
0x13bf   : > { %v10651_v56 = vld [vmem:[#allocation49 + $0x40] sm:$0xff]  }
0x13c0   : > { %v9483_v44 = vpop.f32.mrb[60].mxu0 }
0x13c1   : > { %v9484_v57 = vpop.f32.mrb[61].mxu0 }
0x13c2   : > { %v9485_v58 = vadd.f32 %v9484_v57, %v9483_v44  ;;  %v9486_v60 = vpop.f32.mrb[62].mxu0  ;;  %v10653_v44 = vld [vmem:[#allocation49] sm:$0xff]   ;;  %v10656_v57 = vld [vmem:[#allocation49 + $0x8] sm:$0xff]  }
0x13c3   : > { %v9487_v61 = vpop.f32.mrb[63].mxu0  ;;  %v10659_v60 = vld [vmem:[#allocation49 + $0x10] sm:$0xff]  }
0x13c4   : > { %v6991_v41 = vadd.f32 %v9485_v58, %v8887_v32  ;;  %v10654_v32 = vld [vmem:[#allocation49 + $0x48] sm:$0xff]   ;;  %v10657_v58 = vld [vmem:[#allocation49 + $0x50] sm:$0xff]  }
0x13c6   : > { %v7031_v62 = vadd.f32 %v7030_v24, %v6991_v41  ;;  %v10647_v24 = vld [vmem:[#allocation48 + $0x28] sm:$0xff]  }
0x13c8   : > { %v7036_v63 = vmax.f32 %v7031_v62, 0.0 }
0x13ca   : > { %v7037_v1 = vpack.c.bf16 %v7036_v63, %v7036_v63 }
0x13cc   : > { %9850 = vmatmul.mubr.bf16.vlgmr.msra.gmra.mrb[64].mxu0 %v7037_v1  ;;  %v8921_v1 = vld [vmem:[%s12967_s2] ss:$0 sm:$0xff] }
0x13cd   : > { %9854 = vmatpush3.bf16.msra.mxu0 %v10618_v51  ;;  %9869 = vmatprep.mubr.msk.bf16.mxu0 %vm11672_vm9, %v11673_v0 }
0x13ce   : > { %9855 = vmatprep.subr.bf16.mxu0 %v11673_v0 }
0x13d1   : > { %9856 = vmatpush3.bf16.msra.mxu0 %v10620_v2 }
0x13d2   : > { %9857 = vmatprep.subr.bf16.mxu0 %v11673_v0 }
0x13d5   : > { %9858 = vmatpush3.bf16.msra.mxu0 %v10623_v3 }
0x13d6   : > { %9859 = vmatprep.subr.bf16.mxu0 %v11673_v0 }
0x13d9   : > { %9860 = vmatpush3.bf16.msra.mxu0 %v10626_v5 }
0x13da   : > { %9861 = vmatprep.subr.bf16.mxu0 %v11673_v0 }
0x13dd   : > { %9862 = vmatpush3.bf16.msra.mxu0 %v10629_v9 }
0x13de   : > { %9863 = vmatprep.subr.bf16.mxu0 %v11673_v0 }
0x13e1   : > { %9864 = vmatpush3.bf16.msra.mxu0 %v10632_v13  ;;  %v10652_v13 = vld [vmem:[#allocation49 + $0x88] sm:$0xff]  }
0x13e2   : > { %9865 = vmatprep.subr.bf16.mxu0 %v11673_v0 }
0x13e5   : > { %9866 = vmatpush3.bf16.msra.mxu0 %v10635_v17  ;;  %v10660_v17 = vld [vmem:[#allocation49 + $0x58] sm:$0xff]  }
0x13e6   : > { %9867 = vmatprep.subr.bf16.mxu0 %v11673_v0 }
0x13e9   : > { %9868 = vmatpush3.bf16.msra.mxu0 %v10638_v20  ;;  %v10663_v20 = vld [vmem:[#allocation49 + $0x60] sm:$0xff]  }
0x13ea   : > { %9547 = vmatprep.subr.bf16.mxu0 %v10651_v56  ;;  %v10680_v56 = vld [vmem:[%s11884_s8 + $0x30] sm:$0xff]  }
0x149f   : > { %v7143_v26 = vpop.f32.mrb[64].mxu0 }
0x14a0   : > { %v7144_v27 = vadd.f32 %v8912_v25, %v7143_v26  ;;  %v9851_v28 = vpop.f32.mrb[65].mxu0  ;;  %v10667_v25 = vld [vmem:[#allocation49 + $0xb0] sm:$0xff]   ;;  %v10668_v26 = vld [vmem:[#allocation49 + $0x28] sm:$0xff]  }
0x14a1   : > { %v7146_v29 = vpop.f32.mrb[66].mxu0  ;;  %v10670_v28 = vld [vmem:[#allocation49 + $0xb8] sm:$0xff]  }
0x14a2   : > { %v12798_v30 = vadd.f32 %v7144_v27, %v12769_v38  ;;  %v9852_v31 = vpop.f32.mrb[67].mxu0  ;;  %v10669_v27 = vld [vmem:[#allocation49 + $0x70] sm:$0xff]  }
0x14a3   : > { %v10671_v29 = vld [vmem:[#allocation49 + $0x30] sm:$0xff]   ;;  %v10672_v31 = vld [vmem:[#allocation49 + $0x78] sm:$0xff]  }
0x14a4   : > { %v7150_v33 = vmax.f32 %v12798_v30, 0.0 }
0x14a6   : > { %v7151_v34 = vpack.c.bf16 %v7150_v33, %v7150_v33  ;;  %v10673_v33 = vld [vmem:[#allocation49 + $0x38] sm:$0xff]  }
0x14a8   : > { %v7153_v35 = vshrl.u32 %v7151_v34, 16  ;;  %v7156_v36 = vshll.u32 %v7151_v34, 16  ;;  %v8946_v34 = vld [vmem:[%s12968_s11] ss:$0 sm:$0xff] }
0x14aa   : > { %v7155_v48 = vrot.slane %v7153_v35, 6  ;;  %v7158_v15 = vrot.slane %v7156_v36, 7 }
0x14ac   : > { %v7159_v37 = vor.u32 %v7158_v15, %v7155_v48 }
0x14ae   : > { %v7161_v39 = vsel %vm12476_vm7, 0, %v7159_v37 }
0x14af   : > { %v7165_v40 = vsel %vm7164_vm1, %v7161_v39, 0 }
0x14b0   : > { %v7176_v50 = vrot.slane %v7165_v40, 3  ;;  %v7167_v42 = vshrl.u32 %v7165_v40, 16  ;;  %v7170_v38 = vshll.u32 %v7165_v40, 16 }
0x14b2   : > { %9870 = vmatmul.mubr.bf16.vlgmr.msra.gmra.mrb[68].mxu0 %v7176_v50  ;;  %v7169_v43 = vrot.slane %v7167_v42, 1  ;;  %v7172_v45 = vrot.slane %v7170_v38, 2 }
0x14b3   : > { %9548 = vmatpush3.bf16.msra.mxu0 %v10653_v44  ;;  %v10681_v44 = vld [vmem:[%s11884_s8 + $0x38] sm:$0xff]  }
0x14b4   : > { %v7173_v46 = vor.u32 %v7172_v45, %v7169_v43  ;;  %9549 = vmatprep.subr.bf16.mxu0 %v10654_v32 }
0x14b6   : > { %7409 = vmatprep.mubr.bf16.mxu1 %v7173_v46 }
0x14b7   : > { %7410 = vmatmul.mubr.bf16.vlgmr.msra.gmra.mrb[68].mxu1 %v7165_v40  ;;  %9550 = vmatpush3.bf16.msra.mxu0 %v10656_v57 }
0x14b8   : > { %9874 = vmatpush3.bf16.msra.mxu1 %v10642_v47  ;;  %9889 = vmatprep.mubr.msk.bf16.mxu1 %vm11672_vm9, %v11673_v0 }
0x14b9   : > { %9875 = vmatprep.subr.bf16.mxu1 %v11673_v0  ;;  %9551 = vmatprep.subr.bf16.mxu0 %v10657_v58 }
0x14bb   : > { %9552 = vmatpush3.bf16.msra.mxu0 %v10659_v60 }
0x14bc   : > { %9876 = vmatpush3.bf16.msra.mxu1 %v10643_v49  ;;  %9553 = vmatprep.subr.bf16.mxu0 %v10660_v17 }
0x14bd   : > { %9877 = vmatprep.subr.bf16.mxu1 %v11673_v0 }
0x14bf   : > { %9554 = vmatpush3.bf16.msra.mxu0 %v10662_v19 }
0x14c0   : > { %9878 = vmatpush3.bf16.msra.mxu1 %v10644_v59  ;;  %9555 = vmatprep.subr.bf16.mxu0 %v10663_v20 }
0x14c1   : > { %9879 = vmatprep.subr.bf16.mxu1 %v11673_v0 }
0x14c3   : > { %9556 = vmatpush3.bf16.msra.mxu0 %v10665_v22 }
0x14c4   : > { %9880 = vmatpush3.bf16.msra.mxu1 %v10645_v52  ;;  %9557 = vmatprep.subr.bf16.mxu0 %v10666_v23 }
0x14c5   : > { %9881 = vmatprep.subr.bf16.mxu1 %v11673_v0 }
0x14c7   : > { %9558 = vmatpush3.bf16.msra.mxu0 %v10668_v26 }
0x14c8   : > { %9882 = vmatpush3.bf16.msra.mxu1 %v10646_v53  ;;  %9559 = vmatprep.subr.bf16.mxu0 %v10669_v27  ;;  %v10674_v53 = vld [vmem:[%s11884_s8] sm:$0xff]  }
0x14c9   : > { %9883 = vmatprep.subr.bf16.mxu1 %v11673_v0 }
0x14cb   : > { %9560 = vmatpush3.bf16.msra.mxu0 %v10671_v29 }
0x14cc   : > { %9884 = vmatpush3.bf16.msra.mxu1 %v10647_v24  ;;  %9561 = vmatprep.subr.bf16.mxu0 %v10672_v31  ;;  %v10675_v24 = vld [vmem:[%s11884_s8 + $0x8] sm:$0xff]  }
0x14cd   : > { %9885 = vmatprep.subr.bf16.mxu1 %v11673_v0 }
0x14cf   : > { %9562 = vmatpush3.bf16.msra.mxu0 %v10673_v33 }
0x14d0   : > { %9886 = vmatpush3.bf16.msra.mxu1 %v10648_v54  ;;  %9913 = vmatprep.subr.bf16.mxu0 %v11673_v0  ;;  %v10678_v54 = vld [vmem:[%s11884_s8 + $0x20] sm:$0xff]  }
0x14d1   : > { %9887 = vmatprep.subr.bf16.mxu1 %v11673_v0 }
0x14d4   : > { %9888 = vmatpush3.bf16.msra.mxu1 %v10649_v55  ;;  %v10679_v55 = vld [vmem:[%s11884_s8 + $0x28] sm:$0xff]  }
0x14d5   : > { %9893 = vmatprep.subr.bf16.mxu1 %v11673_v0 }
0x1585   : > { %v7451_v61 = vpop.f32.mrb[68].mxu0 }
0x1586   : > { %v9871_v41 = vpop.f32.mrb[69].mxu0 }
0x1587   : > { %v7454_v62 = vpop.f32.mrb[70].mxu0  ;;  %v8955_v41 = vld [vmem:[%s12969_s23] ss:$0 sm:$0xff] }
0x1588   : > { %v9872_v63 = vpop.f32.mrb[71].mxu0 }
0x158a   : > { %v9523_v51 = vpop.f32.mrb[68].mxu1 }
0x158b   : > { %v9524_v2 = vpop.f32.mrb[69].mxu1 }
0x158c   : > { %v9525_v3 = vadd.f32 %v9524_v2, %v9523_v51  ;;  %v9526_v4 = vpop.f32.mrb[70].mxu1 }
0x158d   : > { %v9527_v5 = vpop.f32.mrb[71].mxu1 }
0x158e   : > { %v7412_v6 = vadd.f32 %v9525_v3, %v8921_v1 }
0x1590   : > { %v7452_v8 = vadd.f32 %v7451_v61, %v7412_v6 }
0x1592   : > { %v7457_v9 = vmax.f32 %v7452_v8, 0.0 }
0x1594   : > { %v7458_v11 = vpack.c.bf16 %v7457_v9, %v7457_v9 }
0x1596   : > { %9890 = vmatmul.mubr.bf16.vlgmr.msra.gmra.mrb[72].mxu1 %v7458_v11 }
0x1597   : > { %9894 = vmatpush3.bf16.msra.mxu1 %v10650_v10  ;;  %9909 = vmatprep.mubr.msk.bf16.mxu1 %vm11672_vm9, %v11673_v0 }
0x1598   : > { %9895 = vmatprep.subr.bf16.mxu1 %v11673_v0 }
0x159b   : > { %9896 = vmatpush3.bf16.msra.mxu1 %v10652_v13 }
0x159c   : > { %9897 = vmatprep.subr.bf16.mxu1 %v11673_v0 }
0x159f   : > { %9898 = vmatpush3.bf16.msra.mxu1 %v10655_v14 }
0x15a0   : > { %9899 = vmatprep.subr.bf16.mxu1 %v11673_v0 }
0x15a3   : > { %9900 = vmatpush3.bf16.msra.mxu1 %v10658_v16 }
0x15a4   : > { %9901 = vmatprep.subr.bf16.mxu1 %v11673_v0 }
0x15a7   : > { %9902 = vmatpush3.bf16.msra.mxu1 %v10661_v18 }
0x15a8   : > { %9903 = vmatprep.subr.bf16.mxu1 %v11673_v0 }
0x15ab   : > { %9904 = vmatpush3.bf16.msra.mxu1 %v10664_v21 }
0x15ac   : > { %9905 = vmatprep.subr.bf16.mxu1 %v11673_v0 }
0x15af   : > { %9906 = vmatpush3.bf16.msra.mxu1 %v10667_v25 }
0x15b0   : > { %9907 = vmatprep.subr.bf16.mxu1 %v11673_v0 }
0x15b3   : > { %9908 = vmatpush3.bf16.msra.mxu1 %v10670_v28 }
0x1669   : > { %v7564_v35 = vpop.f32.mrb[72].mxu1 }
0x166a   : > { %v7565_v36 = vadd.f32 %v8946_v34, %v7564_v35  ;;  %v9891_v48 = vpop.f32.mrb[73].mxu1 }
0x166b   : > { %v7567_v15 = vpop.f32.mrb[74].mxu1 }
0x166c   : > { %v7570_v37 = vadd.f32 %v7565_v36, %v12798_v30  ;;  %v9892_v39 = vpop.f32.mrb[75].mxu1 }
0x166e   : > { %v7571_v40 = vpack.c.bf16 %v7570_v37, %v7570_v37 }
0x1670   : > { %v7573_v50 = vshrl.u32 %v7571_v40, 16  ;;  %v7576_v38 = vshll.u32 %v7571_v40, 16 }
0x1672   : > { %v7575_v42 = vrot.slane %v7573_v50, 7 }
0x1674   : > { %v7578_v43 = vor.u32 %v7576_v38, %v7575_v42 }
0x1676   : > { %v7580_v45 = vsel %vm12369_vm3, 0, %v7578_v43 }
0x1677   : > { %v7581_v46 = vsel %vm12731_vm14, %v7580_v45, 0 }
0x1678   : > { %v7591_v47 = vrot.slane %v7581_v46, 1  ;;  %v7585_v49 = vshll.u32 %v7581_v46, 16  ;;  %v7583_v59 = vshrl.u32 %v7581_v46, 16 }
0x167a   : > { %9910 = vmatmul.mubr.bf16.vlgmr.msra.gmra.mrb[76].mxu1 %v7591_v47  ;;  %v7587_v30 = vrot.slane %v7585_v49, 1 }
0x167c   : > { %v7588_v52 = vor.u32 %v7587_v30, %v7583_v59 }
0x167e   : > { %7824 = vmatprep.mubr.bf16.mxu0 %v7588_v52 }
0x167f   : > { %7825 = vmatmul.mubr.bf16.vlgmr.msra.gmra.mrb[72].mxu0 %v7581_v46 }
0x1680   : > { %9914 = vmatpush3.bf16.msra.mxu0 %v10674_v53  ;;  %9929 = vmatprep.mubr.msk.bf16.mxu0 %vm11672_vm9, %v11673_v0 }
0x1681   : > { %9915 = vmatprep.subr.bf16.mxu0 %v11673_v0 }
0x1684   : > { %9916 = vmatpush3.bf16.msra.mxu0 %v10675_v24 }
0x1685   : > { %9917 = vmatprep.subr.bf16.mxu0 %v11673_v0 }
0x1688   : > { %9918 = vmatpush3.bf16.msra.mxu0 %v10676_v12 }
0x1689   : > { %9919 = vmatprep.subr.bf16.mxu0 %v11673_v0 }
0x168c   : > { %9920 = vmatpush3.bf16.msra.mxu0 %v10677_v7 }
0x168d   : > { %9921 = vmatprep.subr.bf16.mxu0 %v11673_v0 }
0x1690   : > { %9922 = vmatpush3.bf16.msra.mxu0 %v10678_v54 }
0x1691   : > { %9923 = vmatprep.subr.bf16.mxu0 %v11673_v0 }
0x1694   : > { %9924 = vmatpush3.bf16.msra.mxu0 %v10679_v55 }
0x1695   : > { %9925 = vmatprep.subr.bf16.mxu0 %v11673_v0 }
0x1698   : > { %9926 = vmatpush3.bf16.msra.mxu0 %v10680_v56 }
0x1699   : > { %9927 = vmatprep.subr.bf16.mxu0 %v11673_v0  ;;  %v8980_v0 = vld [vmem:[%s11889_s21] ss:$0 sm:$0xff] }
0x169c   : > { %9928 = vmatpush3.bf16.msra.mxu0 %v10681_v44 }
0x174d   : > { %v7866_v32 = vpop.f32.mrb[76].mxu1 }
0x174e   : > { %v9911_v57 = vpop.f32.mrb[77].mxu1 }
0x174f   : > { %v7869_v58 = vpop.f32.mrb[78].mxu1 }
0x1750   : > { %v9912_v60 = vpop.f32.mrb[79].mxu1 }
0x1752   : > { %v9563_v61 = vpop.f32.mrb[72].mxu0 }
0x1753   : > { %v9564_v62 = vpop.f32.mrb[73].mxu0 }
0x1754   : > { %v9565_v63 = vadd.f32 %v9564_v62, %v9563_v61  ;;  %v9566_v51 = vpop.f32.mrb[74].mxu0 }
0x1755   : > { %v9567_v1 = vpop.f32.mrb[75].mxu0 }
0x1756   : > { %v7827_v2 = vadd.f32 %v9565_v63, %v8955_v41 }
0x1758   : > { %v7867_v3 = vadd.f32 %v7866_v32, %v7827_v2 }
0x175a   : > { %v7872_v4 = vpack.c.bf16 %v7867_v3, %v7867_v3 }
0x175c   : > { %9930 = vmatmul.mubr.bf16.vlgmr.msra.gmra.mrb[76].mxu0 %v7872_v4 }
0x182f   : > { %v7978_v5 = vpop.f32.mrb[76].mxu0 }
0x1830   : > { %v7979_v6 = vadd.f32 %v8980_v0, %v7978_v5  ;;  %v9931_v8 = vpop.f32.mrb[77].mxu0 }
0x1831   : > { %v7981_v9 = vpop.f32.mrb[78].mxu0 }
0x1832   : > { %7986 = vst [vmem:[%s1758_s1] sm:$0xf] %v7979_v6  ;;  %v9932_v10 = vpop.f32.mrb[79].mxu0 }
0x1833 PF: > { %s115_s22 = sadd.s32 1, %s11588_s22  }
0x1834   : > { %p112_p3 = scmp.ge.s32.totalorder %s115_s22, 4  }
0x1836   :  { %114 = sbr.rel (!%p112_p3) target bundleno = 93 (0x5d), region = 405 }
0x183d   :  { %8020 = vsyncpa [#allocation3], 1 }
0x183e   :  { %8022 = vsyncpa [#allocation3 + $0x1], 1 }
0x183f   :  { %8023 = vsyncpa [#allocation5], 1 }
0x1840   :  { %8024 = vsyncpa [#allocation8], 1 }
0x1841   :  { %8025 = vsyncpa [#allocation11], 1 }
0x1842   :  { %8026 = vsyncpa [#allocation14], 1 }
0x1843   :  { %8027 = vsyncpa [#allocation17], 1 }
0x1844   :  { %8028 = vsyncpa [#allocation20], 1 }
0x1845   :  { %8029 = vsyncpa [#allocation23], 1 }
0x1846   :  { %8030 = vsyncpa [#allocation26], 1 }
0x1847   :  { %8031 = vsyncpa [#allocation29], 1 }
0x1848   :  { %8032 = vsyncpa [#allocation32], 1 }
0x1849   :  { %8033 = vsyncpa [#allocation35], 1 }
0x184a   :  { %8034 = vsyncpa [#allocation38], 1 }
0x184b   :  { %8035 = vsyncpa [#allocation41], 1 }
0x184c   :  { %8036 = vsyncpa [#allocation44], 1 }
0x184d   :  { %8037 = vsyncpa [#allocation47], 1 }
0x184e   :  { %8038 = vsyncpa [#allocation50], 1 }

</bundles_post_ra>
